<compile_context>
chip_gen: v7x
topology: tpu7x:2x2x1
jax: 0.10.0
libtpu: 0.0.40
codegen_flags: <defaults>
</compile_context>

<pallas_src>
import functools

import jax
import jax.numpy as jnp
from jax.experimental import pallas as pl
from jax.experimental.pallas import tpu as pltpu


def _round_up(x, m):
    return ((x + m - 1) // m) * m


# ---------------------------------------------------------------------------
# Fused RRDB kernel (one batch element per grid step)
# ---------------------------------------------------------------------------
def rrdb_kernel(x_hwc_ref, x_cm_ref, t_ref,
                w1_ref, b1_ref, w2_ref, b2_ref, w3_ref, b3_ref,
                w4_ref, b4_ref, w5_ref, b5_ref,
                o_ref, feat_ref, slab_ref, *, H, W, nf, gc, cpads):
    """Fully fused RRDB forward for one batch element.

    x_hwc_ref : (1, H, W, nf)  f32   NHWC input tile (fills the dense feat map)
    x_cm_ref  : (1, nf, H*W)   f32   channel-major view of x (residual path)
    t_ref     : (nf, nf)       f32   (0.8*mFactor) * identity (MXU transpose)
    wX_ref    : (3, 3*cpad_X, coutX) bf16  per-dy, K-zero-padded HWIO weights
    bX_ref    : (1, coutX)     f32
    o_ref     : (1, nf, H*W)   f32   channel-major (lane-dense) output
    feat_ref  : VMEM (H+2, W+2, CPAD) f32   zero-haloed dense feature map
    slab_ref  : VMEM (H*W, 3*CPAD)    bf16  per-dy, lane-aligned im2col slab
    """
    fdt = feat_ref.dtype
    sdt = slab_ref.dtype

    # (1) Zero the whole feature scratch with one dense store.  This provides:
    #     the 1-pixel zero halo, the zero lane-padding channels [c_total,CPAD)
    #     read by the full-vreg-width slab copies, and a known-finite state on
    #     every grid step (the scratch persists per-core across steps).
    feat_ref[...] = jnp.zeros(feat_ref.shape, fdt)

    # (2) Place x into channels [0, nf) of the interior.
    feat_ref[pl.ds(1, H), pl.ds(1, W), pl.ds(0, nf)] = x_hwc_ref[0].astype(fdt)

    w_refs = (w1_ref, w2_ref, w3_ref, w4_ref, w5_ref)
    b_refs = (b1_ref, b2_ref, b3_ref, b4_ref, b5_ref)

    # (3) Dense block: conv_i reads channels [0, cin_i) of the concatenation
    #     [x | x1 | ... | x_{i-1}] and appends its ReLU'd output as the next
    #     gc channels (torch.cat done in VMEM, never through HBM).
    x5 = None
    for i in range(5):
        cin = nf + i * gc
        cpad = cpads[i]                      # vreg-column round-up of cin
        kw = 3 * cpad
        acc = None
        for dy in range(3):
            # Lane-aligned, full-vreg-width im2col copies: segment dx lands at
            # lane offset dx*cpad (multiple of 128) and copies cpad channels
            # (same vld/vst count as copying exactly cin channels; channels
            # [cin, cpad) are zeros and the matching weight rows are zero).
            for dx in range(3):
                src = feat_ref[pl.ds(dy, H), pl.ds(dx, W), pl.ds(0, cpad)]
                slab_ref[:, pl.ds(dx * cpad, cpad)] = (
                    src.reshape(H * W, cpad).astype(sdt))
            # One large-K bf16 MXU matmul per dy, f32 accumulation.
            part = jnp.dot(slab_ref[:, pl.ds(0, kw)], w_refs[i][dy],
                           preferred_element_type=jnp.float32)
            acc = part if acc is None else acc + part
        acc = acc + b_refs[i][...].astype(jnp.float32)       # (1,cout) bcast
        if i < 4:
            xi = jnp.maximum(acc, 0.0)                       # ReLU
            feat_ref[pl.ds(1, H), pl.ds(1, W), pl.ds(cin, gc)] = (
                xi.reshape(H, W, gc).astype(fdt))
        else:
            x5 = acc                                         # (H*W, nf) f32

    # (4) Lane-dense epilogue.  Transpose x5 to channel-major with a tiny MXU
    #     matmul against the pre-scaled identity t = (0.8*mFactor)*I, then
    #     fuse the double residual:  (x5*m + x)*0.8 + x == x5*(0.8*m) + 1.8*x.
    #     Output store is (nf, H*W): last dim >= 128 lanes -> unmasked vst.
    x5_t = jnp.einsum('cn,mn->cm', t_ref[...], x5,
                      preferred_element_type=jnp.float32)    # (nf, H*W) f32
    out_t = x5_t + x_cm_ref[0].astype(jnp.float32) * 1.8
    o_ref[0] = out_t.astype(o_ref.dtype)


# ---------------------------------------------------------------------------
# Wrapper (PyTorch-compatible NCHW interface)
# ---------------------------------------------------------------------------
def _pack_weight(w, cpad):
    """(3, 3, cin, cout) HWIO f32 -> (3, 3*cpad, cout) bf16, zero K-padding."""
    cin, cout = w.shape[2], w.shape[3]
    wp = jnp.zeros((3, 3 * cpad, cout), jnp.bfloat16)
    for dx in range(3):
        wp = wp.at[:, dx * cpad:dx * cpad + cin, :].set(
            w[:, dx, :, :].astype(jnp.bfloat16))
    return wp


def rrdb_forward(params, x_nchw, *, m_factor=0.2):
    """(N, nf, H, W) -> (N, nf, H, W), matching the PyTorch RRDB.forward."""
    N, nf, H, W = x_nchw.shape
    gc = params["w1"].shape[-1]
    cins = [nf + i * gc for i in range(5)]
    couts = [gc, gc, gc, gc, nf]
    cpads = [_round_up(c, 128) for c in cins]
    CPAD = cpads[-1]

    # One input transpose at the module boundary; the channel-major view of x
    # for the residual path and the final NCHW output reshape are free.
    x_nhwc = jnp.transpose(x_nchw, (0, 2, 3, 1))
    x_cm = x_nchw.reshape(N, nf, H * W)
    t_mat = (0.8 * m_factor) * jnp.eye(nf, dtype=jnp.float32)

    flat_inputs = [x_nhwc, x_cm, t_mat]
    in_specs = [
        pl.BlockSpec((1, H, W, nf), lambda n: (n, 0, 0, 0)),
        pl.BlockSpec((1, nf, H * W), lambda n: (n, 0, 0)),
        pl.BlockSpec((nf, nf), lambda n: (0, 0)),
    ]
    for i in range(5):
        w = params[f"w{i + 1}"]
        b = params[f"b{i + 1}"]
        cout = couts[i]
        flat_inputs.append(_pack_weight(w, cpads[i]))
        flat_inputs.append(b.reshape(1, cout).astype(jnp.float32))
        in_specs.append(
            pl.BlockSpec((3, 3 * cpads[i], cout), lambda n: (0, 0, 0)))
        in_specs.append(pl.BlockSpec((1, cout), lambda n: (0, 0)))

    kern = functools.partial(rrdb_kernel, H=H, W=W, nf=nf, gc=gc,
                             cpads=tuple(cpads))

    # Explicit scoped-VMEM budget: scratch + double-buffered I/O blocks +
    # double-buffered weights, plus generous headroom for compiler scratch.
    bytes_needed = (
        (H + 2) * (W + 2) * CPAD * 4                 # feat scratch (f32)
        + H * W * 3 * CPAD * 2                       # slab scratch (bf16)
        + 2 * (2 * H * W * nf * 4)                   # x_nhwc + x_cm blocks
        + 2 * (nf * H * W * 4)                       # out block
        + 2 * sum(3 * 3 * cpads[i] * couts[i] * 2 for i in range(5))
        + 4 * nf * nf)
    vmem_limit = int(2 * bytes_needed) + (16 << 20)

    out_cm = pl.pallas_call(
        kern,
        out_shape=jax.ShapeDtypeStruct((N, nf, H * W), x_nchw.dtype),
        grid=(N,),
        in_specs=in_specs,
        out_specs=pl.BlockSpec((1, nf, H * W), lambda n: (n, 0, 0)),
        scratch_shapes=[
            pltpu.VMEM((H + 2, W + 2, CPAD), jnp.float32),   # [x|x1..x4] + halo
            pltpu.VMEM((H * W, 3 * CPAD), jnp.bfloat16),     # aligned im2col
        ],
        compiler_params=pltpu.CompilerParams(
            dimension_semantics=("parallel",),
            vmem_limit_bytes=vmem_limit),
    )(*flat_inputs)

    return out_cm.reshape(N, nf, H, W)


# ---------------------------------------------------------------------------
# Parameters + pure-JAX reference for verification
# ---------------------------------------------------------------------------
def init_rrdb_params(key, nf, gc):
    """Deterministic synthetic weights in HWIO layout."""
    params = {}
    cins = [nf, nf + gc, nf + 2 * gc, nf + 3 * gc, nf + 4 * gc]
    couts = [gc, gc, gc, gc, nf]
    for i, (cin, cout) in enumerate(zip(cins, couts), start=1):
        key, kw, kb = jax.random.split(key, 3)
        params[f"w{i}"] = (jax.random.normal(kw, (3, 3, cin, cout),
                                             jnp.float32) * 0.05)
        params[f"b{i}"] = (jax.random.normal(kb, (cout,), jnp.float32) * 0.01)
    return params


def rrdb_reference(params, x_nchw, *, m_factor=0.2):
    x = jnp.transpose(x_nchw, (0, 2, 3, 1))

    def conv(h, w, b):
        return jax.lax.conv_general_dilated(
            h, w, (1, 1), "SAME",
            dimension_numbers=("NHWC", "HWIO", "NHWC"),
            precision=jax.lax.Precision.HIGHEST) + b

    x1 = jax.nn.relu(conv(x, params["w1"], params["b1"]))
    x2 = jax.nn.relu(conv(jnp.concatenate([x, x1], -1),
                          params["w2"], params["b2"]))
    x3 = jax.nn.relu(conv(jnp.concatenate([x, x1, x2], -1),
                          params["w3"], params["b3"]))
    x4 = jax.nn.relu(conv(jnp.concatenate([x, x1, x2, x3], -1),
                          params["w4"], params["b4"]))
    x5 = conv(jnp.concatenate([x, x1, x2, x3, x4], -1),
              params["w5"], params["b5"])
    out = (x5 * m_factor + x) * 0.8 + x
    return jnp.transpose(out, (0, 3, 1, 2))


if __name__ == "__main__":
    key = jax.random.PRNGKey(0)
    k_x, k_p = jax.random.split(key)

    N, nf, H, W = 2, 8, 16, 16
    gc = 4

    x = jax.random.normal(k_x, (N, nf, H, W), jnp.float32)
    params = init_rrdb_params(k_p, nf, gc)

    fwd = jax.jit(functools.partial(rrdb_forward, m_factor=0.2))
    out = jax.block_until_ready(fwd(params, x))

    assert out.shape == (N, nf, H, W), out.shape
    assert bool(jnp.isfinite(out).all())

    ref = rrdb_reference(params, x, m_factor=0.2)
    max_err = float(jnp.max(jnp.abs(out - ref)))
    assert max_err < 2e-2, f"mismatch vs reference: max_err={max_err}"

    print("KERNEL_OK")
</pallas_src>

<mosaic_0001>
module attributes {stable_mosaic.version = 11 : i64} {
  func.func @rrdb_kernel(%arg0: i32, %arg1: memref<1x16x16x8xf32, #tpu.memory_space<vmem>>, %arg2: memref<1x8x256xf32, #tpu.memory_space<vmem>>, %arg3: memref<8x8xf32, #tpu.memory_space<vmem>>, %arg4: memref<3x384x4xbf16, #tpu.memory_space<vmem>>, %arg5: memref<1x4xf32, #tpu.memory_space<vmem>>, %arg6: memref<3x384x4xbf16, #tpu.memory_space<vmem>>, %arg7: memref<1x4xf32, #tpu.memory_space<vmem>>, %arg8: memref<3x384x4xbf16, #tpu.memory_space<vmem>>, %arg9: memref<1x4xf32, #tpu.memory_space<vmem>>, %arg10: memref<3x384x4xbf16, #tpu.memory_space<vmem>>, %arg11: memref<1x4xf32, #tpu.memory_space<vmem>>, %arg12: memref<3x384x8xbf16, #tpu.memory_space<vmem>>, %arg13: memref<1x8xf32, #tpu.memory_space<vmem>>, %arg14: memref<1x8x256xf32, #tpu.memory_space<vmem>>, %arg15: memref<18x18x128xf32, #tpu.memory_space<vmem>>, %arg16: memref<256x384xbf16, #tpu.memory_space<vmem>>) attributes {dimension_semantics = [#tpu.dimension_semantics<parallel>], iteration_bounds = array<i64: 2>, scalar_prefetch = 0 : i64, scratch_operands = 2 : i64, tpu.core_type = #tpu.core_type<tc>, window_params = [{transform_indices = @transform_0, window_bounds = array<i64: 1, 16, 16, 8>}, {transform_indices = @transform_1, window_bounds = array<i64: 1, 8, 256>}, {pipeline_mode = #tpu.pipeline_mode<synchronous>, transform_indices = @transform_2, window_bounds = array<i64: 8, 8>}, {pipeline_mode = #tpu.pipeline_mode<synchronous>, transform_indices = @transform_3, window_bounds = array<i64: 3, 384, 4>}, {pipeline_mode = #tpu.pipeline_mode<synchronous>, transform_indices = @transform_4, window_bounds = array<i64: 1, 4>}, {pipeline_mode = #tpu.pipeline_mode<synchronous>, transform_indices = @transform_5, window_bounds = array<i64: 3, 384, 4>}, {pipeline_mode = #tpu.pipeline_mode<synchronous>, transform_indices = @transform_6, window_bounds = array<i64: 1, 4>}, {pipeline_mode = #tpu.pipeline_mode<synchronous>, transform_indices = @transform_7, window_bounds = array<i64: 3, 384, 4>}, {pipeline_mode = #tpu.pipeline_mode<synchronous>, transform_indices = @transform_8, window_bounds = array<i64: 1, 4>}, {pipeline_mode = #tpu.pipeline_mode<synchronous>, transform_indices = @transform_9, window_bounds = array<i64: 3, 384, 4>}, {pipeline_mode = #tpu.pipeline_mode<synchronous>, transform_indices = @transform_10, window_bounds = array<i64: 1, 4>}, {pipeline_mode = #tpu.pipeline_mode<synchronous>, transform_indices = @transform_11, window_bounds = array<i64: 3, 384, 8>}, {pipeline_mode = #tpu.pipeline_mode<synchronous>, transform_indices = @transform_12, window_bounds = array<i64: 1, 8>}, {transform_indices = @transform_13, window_bounds = array<i64: 1, 8, 256>}]} {
    %cst = arith.constant 0.000000e+00 : f32
    %0 = vector.broadcast %cst : f32 to vector<18x18x128xf32>
    %c0 = arith.constant 0 : index
    %c0_0 = arith.constant 0 : index
    %c0_1 = arith.constant 0 : index
    %1 = vector.load %arg15[%c0, %c0_0, %c0_1] : memref<18x18x128xf32, #tpu.memory_space<vmem>>, vector<18x18x128xf32>
    tpu.vector_store %arg15[%c0, %c0_0, %c0_1], %0 {strides = array<i32>} : memref<18x18x128xf32, #tpu.memory_space<vmem>>, vector<18x18x128xf32>,
    %c0_2 = arith.constant 0 : index
    %c0_3 = arith.constant 0 : index
    %c0_4 = arith.constant 0 : index
    %c0_5 = arith.constant 0 : index
    %2 = vector.load %arg1[%c0_2, %c0_3, %c0_4, %c0_5] : memref<1x16x16x8xf32, #tpu.memory_space<vmem>>, vector<1x16x16x8xf32>
    %3 = vector.shape_cast %2 : vector<1x16x16x8xf32> to vector<16x16x8xf32>
    %c1 = arith.constant 1 : index
    %c1_6 = arith.constant 1 : index
    %c0_7 = arith.constant 0 : index
    %4 = vector.load %arg15[%c1, %c1_6, %c0_7] : memref<18x18x128xf32, #tpu.memory_space<vmem>>, vector<16x16x8xf32>
    tpu.vector_store %arg15[%c1, %c1_6, %c0_7], %3 {strides = array<i32>} : memref<18x18x128xf32, #tpu.memory_space<vmem>>, vector<16x16x8xf32>,
    %c0_8 = arith.constant 0 : index
    %c0_9 = arith.constant 0 : index
    %c0_10 = arith.constant 0 : index
    %5 = vector.load %arg15[%c0_8, %c0_9, %c0_10] : memref<18x18x128xf32, #tpu.memory_space<vmem>>, vector<16x16x128xf32>
    %6 = vector.shape_cast %5 : vector<16x16x128xf32> to vector<256x128xf32>
    %7 = arith.truncf %6 : vector<256x128xf32> to vector<256x128xbf16>
    %c0_11 = arith.constant 0 : index
    %c0_12 = arith.constant 0 : index
    %8 = vector.load %arg16[%c0_11, %c0_12] : memref<256x384xbf16, #tpu.memory_space<vmem>>, vector<256x128xbf16>
    tpu.vector_store %arg16[%c0_11, %c0_12], %7 {strides = array<i32>} : memref<256x384xbf16, #tpu.memory_space<vmem>>, vector<256x128xbf16>,
    %c0_13 = arith.constant 0 : index
    %c1_14 = arith.constant 1 : index
    %c0_15 = arith.constant 0 : index
    %9 = vector.load %arg15[%c0_13, %c1_14, %c0_15] : memref<18x18x128xf32, #tpu.memory_space<vmem>>, vector<16x16x128xf32>
    %10 = vector.shape_cast %9 : vector<16x16x128xf32> to vector<256x128xf32>
    %11 = arith.truncf %10 : vector<256x128xf32> to vector<256x128xbf16>
    %c0_16 = arith.constant 0 : index
    %c128 = arith.constant 128 : index
    %12 = vector.load %arg16[%c0_16, %c128] : memref<256x384xbf16, #tpu.memory_space<vmem>>, vector<256x128xbf16>
    tpu.vector_store %arg16[%c0_16, %c128], %11 {strides = array<i32>} : memref<256x384xbf16, #tpu.memory_space<vmem>>, vector<256x128xbf16>,
    %c0_17 = arith.constant 0 : index
    %c2 = arith.constant 2 : index
    %c0_18 = arith.constant 0 : index
    %13 = vector.load %arg15[%c0_17, %c2, %c0_18] : memref<18x18x128xf32, #tpu.memory_space<vmem>>, vector<16x16x128xf32>
    %14 = vector.shape_cast %13 : vector<16x16x128xf32> to vector<256x128xf32>
    %15 = arith.truncf %14 : vector<256x128xf32> to vector<256x128xbf16>
    %c0_19 = arith.constant 0 : index
    %c256 = arith.constant 256 : index
    %16 = vector.load %arg16[%c0_19, %c256] : memref<256x384xbf16, #tpu.memory_space<vmem>>, vector<256x128xbf16>
    tpu.vector_store %arg16[%c0_19, %c256], %15 {strides = array<i32>} : memref<256x384xbf16, #tpu.memory_space<vmem>>, vector<256x128xbf16>,
    %c0_20 = arith.constant 0 : index
    %c0_21 = arith.constant 0 : index
    %17 = vector.load %arg16[%c0_20, %c0_21] : memref<256x384xbf16, #tpu.memory_space<vmem>>, vector<256x384xbf16>
    %c0_22 = arith.constant 0 : index
    %c0_23 = arith.constant 0 : index
    %c0_24 = arith.constant 0 : index
    %18 = vector.load %arg4[%c0_22, %c0_23, %c0_24] : memref<3x384x4xbf16, #tpu.memory_space<vmem>>, vector<1x384x4xbf16>
    %19 = vector.shape_cast %18 : vector<1x384x4xbf16> to vector<384x4xbf16>
    %cst_25 = arith.constant dense<0.000000e+00> : vector<256x4xf32>
    %20 = tpu.matmul %17, %19, %cst_25 {dimension_numbers = #tpu.dot_dimension_numbers<[1], [0], [0], [1], [0, 0, 1, 1], [], []>} : vector<256x384xbf16>, vector<384x4xbf16>, vector<256x4xf32> -> vector<256x4xf32>
    %c1_26 = arith.constant 1 : index
    %c0_27 = arith.constant 0 : index
    %c0_28 = arith.constant 0 : index
    %21 = vector.load %arg15[%c1_26, %c0_27, %c0_28] : memref<18x18x128xf32, #tpu.memory_space<vmem>>, vector<16x16x128xf32>
    %22 = vector.shape_cast %21 : vector<16x16x128xf32> to vector<256x128xf32>
    %23 = arith.truncf %22 : vector<256x128xf32> to vector<256x128xbf16>
    %c0_29 = arith.constant 0 : index
    %c0_30 = arith.constant 0 : index
    %24 = vector.load %arg16[%c0_29, %c0_30] : memref<256x384xbf16, #tpu.memory_space<vmem>>, vector<256x128xbf16>
    tpu.vector_store %arg16[%c0_29, %c0_30], %23 {strides = array<i32>} : memref<256x384xbf16, #tpu.memory_space<vmem>>, vector<256x128xbf16>,
    %c1_31 = arith.constant 1 : index
    %c1_32 = arith.constant 1 : index
    %c0_33 = arith.constant 0 : index
    %25 = vector.load %arg15[%c1_31, %c1_32, %c0_33] : memref<18x18x128xf32, #tpu.memory_space<vmem>>, vector<16x16x128xf32>
    %26 = vector.shape_cast %25 : vector<16x16x128xf32> to vector<256x128xf32>
    %27 = arith.truncf %26 : vector<256x128xf32> to vector<256x128xbf16>
    %c0_34 = arith.constant 0 : index
    %c128_35 = arith.constant 128 : index
    %28 = vector.load %arg16[%c0_34, %c128_35] : memref<256x384xbf16, #tpu.memory_space<vmem>>, vector<256x128xbf16>
    tpu.vector_store %arg16[%c0_34, %c128_35], %27 {strides = array<i32>} : memref<256x384xbf16, #tpu.memory_space<vmem>>, vector<256x128xbf16>,
    %c1_36 = arith.constant 1 : index
    %c2_37 = arith.constant 2 : index
    %c0_38 = arith.constant 0 : index
    %29 = vector.load %arg15[%c1_36, %c2_37, %c0_38] : memref<18x18x128xf32, #tpu.memory_space<vmem>>, vector<16x16x128xf32>
    %30 = vector.shape_cast %29 : vector<16x16x128xf32> to vector<256x128xf32>
    %31 = arith.truncf %30 : vector<256x128xf32> to vector<256x128xbf16>
    %c0_39 = arith.constant 0 : index
    %c256_40 = arith.constant 256 : index
    %32 = vector.load %arg16[%c0_39, %c256_40] : memref<256x384xbf16, #tpu.memory_space<vmem>>, vector<256x128xbf16>
    tpu.vector_store %arg16[%c0_39, %c256_40], %31 {strides = array<i32>} : memref<256x384xbf16, #tpu.memory_space<vmem>>, vector<256x128xbf16>,
    %c0_41 = arith.constant 0 : index
    %c0_42 = arith.constant 0 : index
    %33 = vector.load %arg16[%c0_41, %c0_42] : memref<256x384xbf16, #tpu.memory_space<vmem>>, vector<256x384xbf16>
    %c1_43 = arith.constant 1 : index
    %c0_44 = arith.constant 0 : index
    %c0_45 = arith.constant 0 : index
    %34 = vector.load %arg4[%c1_43, %c0_44, %c0_45] : memref<3x384x4xbf16, #tpu.memory_space<vmem>>, vector<1x384x4xbf16>
    %35 = vector.shape_cast %34 : vector<1x384x4xbf16> to vector<384x4xbf16>
    %cst_46 = arith.constant dense<0.000000e+00> : vector<256x4xf32>
    %36 = tpu.matmul %33, %35, %cst_46 {dimension_numbers = #tpu.dot_dimension_numbers<[1], [0], [0], [1], [0, 0, 1, 1], [], []>} : vector<256x384xbf16>, vector<384x4xbf16>, vector<256x4xf32> -> vector<256x4xf32>
    %37 = arith.addf %20, %36 : vector<256x4xf32>
    %c2_47 = arith.constant 2 : index
    %c0_48 = arith.constant 0 : index
    %c0_49 = arith.constant 0 : index
    %38 = vector.load %arg15[%c2_47, %c0_48, %c0_49] : memref<18x18x128xf32, #tpu.memory_space<vmem>>, vector<16x16x128xf32>
    %39 = vector.shape_cast %38 : vector<16x16x128xf32> to vector<256x128xf32>
    %40 = arith.truncf %39 : vector<256x128xf32> to vector<256x128xbf16>
    %c0_50 = arith.constant 0 : index
    %c0_51 = arith.constant 0 : index
    %41 = vector.load %arg16[%c0_50, %c0_51] : memref<256x384xbf16, #tpu.memory_space<vmem>>, vector<256x128xbf16>
    tpu.vector_store %arg16[%c0_50, %c0_51], %40 {strides = array<i32>} : memref<256x384xbf16, #tpu.memory_space<vmem>>, vector<256x128xbf16>,
    %c2_52 = arith.constant 2 : index
    %c1_53 = arith.constant 1 : index
    %c0_54 = arith.constant 0 : index
    %42 = vector.load %arg15[%c2_52, %c1_53, %c0_54] : memref<18x18x128xf32, #tpu.memory_space<vmem>>, vector<16x16x128xf32>
    %43 = vector.shape_cast %42 : vector<16x16x128xf32> to vector<256x128xf32>
    %44 = arith.truncf %43 : vector<256x128xf32> to vector<256x128xbf16>
    %c0_55 = arith.constant 0 : index
    %c128_56 = arith.constant 128 : index
    %45 = vector.load %arg16[%c0_55, %c128_56] : memref<256x384xbf16, #tpu.memory_space<vmem>>, vector<256x128xbf16>
    tpu.vector_store %arg16[%c0_55, %c128_56], %44 {strides = array<i32>} : memref<256x384xbf16, #tpu.memory_space<vmem>>, vector<256x128xbf16>,
    %c2_57 = arith.constant 2 : index
    %c2_58 = arith.constant 2 : index
    %c0_59 = arith.constant 0 : index
    %46 = vector.load %arg15[%c2_57, %c2_58, %c0_59] : memref<18x18x128xf32, #tpu.memory_space<vmem>>, vector<16x16x128xf32>
    %47 = vector.shape_cast %46 : vector<16x16x128xf32> to vector<256x128xf32>
    %48 = arith.truncf %47 : vector<256x128xf32> to vector<256x128xbf16>
    %c0_60 = arith.constant 0 : index
    %c256_61 = arith.constant 256 : index
    %49 = vector.load %arg16[%c0_60, %c256_61] : memref<256x384xbf16, #tpu.memory_space<vmem>>, vector<256x128xbf16>
    tpu.vector_store %arg16[%c0_60, %c256_61], %48 {strides = array<i32>} : memref<256x384xbf16, #tpu.memory_space<vmem>>, vector<256x128xbf16>,
    %c0_62 = arith.constant 0 : index
    %c0_63 = arith.constant 0 : index
    %50 = vector.load %arg16[%c0_62, %c0_63] : memref<256x384xbf16, #tpu.memory_space<vmem>>, vector<256x384xbf16>
    %c2_64 = arith.constant 2 : index
    %c0_65 = arith.constant 0 : index
    %c0_66 = arith.constant 0 : index
    %51 = vector.load %arg4[%c2_64, %c0_65, %c0_66] : memref<3x384x4xbf16, #tpu.memory_space<vmem>>, vector<1x384x4xbf16>
    %52 = vector.shape_cast %51 : vector<1x384x4xbf16> to vector<384x4xbf16>
    %cst_67 = arith.constant dense<0.000000e+00> : vector<256x4xf32>
    %53 = tpu.matmul %50, %52, %cst_67 {dimension_numbers = #tpu.dot_dimension_numbers<[1], [0], [0], [1], [0, 0, 1, 1], [], []>} : vector<256x384xbf16>, vector<384x4xbf16>, vector<256x4xf32> -> vector<256x4xf32>
    %54 = arith.addf %37, %53 : vector<256x4xf32>
    %c0_68 = arith.constant 0 : index
    %c0_69 = arith.constant 0 : index
    %55 = vector.load %arg5[%c0_68, %c0_69] : memref<1x4xf32, #tpu.memory_space<vmem>>, vector<1x4xf32>
    %56 = vector.broadcast %55 : vector<1x4xf32> to vector<256x4xf32>
    %57 = arith.addf %54, %56 : vector<256x4xf32>
    %cst_70 = arith.constant 0.000000e+00 : f32
    %58 = vector.broadcast %cst_70 : f32 to vector<256x4xf32>
    %59 = arith.maximumf %57, %58 : vector<256x4xf32>
    %60 = vector.shape_cast %59 : vector<256x4xf32> to vector<16x16x4xf32>
    %c1_71 = arith.constant 1 : index
    %c1_72 = arith.constant 1 : index
    %c8 = arith.constant 8 : index
    %61 = vector.load %arg15[%c1_71, %c1_72, %c8] : memref<18x18x128xf32, #tpu.memory_space<vmem>>, vector<16x16x4xf32>
    tpu.vector_store %arg15[%c1_71, %c1_72, %c8], %60 {strides = array<i32>} : memref<18x18x128xf32, #tpu.memory_space<vmem>>, vector<16x16x4xf32>,
    %c0_73 = arith.constant 0 : index
    %c0_74 = arith.constant 0 : index
    %c0_75 = arith.constant 0 : index
    %62 = vector.load %arg15[%c0_73, %c0_74, %c0_75] : memref<18x18x128xf32, #tpu.memory_space<vmem>>, vector<16x16x128xf32>
    %63 = vector.shape_cast %62 : vector<16x16x128xf32> to vector<256x128xf32>
    %64 = arith.truncf %63 : vector<256x128xf32> to vector<256x128xbf16>
    %c0_76 = arith.constant 0 : index
    %c0_77 = arith.constant 0 : index
    %65 = vector.load %arg16[%c0_76, %c0_77] : memref<256x384xbf16, #tpu.memory_space<vmem>>, vector<256x128xbf16>
    tpu.vector_store %arg16[%c0_76, %c0_77], %64 {strides = array<i32>} : memref<256x384xbf16, #tpu.memory_space<vmem>>, vector<256x128xbf16>,
    %c0_78 = arith.constant 0 : index
    %c1_79 = arith.constant 1 : index
    %c0_80 = arith.constant 0 : index
    %66 = vector.load %arg15[%c0_78, %c1_79, %c0_80] : memref<18x18x128xf32, #tpu.memory_space<vmem>>, vector<16x16x128xf32>
    %67 = vector.shape_cast %66 : vector<16x16x128xf32> to vector<256x128xf32>
    %68 = arith.truncf %67 : vector<256x128xf32> to vector<256x128xbf16>
    %c0_81 = arith.constant 0 : index
    %c128_82 = arith.constant 128 : index
    %69 = vector.load %arg16[%c0_81, %c128_82] : memref<256x384xbf16, #tpu.memory_space<vmem>>, vector<256x128xbf16>
    tpu.vector_store %arg16[%c0_81, %c128_82], %68 {strides = array<i32>} : memref<256x384xbf16, #tpu.memory_space<vmem>>, vector<256x128xbf16>,
    %c0_83 = arith.constant 0 : index
    %c2_84 = arith.constant 2 : index
    %c0_85 = arith.constant 0 : index
    %70 = vector.load %arg15[%c0_83, %c2_84, %c0_85] : memref<18x18x128xf32, #tpu.memory_space<vmem>>, vector<16x16x128xf32>
    %71 = vector.shape_cast %70 : vector<16x16x128xf32> to vector<256x128xf32>
    %72 = arith.truncf %71 : vector<256x128xf32> to vector<256x128xbf16>
    %c0_86 = arith.constant 0 : index
    %c256_87 = arith.constant 256 : index
    %73 = vector.load %arg16[%c0_86, %c256_87] : memref<256x384xbf16, #tpu.memory_space<vmem>>, vector<256x128xbf16>
    tpu.vector_store %arg16[%c0_86, %c256_87], %72 {strides = array<i32>} : memref<256x384xbf16, #tpu.memory_space<vmem>>, vector<256x128xbf16>,
    %c0_88 = arith.constant 0 : index
    %c0_89 = arith.constant 0 : index
    %74 = vector.load %arg16[%c0_88, %c0_89] : memref<256x384xbf16, #tpu.memory_space<vmem>>, vector<256x384xbf16>
    %c0_90 = arith.constant 0 : index
    %c0_91 = arith.constant 0 : index
    %c0_92 = arith.constant 0 : index
    %75 = vector.load %arg6[%c0_90, %c0_91, %c0_92] : memref<3x384x4xbf16, #tpu.memory_space<vmem>>, vector<1x384x4xbf16>
    %76 = vector.shape_cast %75 : vector<1x384x4xbf16> to vector<384x4xbf16>
    %cst_93 = arith.constant dense<0.000000e+00> : vector<256x4xf32>
    %77 = tpu.matmul %74, %76, %cst_93 {dimension_numbers = #tpu.dot_dimension_numbers<[1], [0], [0], [1], [0, 0, 1, 1], [], []>} : vector<256x384xbf16>, vector<384x4xbf16>, vector<256x4xf32> -> vector<256x4xf32>
    %c1_94 = arith.constant 1 : index
    %c0_95 = arith.constant 0 : index
    %c0_96 = arith.constant 0 : index
    %78 = vector.load %arg15[%c1_94, %c0_95, %c0_96] : memref<18x18x128xf32, #tpu.memory_space<vmem>>, vector<16x16x128xf32>
    %79 = vector.shape_cast %78 : vector<16x16x128xf32> to vector<256x128xf32>
    %80 = arith.truncf %79 : vector<256x128xf32> to vector<256x128xbf16>
    %c0_97 = arith.constant 0 : index
    %c0_98 = arith.constant 0 : index
    %81 = vector.load %arg16[%c0_97, %c0_98] : memref<256x384xbf16, #tpu.memory_space<vmem>>, vector<256x128xbf16>
    tpu.vector_store %arg16[%c0_97, %c0_98], %80 {strides = array<i32>} : memref<256x384xbf16, #tpu.memory_space<vmem>>, vector<256x128xbf16>,
    %c1_99 = arith.constant 1 : index
    %c1_100 = arith.constant 1 : index
    %c0_101 = arith.constant 0 : index
    %82 = vector.load %arg15[%c1_99, %c1_100, %c0_101] : memref<18x18x128xf32, #tpu.memory_space<vmem>>, vector<16x16x128xf32>
    %83 = vector.shape_cast %82 : vector<16x16x128xf32> to vector<256x128xf32>
    %84 = arith.truncf %83 : vector<256x128xf32> to vector<256x128xbf16>
    %c0_102 = arith.constant 0 : index
    %c128_103 = arith.constant 128 : index
    %85 = vector.load %arg16[%c0_102, %c128_103] : memref<256x384xbf16, #tpu.memory_space<vmem>>, vector<256x128xbf16>
    tpu.vector_store %arg16[%c0_102, %c128_103], %84 {strides = array<i32>} : memref<256x384xbf16, #tpu.memory_space<vmem>>, vector<256x128xbf16>,
    %c1_104 = arith.constant 1 : index
    %c2_105 = arith.constant 2 : index
    %c0_106 = arith.constant 0 : index
    %86 = vector.load %arg15[%c1_104, %c2_105, %c0_106] : memref<18x18x128xf32, #tpu.memory_space<vmem>>, vector<16x16x128xf32>
    %87 = vector.shape_cast %86 : vector<16x16x128xf32> to vector<256x128xf32>
    %88 = arith.truncf %87 : vector<256x128xf32> to vector<256x128xbf16>
    %c0_107 = arith.constant 0 : index
    %c256_108 = arith.constant 256 : index
    %89 = vector.load %arg16[%c0_107, %c256_108] : memref<256x384xbf16, #tpu.memory_space<vmem>>, vector<256x128xbf16>
    tpu.vector_store %arg16[%c0_107, %c256_108], %88 {strides = array<i32>} : memref<256x384xbf16, #tpu.memory_space<vmem>>, vector<256x128xbf16>,
    %c0_109 = arith.constant 0 : index
    %c0_110 = arith.constant 0 : index
    %90 = vector.load %arg16[%c0_109, %c0_110] : memref<256x384xbf16, #tpu.memory_space<vmem>>, vector<256x384xbf16>
    %c1_111 = arith.constant 1 : index
    %c0_112 = arith.constant 0 : index
    %c0_113 = arith.constant 0 : index
    %91 = vector.load %arg6[%c1_111, %c0_112, %c0_113] : memref<3x384x4xbf16, #tpu.memory_space<vmem>>, vector<1x384x4xbf16>
    %92 = vector.shape_cast %91 : vector<1x384x4xbf16> to vector<384x4xbf16>
    %cst_114 = arith.constant dense<0.000000e+00> : vector<256x4xf32>
    %93 = tpu.matmul %90, %92, %cst_114 {dimension_numbers = #tpu.dot_dimension_numbers<[1], [0], [0], [1], [0, 0, 1, 1], [], []>} : vector<256x384xbf16>, vector<384x4xbf16>, vector<256x4xf32> -> vector<256x4xf32>
    %94 = arith.addf %77, %93 : vector<256x4xf32>
    %c2_115 = arith.constant 2 : index
    %c0_116 = arith.constant 0 : index
    %c0_117 = arith.constant 0 : index
    %95 = vector.load %arg15[%c2_115, %c0_116, %c0_117] : memref<18x18x128xf32, #tpu.memory_space<vmem>>, vector<16x16x128xf32>
    %96 = vector.shape_cast %95 : vector<16x16x128xf32> to vector<256x128xf32>
    %97 = arith.truncf %96 : vector<256x128xf32> to vector<256x128xbf16>
    %c0_118 = arith.constant 0 : index
    %c0_119 = arith.constant 0 : index
    %98 = vector.load %arg16[%c0_118, %c0_119] : memref<256x384xbf16, #tpu.memory_space<vmem>>, vector<256x128xbf16>
    tpu.vector_store %arg16[%c0_118, %c0_119], %97 {strides = array<i32>} : memref<256x384xbf16, #tpu.memory_space<vmem>>, vector<256x128xbf16>,
    %c2_120 = arith.constant 2 : index
    %c1_121 = arith.constant 1 : index
    %c0_122 = arith.constant 0 : index
    %99 = vector.load %arg15[%c2_120, %c1_121, %c0_122] : memref<18x18x128xf32, #tpu.memory_space<vmem>>, vector<16x16x128xf32>
    %100 = vector.shape_cast %99 : vector<16x16x128xf32> to vector<256x128xf32>
    %101 = arith.truncf %100 : vector<256x128xf32> to vector<256x128xbf16>
    %c0_123 = arith.constant 0 : index
    %c128_124 = arith.constant 128 : index
    %102 = vector.load %arg16[%c0_123, %c128_124] : memref<256x384xbf16, #tpu.memory_space<vmem>>, vector<256x128xbf16>
    tpu.vector_store %arg16[%c0_123, %c128_124], %101 {strides = array<i32>} : memref<256x384xbf16, #tpu.memory_space<vmem>>, vector<256x128xbf16>,
    %c2_125 = arith.constant 2 : index
    %c2_126 = arith.constant 2 : index
    %c0_127 = arith.constant 0 : index
    %103 = vector.load %arg15[%c2_125, %c2_126, %c0_127] : memref<18x18x128xf32, #tpu.memory_space<vmem>>, vector<16x16x128xf32>
    %104 = vector.shape_cast %103 : vector<16x16x128xf32> to vector<256x128xf32>
    %105 = arith.truncf %104 : vector<256x128xf32> to vector<256x128xbf16>
    %c0_128 = arith.constant 0 : index
    %c256_129 = arith.constant 256 : index
    %106 = vector.load %arg16[%c0_128, %c256_129] : memref<256x384xbf16, #tpu.memory_space<vmem>>, vector<256x128xbf16>
    tpu.vector_store %arg16[%c0_128, %c256_129], %105 {strides = array<i32>} : memref<256x384xbf16, #tpu.memory_space<vmem>>, vector<256x128xbf16>,
    %c0_130 = arith.constant 0 : index
    %c0_131 = arith.constant 0 : index
    %107 = vector.load %arg16[%c0_130, %c0_131] : memref<256x384xbf16, #tpu.memory_space<vmem>>, vector<256x384xbf16>
    %c2_132 = arith.constant 2 : index
    %c0_133 = arith.constant 0 : index
    %c0_134 = arith.constant 0 : index
    %108 = vector.load %arg6[%c2_132, %c0_133, %c0_134] : memref<3x384x4xbf16, #tpu.memory_space<vmem>>, vector<1x384x4xbf16>
    %109 = vector.shape_cast %108 : vector<1x384x4xbf16> to vector<384x4xbf16>
    %cst_135 = arith.constant dense<0.000000e+00> : vector<256x4xf32>
    %110 = tpu.matmul %107, %109, %cst_135 {dimension_numbers = #tpu.dot_dimension_numbers<[1], [0], [0], [1], [0, 0, 1, 1], [], []>} : vector<256x384xbf16>, vector<384x4xbf16>, vector<256x4xf32> -> vector<256x4xf32>
    %111 = arith.addf %94, %110 : vector<256x4xf32>
    %c0_136 = arith.constant 0 : index
    %c0_137 = arith.constant 0 : index
    %112 = vector.load %arg7[%c0_136, %c0_137] : memref<1x4xf32, #tpu.memory_space<vmem>>, vector<1x4xf32>
    %113 = vector.broadcast %112 : vector<1x4xf32> to vector<256x4xf32>
    %114 = arith.addf %111, %113 : vector<256x4xf32>
    %cst_138 = arith.constant 0.000000e+00 : f32
    %115 = vector.broadcast %cst_138 : f32 to vector<256x4xf32>
    %116 = arith.maximumf %114, %115 : vector<256x4xf32>
    %117 = vector.shape_cast %116 : vector<256x4xf32> to vector<16x16x4xf32>
    %c1_139 = arith.constant 1 : index
    %c1_140 = arith.constant 1 : index
    %c12 = arith.constant 12 : index
    %118 = vector.load %arg15[%c1_139, %c1_140, %c12] : memref<18x18x128xf32, #tpu.memory_space<vmem>>, vector<16x16x4xf32>
    tpu.vector_store %arg15[%c1_139, %c1_140, %c12], %117 {strides = array<i32>} : memref<18x18x128xf32, #tpu.memory_space<vmem>>, vector<16x16x4xf32>,
    %c0_141 = arith.constant 0 : index
    %c0_142 = arith.constant 0 : index
    %c0_143 = arith.constant 0 : index
    %119 = vector.load %arg15[%c0_141, %c0_142, %c0_143] : memref<18x18x128xf32, #tpu.memory_space<vmem>>, vector<16x16x128xf32>
    %120 = vector.shape_cast %119 : vector<16x16x128xf32> to vector<256x128xf32>
    %121 = arith.truncf %120 : vector<256x128xf32> to vector<256x128xbf16>
    %c0_144 = arith.constant 0 : index
    %c0_145 = arith.constant 0 : index
    %122 = vector.load %arg16[%c0_144, %c0_145] : memref<256x384xbf16, #tpu.memory_space<vmem>>, vector<256x128xbf16>
    tpu.vector_store %arg16[%c0_144, %c0_145], %121 {strides = array<i32>} : memref<256x384xbf16, #tpu.memory_space<vmem>>, vector<256x128xbf16>,
    %c0_146 = arith.constant 0 : index
    %c1_147 = arith.constant 1 : index
    %c0_148 = arith.constant 0 : index
    %123 = vector.load %arg15[%c0_146, %c1_147, %c0_148] : memref<18x18x128xf32, #tpu.memory_space<vmem>>, vector<16x16x128xf32>
    %124 = vector.shape_cast %123 : vector<16x16x128xf32> to vector<256x128xf32>
    %125 = arith.truncf %124 : vector<256x128xf32> to vector<256x128xbf16>
    %c0_149 = arith.constant 0 : index
    %c128_150 = arith.constant 128 : index
    %126 = vector.load %arg16[%c0_149, %c128_150] : memref<256x384xbf16, #tpu.memory_space<vmem>>, vector<256x128xbf16>
    tpu.vector_store %arg16[%c0_149, %c128_150], %125 {strides = array<i32>} : memref<256x384xbf16, #tpu.memory_space<vmem>>, vector<256x128xbf16>,
    %c0_151 = arith.constant 0 : index
    %c2_152 = arith.constant 2 : index
    %c0_153 = arith.constant 0 : index
    %127 = vector.load %arg15[%c0_151, %c2_152, %c0_153] : memref<18x18x128xf32, #tpu.memory_space<vmem>>, vector<16x16x128xf32>
    %128 = vector.shape_cast %127 : vector<16x16x128xf32> to vector<256x128xf32>
    %129 = arith.truncf %128 : vector<256x128xf32> to vector<256x128xbf16>
    %c0_154 = arith.constant 0 : index
    %c256_155 = arith.constant 256 : index
    %130 = vector.load %arg16[%c0_154, %c256_155] : memref<256x384xbf16, #tpu.memory_space<vmem>>, vector<256x128xbf16>
    tpu.vector_store %arg16[%c0_154, %c256_155], %129 {strides = array<i32>} : memref<256x384xbf16, #tpu.memory_space<vmem>>, vector<256x128xbf16>,
    %c0_156 = arith.constant 0 : index
    %c0_157 = arith.constant 0 : index
    %131 = vector.load %arg16[%c0_156, %c0_157] : memref<256x384xbf16, #tpu.memory_space<vmem>>, vector<256x384xbf16>
    %c0_158 = arith.constant 0 : index
    %c0_159 = arith.constant 0 : index
    %c0_160 = arith.constant 0 : index
    %132 = vector.load %arg8[%c0_158, %c0_159, %c0_160] : memref<3x384x4xbf16, #tpu.memory_space<vmem>>, vector<1x384x4xbf16>
    %133 = vector.shape_cast %132 : vector<1x384x4xbf16> to vector<384x4xbf16>
    %cst_161 = arith.constant dense<0.000000e+00> : vector<256x4xf32>
    %134 = tpu.matmul %131, %133, %cst_161 {dimension_numbers = #tpu.dot_dimension_numbers<[1], [0], [0], [1], [0, 0, 1, 1], [], []>} : vector<256x384xbf16>, vector<384x4xbf16>, vector<256x4xf32> -> vector<256x4xf32>
    %c1_162 = arith.constant 1 : index
    %c0_163 = arith.constant 0 : index
    %c0_164 = arith.constant 0 : index
    %135 = vector.load %arg15[%c1_162, %c0_163, %c0_164] : memref<18x18x128xf32, #tpu.memory_space<vmem>>, vector<16x16x128xf32>
    %136 = vector.shape_cast %135 : vector<16x16x128xf32> to vector<256x128xf32>
    %137 = arith.truncf %136 : vector<256x128xf32> to vector<256x128xbf16>
    %c0_165 = arith.constant 0 : index
    %c0_166 = arith.constant 0 : index
    %138 = vector.load %arg16[%c0_165, %c0_166] : memref<256x384xbf16, #tpu.memory_space<vmem>>, vector<256x128xbf16>
    tpu.vector_store %arg16[%c0_165, %c0_166], %137 {strides = array<i32>} : memref<256x384xbf16, #tpu.memory_space<vmem>>, vector<256x128xbf16>,
    %c1_167 = arith.constant 1 : index
    %c1_168 = arith.constant 1 : index
    %c0_169 = arith.constant 0 : index
    %139 = vector.load %arg15[%c1_167, %c1_168, %c0_169] : memref<18x18x128xf32, #tpu.memory_space<vmem>>, vector<16x16x128xf32>
    %140 = vector.shape_cast %139 : vector<16x16x128xf32> to vector<256x128xf32>
    %141 = arith.truncf %140 : vector<256x128xf32> to vector<256x128xbf16>
    %c0_170 = arith.constant 0 : index
    %c128_171 = arith.constant 128 : index
    %142 = vector.load %arg16[%c0_170, %c128_171] : memref<256x384xbf16, #tpu.memory_space<vmem>>, vector<256x128xbf16>
    tpu.vector_store %arg16[%c0_170, %c128_171], %141 {strides = array<i32>} : memref<256x384xbf16, #tpu.memory_space<vmem>>, vector<256x128xbf16>,
    %c1_172 = arith.constant 1 : index
    %c2_173 = arith.constant 2 : index
    %c0_174 = arith.constant 0 : index
    %143 = vector.load %arg15[%c1_172, %c2_173, %c0_174] : memref<18x18x128xf32, #tpu.memory_space<vmem>>, vector<16x16x128xf32>
    %144 = vector.shape_cast %143 : vector<16x16x128xf32> to vector<256x128xf32>
    %145 = arith.truncf %144 : vector<256x128xf32> to vector<256x128xbf16>
    %c0_175 = arith.constant 0 : index
    %c256_176 = arith.constant 256 : index
    %146 = vector.load %arg16[%c0_175, %c256_176] : memref<256x384xbf16, #tpu.memory_space<vmem>>, vector<256x128xbf16>
    tpu.vector_store %arg16[%c0_175, %c256_176], %145 {strides = array<i32>} : memref<256x384xbf16, #tpu.memory_space<vmem>>, vector<256x128xbf16>,
    %c0_177 = arith.constant 0 : index
    %c0_178 = arith.constant 0 : index
    %147 = vector.load %arg16[%c0_177, %c0_178] : memref<256x384xbf16, #tpu.memory_space<vmem>>, vector<256x384xbf16>
    %c1_179 = arith.constant 1 : index
    %c0_180 = arith.constant 0 : index
    %c0_181 = arith.constant 0 : index
    %148 = vector.load %arg8[%c1_179, %c0_180, %c0_181] : memref<3x384x4xbf16, #tpu.memory_space<vmem>>, vector<1x384x4xbf16>
    %149 = vector.shape_cast %148 : vector<1x384x4xbf16> to vector<384x4xbf16>
    %cst_182 = arith.constant dense<0.000000e+00> : vector<256x4xf32>
    %150 = tpu.matmul %147, %149, %cst_182 {dimension_numbers = #tpu.dot_dimension_numbers<[1], [0], [0], [1], [0, 0, 1, 1], [], []>} : vector<256x384xbf16>, vector<384x4xbf16>, vector<256x4xf32> -> vector<256x4xf32>
    %151 = arith.addf %134, %150 : vector<256x4xf32>
    %c2_183 = arith.constant 2 : index
    %c0_184 = arith.constant 0 : index
    %c0_185 = arith.constant 0 : index
    %152 = vector.load %arg15[%c2_183, %c0_184, %c0_185] : memref<18x18x128xf32, #tpu.memory_space<vmem>>, vector<16x16x128xf32>
    %153 = vector.shape_cast %152 : vector<16x16x128xf32> to vector<256x128xf32>
    %154 = arith.truncf %153 : vector<256x128xf32> to vector<256x128xbf16>
    %c0_186 = arith.constant 0 : index
    %c0_187 = arith.constant 0 : index
    %155 = vector.load %arg16[%c0_186, %c0_187] : memref<256x384xbf16, #tpu.memory_space<vmem>>, vector<256x128xbf16>
    tpu.vector_store %arg16[%c0_186, %c0_187], %154 {strides = array<i32>} : memref<256x384xbf16, #tpu.memory_space<vmem>>, vector<256x128xbf16>,
    %c2_188 = arith.constant 2 : index
    %c1_189 = arith.constant 1 : index
    %c0_190 = arith.constant 0 : index
    %156 = vector.load %arg15[%c2_188, %c1_189, %c0_190] : memref<18x18x128xf32, #tpu.memory_space<vmem>>, vector<16x16x128xf32>
    %157 = vector.shape_cast %156 : vector<16x16x128xf32> to vector<256x128xf32>
    %158 = arith.truncf %157 : vector<256x128xf32> to vector<256x128xbf16>
    %c0_191 = arith.constant 0 : index
    %c128_192 = arith.constant 128 : index
    %159 = vector.load %arg16[%c0_191, %c128_192] : memref<256x384xbf16, #tpu.memory_space<vmem>>, vector<256x128xbf16>
    tpu.vector_store %arg16[%c0_191, %c128_192], %158 {strides = array<i32>} : memref<256x384xbf16, #tpu.memory_space<vmem>>, vector<256x128xbf16>,
    %c2_193 = arith.constant 2 : index
    %c2_194 = arith.constant 2 : index
    %c0_195 = arith.constant 0 : index
    %160 = vector.load %arg15[%c2_193, %c2_194, %c0_195] : memref<18x18x128xf32, #tpu.memory_space<vmem>>, vector<16x16x128xf32>
    %161 = vector.shape_cast %160 : vector<16x16x128xf32> to vector<256x128xf32>
    %162 = arith.truncf %161 : vector<256x128xf32> to vector<256x128xbf16>
    %c0_196 = arith.constant 0 : index
    %c256_197 = arith.constant 256 : index
    %163 = vector.load %arg16[%c0_196, %c256_197] : memref<256x384xbf16, #tpu.memory_space<vmem>>, vector<256x128xbf16>
    tpu.vector_store %arg16[%c0_196, %c256_197], %162 {strides = array<i32>} : memref<256x384xbf16, #tpu.memory_space<vmem>>, vector<256x128xbf16>,
    %c0_198 = arith.constant 0 : index
    %c0_199 = arith.constant 0 : index
    %164 = vector.load %arg16[%c0_198, %c0_199] : memref<256x384xbf16, #tpu.memory_space<vmem>>, vector<256x384xbf16>
    %c2_200 = arith.constant 2 : index
    %c0_201 = arith.constant 0 : index
    %c0_202 = arith.constant 0 : index
    %165 = vector.load %arg8[%c2_200, %c0_201, %c0_202] : memref<3x384x4xbf16, #tpu.memory_space<vmem>>, vector<1x384x4xbf16>
    %166 = vector.shape_cast %165 : vector<1x384x4xbf16> to vector<384x4xbf16>
    %cst_203 = arith.constant dense<0.000000e+00> : vector<256x4xf32>
    %167 = tpu.matmul %164, %166, %cst_203 {dimension_numbers = #tpu.dot_dimension_numbers<[1], [0], [0], [1], [0, 0, 1, 1], [], []>} : vector<256x384xbf16>, vector<384x4xbf16>, vector<256x4xf32> -> vector<256x4xf32>
    %168 = arith.addf %151, %167 : vector<256x4xf32>
    %c0_204 = arith.constant 0 : index
    %c0_205 = arith.constant 0 : index
    %169 = vector.load %arg9[%c0_204, %c0_205] : memref<1x4xf32, #tpu.memory_space<vmem>>, vector<1x4xf32>
    %170 = vector.broadcast %169 : vector<1x4xf32> to vector<256x4xf32>
    %171 = arith.addf %168, %170 : vector<256x4xf32>
    %cst_206 = arith.constant 0.000000e+00 : f32
    %172 = vector.broadcast %cst_206 : f32 to vector<256x4xf32>
    %173 = arith.maximumf %171, %172 : vector<256x4xf32>
    %174 = vector.shape_cast %173 : vector<256x4xf32> to vector<16x16x4xf32>
    %c1_207 = arith.constant 1 : index
    %c1_208 = arith.constant 1 : index
    %c16 = arith.constant 16 : index
    %175 = vector.load %arg15[%c1_207, %c1_208, %c16] : memref<18x18x128xf32, #tpu.memory_space<vmem>>, vector<16x16x4xf32>
    tpu.vector_store %arg15[%c1_207, %c1_208, %c16], %174 {strides = array<i32>} : memref<18x18x128xf32, #tpu.memory_space<vmem>>, vector<16x16x4xf32>,
    %c0_209 = arith.constant 0 : index
    %c0_210 = arith.constant 0 : index
    %c0_211 = arith.constant 0 : index
    %176 = vector.load %arg15[%c0_209, %c0_210, %c0_211] : memref<18x18x128xf32, #tpu.memory_space<vmem>>, vector<16x16x128xf32>
    %177 = vector.shape_cast %176 : vector<16x16x128xf32> to vector<256x128xf32>
    %178 = arith.truncf %177 : vector<256x128xf32> to vector<256x128xbf16>
    %c0_212 = arith.constant 0 : index
    %c0_213 = arith.constant 0 : index
    %179 = vector.load %arg16[%c0_212, %c0_213] : memref<256x384xbf16, #tpu.memory_space<vmem>>, vector<256x128xbf16>
    tpu.vector_store %arg16[%c0_212, %c0_213], %178 {strides = array<i32>} : memref<256x384xbf16, #tpu.memory_space<vmem>>, vector<256x128xbf16>,
    %c0_214 = arith.constant 0 : index
    %c1_215 = arith.constant 1 : index
    %c0_216 = arith.constant 0 : index
    %180 = vector.load %arg15[%c0_214, %c1_215, %c0_216] : memref<18x18x128xf32, #tpu.memory_space<vmem>>, vector<16x16x128xf32>
    %181 = vector.shape_cast %180 : vector<16x16x128xf32> to vector<256x128xf32>
    %182 = arith.truncf %181 : vector<256x128xf32> to vector<256x128xbf16>
    %c0_217 = arith.constant 0 : index
    %c128_218 = arith.constant 128 : index
    %183 = vector.load %arg16[%c0_217, %c128_218] : memref<256x384xbf16, #tpu.memory_space<vmem>>, vector<256x128xbf16>
    tpu.vector_store %arg16[%c0_217, %c128_218], %182 {strides = array<i32>} : memref<256x384xbf16, #tpu.memory_space<vmem>>, vector<256x128xbf16>,
    %c0_219 = arith.constant 0 : index
    %c2_220 = arith.constant 2 : index
    %c0_221 = arith.constant 0 : index
    %184 = vector.load %arg15[%c0_219, %c2_220, %c0_221] : memref<18x18x128xf32, #tpu.memory_space<vmem>>, vector<16x16x128xf32>
    %185 = vector.shape_cast %184 : vector<16x16x128xf32> to vector<256x128xf32>
    %186 = arith.truncf %185 : vector<256x128xf32> to vector<256x128xbf16>
    %c0_222 = arith.constant 0 : index
    %c256_223 = arith.constant 256 : index
    %187 = vector.load %arg16[%c0_222, %c256_223] : memref<256x384xbf16, #tpu.memory_space<vmem>>, vector<256x128xbf16>
    tpu.vector_store %arg16[%c0_222, %c256_223], %186 {strides = array<i32>} : memref<256x384xbf16, #tpu.memory_space<vmem>>, vector<256x128xbf16>,
    %c0_224 = arith.constant 0 : index
    %c0_225 = arith.constant 0 : index
    %188 = vector.load %arg16[%c0_224, %c0_225] : memref<256x384xbf16, #tpu.memory_space<vmem>>, vector<256x384xbf16>
    %c0_226 = arith.constant 0 : index
    %c0_227 = arith.constant 0 : index
    %c0_228 = arith.constant 0 : index
    %189 = vector.load %arg10[%c0_226, %c0_227, %c0_228] : memref<3x384x4xbf16, #tpu.memory_space<vmem>>, vector<1x384x4xbf16>
    %190 = vector.shape_cast %189 : vector<1x384x4xbf16> to vector<384x4xbf16>
    %cst_229 = arith.constant dense<0.000000e+00> : vector<256x4xf32>
    %191 = tpu.matmul %188, %190, %cst_229 {dimension_numbers = #tpu.dot_dimension_numbers<[1], [0], [0], [1], [0, 0, 1, 1], [], []>} : vector<256x384xbf16>, vector<384x4xbf16>, vector<256x4xf32> -> vector<256x4xf32>
    %c1_230 = arith.constant 1 : index
    %c0_231 = arith.constant 0 : index
    %c0_232 = arith.constant 0 : index
    %192 = vector.load %arg15[%c1_230, %c0_231, %c0_232] : memref<18x18x128xf32, #tpu.memory_space<vmem>>, vector<16x16x128xf32>
    %193 = vector.shape_cast %192 : vector<16x16x128xf32> to vector<256x128xf32>
    %194 = arith.truncf %193 : vector<256x128xf32> to vector<256x128xbf16>
    %c0_233 = arith.constant 0 : index
    %c0_234 = arith.constant 0 : index
    %195 = vector.load %arg16[%c0_233, %c0_234] : memref<256x384xbf16, #tpu.memory_space<vmem>>, vector<256x128xbf16>
    tpu.vector_store %arg16[%c0_233, %c0_234], %194 {strides = array<i32>} : memref<256x384xbf16, #tpu.memory_space<vmem>>, vector<256x128xbf16>,
    %c1_235 = arith.constant 1 : index
    %c1_236 = arith.constant 1 : index
    %c0_237 = arith.constant 0 : index
    %196 = vector.load %arg15[%c1_235, %c1_236, %c0_237] : memref<18x18x128xf32, #tpu.memory_space<vmem>>, vector<16x16x128xf32>
    %197 = vector.shape_cast %196 : vector<16x16x128xf32> to vector<256x128xf32>
    %198 = arith.truncf %197 : vector<256x128xf32> to vector<256x128xbf16>
    %c0_238 = arith.constant 0 : index
    %c128_239 = arith.constant 128 : index
    %199 = vector.load %arg16[%c0_238, %c128_239] : memref<256x384xbf16, #tpu.memory_space<vmem>>, vector<256x128xbf16>
    tpu.vector_store %arg16[%c0_238, %c128_239], %198 {strides = array<i32>} : memref<256x384xbf16, #tpu.memory_space<vmem>>, vector<256x128xbf16>,
    %c1_240 = arith.constant 1 : index
    %c2_241 = arith.constant 2 : index
    %c0_242 = arith.constant 0 : index
    %200 = vector.load %arg15[%c1_240, %c2_241, %c0_242] : memref<18x18x128xf32, #tpu.memory_space<vmem>>, vector<16x16x128xf32>
    %201 = vector.shape_cast %200 : vector<16x16x128xf32> to vector<256x128xf32>
    %202 = arith.truncf %201 : vector<256x128xf32> to vector<256x128xbf16>
    %c0_243 = arith.constant 0 : index
    %c256_244 = arith.constant 256 : index
    %203 = vector.load %arg16[%c0_243, %c256_244] : memref<256x384xbf16, #tpu.memory_space<vmem>>, vector<256x128xbf16>
    tpu.vector_store %arg16[%c0_243, %c256_244], %202 {strides = array<i32>} : memref<256x384xbf16, #tpu.memory_space<vmem>>, vector<256x128xbf16>,
    %c0_245 = arith.constant 0 : index
    %c0_246 = arith.constant 0 : index
    %204 = vector.load %arg16[%c0_245, %c0_246] : memref<256x384xbf16, #tpu.memory_space<vmem>>, vector<256x384xbf16>
    %c1_247 = arith.constant 1 : index
    %c0_248 = arith.constant 0 : index
    %c0_249 = arith.constant 0 : index
    %205 = vector.load %arg10[%c1_247, %c0_248, %c0_249] : memref<3x384x4xbf16, #tpu.memory_space<vmem>>, vector<1x384x4xbf16>
    %206 = vector.shape_cast %205 : vector<1x384x4xbf16> to vector<384x4xbf16>
    %cst_250 = arith.constant dense<0.000000e+00> : vector<256x4xf32>
    %207 = tpu.matmul %204, %206, %cst_250 {dimension_numbers = #tpu.dot_dimension_numbers<[1], [0], [0], [1], [0, 0, 1, 1], [], []>} : vector<256x384xbf16>, vector<384x4xbf16>, vector<256x4xf32> -> vector<256x4xf32>
    %208 = arith.addf %191, %207 : vector<256x4xf32>
    %c2_251 = arith.constant 2 : index
    %c0_252 = arith.constant 0 : index
    %c0_253 = arith.constant 0 : index
    %209 = vector.load %arg15[%c2_251, %c0_252, %c0_253] : memref<18x18x128xf32, #tpu.memory_space<vmem>>, vector<16x16x128xf32>
    %210 = vector.shape_cast %209 : vector<16x16x128xf32> to vector<256x128xf32>
    %211 = arith.truncf %210 : vector<256x128xf32> to vector<256x128xbf16>
    %c0_254 = arith.constant 0 : index
    %c0_255 = arith.constant 0 : index
    %212 = vector.load %arg16[%c0_254, %c0_255] : memref<256x384xbf16, #tpu.memory_space<vmem>>, vector<256x128xbf16>
    tpu.vector_store %arg16[%c0_254, %c0_255], %211 {strides = array<i32>} : memref<256x384xbf16, #tpu.memory_space<vmem>>, vector<256x128xbf16>,
    %c2_256 = arith.constant 2 : index
    %c1_257 = arith.constant 1 : index
    %c0_258 = arith.constant 0 : index
    %213 = vector.load %arg15[%c2_256, %c1_257, %c0_258] : memref<18x18x128xf32, #tpu.memory_space<vmem>>, vector<16x16x128xf32>
    %214 = vector.shape_cast %213 : vector<16x16x128xf32> to vector<256x128xf32>
    %215 = arith.truncf %214 : vector<256x128xf32> to vector<256x128xbf16>
    %c0_259 = arith.constant 0 : index
    %c128_260 = arith.constant 128 : index
    %216 = vector.load %arg16[%c0_259, %c128_260] : memref<256x384xbf16, #tpu.memory_space<vmem>>, vector<256x128xbf16>
    tpu.vector_store %arg16[%c0_259, %c128_260], %215 {strides = array<i32>} : memref<256x384xbf16, #tpu.memory_space<vmem>>, vector<256x128xbf16>,
    %c2_261 = arith.constant 2 : index
    %c2_262 = arith.constant 2 : index
    %c0_263 = arith.constant 0 : index
    %217 = vector.load %arg15[%c2_261, %c2_262, %c0_263] : memref<18x18x128xf32, #tpu.memory_space<vmem>>, vector<16x16x128xf32>
    %218 = vector.shape_cast %217 : vector<16x16x128xf32> to vector<256x128xf32>
    %219 = arith.truncf %218 : vector<256x128xf32> to vector<256x128xbf16>
    %c0_264 = arith.constant 0 : index
    %c256_265 = arith.constant 256 : index
    %220 = vector.load %arg16[%c0_264, %c256_265] : memref<256x384xbf16, #tpu.memory_space<vmem>>, vector<256x128xbf16>
    tpu.vector_store %arg16[%c0_264, %c256_265], %219 {strides = array<i32>} : memref<256x384xbf16, #tpu.memory_space<vmem>>, vector<256x128xbf16>,
    %c0_266 = arith.constant 0 : index
    %c0_267 = arith.constant 0 : index
    %221 = vector.load %arg16[%c0_266, %c0_267] : memref<256x384xbf16, #tpu.memory_space<vmem>>, vector<256x384xbf16>
    %c2_268 = arith.constant 2 : index
    %c0_269 = arith.constant 0 : index
    %c0_270 = arith.constant 0 : index
    %222 = vector.load %arg10[%c2_268, %c0_269, %c0_270] : memref<3x384x4xbf16, #tpu.memory_space<vmem>>, vector<1x384x4xbf16>
    %223 = vector.shape_cast %222 : vector<1x384x4xbf16> to vector<384x4xbf16>
    %cst_271 = arith.constant dense<0.000000e+00> : vector<256x4xf32>
    %224 = tpu.matmul %221, %223, %cst_271 {dimension_numbers = #tpu.dot_dimension_numbers<[1], [0], [0], [1], [0, 0, 1, 1], [], []>} : vector<256x384xbf16>, vector<384x4xbf16>, vector<256x4xf32> -> vector<256x4xf32>
    %225 = arith.addf %208, %224 : vector<256x4xf32>
    %c0_272 = arith.constant 0 : index
    %c0_273 = arith.constant 0 : index
    %226 = vector.load %arg11[%c0_272, %c0_273] : memref<1x4xf32, #tpu.memory_space<vmem>>, vector<1x4xf32>
    %227 = vector.broadcast %226 : vector<1x4xf32> to vector<256x4xf32>
    %228 = arith.addf %225, %227 : vector<256x4xf32>
    %cst_274 = arith.constant 0.000000e+00 : f32
    %229 = vector.broadcast %cst_274 : f32 to vector<256x4xf32>
    %230 = arith.maximumf %228, %229 : vector<256x4xf32>
    %231 = vector.shape_cast %230 : vector<256x4xf32> to vector<16x16x4xf32>
    %c1_275 = arith.constant 1 : index
    %c1_276 = arith.constant 1 : index
    %c20 = arith.constant 20 : index
    %232 = vector.load %arg15[%c1_275, %c1_276, %c20] : memref<18x18x128xf32, #tpu.memory_space<vmem>>, vector<16x16x4xf32>
    tpu.vector_store %arg15[%c1_275, %c1_276, %c20], %231 {strides = array<i32>} : memref<18x18x128xf32, #tpu.memory_space<vmem>>, vector<16x16x4xf32>,
    %c0_277 = arith.constant 0 : index
    %c0_278 = arith.constant 0 : index
    %c0_279 = arith.constant 0 : index
    %233 = vector.load %arg15[%c0_277, %c0_278, %c0_279] : memref<18x18x128xf32, #tpu.memory_space<vmem>>, vector<16x16x128xf32>
    %234 = vector.shape_cast %233 : vector<16x16x128xf32> to vector<256x128xf32>
    %235 = arith.truncf %234 : vector<256x128xf32> to vector<256x128xbf16>
    %c0_280 = arith.constant 0 : index
    %c0_281 = arith.constant 0 : index
    %236 = vector.load %arg16[%c0_280, %c0_281] : memref<256x384xbf16, #tpu.memory_space<vmem>>, vector<256x128xbf16>
    tpu.vector_store %arg16[%c0_280, %c0_281], %235 {strides = array<i32>} : memref<256x384xbf16, #tpu.memory_space<vmem>>, vector<256x128xbf16>,
    %c0_282 = arith.constant 0 : index
    %c1_283 = arith.constant 1 : index
    %c0_284 = arith.constant 0 : index
    %237 = vector.load %arg15[%c0_282, %c1_283, %c0_284] : memref<18x18x128xf32, #tpu.memory_space<vmem>>, vector<16x16x128xf32>
    %238 = vector.shape_cast %237 : vector<16x16x128xf32> to vector<256x128xf32>
    %239 = arith.truncf %238 : vector<256x128xf32> to vector<256x128xbf16>
    %c0_285 = arith.constant 0 : index
    %c128_286 = arith.constant 128 : index
    %240 = vector.load %arg16[%c0_285, %c128_286] : memref<256x384xbf16, #tpu.memory_space<vmem>>, vector<256x128xbf16>
    tpu.vector_store %arg16[%c0_285, %c128_286], %239 {strides = array<i32>} : memref<256x384xbf16, #tpu.memory_space<vmem>>, vector<256x128xbf16>,
    %c0_287 = arith.constant 0 : index
    %c2_288 = arith.constant 2 : index
    %c0_289 = arith.constant 0 : index
    %241 = vector.load %arg15[%c0_287, %c2_288, %c0_289] : memref<18x18x128xf32, #tpu.memory_space<vmem>>, vector<16x16x128xf32>
    %242 = vector.shape_cast %241 : vector<16x16x128xf32> to vector<256x128xf32>
    %243 = arith.truncf %242 : vector<256x128xf32> to vector<256x128xbf16>
    %c0_290 = arith.constant 0 : index
    %c256_291 = arith.constant 256 : index
    %244 = vector.load %arg16[%c0_290, %c256_291] : memref<256x384xbf16, #tpu.memory_space<vmem>>, vector<256x128xbf16>
    tpu.vector_store %arg16[%c0_290, %c256_291], %243 {strides = array<i32>} : memref<256x384xbf16, #tpu.memory_space<vmem>>, vector<256x128xbf16>,
    %c0_292 = arith.constant 0 : index
    %c0_293 = arith.constant 0 : index
    %245 = vector.load %arg16[%c0_292, %c0_293] : memref<256x384xbf16, #tpu.memory_space<vmem>>, vector<256x384xbf16>
    %c0_294 = arith.constant 0 : index
    %c0_295 = arith.constant 0 : index
    %c0_296 = arith.constant 0 : index
    %246 = vector.load %arg12[%c0_294, %c0_295, %c0_296] : memref<3x384x8xbf16, #tpu.memory_space<vmem>>, vector<1x384x8xbf16>
    %247 = vector.shape_cast %246 : vector<1x384x8xbf16> to vector<384x8xbf16>
    %cst_297 = arith.constant dense<0.000000e+00> : vector<256x8xf32>
    %248 = tpu.matmul %245, %247, %cst_297 {dimension_numbers = #tpu.dot_dimension_numbers<[1], [0], [0], [1], [0, 0, 1, 1], [], []>} : vector<256x384xbf16>, vector<384x8xbf16>, vector<256x8xf32> -> vector<256x8xf32>
    %c1_298 = arith.constant 1 : index
    %c0_299 = arith.constant 0 : index
    %c0_300 = arith.constant 0 : index
    %249 = vector.load %arg15[%c1_298, %c0_299, %c0_300] : memref<18x18x128xf32, #tpu.memory_space<vmem>>, vector<16x16x128xf32>
    %250 = vector.shape_cast %249 : vector<16x16x128xf32> to vector<256x128xf32>
    %251 = arith.truncf %250 : vector<256x128xf32> to vector<256x128xbf16>
    %c0_301 = arith.constant 0 : index
    %c0_302 = arith.constant 0 : index
    %252 = vector.load %arg16[%c0_301, %c0_302] : memref<256x384xbf16, #tpu.memory_space<vmem>>, vector<256x128xbf16>
    tpu.vector_store %arg16[%c0_301, %c0_302], %251 {strides = array<i32>} : memref<256x384xbf16, #tpu.memory_space<vmem>>, vector<256x128xbf16>,
    %c1_303 = arith.constant 1 : index
    %c1_304 = arith.constant 1 : index
    %c0_305 = arith.constant 0 : index
    %253 = vector.load %arg15[%c1_303, %c1_304, %c0_305] : memref<18x18x128xf32, #tpu.memory_space<vmem>>, vector<16x16x128xf32>
    %254 = vector.shape_cast %253 : vector<16x16x128xf32> to vector<256x128xf32>
    %255 = arith.truncf %254 : vector<256x128xf32> to vector<256x128xbf16>
    %c0_306 = arith.constant 0 : index
    %c128_307 = arith.constant 128 : index
    %256 = vector.load %arg16[%c0_306, %c128_307] : memref<256x384xbf16, #tpu.memory_space<vmem>>, vector<256x128xbf16>
    tpu.vector_store %arg16[%c0_306, %c128_307], %255 {strides = array<i32>} : memref<256x384xbf16, #tpu.memory_space<vmem>>, vector<256x128xbf16>,
    %c1_308 = arith.constant 1 : index
    %c2_309 = arith.constant 2 : index
    %c0_310 = arith.constant 0 : index
    %257 = vector.load %arg15[%c1_308, %c2_309, %c0_310] : memref<18x18x128xf32, #tpu.memory_space<vmem>>, vector<16x16x128xf32>
    %258 = vector.shape_cast %257 : vector<16x16x128xf32> to vector<256x128xf32>
    %259 = arith.truncf %258 : vector<256x128xf32> to vector<256x128xbf16>
    %c0_311 = arith.constant 0 : index
    %c256_312 = arith.constant 256 : index
    %260 = vector.load %arg16[%c0_311, %c256_312] : memref<256x384xbf16, #tpu.memory_space<vmem>>, vector<256x128xbf16>
    tpu.vector_store %arg16[%c0_311, %c256_312], %259 {strides = array<i32>} : memref<256x384xbf16, #tpu.memory_space<vmem>>, vector<256x128xbf16>,
    %c0_313 = arith.constant 0 : index
    %c0_314 = arith.constant 0 : index
    %261 = vector.load %arg16[%c0_313, %c0_314] : memref<256x384xbf16, #tpu.memory_space<vmem>>, vector<256x384xbf16>
    %c1_315 = arith.constant 1 : index
    %c0_316 = arith.constant 0 : index
    %c0_317 = arith.constant 0 : index
    %262 = vector.load %arg12[%c1_315, %c0_316, %c0_317] : memref<3x384x8xbf16, #tpu.memory_space<vmem>>, vector<1x384x8xbf16>
    %263 = vector.shape_cast %262 : vector<1x384x8xbf16> to vector<384x8xbf16>
    %cst_318 = arith.constant dense<0.000000e+00> : vector<256x8xf32>
    %264 = tpu.matmul %261, %263, %cst_318 {dimension_numbers = #tpu.dot_dimension_numbers<[1], [0], [0], [1], [0, 0, 1, 1], [], []>} : vector<256x384xbf16>, vector<384x8xbf16>, vector<256x8xf32> -> vector<256x8xf32>
    %265 = arith.addf %248, %264 : vector<256x8xf32>
    %c2_319 = arith.constant 2 : index
    %c0_320 = arith.constant 0 : index
    %c0_321 = arith.constant 0 : index
    %266 = vector.load %arg15[%c2_319, %c0_320, %c0_321] : memref<18x18x128xf32, #tpu.memory_space<vmem>>, vector<16x16x128xf32>
    %267 = vector.shape_cast %266 : vector<16x16x128xf32> to vector<256x128xf32>
    %268 = arith.truncf %267 : vector<256x128xf32> to vector<256x128xbf16>
    %c0_322 = arith.constant 0 : index
    %c0_323 = arith.constant 0 : index
    %269 = vector.load %arg16[%c0_322, %c0_323] : memref<256x384xbf16, #tpu.memory_space<vmem>>, vector<256x128xbf16>
    tpu.vector_store %arg16[%c0_322, %c0_323], %268 {strides = array<i32>} : memref<256x384xbf16, #tpu.memory_space<vmem>>, vector<256x128xbf16>,
    %c2_324 = arith.constant 2 : index
    %c1_325 = arith.constant 1 : index
    %c0_326 = arith.constant 0 : index
    %270 = vector.load %arg15[%c2_324, %c1_325, %c0_326] : memref<18x18x128xf32, #tpu.memory_space<vmem>>, vector<16x16x128xf32>
    %271 = vector.shape_cast %270 : vector<16x16x128xf32> to vector<256x128xf32>
    %272 = arith.truncf %271 : vector<256x128xf32> to vector<256x128xbf16>
    %c0_327 = arith.constant 0 : index
    %c128_328 = arith.constant 128 : index
    %273 = vector.load %arg16[%c0_327, %c128_328] : memref<256x384xbf16, #tpu.memory_space<vmem>>, vector<256x128xbf16>
    tpu.vector_store %arg16[%c0_327, %c128_328], %272 {strides = array<i32>} : memref<256x384xbf16, #tpu.memory_space<vmem>>, vector<256x128xbf16>,
    %c2_329 = arith.constant 2 : index
    %c2_330 = arith.constant 2 : index
    %c0_331 = arith.constant 0 : index
    %274 = vector.load %arg15[%c2_329, %c2_330, %c0_331] : memref<18x18x128xf32, #tpu.memory_space<vmem>>, vector<16x16x128xf32>
    %275 = vector.shape_cast %274 : vector<16x16x128xf32> to vector<256x128xf32>
    %276 = arith.truncf %275 : vector<256x128xf32> to vector<256x128xbf16>
    %c0_332 = arith.constant 0 : index
    %c256_333 = arith.constant 256 : index
    %277 = vector.load %arg16[%c0_332, %c256_333] : memref<256x384xbf16, #tpu.memory_space<vmem>>, vector<256x128xbf16>
    tpu.vector_store %arg16[%c0_332, %c256_333], %276 {strides = array<i32>} : memref<256x384xbf16, #tpu.memory_space<vmem>>, vector<256x128xbf16>,
    %c0_334 = arith.constant 0 : index
    %c0_335 = arith.constant 0 : index
    %278 = vector.load %arg16[%c0_334, %c0_335] : memref<256x384xbf16, #tpu.memory_space<vmem>>, vector<256x384xbf16>
    %c2_336 = arith.constant 2 : index
    %c0_337 = arith.constant 0 : index
    %c0_338 = arith.constant 0 : index
    %279 = vector.load %arg12[%c2_336, %c0_337, %c0_338] : memref<3x384x8xbf16, #tpu.memory_space<vmem>>, vector<1x384x8xbf16>
    %280 = vector.shape_cast %279 : vector<1x384x8xbf16> to vector<384x8xbf16>
    %cst_339 = arith.constant dense<0.000000e+00> : vector<256x8xf32>
    %281 = tpu.matmul %278, %280, %cst_339 {dimension_numbers = #tpu.dot_dimension_numbers<[1], [0], [0], [1], [0, 0, 1, 1], [], []>} : vector<256x384xbf16>, vector<384x8xbf16>, vector<256x8xf32> -> vector<256x8xf32>
    %282 = arith.addf %265, %281 : vector<256x8xf32>
    %c0_340 = arith.constant 0 : index
    %c0_341 = arith.constant 0 : index
    %283 = vector.load %arg13[%c0_340, %c0_341] : memref<1x8xf32, #tpu.memory_space<vmem>>, vector<1x8xf32>
    %284 = vector.broadcast %283 : vector<1x8xf32> to vector<256x8xf32>
    %285 = arith.addf %282, %284 : vector<256x8xf32>
    %c0_342 = arith.constant 0 : index
    %c0_343 = arith.constant 0 : index
    %286 = vector.load %arg3[%c0_342, %c0_343] : memref<8x8xf32, #tpu.memory_space<vmem>>, vector<8x8xf32>
    "tpu.trace_start"() <{level = 10 : i32, message = "cn,mn->cm"}> : () -> ()
    %cst_344 = arith.constant dense<0.000000e+00> : vector<8x256xf32>
    %287 = tpu.matmul %286, %285, %cst_344 {dimension_numbers = #tpu.dot_dimension_numbers<[1], [1], [0], [0], [0, 0, 1, 0], [], []>} : vector<8x8xf32>, vector<256x8xf32>, vector<8x256xf32> -> vector<8x256xf32>
    "tpu.trace_stop"() : () -> ()
    %c0_345 = arith.constant 0 : index
    %c0_346 = arith.constant 0 : index
    %c0_347 = arith.constant 0 : index
    %288 = vector.load %arg2[%c0_345, %c0_346, %c0_347] : memref<1x8x256xf32, #tpu.memory_space<vmem>>, vector<1x8x256xf32>
    %289 = vector.shape_cast %288 : vector<1x8x256xf32> to vector<8x256xf32>
    %cst_348 = arith.constant 1.800000e+00 : f32
    %290 = vector.broadcast %cst_348 : f32 to vector<8x256xf32>
    %291 = arith.mulf %289, %290 : vector<8x256xf32>
    %292 = arith.addf %287, %291 : vector<8x256xf32>
    %c0_349 = arith.constant 0 : index
    %c0_350 = arith.constant 0 : index
    %c0_351 = arith.constant 0 : index
    %293 = vector.load %arg14[%c0_349, %c0_350, %c0_351] : memref<1x8x256xf32, #tpu.memory_space<vmem>>, vector<1x8x256xf32>
    %294 = vector.shape_cast %293 : vector<1x8x256xf32> to vector<8x256xf32>
    %295 = vector.shape_cast %292 : vector<8x256xf32> to vector<1x8x256xf32>
    tpu.vector_store %arg14[%c0_349, %c0_350, %c0_351], %295 {strides = array<i32>} : memref<1x8x256xf32, #tpu.memory_space<vmem>>, vector<1x8x256xf32>,
    return
  }
  func.func @transform_0(%arg0: i32) -> (i32, i32, i32, i32) {
    %c0_i32 = arith.constant 0 : i32
    %c0_i32_0 = arith.constant 0 : i32
    %c0_i32_1 = arith.constant 0 : i32
    %c0_i32_2 = arith.constant 0 : i32
    return %arg0, %c0_i32, %c0_i32_0, %c0_i32_1 : i32, i32, i32, i32
  }
  func.func @transform_1(%arg0: i32) -> (i32, i32, i32) {
    %c0_i32 = arith.constant 0 : i32
    %c0_i32_0 = arith.constant 0 : i32
    %c0_i32_1 = arith.constant 0 : i32
    return %arg0, %c0_i32, %c0_i32_0 : i32, i32, i32
  }
  func.func @transform_2(%arg0: i32) -> (i32, i32) {
    %c0_i32 = arith.constant 0 : i32
    %c0_i32_0 = arith.constant 0 : i32
    %c0_i32_1 = arith.constant 0 : i32
    return %c0_i32, %c0_i32_0 : i32, i32
  }
  func.func @transform_3(%arg0: i32) -> (i32, i32, i32) {
    %c0_i32 = arith.constant 0 : i32
    %c0_i32_0 = arith.constant 0 : i32
    %c0_i32_1 = arith.constant 0 : i32
    %c0_i32_2 = arith.constant 0 : i32
    return %c0_i32, %c0_i32_0, %c0_i32_1 : i32, i32, i32
  }
  func.func @transform_4(%arg0: i32) -> (i32, i32) {
    %c0_i32 = arith.constant 0 : i32
    %c0_i32_0 = arith.constant 0 : i32
    %c0_i32_1 = arith.constant 0 : i32
    return %c0_i32, %c0_i32_0 : i32, i32
  }
  func.func @transform_5(%arg0: i32) -> (i32, i32, i32) {
    %c0_i32 = arith.constant 0 : i32
    %c0_i32_0 = arith.constant 0 : i32
    %c0_i32_1 = arith.constant 0 : i32
    %c0_i32_2 = arith.constant 0 : i32
    return %c0_i32, %c0_i32_0, %c0_i32_1 : i32, i32, i32
  }
  func.func @transform_6(%arg0: i32) -> (i32, i32) {
    %c0_i32 = arith.constant 0 : i32
    %c0_i32_0 = arith.constant 0 : i32
    %c0_i32_1 = arith.constant 0 : i32
    return %c0_i32, %c0_i32_0 : i32, i32
  }
  func.func @transform_7(%arg0: i32) -> (i32, i32, i32) {
    %c0_i32 = arith.constant 0 : i32
    %c0_i32_0 = arith.constant 0 : i32
    %c0_i32_1 = arith.constant 0 : i32
    %c0_i32_2 = arith.constant 0 : i32
    return %c0_i32, %c0_i32_0, %c0_i32_1 : i32, i32, i32
  }
  func.func @transform_8(%arg0: i32) -> (i32, i32) {
    %c0_i32 = arith.constant 0 : i32
    %c0_i32_0 = arith.constant 0 : i32
    %c0_i32_1 = arith.constant 0 : i32
    return %c0_i32, %c0_i32_0 : i32, i32
  }
  func.func @transform_9(%arg0: i32) -> (i32, i32, i32) {
    %c0_i32 = arith.constant 0 : i32
    %c0_i32_0 = arith.constant 0 : i32
    %c0_i32_1 = arith.constant 0 : i32
    %c0_i32_2 = arith.constant 0 : i32
    return %c0_i32, %c0_i32_0, %c0_i32_1 : i32, i32, i32
  }
  func.func @transform_10(%arg0: i32) -> (i32, i32) {
    %c0_i32 = arith.constant 0 : i32
    %c0_i32_0 = arith.constant 0 : i32
    %c0_i32_1 = arith.constant 0 : i32
    return %c0_i32, %c0_i32_0 : i32, i32
  }
  func.func @transform_11(%arg0: i32) -> (i32, i32, i32) {
    %c0_i32 = arith.constant 0 : i32
    %c0_i32_0 = arith.constant 0 : i32
    %c0_i32_1 = arith.constant 0 : i32
    %c0_i32_2 = arith.constant 0 : i32
    return %c0_i32, %c0_i32_0, %c0_i32_1 : i32, i32, i32
  }
  func.func @transform_12(%arg0: i32) -> (i32, i32) {
    %c0_i32 = arith.constant 0 : i32
    %c0_i32_0 = arith.constant 0 : i32
    %c0_i32_1 = arith.constant 0 : i32
    return %c0_i32, %c0_i32_0 : i32, i32
  }
  func.func @transform_13(%arg0: i32) -> (i32, i32, i32) {
    %c0_i32 = arith.constant 0 : i32
    %c0_i32_0 = arith.constant 0 : i32
    %c0_i32_1 = arith.constant 0 : i32
    return %arg0, %c0_i32, %c0_i32_0 : i32, i32, i32
  }
}

</mosaic_0001>

<bundles_post_ra>
// kernel: rrdb_forward.1
= control target key start
LH: loop header
LB: loop body
LE: loop exit
PB: predicated region body
PF: predicated region fallthrough
CT: control target
= control target key end

     0   :  { %s18288_s25 = smov 0   ;;  %s21728_s0 = inlined_call_operand.vmem [shape: f32[2,16,16,8], index: 0, kind: input, shape index: {}]   ;;  %s21729_s1 = inlined_call_operand.vmem [shape: f32[2,8,256], index: 1, kind: input, shape index: {}]   ;;  %s21730_s2 = inlined_call_operand.vmem [shape: f32[8,8], index: 2, kind: input, shape index: {}]   ;;  %s21731_s3 = inlined_call_operand.vmem [shape: bf16[3,384,4], index: 3, kind: input, shape index: {}]   ;;  %s21732_s4 = inlined_call_operand.vmem [shape: f32[1,4], index: 4, kind: input, shape index: {}]   ;;  %s21733_s5 = inlined_call_operand.vmem [shape: bf16[3,384,4], index: 5, kind: input, shape index: {}]   ;;  %s21734_s6 = inlined_call_operand.vmem [shape: f32[1,4], index: 6, kind: input, shape index: {}]   ;;  %s21735_s7 = inlined_call_operand.vmem [shape: bf16[3,384,4], index: 7, kind: input, shape index: {}]   ;;  %s21736_s8 = inlined_call_operand.vmem [shape: f32[1,4], index: 8, kind: input, shape index: {}]   ;;  %s21737_s9 = inlined_call_operand.vmem [shape: bf16[3,384,4], index: 9, kind: input, shape index: {}]   ;;  %s21738_s10 = inlined_call_operand.vmem [shape: f32[1,4], index: 10, kind: input, shape index: {}]   ;;  %s21739_s11 = inlined_call_operand.vmem [shape: bf16[3,384,8], index: 11, kind: input, shape index: {}]   ;;  %s21740_s12 = inlined_call_operand.vmem [shape: f32[1,8], index: 12, kind: input, shape index: {}]   ;;  %s21741_s13 = inlined_call_operand.vmem [shape: f32[2,8,256], index: 13, kind: output, shape index: {}]  }
   0x1 LB: > { %s13274_s26 = sadd.s32 4294967295, %s18211_s25   ;;  %p13278_p0 = scmp.ge.s32.totalorder %s18211_s25, 1  ;;  %s18211_s25 = sphi %s18288_s25, %s23_s25  }
   0x2   : > { %p397_p1 = scmp.lt.s32.totalorder %s18211_s25, 3 }
   0x4   : > { %p398_p2 = pnand %p13278_p0, %p397_p1 }
   0x6   : > { %401 = sbr.rel (%p398_p2) target bundleno = 3736 (0xe98), region = 72 }
   0xd   : > { %v17839_v0 = vld [vmem:[%s21731_s3 + $0x100] sm:$0xff]   ;;  %v17841_v2 = vld [vmem:[%s21731_s3 + $0x108] sm:$0xff]   ;;  %p18307_p3 = scmp.lt.s32.totalorder %s13274_s26, 1  ;;  %v18213_v3 = vmov 0.0   ;;  %v17843_v5 = vld [vmem:[%s21731_s3 + $0x110] sm:$0xff]   ;;  %vm549_vm0 = vcmask 64512  }
   0xe   : > { %v17840_v1 = vld [vmem:[%s21731_s3 + $0xc0] sm:$0xff]   ;;  %17010 = vmatprep.subr.bf16.mxu1 %v17839_v0  ;;  %477 = vst [vmem:[#allocation2 + $0x78] sm:$0xff] %v18213_v3  ;;  %478 = vst [vmem:[#allocation2 + $0x80] sm:$0xff] %v18213_v3  ;;  %14168 = vmatprep.subr.bf16.mxu0 %v17839_v0  ;;  %v17842_v4 = vld [vmem:[%s21731_s3 + $0xc8] sm:$0xff]   ;;  %s18214_s15 = smov 8   ;;  %vm3078_vm1 = vcmask 97344  }
   0xf   : > { %479 = vst [vmem:[#allocation2 + $0x88] sm:$0x3] %v18213_v3  ;;  %462 = vst [vmem:[#allocation2] sm:$0xff] %v18213_v3  ;;  %17018 = vmatpush3.bf16.msra.mxu1 %v17840_v1  ;;  %14169 = vmatpush3.bf16.msra.mxu0 %v17840_v1  ;;  %s21770_s26 = smov (!%p18307_p3, %s13274_s26), 1  ;;  %v17844_v6 = vld [vmem:[%s21731_s3 + $0xd0] sm:$0xff]   ;;  %v17845_v7 = vld [vmem:[%s21731_s3 + $0x118] sm:$0xff]  }
  0x10   : > { %463 = vst [vmem:[#allocation2 + $0x8] sm:$0xff] %v18213_v3  ;;  %464 = vst [vmem:[#allocation2 + $0x10] sm:$0x3] %v18213_v3  ;;  %17011 = vmatprep.subr.bf16.mxu1 %v17841_v2  ;;  %14170 = vmatprep.subr.bf16.mxu0 %v17841_v2  ;;  %s14165_s27 = sshll.u32 %s21770_s26, 8  ;;  %v17846_v8 = vld [vmem:[%s21731_s3 + $0xd8] sm:$0xff]   ;;  %v17847_v9 = vld [vmem:[%s21731_s3 + $0x120] sm:$0xff]  }
  0x11   : > { %465 = vst [vmem:[#allocation2 + $0x18] sm:$0xff] %v18213_v3  ;;  %466 = vst [vmem:[#allocation2 + $0x20] sm:$0xff] %v18213_v3  ;;  %s18339_s17 = scalar_lea.vmem %s21728_s0, %s14165_s27  ;;  %v17848_v10 = vld [vmem:[%s21731_s3 + $0xe0] sm:$0xff]   ;;  %v17849_v11 = vld [vmem:[%s21731_s3 + $0x128] sm:$0xff]   ;;  %s18215_s30 = smov 12   ;;  %vm5606_vm2 = vcmask 130144  }
  0x12   : > { %467 = vst [vmem:[#allocation2 + $0x28] sm:$0x3] %v18213_v3  ;;  %468 = vst [vmem:[#allocation2 + $0x30] sm:$0xff] %v18213_v3  ;;  %v524_v12 = vld [vmem:[%s18339_s17 + $0x40] sm:$0xff]  ;;  %v525_v13 = vld [vmem:[%s18339_s17 + $0x48] sm:$0xff]  ;;  %s18216_s27 = smov 16  }
  0x13   : > { %469 = vst [vmem:[#allocation2 + $0x38] sm:$0xff] %v18213_v3  ;;  %470 = vst [vmem:[#allocation2 + $0x40] sm:$0x3] %v18213_v3  ;;  %17019 = vmatpush3.bf16.msra.mxu1 %v17842_v4  ;;  %14171 = vmatpush3.bf16.msra.mxu0 %v17842_v4  ;;  %v526_v14 = vld [vmem:[%s18339_s17 + $0x50] sm:$0xff]  ;;  %v17850_v15 = vld [vmem:[%s21731_s3 + $0xe8] sm:$0xff]   ;;  %vm8134_vm3 = vcmask 162944  }
  0x14   : > { %471 = vst [vmem:[#allocation2 + $0x48] sm:$0xff] %v18213_v3  ;;  %472 = vst [vmem:[#allocation2 + $0x50] sm:$0xff] %v18213_v3  ;;  %17012 = vmatprep.subr.bf16.mxu1 %v17843_v5  ;;  %14172 = vmatprep.subr.bf16.mxu0 %v17843_v5  ;;  %v527_v16 = vld [vmem:[%s18339_s17 + $0x58] sm:$0xff]  ;;  %v528_v17 = vld [vmem:[%s18339_s17 + $0x60] sm:$0xff]  ;;  %s18217_s22 = smov 20   ;;  %vm10662_vm4 = vcmask 195744  }
  0x15   : > { %473 = vst [vmem:[#allocation2 + $0x58] sm:$0x3] %v18213_v3  ;;  %474 = vst [vmem:[#allocation2 + $0x60] sm:$0xff] %v18213_v3  ;;  %v529_v18 = vld [vmem:[%s18339_s17 + $0x68] sm:$0xff]  ;;  %v17851_v19 = vld [vmem:[%s21731_s3 + $0x130] sm:$0xff]  }
  0x16   : > { %475 = vst [vmem:[#allocation2 + $0x68] sm:$0xff] %v18213_v3  ;;  %476 = vst [vmem:[#allocation2 + $0x70] sm:$0x3] %v18213_v3  ;;  %v530_v20 = vld [vmem:[%s18339_s17 + $0x70] sm:$0xff]  ;;  %v531_v21 = vld [vmem:[%s18339_s17 + $0x78] sm:$0xff] }
  0x17   : > { %480 = vst [vmem:[#allocation2 + $0x90] sm:$0xff] %v18213_v3  ;;  %481 = vst [vmem:[#allocation2 + $0x98] sm:$0xff] %v18213_v3  ;;  %17020 = vmatpush3.bf16.msra.mxu1 %v17844_v6  ;;  %14173 = vmatpush3.bf16.msra.mxu0 %v17844_v6  ;;  %v532_v22 = vld [vmem:[%s18339_s17 + $0x80] sm:$0xff]  ;;  %v533_v23 = vld [vmem:[%s18339_s17 + $0x88] sm:$0xff] }
  0x18   : > { %482 = vst [vmem:[#allocation2 + $0xa0] sm:$0x3] %v18213_v3  ;;  %483 = vst [vmem:[#allocation2 + $0xa8] sm:$0xff] %v18213_v3  ;;  %17013 = vmatprep.subr.bf16.mxu1 %v17845_v7  ;;  %14174 = vmatprep.subr.bf16.mxu0 %v17845_v7  ;;  %v534_v24 = vld [vmem:[%s18339_s17 + $0x90] sm:$0xff]  ;;  %v535_v25 = vld [vmem:[%s18339_s17 + $0x98] sm:$0xff] }
  0x19   : > { %484 = vst [vmem:[#allocation2 + $0xb0] sm:$0xff] %v18213_v3  ;;  %485 = vst [vmem:[#allocation2 + $0xb8] sm:$0x3] %v18213_v3  ;;  %v536_v26 = vld [vmem:[%s18339_s17 + $0xa0] sm:$0xff]  ;;  %v537_v27 = vld [vmem:[%s18339_s17 + $0xa8] sm:$0xff] }
  0x1a   : > { %486 = vst [vmem:[#allocation2 + $0xc0] sm:$0xff] %v18213_v3  ;;  %487 = vst [vmem:[#allocation2 + $0xc8] sm:$0xff] %v18213_v3  ;;  %v538_v28 = vld [vmem:[%s18339_s17 + $0xb0] sm:$0xff]  ;;  %v539_v29 = vld [vmem:[%s18339_s17 + $0xb8] sm:$0xff] }
  0x1b   : > { %488 = vst [vmem:[#allocation2 + $0xd0] sm:$0x3] %v18213_v3  ;;  %489 = vst [vmem:[#allocation2 + $0xd8] sm:$0xff] %v18213_v3  ;;  %17021 = vmatpush3.bf16.msra.mxu1 %v17846_v8  ;;  %14175 = vmatpush3.bf16.msra.mxu0 %v17846_v8  ;;  %v540_v30 = vld [vmem:[%s18339_s17 + $0xc0] sm:$0xff]  ;;  %v541_v31 = vld [vmem:[%s18339_s17 + $0xc8] sm:$0xff] }
  0x1c   : > { %490 = vst [vmem:[#allocation2 + $0xe0] sm:$0xff] %v18213_v3  ;;  %491 = vst [vmem:[#allocation2 + $0xe8] sm:$0x3] %v18213_v3  ;;  %17014 = vmatprep.subr.bf16.mxu1 %v17847_v9  ;;  %14176 = vmatprep.subr.bf16.mxu0 %v17847_v9  ;;  %v17852_v32 = vld [vmem:[%s21731_s3 + $0xf0] sm:$0xff]   ;;  %v17853_v33 = vld [vmem:[%s21731_s3 + $0x138] sm:$0xff]  }
  0x1d   : > { %492 = vst [vmem:[#allocation2 + $0xf0] sm:$0xff] %v18213_v3  ;;  %493 = vst [vmem:[#allocation2 + $0xf8] sm:$0xff] %v18213_v3  ;;  %v17854_v37 = vld [vmem:[%s21731_s3 + $0xf8] sm:$0xff]   ;;  %v17855_v42 = vld [vmem:[%s21731_s3 + $0x140] sm:$0xff]  }
  0x1e   : > { %494 = vst [vmem:[#allocation2 + $0x100] sm:$0x3] %v18213_v3  ;;  %495 = vst [vmem:[#allocation2 + $0x108] sm:$0xff] %v18213_v3  ;;  %v17856_v45 = vld [vmem:[%s21731_s3 + $0x148] sm:$0xff]   ;;  %v542_v50 = vld [vmem:[%s18339_s17 + $0xd0] sm:$0xff] }
  0x1f   : > { %496 = vst [vmem:[#allocation2 + $0x110] sm:$0xff] %v18213_v3  ;;  %497 = vst [vmem:[#allocation2 + $0x118] sm:$0x3] %v18213_v3  ;;  %17022 = vmatpush3.bf16.msra.mxu1 %v17848_v10  ;;  %14177 = vmatpush3.bf16.msra.mxu0 %v17848_v10  ;;  %v543_v51 = vld [vmem:[%s18339_s17 + $0xd8] sm:$0xff]  ;;  %v17857_v52 = vld [vmem:[%s21731_s3 + $0x150] sm:$0xff]  }
  0x20   : > { %498 = vst [vmem:[#allocation2 + $0x120] sm:$0xff] %v18213_v3  ;;  %499 = vst [vmem:[#allocation2 + $0x128] sm:$0xff] %v18213_v3  ;;  %17015 = vmatprep.subr.bf16.mxu1 %v17849_v11  ;;  %14178 = vmatprep.subr.bf16.mxu0 %v17849_v11  ;;  %v544_v54 = vld [vmem:[%s18339_s17 + $0xe0] sm:$0xff]  ;;  %v545_v56 = vld [vmem:[%s18339_s17 + $0xe8] sm:$0xff] }
  0x21   : > { %500 = vst [vmem:[#allocation2 + $0x130] sm:$0x3] %v18213_v3  ;;  %501 = vst [vmem:[#allocation2 + $0x138] sm:$0xff] %v18213_v3  ;;  %v17858_v57 = vld [vmem:[%s21731_s3 + $0x158] sm:$0xff]   ;;  %v546_v58 = vld [vmem:[%s18339_s17 + $0xf0] sm:$0xff] }
  0x22   : > { %502 = vst [vmem:[#allocation2 + $0x140] sm:$0xff] %v18213_v3  ;;  %503 = vst [vmem:[#allocation2 + $0x148] sm:$0x3] %v18213_v3  ;;  %v547_v59 = vld [vmem:[%s18339_s17 + $0xf8] sm:$0xff]  ;;  %v17859_v0 = vld [vmem:[%s21731_s3 + $0x160] sm:$0xff]  }
  0x23   : > { %504 = vst [vmem:[#allocation2 + $0x150] sm:$0xff] %v18213_v3  ;;  %505 = vst [vmem:[#allocation2 + $0x158] sm:$0xff] %v18213_v3  ;;  %17023 = vmatpush3.bf16.msra.mxu1 %v17850_v15  ;;  %14179 = vmatpush3.bf16.msra.mxu0 %v17850_v15  ;;  %v516_v1 = vld [vmem:[%s18339_s17] sm:$0xff]  ;;  %v517_v2 = vld [vmem:[%s18339_s17 + $0x8] sm:$0xff] }
  0x24   : > { %506 = vst [vmem:[#allocation2 + $0x160] sm:$0x3] %v18213_v3  ;;  %507 = vst [vmem:[#allocation2 + $0x168] sm:$0xff] %v18213_v3  ;;  %17016 = vmatprep.subr.bf16.mxu1 %v17851_v19  ;;  %14180 = vmatprep.subr.bf16.mxu0 %v17851_v19  ;;  %v518_v4 = vld [vmem:[%s18339_s17 + $0x10] sm:$0xff]  ;;  %v17860_v6 = vld [vmem:[%s21731_s3 + $0x168] sm:$0xff]  }
  0x25   : > { %508 = vst [vmem:[#allocation2 + $0x170] sm:$0xff] %v18213_v3  ;;  %509 = vst [vmem:[#allocation2 + $0x178] sm:$0x3] %v18213_v3  ;;  %v519_v7 = vld [vmem:[%s18339_s17 + $0x18] sm:$0xff]  ;;  %v520_v8 = vld [vmem:[%s18339_s17 + $0x20] sm:$0xff] }
  0x26   : > { %510 = vst [vmem:[#allocation2 + $0x180] sm:$0xff] %v18213_v3  ;;  %511 = vst [vmem:[#allocation2 + $0x188] sm:$0xff] %v18213_v3  ;;  %v521_v9 = vld [vmem:[%s18339_s17 + $0x28] sm:$0xff]  ;;  %v522_v10 = vld [vmem:[%s18339_s17 + $0x30] sm:$0xff] }
  0x27   : > { %512 = vst [vmem:[#allocation2 + $0x190] sm:$0x3] %v18213_v3  ;;  %513 = vst [vmem:[#allocation2 + $0x198] sm:$0xff] %v18213_v3  ;;  %17024 = vmatpush3.bf16.msra.mxu1 %v17852_v32  ;;  %14181 = vmatpush3.bf16.msra.mxu0 %v17852_v32  ;;  %v523_v11 = vld [vmem:[%s18339_s17 + $0x38] sm:$0xff]  ;;  %s14166_s17 = sshll.u32 %s21770_s26, 4 }
  0x28   : > { %514 = vst [vmem:[#allocation2 + $0x1a0] sm:$0xff] %v18213_v3  ;;  %515 = vst [vmem:[#allocation2 + $0x1a8] sm:$0x3] %v18213_v3  ;;  %17017 = vmatprep.subr.bf16.mxu1 %v17853_v33  ;;  %14182 = vmatprep.subr.bf16.mxu0 %v17853_v33  ;;  %v17862_v19 = vld [vmem:[%s21731_s3 + $0x178] sm:$0xff]   ;;  %v17866_v33 = vld [vmem:[%s21731_s3 + $0x180] sm:$0xff]   ;;  %s455_s20 = scalar_lea.vmem %s21729_s1, %s14166_s17  ;;  %s460_s23 = scalar_lea.vmem %s21741_s13, %s14166_s17 }
  0x29   : > { %558 = vst.msk [vmem:[#allocation2 + $0x79] sm:$0xff] %vm549_vm0, %v524_v12  ;;  %559 = vst.msk [vmem:[#allocation2 + $0x81] sm:$0xff] %vm549_vm0, %v525_v13 }
  0x2a   : > { %560 = vst.msk [vmem:[#allocation2 + $0x91] sm:$0xff] %vm549_vm0, %v526_v14  ;;  %561 = vst.msk [vmem:[#allocation2 + $0x99] sm:$0xff] %vm549_vm0, %v527_v16  ;;  %v17861_v16 = vld [vmem:[%s21731_s3 + $0x170] sm:$0xff]  }
  0x2b   : > { %562 = vst.msk [vmem:[#allocation2 + $0xa9] sm:$0xff] %vm549_vm0, %v528_v17  ;;  %563 = vst.msk [vmem:[#allocation2 + $0xb1] sm:$0xff] %vm549_vm0, %v529_v18  ;;  %17025 = vmatpush3.bf16.msra.mxu1 %v17854_v37  ;;  %14183 = vmatpush3.bf16.msra.mxu0 %v17854_v37 }
  0x2c   : > { %564 = vst.msk [vmem:[#allocation2 + $0xc1] sm:$0xff] %vm549_vm0, %v530_v20  ;;  %565 = vst.msk [vmem:[#allocation2 + $0xc9] sm:$0xff] %vm549_vm0, %v531_v21  ;;  %16242 = vmatprep.subr.bf16.mxu1 %v17855_v42 }
  0x2d   : > { %566 = vst.msk [vmem:[#allocation2 + $0xd9] sm:$0xff] %vm549_vm0, %v532_v22  ;;  %567 = vst.msk [vmem:[#allocation2 + $0xe1] sm:$0xff] %vm549_vm0, %v533_v23 }
  0x2e   : > { %568 = vst.msk [vmem:[#allocation2 + $0xf1] sm:$0xff] %vm549_vm0, %v534_v24  ;;  %569 = vst.msk [vmem:[#allocation2 + $0xf9] sm:$0xff] %vm549_vm0, %v535_v25 }
  0x2f   : > { %570 = vst.msk [vmem:[#allocation2 + $0x109] sm:$0xff] %vm549_vm0, %v536_v26  ;;  %571 = vst.msk [vmem:[#allocation2 + $0x111] sm:$0xff] %vm549_vm0, %v537_v27  ;;  %v17863_v26 = vld [vmem:[%s21731_s3 + $0x40] sm:$0xff]  }
  0x30   : > { %572 = vst.msk [vmem:[#allocation2 + $0x121] sm:$0xff] %vm549_vm0, %v538_v28  ;;  %573 = vst.msk [vmem:[#allocation2 + $0x129] sm:$0xff] %vm549_vm0, %v539_v29  ;;  %v942_v34 = vld [vmem:[#allocation2 + $0x79] sm:$0xff]  ;;  %v943_v35 = vld [vmem:[#allocation2 + $0x81] sm:$0xff] }
  0x31   : > { %574 = vst.msk [vmem:[#allocation2 + $0x139] sm:$0xff] %vm549_vm0, %v540_v30  ;;  %575 = vst.msk [vmem:[#allocation2 + $0x141] sm:$0xff] %vm549_vm0, %v541_v31  ;;  %v970_v36 = vpack.c.bf16 %v943_v35, %v942_v34  ;;  %v878_v38 = vld [vmem:[#allocation2 + $0x78] sm:$0xff]  ;;  %v879_v39 = vld [vmem:[#allocation2 + $0x80] sm:$0xff] }
  0x32   : > { %v944_v40 = vld [vmem:[#allocation2 + $0x91] sm:$0xff]  ;;  %v945_v41 = vld [vmem:[#allocation2 + $0x99] sm:$0xff]  ;;  %v18401_v43 = vpack.c.bf16 %v879_v39, %v878_v38  ;;  %v946_v48 = vld [vmem:[#allocation2 + $0xa9] sm:$0xff]  ;;  %576 = vst.msk [vmem:[#allocation2 + $0x151] sm:$0xff] %vm549_vm0, %v542_v50 }
  0x33   : > { %1367 = vmatprep.mubr.bf16.mxu1 %v970_v36  ;;  %v18403_v44 = vpack.c.bf16 %v945_v41, %v944_v40  ;;  %v880_v46 = vld [vmem:[#allocation2 + $0x90] sm:$0xff]  ;;  %v881_v47 = vld [vmem:[#allocation2 + $0x98] sm:$0xff]  ;;  %577 = vst.msk [vmem:[#allocation2 + $0x159] sm:$0xff] %vm549_vm0, %v543_v51  ;;  %578 = vst.msk [vmem:[#allocation2 + $0x169] sm:$0xff] %vm549_vm0, %v544_v54 }
  0x34   : > { %1368 = vmatmul.mubr.bf16.vlgmr.msra.gmra.mrb[0].mxu1 %v18401_v43  ;;  %v947_v49 = vld [vmem:[#allocation2 + $0xb1] sm:$0xff]  ;;  %v18417_v53 = vpack.c.bf16 %v881_v47, %v880_v46  ;;  %579 = vst.msk [vmem:[#allocation2 + $0x171] sm:$0xff] %vm549_vm0, %v545_v56  ;;  %v882_v60 = vld [vmem:[#allocation2 + $0xa8] sm:$0xff]  ;;  %580 = vst.msk [vmem:[#allocation2 + $0x181] sm:$0xff] %vm549_vm0, %v546_v58 }
  0x35   : > { %1375 = vmatprep.mubr.bf16.mxu1 %v18403_v44  ;;  %16243 = vmatpush3.bf16.msra.mxu1 %v17855_v42  ;;  %v18420_v55 = vpack.c.bf16 %v947_v49, %v946_v48  ;;  %581 = vst.msk [vmem:[#allocation2 + $0x189] sm:$0xff] %vm549_vm0, %v547_v59  ;;  %v883_v61 = vld [vmem:[#allocation2 + $0xb0] sm:$0xff]  ;;  %v948_v62 = vld [vmem:[#allocation2 + $0xc1] sm:$0xff]  ;;  %550 = vst.msk [vmem:[#allocation2 + $0x19] sm:$0xff] %vm549_vm0, %v516_v1 }
  0x36   : > { %16244 = vmatprep.subr.bf16.mxu1 %v17856_v45  ;;  %v949_v63 = vld [vmem:[#allocation2 + $0xc9] sm:$0xff]  ;;  %v18439_v3 = vpack.c.bf16 %v883_v61, %v882_v60  ;;  %551 = vst.msk [vmem:[#allocation2 + $0x21] sm:$0xff] %vm549_vm0, %v517_v2  ;;  %552 = vst.msk [vmem:[#allocation2 + $0x31] sm:$0xff] %vm549_vm0, %v518_v4  ;;  %v884_v12 = vld [vmem:[#allocation2 + $0xc0] sm:$0xff] }
  0x37   : > { %v18444_v5 = vpack.c.bf16 %v949_v63, %v948_v62  ;;  %553 = vst.msk [vmem:[#allocation2 + $0x39] sm:$0xff] %vm549_vm0, %v519_v7  ;;  %554 = vst.msk [vmem:[#allocation2 + $0x49] sm:$0xff] %vm549_vm0, %v520_v8  ;;  %v885_v13 = vld [vmem:[#allocation2 + $0xc8] sm:$0xff]  ;;  %v950_v14 = vld [vmem:[#allocation2 + $0xd9] sm:$0xff] }
  0x38   : > { %555 = vst.msk [vmem:[#allocation2 + $0x51] sm:$0xff] %vm549_vm0, %v521_v9  ;;  %556 = vst.msk [vmem:[#allocation2 + $0x61] sm:$0xff] %vm549_vm0, %v522_v10  ;;  %v951_v15 = vld [vmem:[#allocation2 + $0xe1] sm:$0xff]  ;;  %v18465_v17 = vpack.c.bf16 %v885_v13, %v884_v12  ;;  %v886_v20 = vld [vmem:[#allocation2 + $0xd8] sm:$0xff] }
  0x39   : > { %16245 = vmatpush3.bf16.msra.mxu1 %v17856_v45  ;;  %557 = vst.msk [vmem:[#allocation2 + $0x69] sm:$0xff] %vm549_vm0, %v523_v11  ;;  %v974_v18 = vpack.c.bf16 %v951_v15, %v950_v14  ;;  %v887_v21 = vld [vmem:[#allocation2 + $0xe0] sm:$0xff]  ;;  %v952_v23 = vld [vmem:[#allocation2 + $0xf1] sm:$0xff]  ;;  %v17869_v35 = vld [vmem:[%s21731_s3 + $0x1c8] sm:$0xff]  }
  0x3a   : > { %16246 = vmatprep.subr.bf16.mxu1 %v17857_v52  ;;  %v953_v24 = vld [vmem:[#allocation2 + $0xf9] sm:$0xff]  ;;  %v910_v32 = vpack.c.bf16 %v887_v21, %v886_v20  ;;  %v888_v36 = vld [vmem:[#allocation2 + $0xf0] sm:$0xff]  ;;  %v17870_v39 = vld [vmem:[%s21731_s3 + $0x188] sm:$0xff]  }
  0x3b   : > { %v17865_v31 = vld [vmem:[%s21731_s3 + $0x1c0] sm:$0xff]   ;;  %v975_v34 = vpack.c.bf16 %v953_v24, %v952_v23  ;;  %v889_v37 = vld [vmem:[#allocation2 + $0xf8] sm:$0xff]  ;;  %v954_v38 = vld [vmem:[#allocation2 + $0x109] sm:$0xff] }
  0x3c   : > { %1376 = vmatmul.mubr.bf16.gmra.mrb[4].mxu1 %v18417_v53  ;;  %v934_v22 = vld [vmem:[#allocation2 + $0x19] sm:$0xff]  ;;  %14440 = vmatprep.subr.bf16.mxu0 %v17865_v31  ;;  %v955_v40 = vld [vmem:[#allocation2 + $0x111] sm:$0xff]  ;;  %v911_v45 = vpack.c.bf16 %v889_v37, %v888_v36  ;;  %v890_v54 = vld [vmem:[#allocation2 + $0x108] sm:$0xff] }
  0x3d   : > { %1383 = vmatprep.mubr.bf16.mxu1 %v18420_v55  ;;  %16247 = vmatpush3.bf16.msra.mxu1 %v17857_v52  ;;  %v935_v25 = vld [vmem:[#allocation2 + $0x21] sm:$0xff]  ;;  %v870_v28 = vld [vmem:[#allocation2 + $0x18] sm:$0xff]  ;;  %v872_v47 = vld [vmem:[#allocation2 + $0x30] sm:$0xff]  ;;  %v976_v48 = vpack.c.bf16 %v955_v40, %v954_v38 }
  0x3e   : > { %16248 = vmatprep.subr.bf16.mxu1 %v17858_v57  ;;  %v18474_v27 = vpack.c.bf16 %v935_v25, %v934_v22  ;;  %v871_v29 = vld [vmem:[#allocation2 + $0x20] sm:$0xff]  ;;  %v936_v41 = vld [vmem:[#allocation2 + $0x31] sm:$0xff]  ;;  %v957_v58 = vld [vmem:[#allocation2 + $0x129] sm:$0xff] }
  0x3f   : > { %v18477_v30 = vpack.c.bf16 %v871_v29, %v870_v28  ;;  %v937_v42 = vld [vmem:[#allocation2 + $0x39] sm:$0xff]  ;;  %v17873_v51 = vld [vmem:[%s21731_s3 + $0x1d0] sm:$0xff]   ;;  %v893_v2 = vld [vmem:[#allocation2 + $0x128] sm:$0xff] }
  0x40   : > { %1335 = vmatprep.mubr.bf16.mxu0 %v18474_v27  ;;  %v18492_v46 = vpack.c.bf16 %v937_v42, %v936_v41  ;;  %v873_v49 = vld [vmem:[#allocation2 + $0x38] sm:$0xff]  ;;  %v17874_v52 = vld [vmem:[%s21731_s3 + $0x190] sm:$0xff]   ;;  %v892_v1 = vld [vmem:[#allocation2 + $0x120] sm:$0xff] }
  0x41   : > { %16249 = vmatpush3.bf16.msra.mxu1 %v17858_v57  ;;  %1336 = vmatmul.mubr.bf16.vlgmr.msra.gmra.mrb[0].mxu0 %v18477_v30  ;;  %v18495_v50 = vpack.c.bf16 %v873_v49, %v872_v47  ;;  %v891_v56 = vld [vmem:[#allocation2 + $0x110] sm:$0xff]  ;;  %v956_v57 = vld [vmem:[#allocation2 + $0x121] sm:$0xff]  ;;  %v17877_v59 = vld [vmem:[%s21731_s3 + $0x1d8] sm:$0xff]   ;;  %v913_v13 = vpack.c.bf16 %v893_v2, %v892_v1 }
  0x42   : > { %16250 = vmatprep.subr.bf16.mxu1 %v17859_v0  ;;  %14441 = vmatpush3.bf16.msra.mxu0 %v17866_v33  ;;  %v17878_v60 = vld [vmem:[%s21731_s3 + $0x198] sm:$0xff]   ;;  %v912_v61 = vpack.c.bf16 %v891_v56, %v890_v54  ;;  %v977_v62 = vpack.c.bf16 %v957_v58, %v956_v57  ;;  %v938_v63 = vld [vmem:[#allocation2 + $0x49] sm:$0xff]  ;;  %v17881_v10 = vld [vmem:[%s21731_s3 + $0x1e0] sm:$0xff]  }
  0x43   : > { %14442 = vmatprep.subr.bf16.mxu0 %v17869_v35  ;;  %1343 = vmatprep.mubr.bf16.mxu0 %v18492_v46  ;;  %v875_v7 = vld [vmem:[#allocation2 + $0x50] sm:$0xff]  ;;  %v958_v8 = vld [vmem:[#allocation2 + $0x139] sm:$0xff]  ;;  %v959_v12 = vld [vmem:[#allocation2 + $0x141] sm:$0xff] }
  0x44   : > { %1384 = vmatmul.mubr.bf16.gmra.mrb[8].mxu1 %v18439_v3  ;;  %v17882_v11 = vld [vmem:[%s21731_s3 + $0x1a0] sm:$0xff]   ;;  %v17885_v14 = vld [vmem:[%s21731_s3 + $0x1e8] sm:$0xff]   ;;  %v978_v15 = vpack.c.bf16 %v959_v12, %v958_v8  ;;  %v960_v20 = vld [vmem:[#allocation2 + $0x151] sm:$0xff] }
  0x45   : > { %1391 = vmatprep.mubr.bf16.mxu1 %v18444_v5  ;;  %16251 = vmatpush3.bf16.msra.mxu1 %v17859_v0  ;;  %v939_v0 = vld [vmem:[#allocation2 + $0x51] sm:$0xff]  ;;  %v940_v21 = vld [vmem:[#allocation2 + $0x61] sm:$0xff]  ;;  %v941_v22 = vld [vmem:[#allocation2 + $0x69] sm:$0xff] }
  0x46   : > { %16252 = vmatprep.subr.bf16.mxu1 %v17860_v6  ;;  %14443 = vmatpush3.bf16.msra.mxu0 %v17870_v39  ;;  %v18510_v4 = vpack.c.bf16 %v939_v0, %v938_v63  ;;  %v961_v23 = vld [vmem:[#allocation2 + $0x159] sm:$0xff]  ;;  %v18528_v24 = vpack.c.bf16 %v941_v22, %v940_v21  ;;  %v17889_v29 = vld [vmem:[%s21731_s3 + $0x1f0] sm:$0xff]   ;;  %v898_v42 = vld [vmem:[#allocation2 + $0x168] sm:$0xff] }
  0x47   : > { %14444 = vmatprep.subr.bf16.mxu0 %v17873_v51  ;;  %v876_v25 = vld [vmem:[#allocation2 + $0x60] sm:$0xff]  ;;  %v979_v33 = vpack.c.bf16 %v961_v23, %v960_v20  ;;  %v896_v35 = vld [vmem:[#allocation2 + $0x150] sm:$0xff]  ;;  %v897_v36 = vld [vmem:[#allocation2 + $0x158] sm:$0xff] }
  0x48   : > { %v17894_v37 = vld [vmem:[%s21731_s3 + $0x1b8] sm:$0xff]   ;;  %v962_v38 = vld [vmem:[#allocation2 + $0x169] sm:$0xff]  ;;  %v915_v40 = vpack.c.bf16 %v897_v36, %v896_v35  ;;  %v964_v47 = vld [vmem:[#allocation2 + $0x181] sm:$0xff] }
  0x49   : > { %16253 = vmatpush3.bf16.msra.mxu1 %v17860_v6  ;;  %1344 = vmatmul.mubr.bf16.gmra.mrb[4].mxu0 %v18495_v50  ;;  %v874_v6 = vld [vmem:[#allocation2 + $0x48] sm:$0xff]  ;;  %v963_v39 = vld [vmem:[#allocation2 + $0x171] sm:$0xff]  ;;  %v900_v56 = vld [vmem:[#allocation2 + $0x180] sm:$0xff] }
  0x4a   : > { %16254 = vmatprep.subr.bf16.mxu1 %v17861_v16  ;;  %14445 = vmatpush3.bf16.msra.mxu0 %v17874_v52  ;;  %v18512_v9 = vpack.c.bf16 %v875_v7, %v874_v6  ;;  %v980_v41 = vpack.c.bf16 %v963_v39, %v962_v38  ;;  %v2162_v52 = vld [vmem:[#allocation2 + $0x79] sm:$0xff]  ;;  %v2163_v54 = vld [vmem:[#allocation2 + $0x81] sm:$0xff]  ;;  %v1002_v1 = vld [vmem:[#allocation2 + $0x4a] sm:$0xff] }
  0x4b   : > { %14446 = vmatprep.subr.bf16.mxu0 %v17877_v59  ;;  %1351 = vmatprep.mubr.bf16.mxu0 %v18510_v4  ;;  %v901_v57 = vld [vmem:[#allocation2 + $0x188] sm:$0xff]  ;;  %v998_v58 = vld [vmem:[#allocation2 + $0x1a] sm:$0xff]  ;;  %v1000_v63 = vld [vmem:[#allocation2 + $0x32] sm:$0xff] }
  0x4c   : > { %1392 = vmatmul.mubr.bf16.gmra.mrb[12].mxu1 %v18465_v17  ;;  %v999_v59 = vld [vmem:[#allocation2 + $0x22] sm:$0xff]  ;;  %v1001_v0 = vld [vmem:[#allocation2 + $0x3a] sm:$0xff]  ;;  %v1003_v2 = vld [vmem:[#allocation2 + $0x52] sm:$0xff] }
  0x4d   : > { %1399 = vmatprep.mubr.bf16.mxu1 %v974_v18  ;;  %16255 = vmatpush3.bf16.msra.mxu1 %v17861_v16  ;;  %v17886_v16 = vld [vmem:[%s21731_s3 + $0x1a8] sm:$0xff]   ;;  %v894_v18 = vld [vmem:[#allocation2 + $0x138] sm:$0xff]  ;;  %v1031_v6 = vpack.c.bf16 %v1001_v0, %v1000_v63  ;;  %v1032_v7 = vpack.c.bf16 %v1003_v2, %v1002_v1  ;;  %v17864_v8 = vld [vmem:[%s21731_s3] sm:$0xff]  }
  0x4e   : > { %16256 = vmatprep.subr.bf16.mxu1 %v17862_v19  ;;  %14447 = vmatpush3.bf16.msra.mxu0 %v17878_v60  ;;  %v18551_v60 = vpack.c.bf16 %v2163_v54, %v2162_v52  ;;  %v1005_v12 = vld [vmem:[#allocation2 + $0x6a] sm:$0xff]  ;;  %v1008_v20 = vld [vmem:[#allocation2 + $0x92] sm:$0xff]  ;;  %v1009_v21 = vld [vmem:[#allocation2 + $0x9a] sm:$0xff] }
  0x4f   : > { %14448 = vmatprep.subr.bf16.mxu0 %v17881_v10  ;;  %v17867_v10 = vld [vmem:[%s21731_s3 + $0x48] sm:$0xff]   ;;  %v17876_v22 = vld [vmem:[%s21731_s3 + $0x18] sm:$0xff]   ;;  %v17887_v38 = vld [vmem:[%s21731_s3 + $0x70] sm:$0xff]  }
  0x50   : > { %v1010_v23 = vld [vmem:[#allocation2 + $0xaa] sm:$0xff]  ;;  %v2170_v35 = vld [vmem:[#allocation2 + $0xd9] sm:$0xff]  ;;  %v2171_v39 = vld [vmem:[#allocation2 + $0xe1] sm:$0xff] }
  0x51   : > { %16257 = vmatpush3.bf16.msra.mxu1 %v17862_v19  ;;  %1352 = vmatmul.mubr.bf16.gmra.mrb[8].mxu0 %v18512_v9  ;;  %v895_v19 = vld [vmem:[#allocation2 + $0x140] sm:$0xff]  ;;  %v2172_v52 = vld [vmem:[#allocation2 + $0xf1] sm:$0xff]  ;;  %vm21632_vm5 = vmpackc.low %vm549_vm0, %vm549_vm0 }
  0x52   : > { %14304 = vmatprep.subr.bf16.mxu1 %v17863_v26  ;;  %14449 = vmatpush3.bf16.msra.mxu0 %v17882_v11  ;;  %v877_v26 = vld [vmem:[#allocation2 + $0x68] sm:$0xff]  ;;  %v914_v31 = vpack.c.bf16 %v895_v19, %v894_v18  ;;  %v1014_v36 = vld [vmem:[#allocation2 + $0xda] sm:$0xff]  ;;  %v2108_v63 = vld [vmem:[#allocation2 + $0xf0] sm:$0xff] }
  0x53   : > { %14450 = vmatprep.subr.bf16.mxu0 %v17885_v14  ;;  %1359 = vmatprep.mubr.bf16.mxu0 %v18528_v24  ;;  %v18531_v28 = vpack.c.bf16 %v877_v26, %v876_v25  ;;  %v1004_v11 = vld [vmem:[#allocation2 + $0x62] sm:$0xff]  ;;  %v1006_v14 = vld [vmem:[#allocation2 + $0x7a] sm:$0xff]  ;;  %v1011_v25 = vld [vmem:[#allocation2 + $0xb2] sm:$0xff] }
  0x54   : > { %1400 = vmatmul.mubr.bf16.gmra.mrb[16].mxu1 %v910_v32  ;;  %v17890_v32 = vld [vmem:[%s21731_s3 + $0x1b0] sm:$0xff]   ;;  %v1033_v18 = vpack.c.bf16 %v1005_v12, %v1004_v11  ;;  %v17879_v26 = vld [vmem:[%s21731_s3 + $0x60] sm:$0xff]   ;;  %v2109_v2 = vld [vmem:[#allocation2 + $0xf8] sm:$0xff] }
  0x55   : > { %1407 = vmatprep.mubr.bf16.mxu1 %v975_v34  ;;  %v17893_v34 = vld [vmem:[%s21731_s3 + $0x1f8] sm:$0xff]   ;;  %v1020_v0 = vld [vmem:[#allocation2 + $0x122] sm:$0xff]  ;;  %v1021_v1 = vld [vmem:[#allocation2 + $0x12a] sm:$0xff]  ;;  %v18622_v11 = vpack.c.bf16 %v2109_v2, %v2108_v63 }
  0x56   : > { %14451 = vmatpush3.bf16.msra.mxu0 %v17886_v16  ;;  %v17871_v16 = vld [vmem:[%s21731_s3 + $0x50] sm:$0xff]   ;;  %v2173_v54 = vld [vmem:[#allocation2 + $0xf9] sm:$0xff] }
  0x57   : > { %14452 = vmatprep.subr.bf16.mxu0 %v17889_v29  ;;  %v1035_v29 = vpack.c.bf16 %v1009_v21, %v1008_v20  ;;  %v1026_v20 = vld [vmem:[#allocation2 + $0x16a] sm:$0xff]  ;;  %v1027_v21 = vld [vmem:[#allocation2 + $0x172] sm:$0xff] }
  0x58   : > { %v17898_v2 = vld [vmem:[%s21731_s3 + $0x98] sm:$0xff]  }
  0x59   : > { %1360 = vmatmul.mubr.bf16.gmra.mrb[12].mxu0 %v18531_v28 }
  0x5a   : > { %14453 = vmatpush3.bf16.msra.mxu0 %v17890_v32  ;;  %2557 = vmatprep.mubr.bf16.mxu0 %v18492_v46  ;;  %v1012_v32 = vld [vmem:[#allocation2 + $0xc2] sm:$0xff] }
  0x5b   : > { %14454 = vmatprep.subr.bf16.mxu0 %v17893_v34  ;;  %v17884_v34 = vld [vmem:[%s21731_s3 + $0x28] sm:$0xff]  }
  0x5c   : > { %1408 = vmatmul.mubr.bf16.gmra.mrb[20].mxu1 %v911_v45  ;;  %v899_v45 = vld [vmem:[#allocation2 + $0x170] sm:$0xff] }
  0x5d   : > { %1415 = vmatprep.mubr.bf16.mxu1 %v976_v48  ;;  %v965_v48 = vld [vmem:[#allocation2 + $0x189] sm:$0xff]  ;;  %v916_v49 = vpack.c.bf16 %v899_v45, %v898_v42  ;;  %v2106_v45 = vld [vmem:[#allocation2 + $0xd8] sm:$0xff] }
  0x5e   : > { %14455 = vmatpush3.bf16.msra.mxu0 %v17894_v37  ;;  %v981_v51 = vpack.c.bf16 %v965_v48, %v964_v47  ;;  %v1015_v37 = vld [vmem:[#allocation2 + $0xe2] sm:$0xff]  ;;  %v1016_v48 = vld [vmem:[#allocation2 + $0xf2] sm:$0xff] }
  0x5f   : > { %v1038_v42 = vpack.c.bf16 %v1015_v37, %v1014_v36  ;;  %v2107_v47 = vld [vmem:[#allocation2 + $0xe0] sm:$0xff] }
  0x61   : > { %2558 = vmatmul.mubr.bf16.vlgmr.msra.gmra.mrb[16].mxu0 %v18495_v50 }
  0x62   : > { %2565 = vmatprep.mubr.bf16.mxu0 %v18510_v4 }
  0x64   : > { %1416 = vmatmul.mubr.bf16.gmra.mrb[24].mxu1 %v912_v61  ;;  %v917_v61 = vpack.c.bf16 %v901_v57, %v900_v56  ;;  %v1018_v56 = vld [vmem:[#allocation2 + $0x10a] sm:$0xff]  ;;  %v1019_v57 = vld [vmem:[#allocation2 + $0x112] sm:$0xff] }
  0x65   : > { %1423 = vmatprep.mubr.bf16.mxu1 %v977_v62  ;;  %v1030_v62 = vpack.c.bf16 %v999_v59, %v998_v58  ;;  %v18613_v58 = vld [vmem:[%s21731_s3 + $0x80] sm:$0xff]   ;;  %v18617_v59 = vpack.c.bf16 %v2173_v54, %v2172_v52  ;;  %v2116_v52 = vld [vmem:[#allocation2 + $0x150] sm:$0xff]  ;;  %v2117_v54 = vld [vmem:[#allocation2 + $0x158] sm:$0xff] }
  0x69   : > { %2566 = vmatmul.mubr.bf16.gmra.mrb[20].mxu0 %v18512_v9 }
  0x6a   : > { %2573 = vmatprep.mubr.bf16.mxu0 %v18528_v24 }
  0x6c   : > { %1424 = vmatmul.mubr.bf16.gmra.mrb[28].mxu1 %v913_v13  ;;  %v17868_v13 = vld [vmem:[%s21731_s3 + $0x8] sm:$0xff]  }
  0x6d   : > { %1431 = vmatprep.mubr.bf16.mxu1 %v978_v15  ;;  %v1007_v15 = vld [vmem:[#allocation2 + $0x82] sm:$0xff] }
  0x6e   : > { %v1034_v19 = vpack.c.bf16 %v1007_v15, %v1006_v14  ;;  %v2110_v15 = vld [vmem:[#allocation2 + $0x108] sm:$0xff] }
  0x71   : > { %2574 = vmatmul.mubr.bf16.gmra.mrb[24].mxu0 %v18531_v28 }
  0x72   : > { %2581 = vmatprep.mubr.bf16.mxu0 %v18551_v60 }
  0x74   : > { %1432 = vmatmul.mubr.bf16.gmra.mrb[32].mxu1 %v914_v31  ;;  %v1036_v31 = vpack.c.bf16 %v1011_v25, %v1010_v23 }
  0x75   : > { %1439 = vmatprep.mubr.bf16.mxu1 %v979_v33  ;;  %v1013_v33 = vld [vmem:[#allocation2 + $0xca] sm:$0xff] }
  0x79   : > { %2582 = vmatmul.mubr.bf16.gmra.mrb[28].mxu0 %v18401_v43  ;;  %v17872_v43 = vld [vmem:[%s21731_s3 + $0x10] sm:$0xff]  }
  0x7a   : > { %2589 = vmatprep.mubr.bf16.mxu0 %v18403_v44  ;;  %v17875_v44 = vld [vmem:[%s21731_s3 + $0x58] sm:$0xff]  }
  0x7c   : > { %1440 = vmatmul.mubr.bf16.gmra.mrb[36].mxu1 %v915_v40  ;;  %v18600_v40 = vpack.c.bf16 %v2171_v39, %v2170_v35  ;;  %v647_v35 = vld [vmem:[#allocation2 + $0x9] sm:$0xff] }
  0x7d   : > { %1447 = vmatprep.mubr.bf16.mxu1 %v980_v41  ;;  %v1037_v41 = vpack.c.bf16 %v1013_v33, %v1012_v32  ;;  %v2178_v32 = vld [vmem:[#allocation2 + $0x139] sm:$0xff]  ;;  %v2179_v33 = vld [vmem:[#allocation2 + $0x141] sm:$0xff] }
  0x7e   : > { %v18639_v37 = vpack.c.bf16 %v2179_v33, %v2178_v32  ;;  %v596_v32 = vld [vmem:[#allocation2 + $0xa8] sm:$0xff] }
  0x7f   : > { %v662_v33 = vld [vmem:[#allocation2 + $0xc1] sm:$0xff] }
  0x81   : > { %2590 = vmatmul.mubr.bf16.gmra.mrb[32].mxu0 %v18417_v53  ;;  %v17880_v53 = vld [vmem:[%s21731_s3 + $0x20] sm:$0xff]  }
  0x82   : > { %2597 = vmatprep.mubr.bf16.mxu0 %v18420_v55  ;;  %v17883_v55 = vld [vmem:[%s21731_s3 + $0x68] sm:$0xff]  }
  0x84   : > { %1448 = vmatmul.mubr.bf16.gmra.mrb[40].mxu1 %v916_v49  ;;  %v1017_v49 = vld [vmem:[#allocation2 + $0xfa] sm:$0xff] }
  0x85   : > { %1455 = vmatprep.mubr.bf16.mxu1 %v981_v51  ;;  %v17892_v51 = vld [vmem:[%s21731_s3 + $0x38] sm:$0xff]  }
  0x89   : > { %2598 = vmatmul.mubr.bf16.gmra.mrb[36].mxu0 %v18439_v3  ;;  %v17888_v3 = vld [vmem:[%s21731_s3 + $0x30] sm:$0xff]  }
  0x8a   : > { %2605 = vmatprep.mubr.bf16.mxu0 %v18444_v5  ;;  %v17891_v5 = vld [vmem:[%s21731_s3 + $0x78] sm:$0xff]  }
  0x8c   : > { %1456 = vmatmul.mubr.bf16.gmra.mrb[44].mxu1 %v917_v61  ;;  %v1039_v61 = vpack.c.bf16 %v1017_v49, %v1016_v48  ;;  %v18199_v48 = vld [vmem:[#allocation2] sm:$0xff] }
  0x8d   : > { %16258 = vmatprep.mubr.bf16.mxu1 %v1030_v62  ;;  %v1040_v62 = vpack.c.bf16 %v1019_v57, %v1018_v56  ;;  %v614_v49 = vpack.c.bf16 %v18199_v48, %v18199_v48  ;;  %v2182_v56 = vld [vmem:[#allocation2 + $0x169] sm:$0xff]  ;;  %v2183_v57 = vld [vmem:[#allocation2 + $0x171] sm:$0xff]  ;;  %v598_v48 = vld [vmem:[#allocation2 + $0xc0] sm:$0xff] }
  0x8e   : > { %v18659_v63 = vpack.c.bf16 %v2183_v57, %v2182_v56 }
  0x91   : > { %2606 = vmatmul.mubr.bf16.gmra.mrb[40].mxu0 %v18465_v17  ;;  %v18615_v17 = vpack.c.bf16 %v2107_v47, %v2106_v45 }
  0x92   : > { %2613 = vmatprep.mubr.bf16.mxu0 %v18600_v40 }
  0x94   : > { %16259 = vmatmul.mubr.bf16.vlgmr.msra.gmra.mrb[48].mxu1 %v1031_v6  ;;  %v2174_v6 = vld [vmem:[#allocation2 + $0x109] sm:$0xff] }
  0x95   : > { %16262 = vmatprep.mubr.bf16.mxu1 %v1032_v7  ;;  %14305 = vmatpush3.bf16.msra.mxu1 %v17864_v8  ;;  %v1022_v7 = vld [vmem:[#allocation2 + $0x13a] sm:$0xff]  ;;  %v1023_v8 = vld [vmem:[#allocation2 + $0x142] sm:$0xff] }
  0x96   : > { %14306 = vmatprep.subr.bf16.mxu1 %v17867_v10  ;;  %v2175_v10 = vld [vmem:[#allocation2 + $0x111] sm:$0xff]  ;;  %v1042_v14 = vpack.c.bf16 %v1023_v8, %v1022_v7  ;;  %v2185_v7 = vld [vmem:[#allocation2 + $0x189] sm:$0xff] }
  0x97   : > { %v18624_v12 = vpack.c.bf16 %v2175_v10, %v2174_v6  ;;  %v2184_v6 = vld [vmem:[#allocation2 + $0x181] sm:$0xff] }
  0x98   : > { %v2202_v8 = vpack.c.bf16 %v2185_v7, %v2184_v6  ;;  %v2120_v10 = vld [vmem:[#allocation2 + $0x180] sm:$0xff] }
  0x99   : > { %14307 = vmatpush3.bf16.msra.mxu1 %v17868_v13  ;;  %2614 = vmatmul.mubr.bf16.gmra.mrb[44].mxu0 %v18615_v17  ;;  %v1041_v13 = vpack.c.bf16 %v1021_v1, %v1020_v0  ;;  %v2118_v0 = vld [vmem:[#allocation2 + $0x168] sm:$0xff]  ;;  %v2119_v1 = vld [vmem:[#allocation2 + $0x170] sm:$0xff] }
  0x9a   : > { %14308 = vmatprep.subr.bf16.mxu1 %v17871_v16  ;;  %2621 = vmatprep.mubr.bf16.mxu0 %v18617_v59  ;;  %v2111_v16 = vld [vmem:[#allocation2 + $0x110] sm:$0xff] }
  0x9c   : > { %16263 = vmatmul.mubr.bf16.gmra.mrb[52].mxu1 %v1033_v18  ;;  %v1025_v18 = vld [vmem:[#allocation2 + $0x15a] sm:$0xff] }
  0x9d   : > { %16266 = vmatprep.mubr.bf16.mxu1 %v1034_v19  ;;  %14309 = vmatpush3.bf16.msra.mxu1 %v17872_v43  ;;  %v1024_v43 = vld [vmem:[#allocation2 + $0x152] sm:$0xff]  ;;  %v2176_v19 = vld [vmem:[#allocation2 + $0x121] sm:$0xff] }
  0x9e   : > { %14310 = vmatprep.subr.bf16.mxu1 %v17875_v44  ;;  %v2177_v44 = vld [vmem:[#allocation2 + $0x129] sm:$0xff]  ;;  %v1043_v25 = vpack.c.bf16 %v1025_v18, %v1024_v43  ;;  %v17902_v18 = vld [vmem:[%s21731_s3 + $0xb8] sm:$0xff]  }
  0x9f   : > { %v18630_v23 = vpack.c.bf16 %v2177_v44, %v2176_v19  ;;  %v593_v19 = vld [vmem:[#allocation2 + $0x80] sm:$0xff] }
  0xa0   : > { %v659_v44 = vld [vmem:[#allocation2 + $0x99] sm:$0xff] }
  0xa1   : > { %14311 = vmatpush3.bf16.msra.mxu1 %v17876_v22  ;;  %2622 = vmatmul.mubr.bf16.gmra.mrb[48].mxu0 %v18622_v11  ;;  %v18628_v22 = vpack.c.bf16 %v2111_v16, %v2110_v15  ;;  %v17901_v15 = vld [vmem:[%s21731_s3 + $0xb0] sm:$0xff]  }
  0xa2   : > { %14312 = vmatprep.subr.bf16.mxu1 %v17879_v26  ;;  %2629 = vmatprep.mubr.bf16.mxu0 %v18624_v12  ;;  %v18632_v26 = vpack.c.bf16 %v1027_v21, %v1026_v20  ;;  %v594_v21 = vld [vmem:[#allocation2 + $0x90] sm:$0xff] }
  0xa4   : > { %16267 = vmatmul.mubr.bf16.gmra.mrb[56].mxu1 %v1035_v29  ;;  %v2113_v29 = vld [vmem:[#allocation2 + $0x128] sm:$0xff] }
  0xa5   : > { %16270 = vmatprep.mubr.bf16.mxu1 %v1036_v31  ;;  %14313 = vmatpush3.bf16.msra.mxu1 %v17880_v53  ;;  %v2112_v53 = vld [vmem:[#allocation2 + $0x120] sm:$0xff] }
  0xa6   : > { %14314 = vmatprep.subr.bf16.mxu1 %v17883_v55  ;;  %v1028_v31 = vld [vmem:[#allocation2 + $0x182] sm:$0xff]  ;;  %v1029_v55 = vld [vmem:[#allocation2 + $0x18a] sm:$0xff]  ;;  %v18637_v36 = vpack.c.bf16 %v2113_v29, %v2112_v53 }
  0xa7   : > { %v660_v53 = vld [vmem:[#allocation2 + $0xa9] sm:$0xff]  ;;  %v661_v29 = vld [vmem:[#allocation2 + $0xb1] sm:$0xff] }
  0xa9   : > { %14315 = vmatpush3.bf16.msra.mxu1 %v17884_v34  ;;  %2630 = vmatmul.mubr.bf16.gmra.mrb[52].mxu0 %v18628_v22  ;;  %v646_v34 = vld [vmem:[#allocation2 + $0x1] sm:$0xff] }
  0xaa   : > { %14316 = vmatprep.subr.bf16.mxu1 %v17887_v38  ;;  %2637 = vmatprep.mubr.bf16.mxu0 %v18630_v23  ;;  %v1045_v38 = vpack.c.bf16 %v1029_v55, %v1028_v31  ;;  %v678_v39 = vpack.c.bf16 %v647_v35, %v646_v34  ;;  %v685_v55 = vpack.c.bf16 %v661_v29, %v660_v53  ;;  %v663_v34 = vld [vmem:[#allocation2 + $0xc9] sm:$0xff] }
  0xac   : > { %16271 = vmatmul.mubr.bf16.gmra.mrb[60].mxu1 %v1037_v41  ;;  %v2115_v41 = vld [vmem:[#allocation2 + $0x140] sm:$0xff] }
  0xad   : > { %16274 = vmatprep.mubr.bf16.mxu1 %v1038_v42  ;;  %14317 = vmatpush3.bf16.msra.mxu1 %v17888_v3  ;;  %v2114_v3 = vld [vmem:[#allocation2 + $0x138] sm:$0xff] }
  0xae   : > { %14318 = vmatprep.subr.bf16.mxu1 %v17891_v5  ;;  %v2180_v5 = vld [vmem:[#allocation2 + $0x151] sm:$0xff]  ;;  %v2181_v42 = vld [vmem:[#allocation2 + $0x159] sm:$0xff]  ;;  %v18643_v45 = vpack.c.bf16 %v2115_v41, %v2114_v3  ;;  %v686_v41 = vpack.c.bf16 %v663_v34, %v662_v33 }
  0xaf   : > { %v18645_v47 = vpack.c.bf16 %v2181_v42, %v2180_v5 }
  0xb1   : > { %14319 = vmatpush3.bf16.msra.mxu1 %v17892_v51  ;;  %2638 = vmatmul.mubr.bf16.gmra.mrb[56].mxu0 %v18637_v36  ;;  %v17896_v51 = vld [vmem:[%s21731_s3 + $0x88] sm:$0xff]  }
  0xb2   : > { %16290 = vmatprep.subr.bf16.mxu1 %v18613_v58  ;;  %2645 = vmatprep.mubr.bf16.mxu0 %v18639_v37 }
  0xb4   : > { %16275 = vmatmul.mubr.bf16.gmra.mrb[64].mxu1 %v1039_v61  ;;  %v17897_v61 = vld [vmem:[%s21731_s3 + $0x90] sm:$0xff]  }
  0xb5   : > { %16278 = vmatprep.mubr.bf16.mxu1 %v1040_v62  ;;  %v18657_v62 = vpack.c.bf16 %v2117_v54, %v2116_v52 }
  0xb9   : > { %2646 = vmatmul.mubr.bf16.gmra.mrb[60].mxu0 %v18643_v45 }
  0xba   : > { %2653 = vmatprep.mubr.bf16.mxu0 %v18645_v47 }
  0xbc   : > { %16279 = vmatmul.mubr.bf16.gmra.mrb[68].mxu1 %v1041_v13  ;;  %v2121_v13 = vld [vmem:[#allocation2 + $0x188] sm:$0xff] }
  0xbd   : > { %16282 = vmatprep.mubr.bf16.mxu1 %v1042_v14  ;;  %v17900_v14 = vld [vmem:[%s21731_s3 + $0xa8] sm:$0xff]   ;;  %v2138_v16 = vpack.c.bf16 %v2121_v13, %v2120_v10 }
  0xc1   : > { %2654 = vmatmul.mubr.bf16.gmra.mrb[64].mxu0 %v18657_v62 }
  0xc2   : > { %2661 = vmatprep.mubr.bf16.mxu0 %v18659_v63 }
  0xc4   : > { %16283 = vmatmul.mubr.bf16.gmra.mrb[72].mxu1 %v1043_v25  ;;  %v595_v25 = vld [vmem:[#allocation2 + $0x98] sm:$0xff] }
  0xc5   : > { %16286 = vmatprep.mubr.bf16.mxu1 %v18632_v26  ;;  %v620_v31 = vpack.c.bf16 %v595_v25, %v594_v21 }
  0xcc   : > { %16287 = vmatmul.mubr.bf16.gmra.mrb[76].mxu1 %v1045_v38 }
  0xcd   : > { %1801 = vmatprep.mubr.bf16.mxu1 %v678_v39 }
  0xd4   : > { %1802 = vmatmul.mubr.bf16.vlgmr.msra.gmra.mrb[80].mxu1 %v614_v49 }
  0xd5   : > { %1809 = vmatprep.mubr.bf16.mxu1 %v18474_v27  ;;  %16291 = vmatpush3.bf16.msra.mxu1 %v18613_v58  ;;  %v17899_v27 = vld [vmem:[%s21731_s3 + $0xa0] sm:$0xff]   ;;  %v18671_v58 = vpack.c.bf16 %v2119_v1, %v2118_v0 }
  0xd6   : > { %16292 = vmatprep.subr.bf16.mxu1 %v17896_v51 }
  0xd7   : > { %2662 = vmatmul.mubr.bf16.gmra.mrb[68].mxu0 %v18671_v58 }
  0xd8   : > { %2669 = vmatprep.mubr.bf16.mxu0 %v2202_v8 }
  0xd9   : > { %16293 = vmatpush3.bf16.msra.mxu1 %v17896_v51 }
  0xda   : > { %16294 = vmatprep.subr.bf16.mxu1 %v17897_v61 }
  0xdc   : > { %1810 = vmatmul.mubr.bf16.gmra.mrb[84].mxu1 %v18477_v30  ;;  %v2186_v30 = vld [vmem:[#allocation2 + $0x199] sm:$0xff] }
  0xdd   : > { %1817 = vmatprep.mubr.bf16.mxu1 %v18492_v46  ;;  %16295 = vmatpush3.bf16.msra.mxu1 %v17897_v61  ;;  %v2187_v46 = vld [vmem:[#allocation2 + $0x1a1] sm:$0xff] }
  0xde   : > { %16296 = vmatprep.subr.bf16.mxu1 %v17898_v2  ;;  %v2203_v43 = vpack.c.bf16 %v2187_v46, %v2186_v30 }
  0xdf   : > { %2670 = vmatmul.mubr.bf16.gmra.mrb[72].mxu0 %v2138_v16 }
  0xe0   : > { %2677 = vmatprep.mubr.bf16.mxu0 %v2203_v43 }
  0xe1   : > { %16297 = vmatpush3.bf16.msra.mxu1 %v17898_v2 }
  0xe2   : > { %16298 = vmatprep.subr.bf16.mxu1 %v17899_v27 }
  0xe4   : > { %1818 = vmatmul.mubr.bf16.gmra.mrb[88].mxu1 %v18495_v50  ;;  %v18690_v50 = vld [vmem:[%s21731_s3 + $0x200] sm:$0xff]  }
  0xe5   : > { %1825 = vmatprep.mubr.bf16.mxu1 %v18510_v4  ;;  %16299 = vmatpush3.bf16.msra.mxu1 %v17899_v27  ;;  %v592_v4 = vld [vmem:[#allocation2 + $0x78] sm:$0xff] }
  0xe6   : > { %16300 = vmatprep.subr.bf16.mxu1 %v17900_v14 }
  0xe7   : > { %2678 = vmatmul.mubr.bf16.gmra.mrb[76].mxu0 %v614_v49  ;;  %v599_v49 = vld [vmem:[#allocation2 + $0xc8] sm:$0xff] }
  0xe8   : > { %v622_v54 = vpack.c.bf16 %v599_v49, %v598_v48 }
  0xe9   : > { %16301 = vmatpush3.bf16.msra.mxu1 %v17900_v14 }
  0xea   : > { %16302 = vmatprep.subr.bf16.mxu1 %v17901_v15 }
  0xec   : > { %1826 = vmatmul.mubr.bf16.gmra.mrb[92].mxu1 %v18512_v9  ;;  %v658_v9 = vld [vmem:[#allocation2 + $0x91] sm:$0xff] }
  0xed   : > { %1833 = vmatprep.mubr.bf16.mxu1 %v18528_v24  ;;  %16303 = vmatpush3.bf16.msra.mxu1 %v17901_v15  ;;  %v619_v24 = vpack.c.bf16 %v593_v19, %v592_v4  ;;  %v684_v20 = vpack.c.bf16 %v659_v44, %v658_v9 }
  0xee   : > { %16304 = vmatprep.subr.bf16.mxu1 %v17902_v18 }
  0xf1   : > { %16305 = vmatpush3.bf16.msra.mxu1 %v17902_v18 }
  0xf2   : > { %16338 = vmatprep.subr.bf16.mxu1 %v18690_v50 }
  0xf4   : > { %1834 = vmatmul.mubr.bf16.gmra.mrb[96].mxu1 %v18531_v28  ;;  %v597_v28 = vld [vmem:[#allocation2 + $0xb0] sm:$0xff] }
  0xf5   : > { %1841 = vmatprep.mubr.bf16.mxu1 %v18551_v60  ;;  %v621_v38 = vpack.c.bf16 %v597_v28, %v596_v32 }
  0xfc   : > { %1842 = vmatmul.mubr.bf16.gmra.mrb[100].mxu1 %v619_v24 }
  0xfd   : > { %1849 = vmatprep.mubr.bf16.mxu1 %v684_v20 }
 0x104   : > { %1850 = vmatmul.mubr.bf16.gmra.mrb[104].mxu1 %v620_v31 }
 0x105   : > { %1857 = vmatprep.mubr.bf16.mxu1 %v685_v55 }
 0x107   : > { %v14208_v35 = vpop.f32.mrb[0].mxu1 }
 0x108   : > { %v14209_v60 = vpop.f32.mrb[1].mxu1 }
 0x109   : > { %v18695_v39 = vadd.f32 %v14209_v60, %v14208_v35  ;;  %v14211_v3 = vpop.f32.mrb[2].mxu1 }
 0x10a   : > { %v14212_v5 = vpop.f32.mrb[3].mxu1 }
 0x10b   : > { %v18697_v42 = vadd.f32 %v14212_v5, %v14211_v3 }
 0x10c   : > { %1858 = vmatmul.mubr.bf16.gmra.mrb[108].mxu1 %v621_v38 }
 0x10d   : > { %1865 = vmatprep.mubr.bf16.mxu1 %v686_v41 }
 0x10f   : > { %v14214_v51 = vpop.f32.mrb[4].mxu1 }
 0x110   : > { %v14215_v52 = vpop.f32.mrb[5].mxu1 }
 0x111   : > { %v18699_v56 = vadd.f32 %v14215_v52, %v14214_v51  ;;  %v14217_v57 = vpop.f32.mrb[6].mxu1 }
 0x112   : > { %v14218_v61 = vpop.f32.mrb[7].mxu1 }
 0x113   : > { %v18701_v0 = vadd.f32 %v14218_v61, %v14217_v57 }
 0x114   : > { %1866 = vmatmul.mubr.bf16.gmra.mrb[112].mxu1 %v622_v54 }
 0x115   : > { %1873 = vmatprep.mubr.bf16.mxu1 %v18600_v40  ;;  %v14184_v40 = vpop.f32.mrb[0].mxu0 }
 0x116   : > { %v14185_v16 = vpop.f32.mrb[1].mxu0 }
 0x117   : > { %v14220_v1 = vpop.f32.mrb[8].mxu1  ;;  %v18716_v43 = vadd.f32 %v14185_v16, %v14184_v40  ;;  %v14187_v18 = vpop.f32.mrb[2].mxu0 }
 0x118   : > { %v14221_v2 = vpop.f32.mrb[9].mxu1  ;;  %v14188_v4 = vpop.f32.mrb[3].mxu0 }
 0x119   : > { %v18704_v6 = vadd.f32 %v14221_v2, %v14220_v1  ;;  %v14223_v7 = vpop.f32.mrb[10].mxu1  ;;  %v18718_v19 = vadd.f32 %v14188_v4, %v14187_v18 }
 0x11a   : > { %v14224_v27 = vpop.f32.mrb[11].mxu1 }
 0x11b   : > { %v18706_v8 = vadd.f32 %v14224_v27, %v14223_v7  ;;  %v710_v7 = vld [vmem:[#allocation2 + $0x2] sm:$0xff]  ;;  %v711_v27 = vld [vmem:[#allocation2 + $0xa] sm:$0xff] }
 0x11c   : > { %1874 = vmatmul.mubr.bf16.gmra.mrb[116].mxu1 %v18615_v17 }
 0x11d   : > { %1881 = vmatprep.mubr.bf16.mxu1 %v18617_v59 }
 0x11f   : > { %v14226_v10 = vpop.f32.mrb[12].mxu1 }
 0x120   : > { %v14227_v13 = vpop.f32.mrb[13].mxu1 }
 0x121   : > { %v18710_v14 = vadd.f32 %v14227_v13, %v14226_v10  ;;  %v14229_v30 = vpop.f32.mrb[14].mxu1 }
 0x122   : > { %v14230_v46 = vpop.f32.mrb[15].mxu1 }
 0x123   : > { %v18712_v15 = vadd.f32 %v14230_v46, %v14229_v30 }
 0x124   : > { %1882 = vmatmul.mubr.bf16.gmra.mrb[120].mxu1 %v18622_v11 }
 0x125   : > { %1889 = vmatprep.mubr.bf16.mxu1 %v18624_v12  ;;  %v14190_v12 = vpop.f32.mrb[4].mxu0 }
 0x126   : > { %v14191_v25 = vpop.f32.mrb[5].mxu0 }
 0x127   : > { %v14232_v17 = vpop.f32.mrb[16].mxu1  ;;  %v18728_v31 = vadd.f32 %v14191_v25, %v14190_v12  ;;  %v14193_v55 = vpop.f32.mrb[6].mxu0 }
 0x128   : > { %v14233_v59 = vpop.f32.mrb[17].mxu1  ;;  %v14194_v28 = vpop.f32.mrb[7].mxu0 }
 0x129   : > { %v18720_v9 = vadd.f32 %v14233_v59, %v14232_v17  ;;  %v14235_v44 = vpop.f32.mrb[18].mxu1  ;;  %v18732_v34 = vadd.f32 %v14194_v28, %v14193_v55  ;;  %v14196_v38 = vpop.f32.mrb[8].mxu0  ;;  %v742_v17 = vpack.c.bf16 %v711_v27, %v710_v7  ;;  %v712_v59 = vld [vmem:[#allocation2 + $0x1a] sm:$0xff] }
 0x12a   : > { %v14236_v24 = vpop.f32.mrb[19].mxu1  ;;  %v14197_v41 = vpop.f32.mrb[9].mxu0 }
 0x12b   : > { %v18722_v20 = vadd.f32 %v14236_v24, %v14235_v44  ;;  %v18740_v48 = vadd.f32 %v14197_v41, %v14196_v38  ;;  %v14199_v49 = vpop.f32.mrb[10].mxu0  ;;  %v714_v44 = vld [vmem:[#allocation2 + $0x32] sm:$0xff] }
 0x12c   : > { %1890 = vmatmul.mubr.bf16.gmra.mrb[124].mxu1 %v18628_v22  ;;  %v14200_v51 = vpop.f32.mrb[11].mxu0 }
 0x12d   : > { %1897 = vmatprep.mubr.bf16.mxu1 %v18630_v23  ;;  %v14202_v2 = vpop.f32.mrb[12].mxu0 }
 0x12f   : > { %v14238_v11 = vpop.f32.mrb[20].mxu1 }
 0x130   : > { %v14239_v21 = vpop.f32.mrb[21].mxu1 }
 0x131   : > { %v18726_v53 = vadd.f32 %v14239_v21, %v14238_v11  ;;  %v14241_v29 = vpop.f32.mrb[22].mxu1  ;;  %v715_v11 = vld [vmem:[#allocation2 + $0x3a] sm:$0xff] }
 0x132   : > { %v14242_v32 = vpop.f32.mrb[23].mxu1 }
 0x133   : > { %v18730_v33 = vadd.f32 %v14242_v32, %v14241_v29 }
 0x134   : > { %1898 = vmatmul.mubr.bf16.gmra.mrb[128].mxu1 %v18637_v36  ;;  %v18744_v36 = vadd.f32 %v14200_v51, %v14199_v49  ;;  %v716_v49 = vld [vmem:[#allocation2 + $0x4a] sm:$0xff]  ;;  %v717_v51 = vld [vmem:[#allocation2 + $0x52] sm:$0xff] }
 0x135   : > { %1905 = vmatprep.mubr.bf16.mxu1 %v18639_v37 }
 0x137   : > { %v14244_v22 = vpop.f32.mrb[24].mxu1 }
 0x138   : > { %v14245_v23 = vpop.f32.mrb[25].mxu1 }
 0x139   : > { %v18736_v35 = vadd.f32 %v14245_v23, %v14244_v22  ;;  %v14247_v60 = vpop.f32.mrb[26].mxu1 }
 0x13a   : > { %v14248_v3 = vpop.f32.mrb[27].mxu1 }
 0x13b   : > { %v18738_v5 = vadd.f32 %v14248_v3, %v14247_v60  ;;  %v18765_v60 = vpack.c.bf16 %v715_v11, %v714_v44  ;;  %v17904_v3 = vld [vmem:[%s21731_s3 + $0x208] sm:$0xff]   ;;  %v720_v44 = vld [vmem:[#allocation2 + $0x7a] sm:$0xff]  ;;  %v722_v11 = vld [vmem:[#allocation2 + $0x92] sm:$0xff] }
 0x13c   : > { %1906 = vmatmul.mubr.bf16.gmra.mrb[132].mxu1 %v18643_v45  ;;  %v14203_v45 = vpop.f32.mrb[13].mxu0 }
 0x13d   : > { %21743 = vst [vmem:[#allocation4_spill] sm:$0xff] %v18738_v5  ;;  %1913 = vmatprep.mubr.bf16.mxu1 %v18645_v47  ;;  %v18752_v10 = vadd.f32 %v14203_v45, %v14202_v2  ;;  %v14205_v47 = vpop.f32.mrb[14].mxu0 }
 0x13e   : > { %v14206_v30 = vpop.f32.mrb[15].mxu0 }
 0x13f   : > { %v14250_v37 = vpop.f32.mrb[28].mxu1  ;;  %v18754_v40 = vadd.f32 %v14206_v30, %v14205_v47  ;;  %v14456_v24 = vpop.f32.mrb[16].mxu0 }
 0x140   : > { %v14251_v52 = vpop.f32.mrb[29].mxu1  ;;  %v14457_v12 = vpop.f32.mrb[17].mxu0 }
 0x141   : > { %v18746_v54 = vadd.f32 %v14251_v52, %v14250_v37  ;;  %v14253_v57 = vpop.f32.mrb[30].mxu1  ;;  %v14459_v25 = vpop.f32.mrb[18].mxu0  ;;  %v18761_v29 = vadd.f32 %v14457_v12, %v14456_v24  ;;  %v718_v37 = vld [vmem:[#allocation2 + $0x62] sm:$0xff]  ;;  %v719_v52 = vld [vmem:[#allocation2 + $0x6a] sm:$0xff]  ;;  %v723_v12 = vld [vmem:[#allocation2 + $0x9a] sm:$0xff] }
 0x142   : > { %v14254_v61 = vpop.f32.mrb[31].mxu1  ;;  %v14460_v28 = vpop.f32.mrb[19].mxu0  ;;  %v721_v24 = vld [vmem:[#allocation2 + $0x82] sm:$0xff] }
 0x143   : > { %21744 = vst [vmem:[#allocation5_spill] sm:$0xff] %v18746_v54  ;;  %v18748_v1 = vadd.f32 %v14254_v61, %v14253_v57  ;;  %v18767_v38 = vadd.f32 %v14460_v28, %v14459_v25  ;;  %v14462_v57 = vpop.f32.mrb[20].mxu0  ;;  %v17905_v61 = vld [vmem:[%s21731_s3 + $0x210] sm:$0xff]   ;;  %v17907_v25 = vld [vmem:[%s21731_s3 + $0x220] sm:$0xff]  }
 0x144   : > { %1914 = vmatmul.mubr.bf16.gmra.mrb[136].mxu1 %v18657_v62  ;;  %v14463_v2 = vpop.f32.mrb[21].mxu0 }
 0x145   : > { %21745 = vst [vmem:[#allocation6_spill] sm:$0xff] %v18748_v1  ;;  %1921 = vmatprep.mubr.bf16.mxu1 %v18659_v63  ;;  %v713_v63 = vld [vmem:[#allocation2 + $0x22] sm:$0xff]  ;;  %v14465_v45 = vpop.f32.mrb[22].mxu0  ;;  %v18779_v27 = vadd.f32 %v14463_v2, %v14462_v57 }
 0x146   : > { %v743_v32 = vpack.c.bf16 %v713_v63, %v712_v59  ;;  %v14466_v30 = vpop.f32.mrb[23].mxu0  ;;  %v17906_v59 = vld [vmem:[%s21731_s3 + $0x218] sm:$0xff]   ;;  %v17908_v2 = vld [vmem:[%s21731_s3 + $0x228] sm:$0xff]  }
 0x147   : > { %v14256_v13 = vpop.f32.mrb[32].mxu1 }
 0x148   : > { %v14257_v46 = vpop.f32.mrb[33].mxu1 }
 0x149   : > { %v18756_v16 = vadd.f32 %v14257_v46, %v14256_v13  ;;  %v14259_v18 = vpop.f32.mrb[34].mxu1  ;;  %v18781_v13 = vpack.c.bf16 %v717_v51, %v716_v49 }
 0x14a   : > { %v14260_v4 = vpop.f32.mrb[35].mxu1 }
 0x14b   : > { %21746 = vst [vmem:[#allocation7_spill] sm:$0xff] %v18756_v16  ;;  %v18758_v62 = vadd.f32 %v14260_v4, %v14259_v18 }
 0x14c   : > { %1922 = vmatmul.mubr.bf16.gmra.mrb[140].mxu1 %v18671_v58 }
 0x14d   : > { %21747 = vst [vmem:[#allocation8_spill] sm:$0xff] %v18758_v62  ;;  %16306 = vmatprep.mubr.bf16.mxu1 %v742_v17  ;;  %v18785_v17 = vpack.c.bf16 %v719_v52, %v718_v37  ;;  %v18805_v52 = vpack.c.bf16 %v723_v12, %v722_v11 }
 0x14f   : > { %v14262_v21 = vpop.f32.mrb[36].mxu1 }
 0x150   : > { %v14263_v55 = vpop.f32.mrb[37].mxu1 }
 0x151   : > { %v18763_v22 = vadd.f32 %v14263_v55, %v14262_v21  ;;  %v14265_v23 = vpop.f32.mrb[38].mxu1  ;;  %v14468_v21 = vpop.f32.mrb[24].mxu0 }
 0x152   : > { %v14266_v58 = vpop.f32.mrb[39].mxu1  ;;  %v14469_v55 = vpop.f32.mrb[25].mxu0 }
 0x153   : > { %21748 = vst [vmem:[#allocation9_spill] sm:$0xff] %v18763_v22  ;;  %v18772_v41 = vadd.f32 %v14266_v58, %v14265_v23  ;;  %v18799_v28 = vadd.f32 %v14469_v55, %v14468_v21  ;;  %v14471_v23 = vpop.f32.mrb[26].mxu0  ;;  %v17910_v21 = vld [vmem:[%s21731_s3 + $0x238] sm:$0xff]  }
 0x154   : > { %16307 = vmatmul.mubr.bf16.vlgmr.msra.gmra.mrb[48].mxu1 %v743_v32  ;;  %v14472_v49 = vpop.f32.mrb[27].mxu0 }
 0x155   : > { %21749 = vst [vmem:[#allocation10_spill] sm:$0xff] %v18772_v41  ;;  %16310 = vmatprep.mubr.bf16.mxu1 %v18765_v60  ;;  %16339 = vmatpush3.bf16.msra.mxu1 %v18690_v50  ;;  %v18787_v50 = vadd.f32 %v14466_v30, %v14465_v45  ;;  %v18807_v57 = vadd.f32 %v14472_v49, %v14471_v23  ;;  %v724_v45 = vld [vmem:[#allocation2 + $0xaa] sm:$0xff]  ;;  %v726_v30 = vld [vmem:[#allocation2 + $0xc2] sm:$0xff]  ;;  %v728_v23 = vld [vmem:[#allocation2 + $0xda] sm:$0xff] }
 0x156   : > { %16340 = vmatprep.subr.bf16.mxu1 %v17904_v3  ;;  %v730_v49 = vld [vmem:[#allocation2 + $0xf2] sm:$0xff]  ;;  %v739_v41 = vld [vmem:[#allocation2 + $0x15a] sm:$0xff] }
 0x157   : > { %v14268_v7 = vpop.f32.mrb[40].mxu1 }
 0x158   : > { %v14269_v47 = vpop.f32.mrb[41].mxu1 }
 0x159   : > { %v18783_v46 = vadd.f32 %v14269_v47, %v14268_v7  ;;  %v14271_v18 = vpop.f32.mrb[42].mxu1  ;;  %16341 = vmatpush3.bf16.msra.mxu1 %v17904_v3  ;;  %v18801_v3 = vpack.c.bf16 %v721_v24, %v720_v44  ;;  %v725_v47 = vld [vmem:[#allocation2 + $0xb2] sm:$0xff] }
 0x15a   : > { %v14272_v4 = vpop.f32.mrb[43].mxu1  ;;  %16342 = vmatprep.subr.bf16.mxu1 %v17905_v61  ;;  %v18821_v12 = vpack.c.bf16 %v725_v47, %v724_v45 }
 0x15b   : > { %21750 = vst [vmem:[#allocation11_spill] sm:$0xff] %v18783_v46  ;;  %v18792_v63 = vadd.f32 %v14272_v4, %v14271_v18  ;;  %v727_v18 = vld [vmem:[#allocation2 + $0xca] sm:$0xff]  ;;  %v14474_v4 = vpop.f32.mrb[28].mxu0  ;;  %v738_v46 = vld [vmem:[#allocation2 + $0x152] sm:$0xff] }
 0x15c   : > { %16311 = vmatmul.mubr.bf16.gmra.mrb[52].mxu1 %v18781_v13  ;;  %v14475_v44 = vpop.f32.mrb[29].mxu0 }
 0x15d   : > { %21751 = vst [vmem:[#allocation12_spill] sm:$0xff] %v18792_v63  ;;  %16314 = vmatprep.mubr.bf16.mxu1 %v18785_v17  ;;  %16343 = vmatpush3.bf16.msra.mxu1 %v17905_v61  ;;  %v18819_v24 = vadd.f32 %v14475_v44, %v14474_v4  ;;  %v14477_v11 = vpop.f32.mrb[30].mxu0 }
 0x15e   : > { %16344 = vmatprep.subr.bf16.mxu1 %v17906_v59  ;;  %v14478_v55 = vpop.f32.mrb[31].mxu0 }
 0x15f   : > { %v14274_v32 = vpop.f32.mrb[44].mxu1 }
 0x160   : > { %v14275_v58 = vpop.f32.mrb[45].mxu1 }
 0x161   : > { %v18803_v51 = vadd.f32 %v14275_v58, %v14274_v32  ;;  %v14277_v37 = vpop.f32.mrb[46].mxu1  ;;  %16345 = vmatpush3.bf16.msra.mxu1 %v17906_v59  ;;  %v17909_v59 = vld [vmem:[%s21731_s3 + $0x230] sm:$0xff]   ;;  %v18826_v32 = vpack.c.bf16 %v727_v18, %v726_v30  ;;  %v729_v58 = vld [vmem:[#allocation2 + $0xe2] sm:$0xff] }
 0x162   : > { %v14278_v61 = vpop.f32.mrb[47].mxu1  ;;  %16346 = vmatprep.subr.bf16.mxu1 %v17907_v25  ;;  %v18834_v18 = vpack.c.bf16 %v729_v58, %v728_v23 }
 0x163   : > { %21752 = vst [vmem:[#allocation13_spill] sm:$0xff] %v18803_v51  ;;  %v18812_v7 = vadd.f32 %v14278_v61, %v14277_v37  ;;  %v14480_v37 = vpop.f32.mrb[32].mxu0  ;;  %v731_v61 = vld [vmem:[#allocation2 + $0xfa] sm:$0xff]  ;;  %v735_v51 = vld [vmem:[#allocation2 + $0x12a] sm:$0xff] }
 0x164   : > { %16315 = vmatmul.mubr.bf16.gmra.mrb[56].mxu1 %v18801_v3  ;;  %v14481_v45 = vpop.f32.mrb[33].mxu0  ;;  %v18836_v4 = vpack.c.bf16 %v731_v61, %v730_v49 }
 0x165   : > { %21753 = vst [vmem:[#allocation14_spill] sm:$0xff] %v18812_v7  ;;  %16318 = vmatprep.mubr.bf16.mxu1 %v18805_v52  ;;  %16347 = vmatpush3.bf16.msra.mxu1 %v17907_v25  ;;  %v18828_v25 = vadd.f32 %v14478_v55, %v14477_v11  ;;  %v18832_v47 = vadd.f32 %v14481_v45, %v14480_v37  ;;  %v14483_v30 = vpop.f32.mrb[34].mxu0  ;;  %v732_v11 = vld [vmem:[#allocation2 + $0x10a] sm:$0xff]  ;;  %v733_v55 = vld [vmem:[#allocation2 + $0x112] sm:$0xff] }
 0x166   : > { %16348 = vmatprep.subr.bf16.mxu1 %v17908_v2  ;;  %v18844_v58 = vpack.c.bf16 %v733_v55, %v732_v11 }
 0x169   : > { %16349 = vmatpush3.bf16.msra.mxu1 %v17908_v2  ;;  %v14484_v2 = vpop.f32.mrb[35].mxu0 }
 0x16a   : > { %16350 = vmatprep.subr.bf16.mxu1 %v17909_v59  ;;  %v18838_v44 = vadd.f32 %v14484_v2, %v14483_v30  ;;  %v14486_v7 = vpop.f32.mrb[36].mxu0  ;;  %v736_v30 = vld [vmem:[#allocation2 + $0x13a] sm:$0xff]  ;;  %v737_v2 = vld [vmem:[#allocation2 + $0x142] sm:$0xff] }
 0x16b   : > { %v14487_v37 = vpop.f32.mrb[37].mxu0  ;;  %v18854_v11 = vpack.c.bf16 %v737_v2, %v736_v30 }
 0x16c   : > { %16319 = vmatmul.mubr.bf16.gmra.mrb[60].mxu1 %v18821_v12  ;;  %v18842_v45 = vadd.f32 %v14487_v37, %v14486_v7  ;;  %v14489_v23 = vpop.f32.mrb[38].mxu0 }
 0x16d   : > { %16322 = vmatprep.mubr.bf16.mxu1 %v18826_v32  ;;  %16351 = vmatpush3.bf16.msra.mxu1 %v17909_v59  ;;  %v734_v59 = vld [vmem:[#allocation2 + $0x122] sm:$0xff]  ;;  %v14490_v49 = vpop.f32.mrb[39].mxu0 }
 0x16e   : > { %16352 = vmatprep.subr.bf16.mxu1 %v17910_v21  ;;  %v18846_v61 = vpack.c.bf16 %v735_v51, %v734_v59  ;;  %v14492_v63 = vpop.f32.mrb[40].mxu0  ;;  %v18856_v51 = vpack.c.bf16 %v739_v41, %v738_v46 }
 0x16f   : > { %v14493_v22 = vpop.f32.mrb[41].mxu0 }
 0x170   : > { %v18852_v7 = vadd.f32 %v14493_v22, %v14492_v63  ;;  %v14495_v37 = vpop.f32.mrb[42].mxu0 }
 0x171   : > { %16353 = vmatpush3.bf16.msra.mxu1 %v17910_v21  ;;  %v18848_v21 = vadd.f32 %v14490_v49, %v14489_v23  ;;  %v14496_v55 = vpop.f32.mrb[43].mxu0 }
 0x172   : > { %v18858_v59 = vadd.f32 %v14496_v55, %v14495_v37  ;;  %v14498_v23 = vpop.f32.mrb[44].mxu0 }
 0x173   : > { %v14499_v49 = vpop.f32.mrb[45].mxu0 }
 0x174   : > { %16323 = vmatmul.mubr.bf16.gmra.mrb[64].mxu1 %v18834_v18  ;;  %v18862_v62 = vadd.f32 %v14499_v49, %v14498_v23  ;;  %v14501_v16 = vpop.f32.mrb[46].mxu0 }
 0x175   : > { %16326 = vmatprep.mubr.bf16.mxu1 %v18836_v4  ;;  %v14502_v1 = vpop.f32.mrb[47].mxu0 }
 0x176   : > { %v18864_v22 = vadd.f32 %v14502_v1, %v14501_v16  ;;  %v14504_v41 = vpop.f32.mrb[48].mxu0 }
 0x177   : > { %v14505_v46 = vpop.f32.mrb[49].mxu0 }
 0x178   : > { %v18868_v63 = vadd.f32 %v14505_v46, %v14504_v41  ;;  %v14507_v30 = vpop.f32.mrb[50].mxu0 }
 0x179   : > { %v14508_v2 = vpop.f32.mrb[51].mxu0 }
 0x17a   : > { %v18870_v37 = vadd.f32 %v14508_v2, %v14507_v30 }
 0x17c   : > { %16327 = vmatmul.mubr.bf16.gmra.mrb[68].mxu1 %v18844_v58  ;;  %v14510_v55 = vpop.f32.mrb[52].mxu0 }
 0x17d   : > { %16330 = vmatprep.mubr.bf16.mxu1 %v18846_v61  ;;  %v14511_v23 = vpop.f32.mrb[53].mxu0 }
 0x17e   : > { %v18874_v1 = vadd.f32 %v14511_v23, %v14510_v55  ;;  %v14513_v16 = vpop.f32.mrb[54].mxu0 }
 0x184   : > { %16331 = vmatmul.mubr.bf16.gmra.mrb[72].mxu1 %v18854_v11 }
 0x185   : > { %16334 = vmatprep.mubr.bf16.mxu1 %v18856_v51 }
 0x18c   : > { %16335 = vmatmul.mubr.bf16.gmra.mrb[76].mxu1 %v18632_v26  ;;  %v14514_v26 = vpop.f32.mrb[55].mxu0 }
 0x18d   : > { %16354 = vmatprep.mubr.bf16.mxu1 %v18765_v60  ;;  %v18876_v49 = vadd.f32 %v14514_v26, %v14513_v16  ;;  %v14516_v60 = vpop.f32.mrb[56].mxu0 }
 0x18e   : > { %v14517_v41 = vpop.f32.mrb[57].mxu0 }
 0x18f   : > { %v18880_v46 = vadd.f32 %v14517_v41, %v14516_v60  ;;  %v14519_v30 = vpop.f32.mrb[58].mxu0 }
 0x194   : > { %16355 = vmatmul.mubr.bf16.vlgmr.msra.gmra.mrb[48].mxu1 %v18781_v13  ;;  %v14520_v13 = vpop.f32.mrb[59].mxu0 }
 0x195   : > { %16358 = vmatprep.mubr.bf16.mxu1 %v18785_v17  ;;  %v18882_v2 = vadd.f32 %v14520_v13, %v14519_v30  ;;  %v14522_v17 = vpop.f32.mrb[60].mxu0 }
 0x196   : > { %v14523_v55 = vpop.f32.mrb[61].mxu0 }
 0x197   : > { %v18886_v16 = vadd.f32 %v14523_v55, %v14522_v17 }
 0x199   : > { %21754 = vst [vmem:[#allocation15_spill] sm:$0xff] %v18886_v16 }
 0x19c   : > { %16359 = vmatmul.mubr.bf16.gmra.mrb[52].mxu1 %v18801_v3  ;;  %v14525_v3 = vpop.f32.mrb[62].mxu0 }
 0x19d   : > { %16362 = vmatprep.mubr.bf16.mxu1 %v18805_v52  ;;  %v14526_v52 = vpop.f32.mrb[63].mxu0 }
 0x19e   : > { %v18888_v60 = vadd.f32 %v14526_v52, %v14525_v3 }
 0x1a4   : > { %16363 = vmatmul.mubr.bf16.gmra.mrb[56].mxu1 %v18821_v12 }
 0x1a5   : > { %16366 = vmatprep.mubr.bf16.mxu1 %v18826_v32  ;;  %v14528_v32 = vpop.f32.mrb[64].mxu0 }
 0x1a6   : > { %v14529_v55 = vpop.f32.mrb[65].mxu0 }
 0x1a7   : > { %v14320_v23 = vpop.f32.mrb[80].mxu1  ;;  %v14531_v3 = vpop.f32.mrb[66].mxu0 }
 0x1a8   : > { %v14321_v26 = vpop.f32.mrb[81].mxu1 }
 0x1a9   : > { %v14322_v54 = vadd.f32 %v14321_v26, %v14320_v23  ;;  %v14323_v5 = vpop.f32.mrb[82].mxu1  ;;  %v18897_v23 = vadd.f32 %v14529_v55, %v14528_v32 }
 0x1aa   : > { %v14324_v41 = vpop.f32.mrb[83].mxu1 }
 0x1ab   : > { %v17029_v30 = vadd.f32 %v14322_v54, %v18716_v43  ;;  %v14325_v13 = vadd.f32 %v14324_v41, %v14323_v5  ;;  %v14532_v5 = vpop.f32.mrb[67].mxu0 }
 0x1ac   : > { %16367 = vmatmul.mubr.bf16.gmra.mrb[60].mxu1 %v18834_v18  ;;  %v18902_v52 = vadd.f32 %v14532_v5, %v14531_v3 }
 0x1ad   : > { %v17035_v12 = vadd.f32 %v14325_v13, %v18718_v19  ;;  %16370 = vmatprep.mubr.bf16.mxu1 %v18836_v4  ;;  %v18895_v17 = vadd.f32 %v17029_v30, %v18761_v29  ;;  %v14534_v30 = vpop.f32.mrb[68].mxu0 }
 0x1ae   : > { %v14535_v13 = vpop.f32.mrb[69].mxu0 }
 0x1af   : > { %v14326_v16 = vpop.f32.mrb[84].mxu1  ;;  %v18900_v26 = vadd.f32 %v17035_v12, %v18767_v38  ;;  %v14537_v32 = vpop.f32.mrb[70].mxu0 }
 0x1b0   : > { %v14327_v43 = vpop.f32.mrb[85].mxu1  ;;  %v14538_v3 = vpop.f32.mrb[71].mxu0 }
 0x1b1   : > { %v14328_v54 = vadd.f32 %v14327_v43, %v14326_v16  ;;  %v14329_v18 = vpop.f32.mrb[86].mxu1  ;;  %v18911_v16 = vadd.f32 %v14535_v13, %v14534_v30  ;;  %v18916_v5 = vadd.f32 %v14538_v3, %v14537_v32 }
 0x1b2   : > { %v14330_v19 = vpop.f32.mrb[87].mxu1 }
 0x1b3   : > { %v17026_v4 = vadd.f32 %v14328_v54, %v18728_v31  ;;  %v14331_v41 = vadd.f32 %v14330_v19, %v14329_v18  ;;  %v2246_v18 = vld [vmem:[#allocation2 + $0x16a] sm:$0xff]  ;;  %v2247_v19 = vld [vmem:[#allocation2 + $0x172] sm:$0xff] }
 0x1b4   : > { %16371 = vmatmul.mubr.bf16.gmra.mrb[64].mxu1 %v18844_v58 }
 0x1b5   : > { %v17032_v29 = vadd.f32 %v14331_v41, %v18732_v34  ;;  %16374 = vmatprep.mubr.bf16.mxu1 %v18846_v61  ;;  %v18909_v38 = vadd.f32 %v17026_v4, %v18779_v27  ;;  %v2248_v41 = vld [vmem:[#allocation2 + $0x182] sm:$0xff] }
 0x1b7   : > { %v14332_v12 = vpop.f32.mrb[88].mxu1  ;;  %v18914_v55 = vadd.f32 %v17032_v29, %v18787_v50  ;;  %v14540_v50 = vpop.f32.mrb[72].mxu0  ;;  %v2249_v29 = vld [vmem:[#allocation2 + $0x18a] sm:$0xff] }
 0x1b8   : > { %v14333_v31 = vpop.f32.mrb[89].mxu1  ;;  %v14541_v30 = vpop.f32.mrb[73].mxu0 }
 0x1b9   : > { %v14334_v43 = vadd.f32 %v14333_v31, %v14332_v12  ;;  %v14335_v58 = vpop.f32.mrb[90].mxu1  ;;  %v18925_v12 = vadd.f32 %v14541_v30, %v14540_v50  ;;  %v2250_v50 = vld [vmem:[#allocation2 + $0x19a] sm:$0xff]  ;;  %v2251_v30 = vld [vmem:[#allocation2 + $0x1a2] sm:$0xff] }
 0x1ba   : > { %v14336_v34 = vpop.f32.mrb[91].mxu1 }
 0x1bb   : > { %v17041_v61 = vadd.f32 %v14334_v43, %v18740_v48  ;;  %v14337_v54 = vadd.f32 %v14336_v34, %v14335_v58  ;;  %v14543_v48 = vpop.f32.mrb[74].mxu0  ;;  %v2266_v43 = vpack.c.bf16 %v2249_v29, %v2248_v41 }
 0x1bc   : > { %16375 = vmatmul.mubr.bf16.gmra.mrb[68].mxu1 %v18854_v11  ;;  %v14544_v31 = vpop.f32.mrb[75].mxu0 }
 0x1bd   : > { %v17047_v27 = vadd.f32 %v14337_v54, %v18744_v36  ;;  %16378 = vmatprep.mubr.bf16.mxu1 %v18856_v51  ;;  %v18923_v4 = vadd.f32 %v17041_v61, %v18799_v28  ;;  %v2265_v36 = vpack.c.bf16 %v2247_v19, %v2246_v18  ;;  %v18930_v58 = vadd.f32 %v14544_v31, %v14543_v48 }
 0x1be   : > { %v2267_v48 = vpack.c.bf16 %v2251_v30, %v2250_v50 }
 0x1bf   : > { %v14338_v13 = vpop.f32.mrb[92].mxu1  ;;  %v18928_v32 = vadd.f32 %v17047_v27, %v18807_v57  ;;  %v14546_v57 = vpop.f32.mrb[76].mxu0 }
 0x1c0   : > { %v14339_v11 = vpop.f32.mrb[93].mxu1  ;;  %v14547_v18 = vpop.f32.mrb[77].mxu0 }
 0x1c1   : > { %v14340_v51 = vadd.f32 %v14339_v11, %v14338_v13  ;;  %v14341_v3 = vpop.f32.mrb[94].mxu1  ;;  %v18937_v13 = vadd.f32 %v14547_v18, %v14546_v57  ;;  %v14549_v41 = vpop.f32.mrb[78].mxu0 }
 0x1c2   : > { %v14342_v28 = vpop.f32.mrb[95].mxu1  ;;  %v14550_v11 = vpop.f32.mrb[79].mxu0 }
 0x1c3   : > { %v17038_v34 = vadd.f32 %v14340_v51, %v18752_v10  ;;  %v14343_v61 = vadd.f32 %v14342_v28, %v14341_v3  ;;  %v18942_v31 = vadd.f32 %v14550_v11, %v14549_v41 }
 0x1c4   : > { %16379 = vmatmul.mubr.bf16.gmra.mrb[72].mxu1 %v2265_v36 }
 0x1c5   : > { %v17044_v54 = vadd.f32 %v14343_v61, %v18754_v40  ;;  %16382 = vmatprep.mubr.bf16.mxu1 %v2266_v43  ;;  %v18935_v27 = vadd.f32 %v17038_v34, %v18819_v24 }
 0x1c7   : > { %v14344_v19 = vpop.f32.mrb[96].mxu1  ;;  %v18940_v29 = vadd.f32 %v17044_v54, %v18828_v25 }
 0x1c8   : > { %v14345_v10 = vpop.f32.mrb[97].mxu1 }
 0x1c9   : > { %v14346_v36 = vadd.f32 %v14345_v10, %v14344_v19  ;;  %v14347_v40 = vpop.f32.mrb[98].mxu1 }
 0x1ca   : > { %v14348_v51 = vpop.f32.mrb[99].mxu1 }
 0x1cb   : > { %v17053_v3 = vadd.f32 %v14346_v36, %v18695_v39  ;;  %v14349_v24 = vadd.f32 %v14348_v51, %v14347_v40 }
 0x1cc   : > { %16383 = vmatmul.mubr.bf16.gmra.mrb[76].mxu1 %v2267_v48 }
 0x1cd   : > { %v17059_v43 = vadd.f32 %v14349_v24, %v18697_v42  ;;  %v18947_v28 = vadd.f32 %v17053_v3, %v18832_v47 }
 0x1cf   : > { %v14350_v34 = vpop.f32.mrb[100].mxu1  ;;  %v18950_v25 = vadd.f32 %v17059_v43, %v18838_v44 }
 0x1d0   : > { %v14351_v61 = vpop.f32.mrb[101].mxu1 }
 0x1d1   : > { %v14352_v54 = vadd.f32 %v14351_v61, %v14350_v34  ;;  %v14353_v50 = vpop.f32.mrb[102].mxu1 }
 0x1d2   : > { %v14354_v30 = vpop.f32.mrb[103].mxu1 }
 0x1d3   : > { %v17050_v57 = vadd.f32 %v14352_v54, %v18699_v56  ;;  %v14355_v18 = vadd.f32 %v14354_v30, %v14353_v50 }
 0x1d5   : > { %v17056_v39 = vadd.f32 %v14355_v18, %v18701_v0  ;;  %v18955_v19 = vadd.f32 %v17050_v57, %v18842_v45 }
 0x1d7   : > { %v14356_v42 = vpop.f32.mrb[104].mxu1  ;;  %v18958_v47 = vadd.f32 %v17056_v39, %v18848_v21 }
 0x1d8   : > { %v14357_v41 = vpop.f32.mrb[105].mxu1 }
 0x1d9   : > { %v14358_v10 = vadd.f32 %v14357_v41, %v14356_v42  ;;  %v14359_v44 = vpop.f32.mrb[106].mxu1 }
 0x1da   : > { %v14360_v48 = vpop.f32.mrb[107].mxu1 }
 0x1db   : > { %v17065_v11 = vadd.f32 %v14358_v10, %v18704_v6  ;;  %v14361_v36 = vadd.f32 %v14360_v48, %v14359_v44 }
 0x1dd   : > { %v17071_v40 = vadd.f32 %v14361_v36, %v18706_v8  ;;  %v18963_v56 = vadd.f32 %v17065_v11, %v18852_v7 }
 0x1df   : > { %v14362_v0 = vpop.f32.mrb[108].mxu1  ;;  %v18966_v45 = vadd.f32 %v17071_v40, %v18858_v59 }
 0x1e0   : > { %v14363_v51 = vpop.f32.mrb[109].mxu1 }
 0x1e1   : > { %v14364_v3 = vadd.f32 %v14363_v51, %v14362_v0  ;;  %v14365_v21 = vpop.f32.mrb[110].mxu1 }
 0x1e2   : > { %v14366_v24 = vpop.f32.mrb[111].mxu1 }
 0x1e3   : > { %v17062_v43 = vadd.f32 %v14364_v3, %v18710_v14  ;;  %v14367_v34 = vadd.f32 %v14366_v24, %v14365_v21  ;;  %v21755_v21 = vld [vmem:[#allocation4_spill] sm:$0xff] }
 0x1e5   : > { %v17068_v61 = vadd.f32 %v14367_v34, %v18712_v15  ;;  %v18971_v6 = vadd.f32 %v17062_v43, %v18862_v62 }
 0x1e7   : > { %v14368_v8 = vpop.f32.mrb[112].mxu1  ;;  %v18974_v7 = vadd.f32 %v17068_v61, %v18864_v22 }
 0x1e8   : > { %v14369_v54 = vpop.f32.mrb[113].mxu1 }
 0x1e9   : > { %v14370_v50 = vadd.f32 %v14369_v54, %v14368_v8  ;;  %v14371_v59 = vpop.f32.mrb[114].mxu1  ;;  %v21756_v8 = vld [vmem:[#allocation5_spill] sm:$0xff] }
 0x1ea   : > { %v14372_v30 = vpop.f32.mrb[115].mxu1 }
 0x1eb   : > { %v17077_v57 = vadd.f32 %v14370_v50, %v18720_v9  ;;  %v14373_v18 = vadd.f32 %v14372_v30, %v14371_v59  ;;  %v21757_v59 = vld [vmem:[#allocation6_spill] sm:$0xff] }
 0x1ed   : > { %v17083_v39 = vadd.f32 %v14373_v18, %v18722_v20  ;;  %v18979_v14 = vadd.f32 %v17077_v57, %v18868_v63 }
 0x1ef   : > { %v18982_v15 = vadd.f32 %v17083_v39, %v18870_v37  ;;  %v14374_v62 = vpop.f32.mrb[116].mxu1 }
 0x1f0   : > { %v14375_v42 = vpop.f32.mrb[117].mxu1 }
 0x1f1   : > { %v14376_v41 = vadd.f32 %v14375_v42, %v14374_v62  ;;  %v14377_v22 = vpop.f32.mrb[118].mxu1 }
 0x1f2   : > { %v14378_v10 = vpop.f32.mrb[119].mxu1 }
 0x1f3   : > { %v17074_v44 = vadd.f32 %v14376_v41, %v18726_v53  ;;  %v14379_v48 = vadd.f32 %v14378_v10, %v14377_v22  ;;  %v21759_v41 = vld [vmem:[#allocation7_spill] sm:$0xff] }
 0x1f5   : > { %v17080_v11 = vadd.f32 %v14379_v48, %v18730_v33  ;;  %v18987_v9 = vadd.f32 %v17074_v44, %v18874_v1  ;;  %v21760_v44 = vld [vmem:[#allocation8_spill] sm:$0xff] }
 0x1f7   : > { %v18990_v20 = vadd.f32 %v17080_v11, %v18876_v49  ;;  %v14380_v63 = vpop.f32.mrb[120].mxu1 }
 0x1f8   : > { %v14381_v36 = vpop.f32.mrb[121].mxu1 }
 0x1f9   : > { %v14382_v37 = vadd.f32 %v14381_v36, %v14380_v63  ;;  %v14383_v40 = vpop.f32.mrb[122].mxu1 }
 0x1fa   : > { %v14384_v0 = vpop.f32.mrb[123].mxu1 }
 0x1fb   : > { %v17089_v51 = vadd.f32 %v14382_v37, %v18736_v35  ;;  %v14385_v3 = vadd.f32 %v14384_v0, %v14383_v40  ;;  %v21758_v35 = vld [vmem:[#allocation15_spill] sm:$0xff] }
 0x1fd   : > { %v17095_v24 = vadd.f32 %v14385_v3, %v21755_v21  ;;  %v18995_v53 = vadd.f32 %v17089_v51, %v18880_v46  ;;  %v21761_v51 = vld [vmem:[#allocation9_spill] sm:$0xff] }
 0x1ff   : > { %v18998_v33 = vadd.f32 %v17095_v24, %v18882_v2  ;;  %v14386_v1 = vpop.f32.mrb[124].mxu1  ;;  %v21762_v24 = vld [vmem:[#allocation10_spill] sm:$0xff] }
 0x200   : > { %v14387_v43 = vpop.f32.mrb[125].mxu1 }
 0x201   : > { %v14388_v49 = vadd.f32 %v14387_v43, %v14386_v1  ;;  %v14389_v34 = vpop.f32.mrb[126].mxu1 }
 0x202   : > { %v14390_v61 = vpop.f32.mrb[127].mxu1 }
 0x203   : > { %v17086_v54 = vadd.f32 %v14388_v49, %v21756_v8  ;;  %v14391_v50 = vadd.f32 %v14390_v61, %v14389_v34 }
 0x205   : > { %v17092_v30 = vadd.f32 %v14391_v50, %v21757_v59  ;;  %v19003_v57 = vadd.f32 %v17086_v54, %v21758_v35  ;;  %v21763_v54 = vld [vmem:[#allocation11_spill] sm:$0xff] }
 0x207   : > { %v19006_v18 = vadd.f32 %v17092_v30, %v18888_v60  ;;  %v14392_v46 = vpop.f32.mrb[128].mxu1  ;;  %v21764_v30 = vld [vmem:[#allocation12_spill] sm:$0xff] }
 0x208   : > { %v14393_v39 = vpop.f32.mrb[129].mxu1 }
 0x209   : > { %v14394_v2 = vadd.f32 %v14393_v39, %v14392_v46  ;;  %v14395_v62 = vpop.f32.mrb[130].mxu1 }
 0x20a   : > { %v14396_v42 = vpop.f32.mrb[131].mxu1 }
 0x20b   : > { %v17101_v22 = vadd.f32 %v14394_v2, %v21759_v41  ;;  %v14397_v10 = vadd.f32 %v14396_v42, %v14395_v62  ;;  %v21765_v41 = vld [vmem:[#allocation13_spill] sm:$0xff] }
 0x20d   : > { %v17107_v48 = vadd.f32 %v14397_v10, %v21760_v44  ;;  %v19011_v11 = vadd.f32 %v17101_v22, %v18897_v23  ;;  %v21766_v44 = vld [vmem:[#allocation14_spill] sm:$0xff] }
 0x20f   : > { %v19014_v63 = vadd.f32 %v17107_v48, %v18902_v52  ;;  %v14398_v36 = vpop.f32.mrb[132].mxu1 }
 0x210   : > { %v14399_v37 = vpop.f32.mrb[133].mxu1 }
 0x211   : > { %v14400_v60 = vadd.f32 %v14399_v37, %v14398_v36  ;;  %v14401_v40 = vpop.f32.mrb[134].mxu1 }
 0x212   : > { %v14402_v0 = vpop.f32.mrb[135].mxu1 }
 0x213   : > { %v17098_v3 = vadd.f32 %v14400_v60, %v21761_v51  ;;  %v14403_v21 = vadd.f32 %v14402_v0, %v14401_v40  ;;  %v17913_v60 = vld [vmem:[%s21733_s5 + $0xc0] sm:$0xff]   ;;  %v17916_v40 = vld [vmem:[%s21733_s5 + $0xc8] sm:$0xff]   ;;  %v17917_v0 = vld [vmem:[%s21733_s5 + $0x110] sm:$0xff]  }
 0x214   : > { %v17918_v51 = vld [vmem:[%s21733_s5 + $0x150] sm:$0xff]  }
 0x215   : > { %v17104_v1 = vadd.f32 %v14403_v21, %v21762_v24  ;;  %v19019_v43 = vadd.f32 %v17098_v3, %v18911_v16  ;;  %v17919_v3 = vld [vmem:[%s21733_s5 + $0xd0] sm:$0xff]   ;;  %v17920_v21 = vld [vmem:[%s21733_s5 + $0x118] sm:$0xff]  }
 0x216   : > { %v17921_v24 = vld [vmem:[%s21733_s5 + $0x158] sm:$0xff]  }
 0x217   : > { %v19022_v49 = vadd.f32 %v17104_v1, %v18916_v5  ;;  %v14404_v23 = vpop.f32.mrb[136].mxu1  ;;  %v17922_v1 = vld [vmem:[%s21733_s5 + $0xd8] sm:$0xff]  }
 0x218   : > { %v14405_v34 = vpop.f32.mrb[137].mxu1 }
 0x219   : > { %v14406_v52 = vadd.f32 %v14405_v34, %v14404_v23  ;;  %v14407_v61 = vpop.f32.mrb[138].mxu1  ;;  %v17923_v23 = vld [vmem:[%s21733_s5 + $0x120] sm:$0xff]  }
 0x21a   : > { %v14408_v8 = vpop.f32.mrb[139].mxu1  ;;  %v17924_v34 = vld [vmem:[%s21733_s5 + $0x160] sm:$0xff]  }
 0x21b   : > { %v17113_v50 = vadd.f32 %v14406_v52, %v21763_v54  ;;  %v14409_v59 = vadd.f32 %v14408_v8, %v14407_v61  ;;  %v17925_v52 = vld [vmem:[%s21733_s5 + $0xe0] sm:$0xff]   ;;  %v17926_v61 = vld [vmem:[%s21733_s5 + $0x128] sm:$0xff]  }
 0x21c   : > { %v17927_v8 = vld [vmem:[%s21733_s5 + $0x168] sm:$0xff]  }
 0x21d   : > { %v17119_v35 = vadd.f32 %v14409_v59, %v21764_v30  ;;  %v19027_v46 = vadd.f32 %v17113_v50, %v18925_v12  ;;  %v17911_v12 = vld [vmem:[%s21733_s5 + $0x100] sm:$0xff]   ;;  %v17928_v54 = vld [vmem:[%s21733_s5 + $0xe8] sm:$0xff]   ;;  %v17929_v50 = vld [vmem:[%s21733_s5 + $0x130] sm:$0xff]  }
 0x21e   : > { %14576 = vmatprep.subr.bf16.mxu0 %v17911_v12  ;;  %v17930_v59 = vld [vmem:[%s21733_s5 + $0x170] sm:$0xff]   ;;  %v17933_v12 = vld [vmem:[%s21733_s5 + $0x178] sm:$0xff]  }
 0x21f   : > { %v19030_v39 = vadd.f32 %v17119_v35, %v18930_v58  ;;  %v14410_v16 = vpop.f32.mrb[140].mxu1  ;;  %v17912_v58 = vld [vmem:[%s21733_s5 + $0x140] sm:$0xff]   ;;  %14577 = vmatpush3.bf16.msra.mxu0 %v17913_v60 }
 0x220   : > { %v14411_v2 = vpop.f32.mrb[141].mxu1  ;;  %16386 = vmatprep.subr.bf16.mxu1 %v17912_v58  ;;  %v19103_v35 = vld [vmem:[%s21732_s4] ss:$0 sm:$0xff] }
 0x221   : > { %v14412_v5 = vadd.f32 %v14411_v2, %v14410_v16  ;;  %v14413_v62 = vpop.f32.mrb[142].mxu1  ;;  %16387 = vmatpush3.bf16.msra.mxu1 %v17912_v58 }
 0x222   : > { %v14414_v42 = vpop.f32.mrb[143].mxu1 }
 0x223   : > { %v17110_v22 = vadd.f32 %v14412_v5, %v21765_v41  ;;  %v14415_v10 = vadd.f32 %v14414_v42, %v14413_v62  ;;  %v17931_v5 = vld [vmem:[%s21733_s5 + $0xf0] sm:$0xff]  }
 0x225   : > { %v17116_v48 = vadd.f32 %v14415_v10, %v21766_v44  ;;  %v19035_v36 = vadd.f32 %v17110_v22, %v18937_v13  ;;  %v17914_v13 = vld [vmem:[%s21733_s5 + $0x108] sm:$0xff]  }
 0x226   : > { %14578 = vmatprep.subr.bf16.mxu0 %v17914_v13 }
 0x227   : > { %v19038_v37 = vadd.f32 %v17116_v48, %v18942_v31  ;;  %v17915_v31 = vld [vmem:[%s21733_s5 + $0x148] sm:$0xff]   ;;  %14579 = vmatpush3.bf16.msra.mxu0 %v17916_v40  ;;  %v17932_v48 = vld [vmem:[%s21733_s5 + $0x138] sm:$0xff]  }
 0x228   : > { %16388 = vmatprep.subr.bf16.mxu1 %v17915_v31  ;;  %14580 = vmatprep.subr.bf16.mxu0 %v17917_v0 }
 0x229   : > { %16389 = vmatpush3.bf16.msra.mxu1 %v17915_v31 }
 0x22a   : > { %16390 = vmatprep.subr.bf16.mxu1 %v17918_v51 }
 0x22b   : > { %14581 = vmatpush3.bf16.msra.mxu0 %v17919_v3 }
 0x22c   : > { %14582 = vmatprep.subr.bf16.mxu0 %v17920_v21 }
 0x22d   : > { %16391 = vmatpush3.bf16.msra.mxu1 %v17918_v51 }
 0x22e   : > { %16392 = vmatprep.subr.bf16.mxu1 %v17921_v24 }
 0x22f   : > { %14583 = vmatpush3.bf16.msra.mxu0 %v17922_v1 }
 0x230   : > { %14584 = vmatprep.subr.bf16.mxu0 %v17923_v23 }
 0x231   : > { %16393 = vmatpush3.bf16.msra.mxu1 %v17921_v24 }
 0x232   : > { %16394 = vmatprep.subr.bf16.mxu1 %v17924_v34 }
 0x233   : > { %14585 = vmatpush3.bf16.msra.mxu0 %v17925_v52 }
 0x234   : > { %14586 = vmatprep.subr.bf16.mxu0 %v17926_v61 }
 0x235   : > { %16395 = vmatpush3.bf16.msra.mxu1 %v17924_v34 }
 0x236   : > { %16396 = vmatprep.subr.bf16.mxu1 %v17927_v8 }
 0x237   : > { %14587 = vmatpush3.bf16.msra.mxu0 %v17928_v54 }
 0x238   : > { %14588 = vmatprep.subr.bf16.mxu0 %v17929_v50 }
 0x239   : > { %16397 = vmatpush3.bf16.msra.mxu1 %v17927_v8 }
 0x23a   : > { %16398 = vmatprep.subr.bf16.mxu1 %v17930_v59 }
 0x23b   : > { %14589 = vmatpush3.bf16.msra.mxu0 %v17931_v5 }
 0x23c   : > { %14590 = vmatprep.subr.bf16.mxu0 %v17932_v48 }
 0x23d   : > { %16399 = vmatpush3.bf16.msra.mxu1 %v17930_v59 }
 0x23e   : > { %16400 = vmatprep.subr.bf16.mxu1 %v17933_v12 }
 0x241   : > { %16401 = vmatpush3.bf16.msra.mxu1 %v17933_v12 }
 0x267   : > { %v16356_v30 = vpop.f32.mrb[48].mxu1 }
 0x268   : > { %v2720_v16 = vpop.f32.mrb[49].mxu1  ;;  %v17028_v2 = vadd.f32 %v18909_v38, %v16356_v30 }
 0x269   : > { %v16357_v62 = vpop.f32.mrb[50].mxu1  ;;  %v17031_v42 = vadd.f32 %v18895_v17, %v2720_v16 }
 0x26a   : > { %v2723_v41 = vpop.f32.mrb[51].mxu1  ;;  %v2888_v22 = vadd.f32 %v17028_v2, %v19103_v35  ;;  %v17034_v10 = vadd.f32 %v18914_v55, %v16357_v62  ;;  %v17934_v55 = vld [vmem:[%s21733_s5 + $0xf8] sm:$0xff]  }
 0x26b   : > { %v2886_v44 = vadd.f32 %v17031_v42, %v19103_v35  ;;  %v17037_v38 = vadd.f32 %v18900_v26, %v2723_v41  ;;  %14591 = vmatpush3.bf16.msra.mxu0 %v17934_v55 }
 0x26c   : > { %v2920_v17 = vmax.f32 %v2888_v22, 0.0  ;;  %v2889_v58 = vadd.f32 %v17034_v10, %v19103_v35 }
 0x26d   : > { %v2918_v60 = vmax.f32 %v2886_v44, 0.0  ;;  %v2887_v13 = vadd.f32 %v17037_v38, %v19103_v35 }
 0x26e   : > { %2986 = vrot.lane.b32.xlu1 %v2920_v17, %s18214_s15  ;;  %v2921_v40 = vmax.f32 %v2889_v58, 0.0 }
 0x26f   : > { %2982 = vrot.lane.b32.xlu0 %v2918_v60, %s18214_s15  ;;  %v16360_v26 = vpop.f32.mrb[52].mxu1  ;;  %v2919_v3 = vmax.f32 %v2887_v13, 0.0 }
 0x270   : > { %v2736_v31 = vpop.f32.mrb[53].mxu1  ;;  %v17040_v0 = vadd.f32 %v18935_v27, %v16360_v26 }
 0x271   : > { %v16361_v51 = vpop.f32.mrb[54].mxu1  ;;  %v17043_v21 = vadd.f32 %v18923_v4, %v2736_v31 }
 0x272   : > { %v2739_v24 = vpop.f32.mrb[55].mxu1  ;;  %2988 = vrot.lane.b32.xlu1 %v2921_v40, %s18214_s15  ;;  %v17046_v1 = vadd.f32 %v18940_v29, %v16361_v51  ;;  %v2892_v27 = vadd.f32 %v17040_v0, %v19103_v35 }
 0x273   : > { %2984 = vrot.lane.b32.xlu0 %v2919_v3, %s18214_s15  ;;  %v2890_v23 = vadd.f32 %v17043_v21, %v19103_v35  ;;  %v17049_v34 = vadd.f32 %v18928_v32, %v2739_v24 }
 0x274   : > { %v2893_v54 = vadd.f32 %v17046_v1, %v19103_v35  ;;  %v2924_v30 = vmax.f32 %v2892_v27, 0.0 }
 0x275   : > { %v2922_v52 = vmax.f32 %v2890_v23, 0.0  ;;  %v2891_v61 = vadd.f32 %v17049_v34, %v19103_v35 }
 0x276   : > { %v2925_v5 = vmax.f32 %v2893_v54, 0.0 }
 0x277   : > { %v16364_v8 = vpop.f32.mrb[56].mxu1  ;;  %2990 = vrot.lane.b32.xlu0 %v2922_v52, %s18214_s15  ;;  %v2923_v4 = vmax.f32 %v2891_v61, 0.0 }
 0x278   : > { %v2752_v50 = vpop.f32.mrb[57].mxu1  ;;  %v17052_v29 = vadd.f32 %v18955_v19, %v16364_v8 }
 0x279   : > { %v16365_v59 = vpop.f32.mrb[58].mxu1  ;;  %2992 = vrot.lane.b32.xlu1 %v2923_v4, %s18214_s15  ;;  %v17055_v32 = vadd.f32 %v18947_v28, %v2752_v50 }
 0x27a   : > { %v2755_v16 = vpop.f32.mrb[59].mxu1  ;;  %v17058_v2 = vadd.f32 %v18958_v47, %v16365_v59  ;;  %v2896_v22 = vadd.f32 %v17052_v29, %v19103_v35 }
 0x27b   : > { %2994 = vrot.lane.b32.xlu0 %v2924_v30, %s18214_s15  ;;  %v2894_v62 = vadd.f32 %v17055_v32, %v19103_v35  ;;  %v17061_v42 = vadd.f32 %v18950_v25, %v2755_v16  ;;  %v19181_v32 = vld [vmem:[%s21733_s5 + $0x80] sm:$0xff]  }
 0x27c   : > { %v2897_v47 = vadd.f32 %v17058_v2, %v19103_v35  ;;  %v2928_v25 = vmax.f32 %v2896_v22, 0.0  ;;  %16434 = vmatprep.subr.bf16.mxu1 %v19181_v32 }
 0x27d   : > { %2996 = vrot.lane.b32.xlu1 %v2925_v5, %s18214_s15  ;;  %v2926_v41 = vmax.f32 %v2894_v62, 0.0  ;;  %v2895_v19 = vadd.f32 %v17061_v42, %v19103_v35 }
 0x27e   : > { %v2929_v55 = vmax.f32 %v2897_v47, 0.0 }
 0x27f   : > { %v16368_v10 = vpop.f32.mrb[60].mxu1  ;;  %2998 = vrot.lane.b32.xlu0 %v2926_v41, %s18214_s15  ;;  %v2927_v28 = vmax.f32 %v2895_v19, 0.0 }
 0x280   : > { %v2768_v44 = vpop.f32.mrb[61].mxu1  ;;  %v17064_v38 = vadd.f32 %v18971_v6, %v16368_v10 }
 0x281   : > { %v16369_v48 = vpop.f32.mrb[62].mxu1  ;;  %3000 = vrot.lane.b32.xlu1 %v2927_v28, %s18214_s15  ;;  %v17067_v12 = vadd.f32 %v18963_v56, %v2768_v44 }
 0x282   : > { %v2771_v17 = vpop.f32.mrb[63].mxu1  ;;  %v17070_v58 = vadd.f32 %v18974_v7, %v16369_v48  ;;  %v2900_v31 = vadd.f32 %v17064_v38, %v19103_v35 }
 0x283   : > { %3002 = vrot.lane.b32.xlu0 %v2928_v25, %s18214_s15  ;;  %v2898_v60 = vadd.f32 %v17067_v12, %v19103_v35  ;;  %v17073_v13 = vadd.f32 %v18966_v45, %v2771_v17 }
 0x284   : > { %v2901_v7 = vadd.f32 %v17070_v58, %v19103_v35  ;;  %v2932_v45 = vmax.f32 %v2900_v31, 0.0 }
 0x285   : > { %3004 = vrot.lane.b32.xlu1 %v2929_v55, %s18214_s15  ;;  %v2930_v26 = vmax.f32 %v2898_v60, 0.0  ;;  %v2899_v6 = vadd.f32 %v17073_v13, %v19103_v35 }
 0x286   : > { %v2933_v23 = vmax.f32 %v2901_v7, 0.0 }
 0x287   : > { %v16372_v40 = vpop.f32.mrb[64].mxu1  ;;  %3006 = vrot.lane.b32.xlu0 %v2930_v26, %s18214_s15  ;;  %v2931_v56 = vmax.f32 %v2899_v6, 0.0 }
 0x288   : > { %v2784_v0 = vpop.f32.mrb[65].mxu1  ;;  %v17076_v51 = vadd.f32 %v18987_v9, %v16372_v40 }
 0x289   : > { %v16373_v3 = vpop.f32.mrb[66].mxu1  ;;  %3008 = vrot.lane.b32.xlu1 %v2931_v56, %s18214_s15  ;;  %v17079_v21 = vadd.f32 %v18979_v14, %v2784_v0 }
 0x28a   : > { %v2787_v24 = vpop.f32.mrb[67].mxu1  ;;  %v17082_v1 = vadd.f32 %v18990_v20, %v16373_v3  ;;  %v2904_v27 = vadd.f32 %v17076_v51, %v19103_v35 }
 0x28b   : > { %3010 = vrot.lane.b32.xlu0 %v2932_v45, %s18214_s15  ;;  %v2902_v34 = vadd.f32 %v17079_v21, %v19103_v35  ;;  %v17085_v52 = vadd.f32 %v18982_v15, %v2787_v24 }
 0x28c   : > { %v2905_v20 = vadd.f32 %v17082_v1, %v19103_v35  ;;  %v2936_v15 = vmax.f32 %v2904_v27, 0.0 }
 0x28d   : > { %3012 = vrot.lane.b32.xlu1 %v2933_v23, %s18214_s15  ;;  %v2934_v61 = vmax.f32 %v2902_v34, 0.0  ;;  %v2903_v9 = vadd.f32 %v17085_v52, %v19103_v35 }
 0x28e   : > { %v2937_v16 = vmax.f32 %v2905_v20, 0.0 }
 0x28f   : > { %v16376_v8 = vpop.f32.mrb[68].mxu1  ;;  %3014 = vrot.lane.b32.xlu0 %v2934_v61, %s18214_s15  ;;  %v2935_v14 = vmax.f32 %v2903_v9, 0.0 }
 0x290   : > { %v2800_v4 = vpop.f32.mrb[69].mxu1  ;;  %v17088_v54 = vadd.f32 %v19003_v57, %v16376_v8 }
 0x291   : > { %v16377_v50 = vpop.f32.mrb[70].mxu1  ;;  %3016 = vrot.lane.b32.xlu1 %v2935_v14, %s18214_s15  ;;  %v17091_v29 = vadd.f32 %v18995_v53, %v2800_v4 }
 0x292   : > { %v2803_v59 = vpop.f32.mrb[71].mxu1  ;;  %v17094_v30 = vadd.f32 %v19006_v18, %v16377_v50  ;;  %v2908_v18 = vadd.f32 %v17088_v54, %v19103_v35 }
 0x293   : > { %3018 = vrot.lane.b32.xlu0 %v2936_v15, %s18214_s15  ;;  %v2906_v2 = vadd.f32 %v17091_v29, %v19103_v35  ;;  %v17097_v57 = vadd.f32 %v18998_v33, %v2803_v59 }
 0x294   : > { %v2909_v41 = vadd.f32 %v17094_v30, %v19103_v35  ;;  %v2940_v33 = vmax.f32 %v2908_v18, 0.0  ;;  %v17947_v18 = vld [vmem:[%s21733_s5 + $0x48] sm:$0xff]  }
 0x295   : > { %3020 = vrot.lane.b32.xlu1 %v2937_v16, %s18214_s15  ;;  %v2938_v53 = vmax.f32 %v2906_v2, 0.0  ;;  %v2907_v5 = vadd.f32 %v17097_v57, %v19103_v35  ;;  %v17936_v57 = vld [vmem:[%s21733_s5 + $0x88] sm:$0xff]  }
 0x296   : > { %v2941_v38 = vmax.f32 %v2909_v41, 0.0 }
 0x297   : > { %v16380_v62 = vpop.f32.mrb[72].mxu1  ;;  %3022 = vrot.lane.b32.xlu0 %v2938_v53, %s18214_s15  ;;  %v2939_v42 = vmax.f32 %v2907_v5, 0.0  ;;  %v17944_v53 = vld [vmem:[%s21733_s5] sm:$0xff]  }
 0x298   : > { %v2816_v19 = vpop.f32.mrb[73].mxu1  ;;  %v17100_v22 = vadd.f32 %v19019_v43, %v16380_v62 }
 0x299   : > { %v16381_v10 = vpop.f32.mrb[74].mxu1  ;;  %3024 = vrot.lane.b32.xlu1 %v2939_v42, %s18214_s15  ;;  %v17103_v28 = vadd.f32 %v19011_v11, %v2816_v19  ;;  %v17937_v42 = vld [vmem:[%s21733_s5 + $0x90] sm:$0xff]  }
 0x29a   : > { %v2819_v47 = vpop.f32.mrb[75].mxu1  ;;  %v17106_v44 = vadd.f32 %v19022_v49, %v16381_v10  ;;  %v2912_v17 = vadd.f32 %v17100_v22, %v19103_v35  ;;  %v17948_v10 = vld [vmem:[%s21733_s5 + $0x8] sm:$0xff]  }
 0x29b   : > { %3026 = vrot.lane.b32.xlu0 %v2940_v33, %s18214_s15  ;;  %v2910_v48 = vadd.f32 %v17103_v28, %v19103_v35  ;;  %v17109_v25 = vadd.f32 %v19014_v63, %v2819_v47 }
 0x29c   : > { %v2913_v49 = vadd.f32 %v17106_v44, %v19103_v35  ;;  %v2944_v63 = vmax.f32 %v2912_v17, 0.0 }
 0x29d   : > { %3028 = vrot.lane.b32.xlu1 %v2941_v38, %s18214_s15  ;;  %v2942_v12 = vmax.f32 %v2910_v48, 0.0  ;;  %v2911_v43 = vadd.f32 %v17109_v25, %v19103_v35  ;;  %v17952_v48 = vld [vmem:[%s21733_s5 + $0x10] sm:$0xff]  }
 0x29e   : > { %v2945_v40 = vmax.f32 %v2913_v49, 0.0 }
 0x29f   : > { %v16384_v58 = vpop.f32.mrb[76].mxu1  ;;  %3030 = vrot.lane.b32.xlu0 %v2942_v12, %s18214_s15  ;;  %v2943_v11 = vmax.f32 %v2911_v43, 0.0 }
 0x2a0   : > { %v2832_v55 = vpop.f32.mrb[77].mxu1  ;;  %v17112_v60 = vadd.f32 %v19035_v36, %v16384_v58 }
 0x2a1   : > { %v16385_v13 = vpop.f32.mrb[78].mxu1  ;;  %3032 = vrot.lane.b32.xlu1 %v2943_v11, %s18214_s15  ;;  %v17115_v26 = vadd.f32 %v19027_v46, %v2832_v55  ;;  %v17938_v55 = vld [vmem:[%s21733_s5 + $0x98] sm:$0xff]  }
 0x2a2   : > { %v2835_v6 = vpop.f32.mrb[79].mxu1  ;;  %v17118_v31 = vadd.f32 %v19038_v37, %v16385_v13  ;;  %v2916_v51 = vadd.f32 %v17112_v60, %v19103_v35  ;;  %v17955_v60 = vld [vmem:[%s21733_s5 + $0x58] sm:$0xff]  }
 0x2a3   : > { %3034 = vrot.lane.b32.xlu0 %v2944_v63, %s18214_s15  ;;  %v2914_v56 = vadd.f32 %v17115_v26, %v19103_v35  ;;  %v17121_v7 = vadd.f32 %v19030_v39, %v2835_v6  ;;  %v17943_v39 = vld [vmem:[%s21733_s5 + $0x40] sm:$0xff]  }
 0x2a4   : > { %v2917_v3 = vadd.f32 %v17118_v31, %v19103_v35  ;;  %v2948_v37 = vmax.f32 %v2916_v51, 0.0  ;;  %14712 = vmatprep.subr.bf16.mxu0 %v17943_v39  ;;  %v17956_v31 = vld [vmem:[%s21733_s5 + $0x18] sm:$0xff]  }
 0x2a5   : > { %3036 = vrot.lane.b32.xlu1 %v2945_v40, %s18214_s15  ;;  %v2946_v0 = vmax.f32 %v2914_v56, 0.0  ;;  %v2915_v36 = vadd.f32 %v17121_v7, %v19103_v35  ;;  %v17939_v7 = vld [vmem:[%s21733_s5 + $0xa0] sm:$0xff]  }
 0x2a6   : > { %v2949_v45 = vmax.f32 %v2917_v3, 0.0  ;;  %v17960_v3 = vld [vmem:[%s21733_s5 + $0x20] sm:$0xff]  }
 0x2a7   : > { %3038 = vrot.lane.b32.xlu0 %v2946_v0, %s18214_s15  ;;  %v2947_v46 = vmax.f32 %v2915_v36, 0.0  ;;  %v17959_v0 = vld [vmem:[%s21733_s5 + $0x60] sm:$0xff]  }
 0x2a9   : > { %3040 = vrot.lane.b32.xlu1 %v2947_v46, %s18214_s15 }
 0x2ab   : > { %3042 = vrot.lane.b32.xlu0 %v2948_v37, %s18214_s15 }
 0x2ad   : > { %3044 = vrot.lane.b32.xlu1 %v2949_v45, %s18214_s15 }
 0x2e0   : > { %v2987_v21 = vpop.permute.xlu1 %2986 }
 0x2e1   : > { %3081 = vst.msk [vmem:[#allocation2 + $0x31] sm:$0xff] %vm3078_vm1, %v2987_v21  ;;  %v2983_v24 = vpop.permute.xlu0 %2982 }
 0x2e2   : > { %3079 = vst.msk [vmem:[#allocation2 + $0x19] sm:$0xff] %vm3078_vm1, %v2983_v24 }
 0x2e4   : > { %v2989_v35 = vpop.permute.xlu1 %2988 }
 0x2e5   : > { %3082 = vst.msk [vmem:[#allocation2 + $0x39] sm:$0xff] %vm3078_vm1, %v2989_v35  ;;  %v2985_v1 = vpop.permute.xlu0 %2984 }
 0x2e6   : > { %3080 = vst.msk [vmem:[#allocation2 + $0x21] sm:$0xff] %vm3078_vm1, %v2985_v1 }
 0x2e8   : > { %v3465_v2 = vld [vmem:[#allocation2 + $0x31] sm:$0xff] }
 0x2e9   : > { %v2991_v23 = vpop.permute.xlu0 %2990  ;;  %v3463_v52 = vld [vmem:[#allocation2 + $0x19] sm:$0xff]  ;;  %v3401_v38 = vld [vmem:[#allocation2 + $0x30] sm:$0xff] }
 0x2ea   : > { %3083 = vst.msk [vmem:[#allocation2 + $0x49] sm:$0xff] %vm3078_vm1, %v2991_v23  ;;  %v3399_v15 = vld [vmem:[#allocation2 + $0x18] sm:$0xff]  ;;  %v17940_v23 = vld [vmem:[%s21733_s5 + $0xa8] sm:$0xff]  }
 0x2eb   : > { %v2993_v34 = vpop.permute.xlu1 %2992 }
 0x2ec   : > { %3084 = vst.msk [vmem:[#allocation2 + $0x51] sm:$0xff] %vm3078_vm1, %v2993_v34  ;;  %v3529_v61 = vld [vmem:[#allocation2 + $0x32] sm:$0xff]  ;;  %v3530_v9 = vld [vmem:[#allocation2 + $0x3a] sm:$0xff]  ;;  %v17963_v34 = vld [vmem:[%s21733_s5 + $0x68] sm:$0xff]  }
 0x2ed   : > { %v3466_v27 = vld [vmem:[#allocation2 + $0x39] sm:$0xff]  ;;  %v2995_v8 = vpop.permute.xlu0 %2994  ;;  %v3464_v14 = vld [vmem:[#allocation2 + $0x21] sm:$0xff]  ;;  %v19235_v16 = vpack.c.bf16 %v3530_v9, %v3529_v61 }
 0x2ee   : > { %v3527_v20 = vld [vmem:[#allocation2 + $0x1a] sm:$0xff]  ;;  %v3528_v4 = vld [vmem:[#allocation2 + $0x22] sm:$0xff]  ;;  %3085 = vst.msk [vmem:[#allocation2 + $0x61] sm:$0xff] %vm3078_vm1, %v2995_v8  ;;  %v19229_v54 = vpack.c.bf16 %v3464_v14, %v3463_v52  ;;  %v19246_v5 = vpack.c.bf16 %v3466_v27, %v3465_v2 }
 0x2ef   : > { %v19231_v50 = vpack.c.bf16 %v3528_v4, %v3527_v20  ;;  %v3400_v29 = vld [vmem:[#allocation2 + $0x20] sm:$0xff]  ;;  %v2997_v59 = vpop.permute.xlu1 %2996  ;;  %v3402_v28 = vld [vmem:[#allocation2 + $0x38] sm:$0xff]  ;;  %v17964_v8 = vld [vmem:[%s21733_s5 + $0x28] sm:$0xff]  }
 0x2f0   : > { %v19233_v30 = vpack.c.bf16 %v3400_v29, %v3399_v15  ;;  %3086 = vst.msk [vmem:[#allocation2 + $0x69] sm:$0xff] %vm3078_vm1, %v2997_v59  ;;  %3864 = vmatprep.mubr.bf16.mxu0 %v19229_v54  ;;  %v19273_v12 = vpack.c.bf16 %v3402_v28, %v3401_v38  ;;  %v17941_v4 = vld [vmem:[%s21733_s5 + $0xb0] sm:$0xff]   ;;  %v17971_v28 = vld [vmem:[%s21733_s5 + $0x78] sm:$0xff]  }
 0x2f1   : > { %16402 = vmatprep.mubr.bf16.mxu1 %v19231_v50  ;;  %v2999_v62 = vpop.permute.xlu0 %2998  ;;  %v3467_v43 = vld [vmem:[#allocation2 + $0x49] sm:$0xff] }
 0x2f2   : > { %3865 = vmatmul.mubr.bf16.vlgmr.msra.gmra.mrb[80].mxu0 %v19233_v30  ;;  %16403 = vmatmul.mubr.bf16.vlgmr.msra.gmra.mrb[144].mxu1 %v19235_v16  ;;  %3087 = vst.msk [vmem:[#allocation2 + $0x79] sm:$0xff] %vm3078_vm1, %v2999_v62  ;;  %v3403_v46 = vld [vmem:[#allocation2 + $0x48] sm:$0xff]  ;;  %v17967_v15 = vld [vmem:[%s21733_s5 + $0x70] sm:$0xff]  }
 0x2f3   : > { %3872 = vmatprep.mubr.bf16.mxu0 %v19246_v5  ;;  %16435 = vmatpush3.bf16.msra.mxu1 %v19181_v32  ;;  %v3001_v41 = vpop.permute.xlu1 %3000  ;;  %v3531_v19 = vld [vmem:[#allocation2 + $0x4a] sm:$0xff]  ;;  %v3532_v22 = vld [vmem:[#allocation2 + $0x52] sm:$0xff] }
 0x2f4   : > { %16436 = vmatprep.subr.bf16.mxu1 %v17936_v57  ;;  %14713 = vmatpush3.bf16.msra.mxu0 %v17944_v53  ;;  %3088 = vst.msk [vmem:[#allocation2 + $0x81] sm:$0xff] %vm3078_vm1, %v3001_v41  ;;  %v19263_v33 = vpack.c.bf16 %v3532_v22, %v3531_v19  ;;  %v17951_v32 = vld [vmem:[%s21733_s5 + $0x50] sm:$0xff]  }
 0x2f5   : > { %14714 = vmatprep.subr.bf16.mxu0 %v17947_v18  ;;  %v3003_v47 = vpop.permute.xlu0 %3002  ;;  %v3468_v44 = vld [vmem:[#allocation2 + $0x51] sm:$0xff]  ;;  %v3469_v39 = vld [vmem:[#allocation2 + $0x61] sm:$0xff] }
 0x2f6   : > { %3089 = vst.msk [vmem:[#allocation2 + $0x91] sm:$0xff] %vm3078_vm1, %v3003_v47  ;;  %16406 = vmatprep.mubr.bf16.mxu1 %v19263_v33  ;;  %v19276_v11 = vpack.c.bf16 %v3468_v44, %v3467_v43  ;;  %v3404_v56 = vld [vmem:[#allocation2 + $0x50] sm:$0xff]  ;;  %v3405_v2 = vld [vmem:[#allocation2 + $0x60] sm:$0xff] }
 0x2f7   : > { %16437 = vmatpush3.bf16.msra.mxu1 %v17936_v57  ;;  %v3005_v25 = vpop.permute.xlu1 %3004  ;;  %v3533_v17 = vld [vmem:[#allocation2 + $0x62] sm:$0xff]  ;;  %v3534_v58 = vld [vmem:[#allocation2 + $0x6a] sm:$0xff]  ;;  %v19307_v45 = vpack.c.bf16 %v3404_v56, %v3403_v46 }
 0x2f8   : > { %16438 = vmatprep.subr.bf16.mxu1 %v17937_v42  ;;  %14715 = vmatpush3.bf16.msra.mxu0 %v17948_v10  ;;  %3090 = vst.msk [vmem:[#allocation2 + $0x99] sm:$0xff] %vm3078_vm1, %v3005_v25  ;;  %v19278_v49 = vpack.c.bf16 %v3534_v58, %v3533_v17  ;;  %v3470_v51 = vld [vmem:[#allocation2 + $0x69] sm:$0xff]  ;;  %v17942_v10 = vld [vmem:[%s21733_s5 + $0xb8] sm:$0xff]   ;;  %v17945_v17 = vld [vmem:[%s21733_s5 + $0x1c0] sm:$0xff]  }
 0x2f9   : > { %14716 = vmatprep.subr.bf16.mxu0 %v17951_v32  ;;  %v3007_v13 = vpop.permute.xlu0 %3006  ;;  %v19310_v35 = vpack.c.bf16 %v3470_v51, %v3469_v39  ;;  %v3406_v20 = vld [vmem:[#allocation2 + $0x68] sm:$0xff]  ;;  %v17968_v57 = vld [vmem:[%s21733_s5 + $0x30] sm:$0xff]   ;;  %v3471_v62 = vld [vmem:[#allocation2 + $0x79] sm:$0xff] }
 0x2fa   : > { %3873 = vmatmul.mubr.bf16.gmra.mrb[84].mxu0 %v19273_v12  ;;  %3091 = vst.msk [vmem:[#allocation2 + $0xa9] sm:$0xff] %vm3078_vm1, %v3007_v13  ;;  %16407 = vmatmul.mubr.bf16.gmra.mrb[148].mxu1 %v19278_v49  ;;  %v19341_v18 = vpack.c.bf16 %v3406_v20, %v3405_v2 }
 0x2fb   : > { %3880 = vmatprep.mubr.bf16.mxu0 %v19276_v11  ;;  %v3009_v63 = vpop.permute.xlu1 %3008  ;;  %v3535_v26 = vld [vmem:[#allocation2 + $0x7a] sm:$0xff]  ;;  %v3536_v6 = vld [vmem:[#allocation2 + $0x82] sm:$0xff]  ;;  %16439 = vmatpush3.bf16.msra.mxu1 %v17937_v42 }
 0x2fc   : > { %14717 = vmatpush3.bf16.msra.mxu0 %v17952_v48  ;;  %3092 = vst.msk [vmem:[#allocation2 + $0xb1] sm:$0xff] %vm3078_vm1, %v3009_v63  ;;  %v19294_v40 = vpack.c.bf16 %v3536_v6, %v3535_v26  ;;  %16440 = vmatprep.subr.bf16.mxu1 %v17938_v55  ;;  %v3472_v59 = vld [vmem:[#allocation2 + $0x81] sm:$0xff]  ;;  %v17972_v48 = vld [vmem:[%s21733_s5 + $0x38] sm:$0xff]  }
 0x2fd   : > { %14718 = vmatprep.subr.bf16.mxu0 %v17955_v60  ;;  %v3011_v36 = vpop.permute.xlu0 %3010  ;;  %v19344_v19 = vpack.c.bf16 %v3472_v59, %v3471_v62  ;;  %v3408_v43 = vld [vmem:[#allocation2 + $0x80] sm:$0xff]  ;;  %v3407_v60 = vld [vmem:[#allocation2 + $0x78] sm:$0xff] }
 0x2fe   : > { %3093 = vst.msk [vmem:[#allocation2 + $0xc1] sm:$0xff] %vm3078_vm1, %v3011_v36  ;;  %16410 = vmatprep.mubr.bf16.mxu1 %v19294_v40  ;;  %v19369_v63 = vpack.c.bf16 %v3408_v43, %v3407_v60  ;;  %v3473_v26 = vld [vmem:[#allocation2 + $0x91] sm:$0xff] }
 0x2ff   : > { %v3013_v37 = vpop.permute.xlu1 %3012  ;;  %v3537_v21 = vld [vmem:[#allocation2 + $0x92] sm:$0xff]  ;;  %v3538_v24 = vld [vmem:[#allocation2 + $0x9a] sm:$0xff]  ;;  %16441 = vmatpush3.bf16.msra.mxu1 %v17938_v55 }
 0x300   : > { %14719 = vmatpush3.bf16.msra.mxu0 %v17956_v31  ;;  %3094 = vst.msk [vmem:[#allocation2 + $0xc9] sm:$0xff] %vm3078_vm1, %v3013_v37  ;;  %v19312_v1 = vpack.c.bf16 %v3538_v24, %v3537_v21  ;;  %16442 = vmatprep.subr.bf16.mxu1 %v17939_v7  ;;  %v3474_v55 = vld [vmem:[#allocation2 + $0x99] sm:$0xff]  ;;  %v3409_v24 = vld [vmem:[#allocation2 + $0x90] sm:$0xff] }
 0x301   : > { %14720 = vmatprep.subr.bf16.mxu0 %v17959_v0  ;;  %v3015_v52 = vpop.permute.xlu0 %3014  ;;  %v19372_v56 = vpack.c.bf16 %v3474_v55, %v3473_v26  ;;  %v3410_v37 = vld [vmem:[#allocation2 + $0x98] sm:$0xff]  ;;  %v3411_v62 = vld [vmem:[#allocation2 + $0xa8] sm:$0xff] }
 0x302   : > { %3881 = vmatmul.mubr.bf16.gmra.mrb[88].mxu0 %v19307_v45  ;;  %3095 = vst.msk [vmem:[#allocation2 + $0xd9] sm:$0xff] %vm3078_vm1, %v3015_v52  ;;  %16411 = vmatmul.mubr.bf16.gmra.mrb[152].mxu1 %v19312_v1  ;;  %v3475_v52 = vld [vmem:[#allocation2 + $0xa9] sm:$0xff] }
 0x303   : > { %3888 = vmatprep.mubr.bf16.mxu0 %v19310_v35  ;;  %v3017_v61 = vpop.permute.xlu1 %3016  ;;  %v3539_v9 = vld [vmem:[#allocation2 + $0xaa] sm:$0xff]  ;;  %v3540_v27 = vld [vmem:[#allocation2 + $0xb2] sm:$0xff]  ;;  %16443 = vmatpush3.bf16.msra.mxu1 %v17939_v7 }
 0x304   : > { %14721 = vmatpush3.bf16.msra.mxu0 %v17960_v3  ;;  %3096 = vst.msk [vmem:[#allocation2 + $0xe1] sm:$0xff] %vm3078_vm1, %v3017_v61  ;;  %v19328_v14 = vpack.c.bf16 %v3540_v27, %v3539_v9  ;;  %16444 = vmatprep.subr.bf16.mxu1 %v17940_v23  ;;  %v3476_v21 = vld [vmem:[#allocation2 + $0xb1] sm:$0xff] }
 0x305   : > { %14722 = vmatprep.subr.bf16.mxu0 %v17963_v34  ;;  %v3019_v29 = vpop.permute.xlu0 %3018  ;;  %v19385_v34 = vpack.c.bf16 %v3410_v37, %v3409_v24  ;;  %v19388_v27 = vpack.c.bf16 %v3476_v21, %v3475_v52  ;;  %v3412_v2 = vld [vmem:[#allocation2 + $0xb0] sm:$0xff]  ;;  %v17946_v52 = vld [vmem:[%s21733_s5 + $0x180] sm:$0xff]  }
 0x306   : > { %3097 = vst.msk [vmem:[#allocation2 + $0xf1] sm:$0xff] %vm3078_vm1, %v3019_v29  ;;  %16414 = vmatprep.mubr.bf16.mxu1 %v19328_v14  ;;  %v3240_v55 = vld [vmem:[#allocation2 + $0xa] sm:$0xff] }
 0x307   : > { %v3021_v53 = vpop.permute.xlu1 %3020  ;;  %v3541_v42 = vld [vmem:[#allocation2 + $0xc2] sm:$0xff]  ;;  %v3542_v41 = vld [vmem:[#allocation2 + $0xca] sm:$0xff]  ;;  %16445 = vmatpush3.bf16.msra.mxu1 %v17940_v23 }
 0x308   : > { %14723 = vmatpush3.bf16.msra.mxu0 %v17964_v8  ;;  %3098 = vst.msk [vmem:[#allocation2 + $0xf9] sm:$0xff] %vm3078_vm1, %v3021_v53  ;;  %v19346_v22 = vpack.c.bf16 %v3542_v41, %v3541_v42  ;;  %16446 = vmatprep.subr.bf16.mxu1 %v17941_v4  ;;  %v3478_v53 = vld [vmem:[#allocation2 + $0xc9] sm:$0xff]  ;;  %v19401_v41 = vpack.c.bf16 %v3412_v2, %v3411_v62  ;;  %v17957_v62 = vld [vmem:[%s21733_s5 + $0x1d8] sm:$0xff]  }
 0x309   : > { %14724 = vmatprep.subr.bf16.mxu0 %v17967_v15  ;;  %v3023_v32 = vpop.permute.xlu0 %3022  ;;  %v3415_v21 = vld [vmem:[#allocation2 + $0xd8] sm:$0xff] }
 0x30a   : > { %3889 = vmatmul.mubr.bf16.gmra.mrb[92].mxu0 %v19341_v18  ;;  %3099 = vst.msk [vmem:[#allocation2 + $0x109] sm:$0xff] %vm3078_vm1, %v3023_v32  ;;  %16415 = vmatmul.mubr.bf16.gmra.mrb[156].mxu1 %v19346_v22 }
 0x30b   : > { %3896 = vmatprep.mubr.bf16.mxu0 %v19344_v19  ;;  %v3025_v47 = vpop.permute.xlu1 %3024  ;;  %v3543_v44 = vld [vmem:[#allocation2 + $0xda] sm:$0xff]  ;;  %v3544_v38 = vld [vmem:[#allocation2 + $0xe2] sm:$0xff]  ;;  %16447 = vmatpush3.bf16.msra.mxu1 %v17941_v4 }
 0x30c   : > { %14725 = vmatpush3.bf16.msra.mxu0 %v17968_v57  ;;  %3100 = vst.msk [vmem:[#allocation2 + $0x111] sm:$0xff] %vm3078_vm1, %v3025_v47  ;;  %v19362_v25 = vpack.c.bf16 %v3544_v38, %v3543_v44  ;;  %16448 = vmatprep.subr.bf16.mxu1 %v17942_v10  ;;  %v3480_v60 = vld [vmem:[#allocation2 + $0xe1] sm:$0xff] }
 0x30d   : > { %14726 = vmatprep.subr.bf16.mxu0 %v17971_v28  ;;  %v3027_v58 = vpop.permute.xlu0 %3026  ;;  %v3416_v37 = vld [vmem:[#allocation2 + $0xe0] sm:$0xff]  ;;  %v3417_v2 = vld [vmem:[#allocation2 + $0xf0] sm:$0xff] }
 0x30e   : > { %3101 = vst.msk [vmem:[#allocation2 + $0x121] sm:$0xff] %vm3078_vm1, %v3027_v58  ;;  %16418 = vmatprep.mubr.bf16.mxu1 %v19362_v25  ;;  %v3239_v58 = vld [vmem:[#allocation2 + $0x2] sm:$0xff]  ;;  %v19420_v24 = vpack.c.bf16 %v3416_v37, %v3415_v21  ;;  %v17974_v37 = vld [vmem:[%s21733_s5 + $0x1b8] sm:$0xff]  }
 0x30f   : > { %v3029_v13 = vpop.permute.xlu1 %3028  ;;  %v3545_v6 = vld [vmem:[#allocation2 + $0xf2] sm:$0xff]  ;;  %v3546_v31 = vld [vmem:[#allocation2 + $0xfa] sm:$0xff]  ;;  %16449 = vmatpush3.bf16.msra.mxu1 %v17942_v10 }
 0x310   : > { %14727 = vmatpush3.bf16.msra.mxu0 %v17972_v48  ;;  %3102 = vst.msk [vmem:[#allocation2 + $0x129] sm:$0xff] %vm3078_vm1, %v3029_v13  ;;  %v19374_v7 = vpack.c.bf16 %v3546_v31, %v3545_v6  ;;  %14848 = vmatprep.subr.bf16.mxu1 %v17945_v17  ;;  %v3477_v10 = vld [vmem:[#allocation2 + $0xc1] sm:$0xff]  ;;  %v3479_v6 = vld [vmem:[#allocation2 + $0xd9] sm:$0xff] }
 0x311   : > { %v3031_v0 = vpop.permute.xlu0 %3030  ;;  %v19404_v47 = vpack.c.bf16 %v3478_v53, %v3477_v10  ;;  %v3414_v17 = vld [vmem:[#allocation2 + $0xc8] sm:$0xff]  ;;  %v3413_v13 = vld [vmem:[#allocation2 + $0xc0] sm:$0xff] }
 0x312   : > { %3897 = vmatmul.mubr.bf16.gmra.mrb[96].mxu0 %v19369_v63  ;;  %3103 = vst.msk [vmem:[#allocation2 + $0x139] sm:$0xff] %vm3078_vm1, %v3031_v0  ;;  %16419 = vmatmul.mubr.bf16.gmra.mrb[160].mxu1 %v19374_v7  ;;  %v19414_v26 = vpack.c.bf16 %v3414_v17, %v3413_v13  ;;  %v3483_v53 = vld [vmem:[#allocation2 + $0x109] sm:$0xff]  ;;  %v17975_v21 = vld [vmem:[%s21733_s5 + $0x200] sm:$0xff]  }
 0x313   : > { %3904 = vmatprep.mubr.bf16.mxu0 %v19372_v56  ;;  %v3033_v36 = vpop.permute.xlu1 %3032  ;;  %v3547_v51 = vld [vmem:[#allocation2 + $0x10a] sm:$0xff]  ;;  %v3548_v46 = vld [vmem:[#allocation2 + $0x112] sm:$0xff] }
 0x314   : > { %3104 = vst.msk [vmem:[#allocation2 + $0x141] sm:$0xff] %vm3078_vm1, %v3033_v36  ;;  %v19381_v3 = vpack.c.bf16 %v3548_v46, %v3547_v51  ;;  %v3271_v36 = vpack.c.bf16 %v3240_v55, %v3239_v58  ;;  %v19416_v51 = vpack.c.bf16 %v3480_v60, %v3479_v6  ;;  %v3420_v10 = vld [vmem:[#allocation2 + $0x110] sm:$0xff]  ;;  %v17965_v58 = vld [vmem:[%s21733_s5 + $0x1e8] sm:$0xff]  }
 0x315   : > { %v3035_v39 = vpop.permute.xlu0 %3034  ;;  %v3485_v17 = vld [vmem:[#allocation2 + $0x121] sm:$0xff]  ;;  %v17969_v13 = vld [vmem:[%s21733_s5 + $0x1f0] sm:$0xff]  }
 0x316   : > { %3105 = vst.msk [vmem:[#allocation2 + $0x151] sm:$0xff] %vm3078_vm1, %v3035_v39  ;;  %16422 = vmatprep.mubr.bf16.mxu1 %v19381_v3  ;;  %v3482_v39 = vld [vmem:[#allocation2 + $0xf9] sm:$0xff]  ;;  %v17966_v55 = vld [vmem:[%s21733_s5 + $0x1a8] sm:$0xff]  }
 0x317   : > { %v3037_v23 = vpop.permute.xlu1 %3036  ;;  %v3549_v61 = vld [vmem:[#allocation2 + $0x122] sm:$0xff]  ;;  %v3550_v9 = vld [vmem:[#allocation2 + $0x12a] sm:$0xff] }
 0x318   : > { %3106 = vst.msk [vmem:[#allocation2 + $0x159] sm:$0xff] %vm3078_vm1, %v3037_v23  ;;  %v19390_v8 = vpack.c.bf16 %v3550_v9, %v3549_v61  ;;  %v3481_v23 = vld [vmem:[#allocation2 + $0xf1] sm:$0xff]  ;;  %v17949_v9 = vld [vmem:[%s21733_s5 + $0x1c8] sm:$0xff]  }
 0x319   : > { %v3039_v20 = vpop.permute.xlu0 %3038  ;;  %v19425_v61 = vpack.c.bf16 %v3482_v39, %v3481_v23  ;;  %v3422_v60 = vld [vmem:[#allocation2 + $0x128] sm:$0xff] }
 0x31a   : > { %3905 = vmatmul.mubr.bf16.gmra.mrb[100].mxu0 %v19385_v34  ;;  %3107 = vst.msk [vmem:[#allocation2 + $0x169] sm:$0xff] %vm3078_vm1, %v3039_v20  ;;  %16423 = vmatmul.mubr.bf16.gmra.mrb[164].mxu1 %v19390_v8  ;;  %v17950_v20 = vld [vmem:[%s21733_s5 + $0x188] sm:$0xff]  }
 0x31b   : > { %3912 = vmatprep.mubr.bf16.mxu0 %v19388_v27  ;;  %v3041_v4 = vpop.permute.xlu1 %3040  ;;  %v3551_v15 = vld [vmem:[#allocation2 + $0x13a] sm:$0xff]  ;;  %v3552_v29 = vld [vmem:[#allocation2 + $0x142] sm:$0xff] }
 0x31c   : > { %3108 = vst.msk [vmem:[#allocation2 + $0x171] sm:$0xff] %vm3078_vm1, %v3041_v4  ;;  %v19397_v59 = vpack.c.bf16 %v3552_v29, %v3551_v15  ;;  %v3418_v4 = vld [vmem:[#allocation2 + $0xf8] sm:$0xff]  ;;  %v17953_v15 = vld [vmem:[%s21733_s5 + $0x1d0] sm:$0xff]   ;;  %v3488_v6 = vld [vmem:[#allocation2 + $0x141] sm:$0xff] }
 0x31d   : > { %v3043_v57 = vpop.permute.xlu0 %3042  ;;  %v3484_v29 = vld [vmem:[#allocation2 + $0x111] sm:$0xff]  ;;  %v3424_v39 = vld [vmem:[#allocation2 + $0x140] sm:$0xff] }
 0x31e   : > { %3109 = vst.msk [vmem:[#allocation2 + $0x181] sm:$0xff] %vm3078_vm1, %v3043_v57  ;;  %16426 = vmatprep.mubr.bf16.mxu1 %v19397_v59  ;;  %v19440_v57 = vpack.c.bf16 %v3418_v4, %v3417_v2 }
 0x31f   : > { %v3045_v42 = vpop.permute.xlu1 %3044  ;;  %v3553_v28 = vld [vmem:[#allocation2 + $0x152] sm:$0xff]  ;;  %v3554_v32 = vld [vmem:[#allocation2 + $0x15a] sm:$0xff] }
 0x320   : > { %3110 = vst.msk [vmem:[#allocation2 + $0x189] sm:$0xff] %vm3078_vm1, %v3045_v42  ;;  %v19406_v44 = vpack.c.bf16 %v3554_v32, %v3553_v28  ;;  %v17958_v42 = vld [vmem:[%s21733_s5 + $0x198] sm:$0xff]   ;;  %v17961_v28 = vld [vmem:[%s21733_s5 + $0x1e0] sm:$0xff]   ;;  %v3486_v32 = vld [vmem:[#allocation2 + $0x129] sm:$0xff] }
 0x321   : > { %v3490_v23 = vld [vmem:[#allocation2 + $0x159] sm:$0xff]  ;;  %v3491_v2 = vld [vmem:[#allocation2 + $0x169] sm:$0xff] }
 0x322   : > { %3913 = vmatmul.mubr.bf16.gmra.mrb[104].mxu0 %v19401_v41  ;;  %16427 = vmatmul.mubr.bf16.gmra.mrb[168].mxu1 %v19406_v44 }
 0x323   : > { %3920 = vmatprep.mubr.bf16.mxu0 %v19404_v47  ;;  %v3555_v38 = vld [vmem:[#allocation2 + $0x16a] sm:$0xff]  ;;  %v3556_v48 = vld [vmem:[#allocation2 + $0x172] sm:$0xff] }
 0x324   : > { %v19411_v43 = vpack.c.bf16 %v3556_v48, %v3555_v38  ;;  %v3419_v38 = vld [vmem:[#allocation2 + $0x108] sm:$0xff]  ;;  %v3492_v4 = vld [vmem:[#allocation2 + $0x171] sm:$0xff] }
 0x325   : > { %v19460_v48 = vpack.c.bf16 %v3420_v10, %v3419_v38 }
 0x326   : > { %16430 = vmatprep.mubr.bf16.mxu1 %v19411_v43 }
 0x327   : > { %v3557_v31 = vld [vmem:[#allocation2 + $0x182] sm:$0xff]  ;;  %v3558_v0 = vld [vmem:[#allocation2 + $0x18a] sm:$0xff] }
 0x328   : > { %v3574_v46 = vpack.c.bf16 %v3558_v0, %v3557_v31  ;;  %v3421_v31 = vld [vmem:[#allocation2 + $0x120] sm:$0xff] }
 0x329   : > { %v19480_v0 = vpack.c.bf16 %v3422_v60, %v3421_v31  ;;  %v4715_v60 = vld [vmem:[#allocation2 + $0x1a1] sm:$0xff] }
 0x32a   : > { %3921 = vmatmul.mubr.bf16.gmra.mrb[108].mxu0 %v19414_v26  ;;  %16431 = vmatmul.mubr.bf16.gmra.mrb[172].mxu1 %v3574_v46  ;;  %v17973_v46 = vld [vmem:[%s21733_s5 + $0x1f8] sm:$0xff]  }
 0x32b   : > { %3928 = vmatprep.mubr.bf16.mxu0 %v19416_v51  ;;  %16450 = vmatprep.mubr.bf16.mxu1 %v3271_v36  ;;  %v3487_v36 = vld [vmem:[#allocation2 + $0x139] sm:$0xff] }
 0x332   : > { %3929 = vmatmul.mubr.bf16.gmra.mrb[112].mxu0 %v19420_v24  ;;  %16451 = vmatmul.mubr.bf16.vlgmr.msra.gmra.mrb[144].mxu1 %v19231_v50  ;;  %v17954_v50 = vld [vmem:[%s21733_s5 + $0x190] sm:$0xff]  }
 0x333   : > { %3936 = vmatprep.mubr.bf16.mxu0 %v19425_v61  ;;  %16454 = vmatprep.mubr.bf16.mxu1 %v19235_v16  ;;  %v19445_v16 = vpack.c.bf16 %v3484_v29, %v3483_v53  ;;  %v19510_v53 = vpack.c.bf16 %v3492_v4, %v3491_v2  ;;  %v4750_v4 = vld [vmem:[#allocation2 + $0x4a] sm:$0xff] }
 0x334   : > { %14849 = vmatpush3.bf16.msra.mxu1 %v17946_v52  ;;  %v3423_v52 = vld [vmem:[#allocation2 + $0x138] sm:$0xff] }
 0x335   : > { %14850 = vmatprep.subr.bf16.mxu1 %v17949_v9  ;;  %v19500_v9 = vpack.c.bf16 %v3424_v39, %v3423_v52 }
 0x338   : > { %14851 = vmatpush3.bf16.msra.mxu1 %v17950_v20  ;;  %v3489_v20 = vld [vmem:[#allocation2 + $0x151] sm:$0xff] }
 0x339   : > { %14852 = vmatprep.subr.bf16.mxu1 %v17953_v15  ;;  %v3425_v15 = vld [vmem:[#allocation2 + $0x150] sm:$0xff] }
 0x33a   : > { %3937 = vmatmul.mubr.bf16.gmra.mrb[116].mxu0 %v19440_v57  ;;  %16455 = vmatmul.mubr.bf16.gmra.mrb[148].mxu1 %v19263_v33  ;;  %v17962_v33 = vld [vmem:[%s21733_s5 + $0x1a0] sm:$0xff]  }
 0x33b   : > { %3944 = vmatprep.mubr.bf16.mxu0 %v19445_v16  ;;  %16458 = vmatprep.mubr.bf16.mxu1 %v19278_v49  ;;  %v19465_v49 = vpack.c.bf16 %v3486_v32, %v3485_v17  ;;  %v3430_v32 = vld [vmem:[#allocation2 + $0x188] sm:$0xff] }
 0x33c   : > { %14853 = vmatpush3.bf16.msra.mxu1 %v17954_v50  ;;  %v3428_v50 = vld [vmem:[#allocation2 + $0x170] sm:$0xff] }
 0x33d   : > { %14854 = vmatprep.subr.bf16.mxu1 %v17957_v62  ;;  %v3427_v62 = vld [vmem:[#allocation2 + $0x168] sm:$0xff] }
 0x340   : > { %14855 = vmatpush3.bf16.msra.mxu1 %v17958_v42  ;;  %v3493_v42 = vld [vmem:[#allocation2 + $0x181] sm:$0xff] }
 0x341   : > { %14856 = vmatprep.subr.bf16.mxu1 %v17961_v28  ;;  %v3175_v28 = vld [vmem:[#allocation2 + $0x1] sm:$0xff] }
 0x342   : > { %3945 = vmatmul.mubr.bf16.gmra.mrb[120].mxu0 %v19460_v48  ;;  %16459 = vmatmul.mubr.bf16.gmra.mrb[152].mxu1 %v19294_v40  ;;  %v17970_v40 = vld [vmem:[%s21733_s5 + $0x1b0] sm:$0xff]  }
 0x343   : > { %3952 = vmatprep.mubr.bf16.mxu0 %v19465_v49  ;;  %16462 = vmatprep.mubr.bf16.mxu1 %v19312_v1  ;;  %v19485_v1 = vpack.c.bf16 %v3488_v6, %v3487_v36 }
 0x344   : > { %14857 = vmatpush3.bf16.msra.mxu1 %v17962_v33  ;;  %v18200_v33 = vld [vmem:[#allocation2] sm:$0xff] }
 0x345   : > { %14858 = vmatprep.subr.bf16.mxu1 %v17965_v58  ;;  %v19529_v58 = vpack.c.bf16 %v18200_v33, %v18200_v33  ;;  %v4757_v33 = vld [vmem:[#allocation2 + $0x9a] sm:$0xff] }
 0x348   : > { %14859 = vmatpush3.bf16.msra.mxu1 %v17966_v55  ;;  %v17980_v55 = vld [vmem:[%s21733_s5 + $0x228] sm:$0xff]  }
 0x349   : > { %14860 = vmatprep.subr.bf16.mxu1 %v17969_v13 }
 0x34a   : > { %3953 = vmatmul.mubr.bf16.gmra.mrb[124].mxu0 %v19480_v0  ;;  %16463 = vmatmul.mubr.bf16.gmra.mrb[156].mxu1 %v19328_v14  ;;  %v19502_v14 = vpack.c.bf16 %v3490_v23, %v3489_v20  ;;  %v4749_v23 = vld [vmem:[#allocation2 + $0x3a] sm:$0xff] }
 0x34b   : > { %3960 = vmatprep.mubr.bf16.mxu0 %v19485_v1  ;;  %16466 = vmatprep.mubr.bf16.mxu1 %v19346_v22  ;;  %v3426_v22 = vld [vmem:[#allocation2 + $0x158] sm:$0xff] }
 0x34c   : > { %14861 = vmatpush3.bf16.msra.mxu1 %v17970_v40  ;;  %v19508_v29 = vpack.c.bf16 %v3426_v22, %v3425_v15  ;;  %v4751_v15 = vld [vmem:[#allocation2 + $0x52] sm:$0xff] }
 0x34d   : > { %14862 = vmatprep.subr.bf16.mxu1 %v17973_v46 }
 0x350   : > { %14863 = vmatpush3.bf16.msra.mxu1 %v17974_v37 }
 0x351   : > { %16482 = vmatprep.subr.bf16.mxu1 %v17975_v21 }
 0x352   : > { %3961 = vmatmul.mubr.bf16.gmra.mrb[128].mxu0 %v19500_v9  ;;  %16467 = vmatmul.mubr.bf16.gmra.mrb[160].mxu1 %v19362_v25  ;;  %v3494_v25 = vld [vmem:[#allocation2 + $0x189] sm:$0xff] }
 0x353   : > { %3968 = vmatprep.mubr.bf16.mxu0 %v19502_v14  ;;  %16470 = vmatprep.mubr.bf16.mxu1 %v19374_v7  ;;  %v19516_v7 = vpack.c.bf16 %v3428_v50, %v3427_v62  ;;  %v19518_v10 = vpack.c.bf16 %v3494_v25, %v3493_v42  ;;  %v4753_v50 = vld [vmem:[#allocation2 + $0x6a] sm:$0xff]  ;;  %v4781_v42 = vpack.c.bf16 %v4751_v15, %v4750_v4 }
 0x35a   : > { %3969 = vmatmul.mubr.bf16.gmra.mrb[132].mxu0 %v19508_v29  ;;  %16471 = vmatmul.mubr.bf16.gmra.mrb[164].mxu1 %v19381_v3  ;;  %v3176_v3 = vld [vmem:[#allocation2 + $0x9] sm:$0xff] }
 0x35b   : > { %3976 = vmatprep.mubr.bf16.mxu0 %v19510_v53  ;;  %16474 = vmatprep.mubr.bf16.mxu1 %v19390_v8  ;;  %v3429_v8 = vld [vmem:[#allocation2 + $0x180] sm:$0xff]  ;;  %v3207_v38 = vpack.c.bf16 %v3176_v3, %v3175_v28 }
 0x35c   : > { %v19524_v17 = vpack.c.bf16 %v3430_v32, %v3429_v8  ;;  %v4754_v3 = vld [vmem:[#allocation2 + $0x7a] sm:$0xff]  ;;  %v4755_v32 = vld [vmem:[#allocation2 + $0x82] sm:$0xff] }
 0x362   : > { %3977 = vmatmul.mubr.bf16.gmra.mrb[136].mxu0 %v19516_v7  ;;  %16475 = vmatmul.mubr.bf16.gmra.mrb[168].mxu1 %v19397_v59  ;;  %v17976_v59 = vld [vmem:[%s21733_s5 + $0x208] sm:$0xff]  }
 0x363   : > { %3984 = vmatprep.mubr.bf16.mxu0 %v19518_v10  ;;  %16478 = vmatprep.mubr.bf16.mxu1 %v19406_v44  ;;  %v17977_v44 = vld [vmem:[%s21733_s5 + $0x210] sm:$0xff]  }
 0x36a   : > { %3985 = vmatmul.mubr.bf16.gmra.mrb[140].mxu0 %v19524_v17  ;;  %16479 = vmatmul.mubr.bf16.gmra.mrb[172].mxu1 %v19411_v43  ;;  %v17978_v43 = vld [vmem:[%s21733_s5 + $0x218] sm:$0xff]  }
 0x36b   : > { %4330 = vmatprep.mubr.bf16.mxu0 %v3207_v38  ;;  %5085 = vmatprep.mubr.bf16.mxu1 %v19246_v5 }
 0x372   : > { %4331 = vmatmul.mubr.bf16.vlgmr.msra.gmra.mrb[144].mxu0 %v19529_v58  ;;  %5086 = vmatmul.mubr.bf16.vlgmr.msra.gmra.mrb[176].mxu1 %v19273_v12 }
 0x373   : > { %4338 = vmatprep.mubr.bf16.mxu0 %v19229_v54  ;;  %5093 = vmatprep.mubr.bf16.mxu1 %v19276_v11  ;;  %v17979_v54 = vld [vmem:[%s21733_s5 + $0x220] sm:$0xff]  }
 0x374   : > { %16483 = vmatpush3.bf16.msra.mxu1 %v17975_v21  ;;  %v4748_v21 = vld [vmem:[#allocation2 + $0x32] sm:$0xff] }
 0x375   : > { %16484 = vmatprep.subr.bf16.mxu1 %v17976_v59  ;;  %v4780_v20 = vpack.c.bf16 %v4749_v23, %v4748_v21  ;;  %v4766_v21 = vld [vmem:[#allocation2 + $0x10a] sm:$0xff]  ;;  %v4767_v23 = vld [vmem:[#allocation2 + $0x112] sm:$0xff] }
 0x378   : > { %16485 = vmatpush3.bf16.msra.mxu1 %v17976_v59 }
 0x379   : > { %16486 = vmatprep.subr.bf16.mxu1 %v17977_v44 }
 0x37a   : > { %4339 = vmatmul.mubr.bf16.gmra.mrb[148].mxu0 %v19233_v30  ;;  %5094 = vmatmul.mubr.bf16.gmra.mrb[180].mxu1 %v19307_v45  ;;  %v17981_v30 = vld [vmem:[%s21733_s5 + $0x230] sm:$0xff]  }
 0x37b   : > { %4346 = vmatprep.mubr.bf16.mxu0 %v19246_v5  ;;  %5101 = vmatprep.mubr.bf16.mxu1 %v19310_v35  ;;  %v17982_v5 = vld [vmem:[%s21733_s5 + $0x238] sm:$0xff]  }
 0x37c   : > { %16487 = vmatpush3.bf16.msra.mxu1 %v17977_v44  ;;  %v4783_v44 = vpack.c.bf16 %v4755_v32, %v4754_v3  ;;  %v4772_v3 = vld [vmem:[#allocation2 + $0x152] sm:$0xff]  ;;  %v4773_v32 = vld [vmem:[#allocation2 + $0x15a] sm:$0xff] }
 0x37d   : > { %16488 = vmatprep.subr.bf16.mxu1 %v17978_v43 }
 0x380   : > { %16489 = vmatpush3.bf16.msra.mxu1 %v17978_v43 }
 0x381   : > { %16490 = vmatprep.subr.bf16.mxu1 %v17979_v54 }
 0x382   : > { %4347 = vmatmul.mubr.bf16.gmra.mrb[152].mxu0 %v19273_v12  ;;  %5102 = vmatmul.mubr.bf16.gmra.mrb[184].mxu1 %v19341_v18 }
 0x383   : > { %4354 = vmatprep.mubr.bf16.mxu0 %v19276_v11  ;;  %5109 = vmatprep.mubr.bf16.mxu1 %v19344_v19 }
 0x384   : > { %16491 = vmatpush3.bf16.msra.mxu1 %v17979_v54 }
 0x385   : > { %16492 = vmatprep.subr.bf16.mxu1 %v17980_v55 }
 0x388   : > { %16493 = vmatpush3.bf16.msra.mxu1 %v17980_v55 }
 0x389   : > { %16494 = vmatprep.subr.bf16.mxu1 %v17981_v30 }
 0x38a   : > { %4355 = vmatmul.mubr.bf16.gmra.mrb[156].mxu0 %v19307_v45  ;;  %5110 = vmatmul.mubr.bf16.gmra.mrb[188].mxu1 %v19369_v63 }
 0x38b   : > { %4362 = vmatprep.mubr.bf16.mxu0 %v19310_v35  ;;  %5117 = vmatprep.mubr.bf16.mxu1 %v19372_v56 }
 0x38c   : > { %16495 = vmatpush3.bf16.msra.mxu1 %v17981_v30  ;;  %v4758_v30 = vld [vmem:[#allocation2 + $0xaa] sm:$0xff] }
 0x38d   : > { %16496 = vmatprep.subr.bf16.mxu1 %v17982_v5 }
 0x390   : > { %16497 = vmatpush3.bf16.msra.mxu1 %v17982_v5  ;;  %v4759_v5 = vld [vmem:[#allocation2 + $0xb2] sm:$0xff] }
 0x392   : > { %4363 = vmatmul.mubr.bf16.gmra.mrb[160].mxu0 %v19341_v18  ;;  %5118 = vmatmul.mubr.bf16.gmra.mrb[192].mxu1 %v19385_v34 }
 0x393   : > { %4370 = vmatprep.mubr.bf16.mxu0 %v19344_v19  ;;  %5125 = vmatprep.mubr.bf16.mxu1 %v19388_v27 }
 0x39a   : > { %4371 = vmatmul.mubr.bf16.gmra.mrb[164].mxu0 %v19369_v63  ;;  %5126 = vmatmul.mubr.bf16.gmra.mrb[196].mxu1 %v19401_v41 }
 0x39b   : > { %4378 = vmatprep.mubr.bf16.mxu0 %v19372_v56  ;;  %5133 = vmatprep.mubr.bf16.mxu1 %v19404_v47 }
 0x3a2   : > { %4379 = vmatmul.mubr.bf16.gmra.mrb[168].mxu0 %v19385_v34  ;;  %5134 = vmatmul.mubr.bf16.gmra.mrb[200].mxu1 %v19414_v26 }
 0x3a3   : > { %4386 = vmatprep.mubr.bf16.mxu0 %v19388_v27  ;;  %5141 = vmatprep.mubr.bf16.mxu1 %v19416_v51 }
 0x3aa   : > { %4387 = vmatmul.mubr.bf16.gmra.mrb[172].mxu0 %v19401_v41  ;;  %5142 = vmatmul.mubr.bf16.gmra.mrb[204].mxu1 %v19420_v24 }
 0x3ab   : > { %4394 = vmatprep.mubr.bf16.mxu0 %v19404_v47  ;;  %5149 = vmatprep.mubr.bf16.mxu1 %v19425_v61 }
 0x3b2   : > { %4395 = vmatmul.mubr.bf16.gmra.mrb[176].mxu0 %v19414_v26  ;;  %5150 = vmatmul.mubr.bf16.gmra.mrb[208].mxu1 %v19440_v57 }
 0x3b3   : > { %4402 = vmatprep.mubr.bf16.mxu0 %v19416_v51  ;;  %5157 = vmatprep.mubr.bf16.mxu1 %v19445_v16 }
 0x3ba   : > { %4403 = vmatmul.mubr.bf16.gmra.mrb[180].mxu0 %v19420_v24  ;;  %5158 = vmatmul.mubr.bf16.gmra.mrb[212].mxu1 %v19460_v48 }
 0x3bb   : > { %4410 = vmatprep.mubr.bf16.mxu0 %v19425_v61  ;;  %5165 = vmatprep.mubr.bf16.mxu1 %v19465_v49 }
 0x3c2   : > { %4411 = vmatmul.mubr.bf16.gmra.mrb[184].mxu0 %v19440_v57  ;;  %5166 = vmatmul.mubr.bf16.gmra.mrb[216].mxu1 %v19480_v0 }
 0x3c3   : > { %4418 = vmatprep.mubr.bf16.mxu0 %v19445_v16  ;;  %5173 = vmatprep.mubr.bf16.mxu1 %v19485_v1 }
 0x3c5   : > { %v14592_v12 = vpop.f32.mrb[80].mxu0 }
 0x3c6   : > { %v14593_v11 = vpop.f32.mrb[81].mxu0 }
 0x3c7   : > { %v19596_v45 = vadd.f32 %v14593_v11, %v14592_v12  ;;  %v14595_v35 = vpop.f32.mrb[82].mxu0 }
 0x3c8   : > { %v14596_v18 = vpop.f32.mrb[83].mxu0 }
 0x3c9   : > { %v19598_v19 = vadd.f32 %v14596_v18, %v14595_v35  ;;  %v4760_v35 = vld [vmem:[#allocation2 + $0xc2] sm:$0xff]  ;;  %v4761_v18 = vld [vmem:[#allocation2 + $0xca] sm:$0xff] }
 0x3ca   : > { %4419 = vmatmul.mubr.bf16.gmra.mrb[188].mxu0 %v19460_v48  ;;  %5174 = vmatmul.mubr.bf16.gmra.mrb[220].mxu1 %v19500_v9 }
 0x3cb   : > { %4426 = vmatprep.mubr.bf16.mxu0 %v19465_v49  ;;  %5181 = vmatprep.mubr.bf16.mxu1 %v19502_v14  ;;  %v4714_v49 = vld [vmem:[#allocation2 + $0x199] sm:$0xff] }
 0x3cc   : > { %v4731_v36 = vpack.c.bf16 %v4715_v60, %v4714_v49  ;;  %v4764_v60 = vld [vmem:[#allocation2 + $0xf2] sm:$0xff] }
 0x3cd   : > { %v14598_v63 = vpop.f32.mrb[84].mxu0 }
 0x3ce   : > { %v14599_v56 = vpop.f32.mrb[85].mxu0 }
 0x3cf   : > { %v19604_v34 = vadd.f32 %v14599_v56, %v14598_v63  ;;  %v14601_v27 = vpop.f32.mrb[86].mxu0 }
 0x3d0   : > { %v14602_v41 = vpop.f32.mrb[87].mxu0 }
 0x3d1   : > { %v19606_v47 = vadd.f32 %v14602_v41, %v14601_v27  ;;  %v4785_v27 = vpack.c.bf16 %v4759_v5, %v4758_v30  ;;  %v4786_v41 = vpack.c.bf16 %v4761_v18, %v4760_v35  ;;  %v4777_v35 = vld [vmem:[#allocation2 + $0x18a] sm:$0xff] }
 0x3d2   : > { %4427 = vmatmul.mubr.bf16.gmra.mrb[192].mxu0 %v19480_v0  ;;  %5182 = vmatmul.mubr.bf16.gmra.mrb[224].mxu1 %v19508_v29 }
 0x3d3   : > { %4434 = vmatprep.mubr.bf16.mxu0 %v19485_v1  ;;  %5189 = vmatprep.mubr.bf16.mxu1 %v19510_v53 }
 0x3d5   : > { %v14604_v26 = vpop.f32.mrb[88].mxu0 }
 0x3d6   : > { %v14605_v51 = vpop.f32.mrb[89].mxu0 }
 0x3d7   : > { %v19612_v24 = vadd.f32 %v14605_v51, %v14604_v26  ;;  %v14607_v61 = vpop.f32.mrb[90].mxu0 }
 0x3d8   : > { %v14608_v57 = vpop.f32.mrb[91].mxu0 }
 0x3d9   : > { %v19614_v16 = vadd.f32 %v14608_v57, %v14607_v61  ;;  %v4762_v61 = vld [vmem:[#allocation2 + $0xda] sm:$0xff]  ;;  %v4763_v57 = vld [vmem:[#allocation2 + $0xe2] sm:$0xff] }
 0x3da   : > { %4435 = vmatmul.mubr.bf16.gmra.mrb[196].mxu0 %v19500_v9  ;;  %5190 = vmatmul.mubr.bf16.gmra.mrb[228].mxu1 %v19516_v7 }
 0x3db   : > { %4442 = vmatprep.mubr.bf16.mxu0 %v19502_v14  ;;  %5197 = vmatprep.mubr.bf16.mxu1 %v19518_v10 }
 0x3dd   : > { %v14610_v48 = vpop.f32.mrb[92].mxu0 }
 0x3de   : > { %v14611_v13 = vpop.f32.mrb[93].mxu0 }
 0x3df   : > { %v19620_v6 = vadd.f32 %v14611_v13, %v14610_v48  ;;  %v14613_v31 = vpop.f32.mrb[94].mxu0  ;;  %v4765_v13 = vld [vmem:[#allocation2 + $0xfa] sm:$0xff] }
 0x3e0   : > { %v14614_v0 = vpop.f32.mrb[95].mxu0 }
 0x3e1   : > { %v19622_v40 = vadd.f32 %v14614_v0, %v14613_v31 }
 0x3e2   : > { %4443 = vmatmul.mubr.bf16.gmra.mrb[200].mxu0 %v19508_v29  ;;  %5198 = vmatmul.mubr.bf16.gmra.mrb[232].mxu1 %v19524_v17  ;;  %v4756_v17 = vld [vmem:[#allocation2 + $0x92] sm:$0xff] }
 0x3e3   : > { %4450 = vmatprep.mubr.bf16.mxu0 %v19510_v53  ;;  %5205 = vmatprep.mubr.bf16.mxu1 %v4731_v36  ;;  %v4752_v53 = vld [vmem:[#allocation2 + $0x62] sm:$0xff]  ;;  %v4784_v43 = vpack.c.bf16 %v4757_v33, %v4756_v17  ;;  %v4787_v36 = vpack.c.bf16 %v4763_v57, %v4762_v61 }
 0x3e4   : > { %v4782_v10 = vpack.c.bf16 %v4753_v50, %v4752_v53 }
 0x3e5   : > { %v14616_v1 = vpop.f32.mrb[96].mxu0 }
 0x3e6   : > { %v14617_v46 = vpop.f32.mrb[97].mxu0 }
 0x3e7   : > { %v19627_v37 = vadd.f32 %v14617_v46, %v14616_v1  ;;  %v14619_v39 = vpop.f32.mrb[98].mxu0  ;;  %v4788_v1 = vpack.c.bf16 %v4765_v13, %v4764_v60 }
 0x3e8   : > { %v14620_v52 = vpop.f32.mrb[99].mxu0 }
 0x3e9   : > { %v19629_v9 = vadd.f32 %v14620_v52, %v14619_v39 }
 0x3ea   : > { %4451 = vmatmul.mubr.bf16.gmra.mrb[204].mxu0 %v19516_v7  ;;  %5206 = vmatmul.mubr.bf16.gmra.mrb[236].mxu1 %v19529_v58 }
 0x3eb   : > { %16498 = vmatprep.mubr.bf16.mxu1 %v4780_v20 }
 0x3ed   : > { %v14622_v14 = vpop.f32.mrb[100].mxu0 }
 0x3ee   : > { %v14623_v22 = vpop.f32.mrb[101].mxu0 }
 0x3ef   : > { %v19633_v29 = vadd.f32 %v14623_v22, %v14622_v14  ;;  %v14625_v2 = vpop.f32.mrb[102].mxu0  ;;  %v4768_v14 = vld [vmem:[#allocation2 + $0x122] sm:$0xff]  ;;  %v4769_v22 = vld [vmem:[#allocation2 + $0x12a] sm:$0xff] }
 0x3f0   : > { %v14626_v25 = vpop.f32.mrb[103].mxu0  ;;  %v4790_v53 = vpack.c.bf16 %v4769_v22, %v4768_v14 }
 0x3f1   : > { %v19635_v62 = vadd.f32 %v14626_v25, %v14625_v2  ;;  %v4789_v2 = vpack.c.bf16 %v4767_v23, %v4766_v21 }
 0x3f2   : > { %16499 = vmatmul.mubr.bf16.vlgmr.msra.gmra.mrb[144].mxu1 %v4781_v42  ;;  %v4770_v42 = vld [vmem:[#allocation2 + $0x13a] sm:$0xff] }
 0x3f3   : > { %16502 = vmatprep.mubr.bf16.mxu1 %v4782_v10  ;;  %v4771_v10 = vld [vmem:[#allocation2 + $0x142] sm:$0xff] }
 0x3f4   : > { %v4791_v33 = vpack.c.bf16 %v4771_v10, %v4770_v42 }
 0x3f5   : > { %v14628_v7 = vpop.f32.mrb[104].mxu0 }
 0x3f6   : > { %v14629_v28 = vpop.f32.mrb[105].mxu0 }
 0x3f7   : > { %v19637_v8 = vadd.f32 %v14629_v28, %v14628_v7  ;;  %v14631_v38 = vpop.f32.mrb[106].mxu0 }
 0x3f8   : > { %v14632_v58 = vpop.f32.mrb[107].mxu0 }
 0x3f9   : > { %v19639_v59 = vadd.f32 %v14632_v58, %v14631_v38  ;;  %v4792_v58 = vpack.c.bf16 %v4773_v32, %v4772_v3 }
 0x3fa   : > { %16503 = vmatmul.mubr.bf16.gmra.mrb[148].mxu1 %v4783_v44 }
 0x3fb   : > { %16506 = vmatprep.mubr.bf16.mxu1 %v4784_v43 }
 0x3fd   : > { %v14634_v54 = vpop.f32.mrb[108].mxu0 }
 0x3fe   : > { %v14635_v55 = vpop.f32.mrb[109].mxu0 }
 0x3ff   : > { %v19641_v12 = vadd.f32 %v14635_v55, %v14634_v54  ;;  %v14637_v11 = vpop.f32.mrb[110].mxu0  ;;  %v4774_v54 = vld [vmem:[#allocation2 + $0x16a] sm:$0xff]  ;;  %v4775_v55 = vld [vmem:[#allocation2 + $0x172] sm:$0xff] }
 0x400   : > { %v14638_v63 = vpop.f32.mrb[111].mxu0 }
 0x401   : > { %v19643_v56 = vadd.f32 %v14638_v63, %v14637_v11  ;;  %v4776_v11 = vld [vmem:[#allocation2 + $0x182] sm:$0xff] }
 0x402   : > { %16507 = vmatmul.mubr.bf16.gmra.mrb[152].mxu1 %v4785_v27  ;;  %v4793_v27 = vpack.c.bf16 %v4775_v55, %v4774_v54 }
 0x403   : > { %16510 = vmatprep.mubr.bf16.mxu1 %v4786_v41  ;;  %v4794_v41 = vpack.c.bf16 %v4777_v35, %v4776_v11 }
 0x405   : > { %v14640_v26 = vpop.f32.mrb[112].mxu0 }
 0x406   : > { %v14641_v51 = vpop.f32.mrb[113].mxu0 }
 0x407   : > { %v19645_v48 = vadd.f32 %v14641_v51, %v14640_v26  ;;  %v14643_v49 = vpop.f32.mrb[114].mxu0  ;;  %v4778_v26 = vld [vmem:[#allocation2 + $0x19a] sm:$0xff]  ;;  %v4779_v51 = vld [vmem:[#allocation2 + $0x1a2] sm:$0xff] }
 0x408   : > { %v14644_v31 = vpop.f32.mrb[115].mxu0  ;;  %v4795_v13 = vpack.c.bf16 %v4779_v51, %v4778_v26 }
 0x409   : > { %v19647_v0 = vadd.f32 %v14644_v31, %v14643_v49 }
 0x40a   : > { %16511 = vmatmul.mubr.bf16.gmra.mrb[156].mxu1 %v4787_v36 }
 0x40b   : > { %16514 = vmatprep.mubr.bf16.mxu1 %v4788_v1 }
 0x40d   : > { %v14646_v46 = vpop.f32.mrb[116].mxu0 }
 0x40e   : > { %v14647_v39 = vpop.f32.mrb[117].mxu0 }
 0x40f   : > { %v19649_v52 = vadd.f32 %v14647_v39, %v14646_v46  ;;  %v14649_v20 = vpop.f32.mrb[118].mxu0 }
 0x410   : > { %v14650_v4 = vpop.f32.mrb[119].mxu0 }
 0x411   : > { %v19651_v15 = vadd.f32 %v14650_v4, %v14649_v20 }
 0x412   : > { %16515 = vmatmul.mubr.bf16.gmra.mrb[160].mxu1 %v4789_v2 }
 0x413   : > { %16518 = vmatprep.mubr.bf16.mxu1 %v4790_v53 }
 0x415   : > { %v14652_v50 = vpop.f32.mrb[120].mxu0 }
 0x416   : > { %v14653_v25 = vpop.f32.mrb[121].mxu0 }
 0x417   : > { %v19653_v7 = vadd.f32 %v14653_v25, %v14652_v50  ;;  %v14655_v28 = vpop.f32.mrb[122].mxu0 }
 0x418   : > { %v14656_v38 = vpop.f32.mrb[123].mxu0 }
 0x419   : > { %v19655_v17 = vadd.f32 %v14656_v38, %v14655_v28 }
 0x41a   : > { %16519 = vmatmul.mubr.bf16.gmra.mrb[164].mxu1 %v4791_v33 }
 0x41b   : > { %16522 = vmatprep.mubr.bf16.mxu1 %v4792_v58 }
 0x41d   : > { %v14658_v44 = vpop.f32.mrb[124].mxu0 }
 0x41e   : > { %v14659_v43 = vpop.f32.mrb[125].mxu0 }
 0x41f   : > { %v19657_v30 = vadd.f32 %v14659_v43, %v14658_v44  ;;  %v14661_v5 = vpop.f32.mrb[126].mxu0 }
 0x420   : > { %v14662_v18 = vpop.f32.mrb[127].mxu0 }
 0x421   : > { %v19659_v63 = vadd.f32 %v14662_v18, %v14661_v5 }
 0x422   : > { %16523 = vmatmul.mubr.bf16.gmra.mrb[168].mxu1 %v4793_v27 }
 0x423   : > { %16526 = vmatprep.mubr.bf16.mxu1 %v4794_v41 }
 0x425   : > { %v14664_v61 = vpop.f32.mrb[128].mxu0 }
 0x426   : > { %v14665_v57 = vpop.f32.mrb[129].mxu0 }
 0x427   : > { %v19661_v49 = vadd.f32 %v14665_v57, %v14664_v61  ;;  %v14667_v60 = vpop.f32.mrb[130].mxu0 }
 0x428   : > { %v14668_v31 = vpop.f32.mrb[131].mxu0 }
 0x429   : > { %v19663_v36 = vadd.f32 %v14668_v31, %v14667_v60 }
 0x42a   : > { %16527 = vmatmul.mubr.bf16.gmra.mrb[172].mxu1 %v4795_v13 }
 0x42d   : > { %v14670_v1 = vpop.f32.mrb[132].mxu0 }
 0x42e   : > { %v14671_v46 = vpop.f32.mrb[133].mxu0 }
 0x42f   : > { %v19665_v39 = vadd.f32 %v14671_v46, %v14670_v1  ;;  %v14673_v21 = vpop.f32.mrb[134].mxu0 }
 0x430   : > { %v14674_v23 = vpop.f32.mrb[135].mxu0 }
 0x431   : > { %v19667_v20 = vadd.f32 %v14674_v23, %v14673_v21 }
 0x435   : > { %v14676_v14 = vpop.f32.mrb[136].mxu0 }
 0x436   : > { %v14677_v22 = vpop.f32.mrb[137].mxu0 }
 0x437   : > { %v19669_v4 = vadd.f32 %v14677_v22, %v14676_v14  ;;  %v14679_v2 = vpop.f32.mrb[138].mxu0 }
 0x438   : > { %v14680_v53 = vpop.f32.mrb[139].mxu0 }
 0x439   : > { %v19671_v50 = vadd.f32 %v14680_v53, %v14679_v2 }
 0x43d   : > { %v14682_v25 = vpop.f32.mrb[140].mxu0 }
 0x43e   : > { %v14683_v42 = vpop.f32.mrb[141].mxu0 }
 0x43f   : > { %v19673_v10 = vadd.f32 %v14683_v42, %v14682_v25  ;;  %v14685_v28 = vpop.f32.mrb[142].mxu0 }
 0x440   : > { %v14686_v3 = vpop.f32.mrb[143].mxu0 }
 0x441   : > { %v19675_v32 = vadd.f32 %v14686_v3, %v14685_v28 }
 0x445   : > { %v14728_v38 = vpop.f32.mrb[144].mxu0  ;;  %v14864_v58 = vpop.f32.mrb[176].mxu1 }
 0x446   : > { %v14729_v33 = vpop.f32.mrb[145].mxu0  ;;  %v14865_v54 = vpop.f32.mrb[177].mxu1 }
 0x447   : > { %v14730_v44 = vadd.f32 %v14729_v33, %v14728_v38  ;;  %v14731_v43 = vpop.f32.mrb[146].mxu0  ;;  %v14866_v55 = vadd.f32 %v14865_v54, %v14864_v58  ;;  %v14867_v11 = vpop.f32.mrb[178].mxu1 }
 0x448   : > { %v14732_v5 = vpop.f32.mrb[147].mxu0  ;;  %v14868_v27 = vpop.f32.mrb[179].mxu1 }
 0x449   : > { %v17125_v35 = vadd.f32 %v14730_v44, %v19596_v45  ;;  %v14733_v18 = vadd.f32 %v14732_v5, %v14731_v43  ;;  %v14869_v41 = vadd.f32 %v14868_v27, %v14867_v11 }
 0x44b   : > { %v17131_v26 = vadd.f32 %v14733_v18, %v19598_v19  ;;  %v19679_v51 = vadd.f32 %v17125_v35, %v14866_v55 }
 0x44d   : > { %v14734_v61 = vpop.f32.mrb[148].mxu0  ;;  %v19681_v57 = vadd.f32 %v17131_v26, %v14869_v41  ;;  %v14870_v13 = vpop.f32.mrb[180].mxu1 }
 0x44e   : > { %v14735_v60 = vpop.f32.mrb[149].mxu0  ;;  %v14871_v46 = vpop.f32.mrb[181].mxu1 }
 0x44f   : > { %v14736_v31 = vadd.f32 %v14735_v60, %v14734_v61  ;;  %v14737_v1 = vpop.f32.mrb[150].mxu0  ;;  %v14872_v21 = vadd.f32 %v14871_v46, %v14870_v13  ;;  %v14873_v14 = vpop.f32.mrb[182].mxu1 }
 0x450   : > { %v14738_v23 = vpop.f32.mrb[151].mxu0  ;;  %v14874_v2 = vpop.f32.mrb[183].mxu1 }
 0x451   : > { %v17122_v45 = vadd.f32 %v14736_v31, %v19604_v34  ;;  %v14739_v22 = vadd.f32 %v14738_v23, %v14737_v1  ;;  %v14875_v53 = vadd.f32 %v14874_v2, %v14873_v14 }
 0x453   : > { %v17128_v19 = vadd.f32 %v14739_v22, %v19606_v47  ;;  %v19685_v25 = vadd.f32 %v17122_v45, %v14872_v21 }
 0x455   : > { %v14740_v42 = vpop.f32.mrb[152].mxu0  ;;  %v19687_v28 = vadd.f32 %v17128_v19, %v14875_v53  ;;  %v14876_v38 = vpop.f32.mrb[184].mxu1 }
 0x456   : > { %v14741_v3 = vpop.f32.mrb[153].mxu0  ;;  %v14877_v44 = vpop.f32.mrb[185].mxu1 }
 0x457   : > { %v14742_v33 = vadd.f32 %v14741_v3, %v14740_v42  ;;  %v14743_v58 = vpop.f32.mrb[154].mxu0  ;;  %v14878_v43 = vadd.f32 %v14877_v44, %v14876_v38  ;;  %v14879_v55 = vpop.f32.mrb[186].mxu1 }
 0x458   : > { %v14744_v54 = vpop.f32.mrb[155].mxu0  ;;  %v14880_v11 = vpop.f32.mrb[187].mxu1 }
 0x459   : > { %v17137_v34 = vadd.f32 %v14742_v33, %v19612_v24  ;;  %v14745_v5 = vadd.f32 %v14744_v54, %v14743_v58  ;;  %v14881_v35 = vadd.f32 %v14880_v11, %v14879_v55 }
 0x45b   : > { %v17143_v47 = vadd.f32 %v14745_v5, %v19614_v16  ;;  %v19691_v18 = vadd.f32 %v17137_v34, %v14878_v43 }
 0x45d   : > { %v14746_v27 = vpop.f32.mrb[156].mxu0  ;;  %v19693_v41 = vadd.f32 %v17143_v47, %v14881_v35  ;;  %v14882_v61 = vpop.f32.mrb[188].mxu1 }
 0x45e   : > { %v14747_v26 = vpop.f32.mrb[157].mxu0  ;;  %v14883_v31 = vpop.f32.mrb[189].mxu1 }
 0x45f   : > { %v14748_v60 = vadd.f32 %v14747_v26, %v14746_v27  ;;  %v14749_v13 = vpop.f32.mrb[158].mxu0  ;;  %v14884_v1 = vadd.f32 %v14883_v31, %v14882_v61  ;;  %v14885_v21 = vpop.f32.mrb[190].mxu1 }
 0x460   : > { %v14750_v46 = vpop.f32.mrb[159].mxu0  ;;  %v14886_v14 = vpop.f32.mrb[191].mxu1 }
 0x461   : > { %v17134_v24 = vadd.f32 %v14748_v60, %v19620_v6  ;;  %v14751_v23 = vadd.f32 %v14750_v46, %v14749_v13  ;;  %v14887_v45 = vadd.f32 %v14886_v14, %v14885_v21 }
 0x463   : > { %v17140_v16 = vadd.f32 %v14751_v23, %v19622_v40  ;;  %v19697_v22 = vadd.f32 %v17134_v24, %v14884_v1 }
 0x465   : > { %v14752_v2 = vpop.f32.mrb[160].mxu0  ;;  %v19699_v53 = vadd.f32 %v17140_v16, %v14887_v45  ;;  %v14888_v42 = vpop.f32.mrb[192].mxu1 }
 0x466   : > { %v14753_v19 = vpop.f32.mrb[161].mxu0  ;;  %v14889_v33 = vpop.f32.mrb[193].mxu1 }
 0x467   : > { %v14754_v3 = vadd.f32 %v14753_v19, %v14752_v2  ;;  %v14755_v38 = vpop.f32.mrb[162].mxu0  ;;  %v14890_v58 = vadd.f32 %v14889_v33, %v14888_v42  ;;  %v14891_v43 = vpop.f32.mrb[194].mxu1 }
 0x468   : > { %v14756_v44 = vpop.f32.mrb[163].mxu0  ;;  %v14892_v55 = vpop.f32.mrb[195].mxu1 }
 0x469   : > { %v17149_v6 = vadd.f32 %v14754_v3, %v19627_v37  ;;  %v14757_v54 = vadd.f32 %v14756_v44, %v14755_v38  ;;  %v14893_v34 = vadd.f32 %v14892_v55, %v14891_v43 }
 0x46b   : > { %v17155_v40 = vadd.f32 %v14757_v54, %v19629_v9  ;;  %v19703_v5 = vadd.f32 %v17149_v6, %v14890_v58 }
 0x46d   : > { %v14758_v11 = vpop.f32.mrb[164].mxu0  ;;  %v19705_v35 = vadd.f32 %v17155_v40, %v14893_v34  ;;  %v14894_v27 = vpop.f32.mrb[196].mxu1 }
 0x46e   : > { %v14759_v47 = vpop.f32.mrb[165].mxu0  ;;  %v14895_v60 = vpop.f32.mrb[197].mxu1 }
 0x46f   : > { %v14760_v26 = vadd.f32 %v14759_v47, %v14758_v11  ;;  %v14761_v61 = vpop.f32.mrb[166].mxu0  ;;  %v14896_v13 = vadd.f32 %v14895_v60, %v14894_v27  ;;  %v14897_v1 = vpop.f32.mrb[198].mxu1 }
 0x470   : > { %v14762_v31 = vpop.f32.mrb[167].mxu0  ;;  %v14898_v21 = vpop.f32.mrb[199].mxu1 }
 0x471   : > { %v17146_v37 = vadd.f32 %v14760_v26, %v19633_v29  ;;  %v14763_v46 = vadd.f32 %v14762_v31, %v14761_v61  ;;  %v14899_v24 = vadd.f32 %v14898_v21, %v14897_v1 }
 0x473   : > { %v17152_v9 = vadd.f32 %v14763_v46, %v19635_v62  ;;  %v19709_v23 = vadd.f32 %v17146_v37, %v14896_v13 }
 0x475   : > { %v14764_v14 = vpop.f32.mrb[168].mxu0  ;;  %v19711_v45 = vadd.f32 %v17152_v9, %v14899_v24  ;;  %v14900_v2 = vpop.f32.mrb[200].mxu1 }
 0x476   : > { %v14765_v16 = vpop.f32.mrb[169].mxu0  ;;  %v14901_v3 = vpop.f32.mrb[201].mxu1 }
 0x477   : > { %v14766_v19 = vadd.f32 %v14765_v16, %v14764_v14  ;;  %v14767_v42 = vpop.f32.mrb[170].mxu0  ;;  %v14902_v38 = vadd.f32 %v14901_v3, %v14900_v2  ;;  %v14903_v58 = vpop.f32.mrb[202].mxu1 }
 0x478   : > { %v14768_v33 = vpop.f32.mrb[171].mxu0  ;;  %v14904_v43 = vpop.f32.mrb[203].mxu1 }
 0x479   : > { %v17161_v29 = vadd.f32 %v14766_v19, %v19637_v8  ;;  %v14769_v44 = vadd.f32 %v14768_v33, %v14767_v42  ;;  %v14905_v6 = vadd.f32 %v14904_v43, %v14903_v58  ;;  %v17983_v43 = vld [vmem:[%s21735_s7 + $0x100] sm:$0xff]  }
 0x47a   : > { %14984 = vmatprep.subr.bf16.mxu0 %v17983_v43 }
 0x47b   : > { %v17167_v62 = vadd.f32 %v14769_v44, %v19639_v59  ;;  %v19715_v54 = vadd.f32 %v17161_v29, %v14902_v38 }
 0x47d   : > { %v14770_v55 = vpop.f32.mrb[172].mxu0  ;;  %v19717_v34 = vadd.f32 %v17167_v62, %v14905_v6  ;;  %v14906_v11 = vpop.f32.mrb[204].mxu1  ;;  %v17984_v6 = vld [vmem:[%s21735_s7 + $0xc0] sm:$0xff]   ;;  %v17985_v62 = vld [vmem:[%s21735_s7 + $0x108] sm:$0xff]  }
 0x47e   : > { %v14771_v40 = vpop.f32.mrb[173].mxu0  ;;  %v14907_v26 = vpop.f32.mrb[205].mxu1  ;;  %14985 = vmatpush3.bf16.msra.mxu0 %v17984_v6 }
 0x47f   : > { %v14772_v47 = vadd.f32 %v14771_v40, %v14770_v55  ;;  %v14773_v27 = vpop.f32.mrb[174].mxu0  ;;  %v14908_v61 = vadd.f32 %v14907_v26, %v14906_v11  ;;  %v14909_v13 = vpop.f32.mrb[206].mxu1  ;;  %v17988_v40 = vld [vmem:[%s21735_s7] sm:$0xff]   ;;  %14986 = vmatprep.subr.bf16.mxu0 %v17985_v62  ;;  %v18001_v62 = vld [vmem:[%s21735_s7 + $0xd8] sm:$0xff]  }
 0x480   : > { %v14774_v60 = vpop.f32.mrb[175].mxu0  ;;  %v14910_v1 = vpop.f32.mrb[207].mxu1 }
 0x481   : > { %v17158_v8 = vadd.f32 %v14772_v47, %v19641_v12  ;;  %v14775_v31 = vadd.f32 %v14774_v60, %v14773_v27  ;;  %v14911_v37 = vadd.f32 %v14910_v1, %v14909_v13  ;;  %v17989_v27 = vld [vmem:[%s21735_s7 + $0x48] sm:$0xff]  }
 0x482   : > { %v17986_v13 = vld [vmem:[%s21735_s7 + $0xc8] sm:$0xff]  }
 0x483   : > { %v17164_v59 = vadd.f32 %v14775_v31, %v19643_v56  ;;  %v19721_v46 = vadd.f32 %v17158_v8, %v14908_v61  ;;  %14987 = vmatpush3.bf16.msra.mxu0 %v17986_v13 }
 0x485   : > { %v14776_v21 = vpop.f32.mrb[176].mxu0  ;;  %v19723_v24 = vadd.f32 %v17164_v59, %v14911_v37  ;;  %v14912_v14 = vpop.f32.mrb[208].mxu1  ;;  %v17990_v37 = vld [vmem:[%s21735_s7 + $0x8] sm:$0xff]   ;;  %v17991_v59 = vld [vmem:[%s21735_s7 + $0x110] sm:$0xff]  }
 0x486   : > { %v14777_v9 = vpop.f32.mrb[177].mxu0  ;;  %v14913_v19 = vpop.f32.mrb[209].mxu1  ;;  %14988 = vmatprep.subr.bf16.mxu0 %v17991_v59 }
 0x487   : > { %v14778_v16 = vadd.f32 %v14777_v9, %v14776_v21  ;;  %v14779_v2 = vpop.f32.mrb[178].mxu0  ;;  %v14914_v42 = vadd.f32 %v14913_v19, %v14912_v14  ;;  %v14915_v38 = vpop.f32.mrb[210].mxu1 }
 0x488   : > { %v14780_v3 = vpop.f32.mrb[179].mxu0  ;;  %v14916_v58 = vpop.f32.mrb[211].mxu1 }
 0x489   : > { %v17173_v12 = vadd.f32 %v14778_v16, %v19645_v48  ;;  %v14781_v33 = vadd.f32 %v14780_v3, %v14779_v2  ;;  %v14917_v29 = vadd.f32 %v14916_v58, %v14915_v38  ;;  %v17992_v16 = vld [vmem:[%s21735_s7 + $0x50] sm:$0xff]   ;;  %v17999_v38 = vld [vmem:[%s21735_s7 + $0x118] sm:$0xff]  }
 0x48a   : > { %v17993_v3 = vld [vmem:[%s21735_s7 + $0xd0] sm:$0xff]  }
 0x48b   : > { %v17179_v56 = vadd.f32 %v14781_v33, %v19647_v0  ;;  %v19727_v44 = vadd.f32 %v17173_v12, %v14914_v42  ;;  %v17987_v0 = vld [vmem:[%s21735_s7 + $0x40] sm:$0xff]   ;;  %14989 = vmatpush3.bf16.msra.mxu0 %v17993_v3 }
 0x48c   : > { %15120 = vmatprep.subr.bf16.mxu1 %v17987_v0  ;;  %14990 = vmatprep.subr.bf16.mxu0 %v17999_v38  ;;  %v18002_v38 = vld [vmem:[%s21735_s7 + $0x28] sm:$0xff]  }
 0x48d   : > { %v14782_v48 = vpop.f32.mrb[180].mxu0  ;;  %v19738_v55 = vadd.f32 %v17179_v56, %v14917_v29  ;;  %v14918_v47 = vpop.f32.mrb[212].mxu1  ;;  %15121 = vmatpush3.bf16.msra.mxu1 %v17988_v40 }
 0x48e   : > { %v14783_v11 = vpop.f32.mrb[181].mxu0  ;;  %v14919_v60 = vpop.f32.mrb[213].mxu1  ;;  %15122 = vmatprep.subr.bf16.mxu1 %v17989_v27 }
 0x48f   : > { %v14784_v26 = vadd.f32 %v14783_v11, %v14782_v48  ;;  %v14785_v61 = vpop.f32.mrb[182].mxu0  ;;  %v14920_v8 = vadd.f32 %v14919_v60, %v14918_v47  ;;  %v14921_v1 = vpop.f32.mrb[214].mxu1  ;;  %v17996_v11 = vld [vmem:[%s21735_s7 + $0x18] sm:$0xff]   ;;  %v18003_v47 = vld [vmem:[%s21735_s7 + $0x120] sm:$0xff]   ;;  %14991 = vmatpush3.bf16.msra.mxu0 %v18001_v62  ;;  %v18006_v62 = vld [vmem:[%s21735_s7 + $0x30] sm:$0xff]  }
 0x490   : > { %v14786_v31 = vpop.f32.mrb[183].mxu0  ;;  %v14922_v14 = vpop.f32.mrb[215].mxu1  ;;  %v17997_v60 = vld [vmem:[%s21735_s7 + $0x60] sm:$0xff]   ;;  %14992 = vmatprep.subr.bf16.mxu0 %v18003_v47 }
 0x491   : > { %v17170_v21 = vadd.f32 %v14784_v26, %v19649_v52  ;;  %v14787_v9 = vadd.f32 %v14786_v31, %v14785_v61  ;;  %v14923_v2 = vadd.f32 %v14922_v14, %v14921_v1  ;;  %15123 = vmatpush3.bf16.msra.mxu1 %v17990_v37  ;;  %v17994_v52 = vld [vmem:[%s21735_s7 + $0x10] sm:$0xff]   ;;  %v18005_v1 = vld [vmem:[%s21735_s7 + $0xe0] sm:$0xff]  }
 0x492   : > { %15124 = vmatprep.subr.bf16.mxu1 %v17992_v16 }
 0x493   : > { %v17176_v19 = vadd.f32 %v14787_v9, %v19651_v15  ;;  %v19763_v42 = vadd.f32 %v17170_v21, %v14920_v8  ;;  %v17995_v15 = vld [vmem:[%s21735_s7 + $0x58] sm:$0xff]   ;;  %14993 = vmatpush3.bf16.msra.mxu0 %v18005_v1 }
 0x495   : > { %v14788_v12 = vpop.f32.mrb[184].mxu0  ;;  %v19774_v33 = vadd.f32 %v17176_v19, %v14923_v2  ;;  %v14924_v29 = vpop.f32.mrb[216].mxu1  ;;  %15125 = vmatpush3.bf16.msra.mxu1 %v17994_v52 }
 0x496   : > { %v14789_v58 = vpop.f32.mrb[185].mxu0  ;;  %v14925_v6 = vpop.f32.mrb[217].mxu1  ;;  %15126 = vmatprep.subr.bf16.mxu1 %v17995_v15 }
 0x497   : > { %v14790_v56 = vadd.f32 %v14789_v58, %v14788_v12  ;;  %v14791_v43 = vpop.f32.mrb[186].mxu0  ;;  %v14926_v48 = vadd.f32 %v14925_v6, %v14924_v29  ;;  %v14927_v40 = vpop.f32.mrb[218].mxu1  ;;  %v18004_v29 = vld [vmem:[%s21735_s7 + $0x70] sm:$0xff]  }
 0x498   : > { %v14792_v0 = vpop.f32.mrb[187].mxu0  ;;  %v14928_v61 = vpop.f32.mrb[219].mxu1 }
 0x499   : > { %v17185_v27 = vadd.f32 %v14790_v56, %v19653_v7  ;;  %v14793_v26 = vadd.f32 %v14792_v0, %v14791_v43  ;;  %v14929_v13 = vadd.f32 %v14928_v61, %v14927_v40  ;;  %15127 = vmatpush3.bf16.msra.mxu1 %v17996_v11  ;;  %v17998_v7 = vld [vmem:[%s21735_s7 + $0x20] sm:$0xff]  }
 0x49a   : > { %15128 = vmatprep.subr.bf16.mxu1 %v17997_v60 }
 0x49b   : > { %v17191_v8 = vadd.f32 %v14793_v26, %v19655_v17  ;;  %v19793_v31 = vadd.f32 %v17185_v27, %v14926_v48  ;;  %v18000_v17 = vld [vmem:[%s21735_s7 + $0x68] sm:$0xff]  }
 0x49d   : > { %v14794_v37 = vpop.f32.mrb[188].mxu0  ;;  %v19801_v59 = vadd.f32 %v17191_v8, %v14929_v13  ;;  %v14930_v9 = vpop.f32.mrb[220].mxu1  ;;  %15129 = vmatpush3.bf16.msra.mxu1 %v17998_v7 }
 0x49e   : > { %v14795_v21 = vpop.f32.mrb[189].mxu0  ;;  %v14931_v2 = vpop.f32.mrb[221].mxu1  ;;  %15130 = vmatprep.subr.bf16.mxu1 %v18000_v17 }
 0x49f   : > { %v14796_v14 = vadd.f32 %v14795_v21, %v14794_v37  ;;  %v14797_v16 = vpop.f32.mrb[190].mxu0  ;;  %v14932_v19 = vadd.f32 %v14931_v2, %v14930_v9  ;;  %v14933_v52 = vpop.f32.mrb[222].mxu1 }
 0x4a0   : > { %v14798_v3 = vpop.f32.mrb[191].mxu0  ;;  %v14934_v58 = vpop.f32.mrb[223].mxu1 }
 0x4a1   : > { %v17182_v12 = vadd.f32 %v14796_v14, %v19657_v30  ;;  %v14799_v15 = vadd.f32 %v14798_v3, %v14797_v16  ;;  %v14935_v56 = vadd.f32 %v14934_v58, %v14933_v52  ;;  %15131 = vmatpush3.bf16.msra.mxu1 %v18002_v38 }
 0x4a2   : > { %15132 = vmatprep.subr.bf16.mxu1 %v18004_v29 }
 0x4a3   : > { %v17188_v43 = vadd.f32 %v14799_v15, %v19659_v63  ;;  %v19814_v6 = vadd.f32 %v17182_v12, %v14932_v19 }
 0x4a5   : > { %v14800_v48 = vpop.f32.mrb[192].mxu0  ;;  %v19819_v0 = vadd.f32 %v17188_v43, %v14935_v56  ;;  %v14936_v40 = vpop.f32.mrb[224].mxu1  ;;  %15133 = vmatpush3.bf16.msra.mxu1 %v18006_v62 }
 0x4a6   : > { %v14801_v30 = vpop.f32.mrb[193].mxu0  ;;  %v14937_v27 = vpop.f32.mrb[225].mxu1 }
 0x4a7   : > { %v14802_v11 = vadd.f32 %v14801_v30, %v14800_v48  ;;  %v14803_v47 = vpop.f32.mrb[194].mxu0  ;;  %v14938_v26 = vadd.f32 %v14937_v27, %v14936_v40  ;;  %v14939_v60 = vpop.f32.mrb[226].mxu1 }
 0x4a8   : > { %v14804_v61 = vpop.f32.mrb[195].mxu0  ;;  %v14940_v8 = vpop.f32.mrb[227].mxu1 }
 0x4a9   : > { %v17197_v63 = vadd.f32 %v14802_v11, %v19661_v49  ;;  %v14805_v13 = vadd.f32 %v14804_v61, %v14803_v47  ;;  %v14941_v1 = vadd.f32 %v14940_v8, %v14939_v60 }
 0x4ab   : > { %v17203_v7 = vadd.f32 %v14805_v13, %v19663_v36  ;;  %v19823_v37 = vadd.f32 %v17197_v63, %v14938_v26 }
 0x4ad   : > { %v14806_v17 = vpop.f32.mrb[196].mxu0  ;;  %v19825_v21 = vadd.f32 %v17203_v7, %v14941_v1  ;;  %v14942_v14 = vpop.f32.mrb[228].mxu1 }
 0x4ae   : > { %v14807_v9 = vpop.f32.mrb[197].mxu0  ;;  %v14943_v19 = vpop.f32.mrb[229].mxu1 }
 0x4af   : > { %v14808_v16 = vadd.f32 %v14807_v9, %v14806_v17  ;;  %v14809_v2 = vpop.f32.mrb[198].mxu0  ;;  %v14944_v3 = vadd.f32 %v14943_v19, %v14942_v14  ;;  %v14945_v38 = vpop.f32.mrb[230].mxu1 }
 0x4b0   : > { %v14810_v52 = vpop.f32.mrb[199].mxu0  ;;  %v14946_v15 = vpop.f32.mrb[231].mxu1 }
 0x4b1   : > { %v17194_v49 = vadd.f32 %v14808_v16, %v19665_v39  ;;  %v14811_v12 = vadd.f32 %v14810_v52, %v14809_v2  ;;  %v14947_v58 = vadd.f32 %v14946_v15, %v14945_v38  ;;  %v18009_v15 = vld [vmem:[%s21735_s7 + $0xe8] sm:$0xff]  }
 0x4b3   : > { %v17200_v36 = vadd.f32 %v14811_v12, %v19667_v20  ;;  %v19829_v29 = vadd.f32 %v17194_v49, %v14944_v3 }
 0x4b5   : > { %v14812_v56 = vpop.f32.mrb[200].mxu0  ;;  %v19831_v43 = vadd.f32 %v17200_v36, %v14947_v58  ;;  %v14948_v48 = vpop.f32.mrb[232].mxu1  ;;  %v18010_v58 = vld [vmem:[%s21735_s7 + $0x38] sm:$0xff]  }
 0x4b6   : > { %v14813_v62 = vpop.f32.mrb[201].mxu0  ;;  %v14949_v11 = vpop.f32.mrb[233].mxu1 }
 0x4b7   : > { %v14814_v30 = vadd.f32 %v14813_v62, %v14812_v56  ;;  %v14815_v40 = vpop.f32.mrb[202].mxu0  ;;  %v14950_v47 = vadd.f32 %v14949_v11, %v14948_v48  ;;  %v14951_v26 = vpop.f32.mrb[234].mxu1  ;;  %v5704_v62 = vld [vmem:[#allocation2 + $0x9] sm:$0xff] }
 0x4b8   : > { %v14816_v27 = vpop.f32.mrb[203].mxu0  ;;  %v14952_v60 = vpop.f32.mrb[235].mxu1  ;;  %v18011_v48 = vld [vmem:[%s21735_s7 + $0x130] sm:$0xff]  }
 0x4b9   : > { %v17209_v39 = vadd.f32 %v14814_v30, %v19669_v4  ;;  %v14817_v61 = vadd.f32 %v14816_v27, %v14815_v40  ;;  %v14953_v63 = vadd.f32 %v14952_v60, %v14951_v26  ;;  %v18007_v4 = vld [vmem:[%s21735_s7 + $0x128] sm:$0xff]   ;;  %v18201_v30 = vld [vmem:[#allocation2] sm:$0xff] }
 0x4ba   : > { %14994 = vmatprep.subr.bf16.mxu0 %v18007_v4  ;;  %v5671_v40 = vpack.c.bf16 %v18201_v30, %v18201_v30 }
 0x4bb   : > { %v17215_v20 = vadd.f32 %v14817_v61, %v19671_v50  ;;  %v19835_v13 = vadd.f32 %v17209_v39, %v14950_v47  ;;  %v18008_v50 = vld [vmem:[%s21735_s7 + $0x78] sm:$0xff]   ;;  %14995 = vmatpush3.bf16.msra.mxu0 %v18009_v15  ;;  %v19867_v61 = vld [vmem:[%s21734_s6] ss:$0 sm:$0xff] }
 0x4bc   : > { %15134 = vmatprep.subr.bf16.mxu1 %v18008_v50  ;;  %14996 = vmatprep.subr.bf16.mxu0 %v18011_v48 }
 0x4bd   : > { %v14818_v8 = vpop.f32.mrb[204].mxu0  ;;  %v19837_v1 = vadd.f32 %v17215_v20, %v14953_v63  ;;  %v14954_v17 = vpop.f32.mrb[236].mxu1  ;;  %15135 = vmatpush3.bf16.msra.mxu1 %v18010_v58  ;;  %v18013_v20 = vld [vmem:[%s21735_s7 + $0x138] sm:$0xff]  }
 0x4be   : > { %v14819_v7 = vpop.f32.mrb[205].mxu0  ;;  %v14955_v16 = vpop.f32.mrb[237].mxu1 }
 0x4bf   : > { %v14820_v9 = vadd.f32 %v14819_v7, %v14818_v8  ;;  %v14821_v14 = vpop.f32.mrb[206].mxu0  ;;  %v14956_v2 = vadd.f32 %v14955_v16, %v14954_v17  ;;  %v14957_v3 = vpop.f32.mrb[238].mxu1 }
 0x4c0   : > { %v14822_v19 = vpop.f32.mrb[207].mxu0  ;;  %v14958_v49 = vpop.f32.mrb[239].mxu1 }
 0x4c1   : > { %v17206_v52 = vadd.f32 %v14820_v9, %v19673_v10  ;;  %v14823_v38 = vadd.f32 %v14822_v19, %v14821_v14  ;;  %v14959_v12 = vadd.f32 %v14958_v49, %v14957_v3  ;;  %v5703_v10 = vld [vmem:[#allocation2 + $0x1] sm:$0xff]  ;;  %v18014_v9 = vld [vmem:[%s21735_s7 + $0xf8] sm:$0xff]  }
 0x4c2   : > { %v5735_v47 = vpack.c.bf16 %v5704_v62, %v5703_v10 }
 0x4c3   : > { %v17212_v36 = vadd.f32 %v14823_v38, %v19675_v32  ;;  %v19853_v56 = vadd.f32 %v17206_v52, %v14956_v2  ;;  %v18012_v32 = vld [vmem:[%s21735_s7 + $0xf0] sm:$0xff]  }
 0x4c4   : > { %6858 = vmatprep.mubr.bf16.mxu1 %v5735_v47  ;;  %14997 = vmatpush3.bf16.msra.mxu0 %v18012_v32 }
 0x4c5   : > { %v19858_v11 = vadd.f32 %v17212_v36, %v14959_v12  ;;  %v16500_v27 = vpop.f32.mrb[144].mxu1  ;;  %6859 = vmatmul.mubr.bf16.vlgmr.msra.gmra.mrb[240].mxu1 %v5671_v40  ;;  %14998 = vmatprep.subr.bf16.mxu0 %v18013_v20 }
 0x4c6   : > { %v17124_v26 = vadd.f32 %v19685_v25, %v16500_v27  ;;  %v5248_v39 = vpop.f32.mrb[145].mxu1 }
 0x4c7   : > { %v17127_v60 = vadd.f32 %v19679_v51, %v5248_v39  ;;  %v16501_v63 = vpop.f32.mrb[146].mxu1 }
 0x4c8   : > { %v17130_v8 = vadd.f32 %v19687_v28, %v16501_v63  ;;  %v5251_v7 = vpop.f32.mrb[147].mxu1  ;;  %v5416_v16 = vadd.f32 %v17124_v26, %v19867_v61  ;;  %14999 = vmatpush3.bf16.msra.mxu0 %v18014_v9 }
 0x4c9   : > { %v17133_v25 = vadd.f32 %v19681_v57, %v5251_v7  ;;  %v5414_v17 = vadd.f32 %v17127_v60, %v19867_v61 }
 0x4ca   : > { %v5417_v57 = vadd.f32 %v17130_v8, %v19867_v61  ;;  %v5448_v52 = vmax.f32 %v5416_v16, 0.0 }
 0x4cb   : > { %v5446_v51 = vmax.f32 %v5414_v17, 0.0  ;;  %v5415_v14 = vadd.f32 %v17133_v25, %v19867_v61 }
 0x4cc   : > { %v5449_v15 = vmax.f32 %v5417_v57, 0.0 }
 0x4cd   : > { %v16504_v2 = vpop.f32.mrb[148].mxu1  ;;  %5510 = vrot.lane.b32.xlu0 %v5446_v51, %s18215_s30  ;;  %v5447_v28 = vmax.f32 %v5415_v14, 0.0 }
 0x4ce   : > { %v17136_v19 = vadd.f32 %v19697_v22, %v16504_v2  ;;  %v5264_v3 = vpop.f32.mrb[149].mxu1 }
 0x4cf   : > { %v17139_v4 = vadd.f32 %v19691_v18, %v5264_v3  ;;  %v16505_v50 = vpop.f32.mrb[150].mxu1  ;;  %5512 = vrot.lane.b32.xlu1 %v5447_v28, %s18215_s30 }
 0x4d0   : > { %v17142_v38 = vadd.f32 %v19699_v53, %v16505_v50  ;;  %v5267_v49 = vpop.f32.mrb[151].mxu1  ;;  %v5420_v18 = vadd.f32 %v17136_v19, %v19867_v61 }
 0x4d1   : > { %v17145_v12 = vadd.f32 %v19693_v41, %v5267_v49  ;;  %5514 = vrot.lane.b32.xlu0 %v5448_v52, %s18215_s30  ;;  %v5418_v58 = vadd.f32 %v17139_v4, %v19867_v61 }
 0x4d2   : > { %v5421_v53 = vadd.f32 %v17142_v38, %v19867_v61  ;;  %v5452_v47 = vmax.f32 %v5420_v18, 0.0 }
 0x4d3   : > { %5516 = vrot.lane.b32.xlu1 %v5449_v15, %s18215_s30  ;;  %v5450_v22 = vmax.f32 %v5418_v58, 0.0  ;;  %v5419_v36 = vadd.f32 %v17145_v12, %v19867_v61 }
 0x4d4   : > { %v5453_v39 = vmax.f32 %v5421_v53, 0.0 }
 0x4d5   : > { %v16508_v10 = vpop.f32.mrb[152].mxu1  ;;  %5518 = vrot.lane.b32.xlu0 %v5450_v22, %s18215_s30  ;;  %v5451_v62 = vmax.f32 %v5419_v36, 0.0 }
 0x4d6   : > { %v17148_v41 = vadd.f32 %v19709_v23, %v16508_v10  ;;  %v5280_v48 = vpop.f32.mrb[153].mxu1 }
 0x4d7   : > { %v17151_v30 = vadd.f32 %v19703_v5, %v5280_v48  ;;  %v16509_v40 = vpop.f32.mrb[154].mxu1  ;;  %5520 = vrot.lane.b32.xlu1 %v5451_v62, %s18215_s30 }
 0x4d8   : > { %v17154_v27 = vadd.f32 %v19711_v45, %v16509_v40  ;;  %v5283_v32 = vpop.f32.mrb[155].mxu1  ;;  %v5424_v5 = vadd.f32 %v17148_v41, %v19867_v61 }
 0x4d9   : > { %v17157_v26 = vadd.f32 %v19705_v35, %v5283_v32  ;;  %5522 = vrot.lane.b32.xlu0 %v5452_v47, %s18215_s30  ;;  %v5422_v60 = vadd.f32 %v17151_v30, %v19867_v61 }
 0x4da   : > { %v5425_v45 = vadd.f32 %v17154_v27, %v19867_v61  ;;  %v5456_v9 = vmax.f32 %v5424_v5, 0.0 }
 0x4db   : > { %5524 = vrot.lane.b32.xlu1 %v5453_v39, %s18215_s30  ;;  %v5454_v23 = vmax.f32 %v5422_v60, 0.0  ;;  %v5423_v63 = vadd.f32 %v17157_v26, %v19867_v61 }
 0x4dc   : > { %v5457_v2 = vmax.f32 %v5425_v45, 0.0 }
 0x4dd   : > { %v16512_v20 = vpop.f32.mrb[156].mxu1  ;;  %5526 = vrot.lane.b32.xlu0 %v5454_v23, %s18215_s30  ;;  %v5455_v8 = vmax.f32 %v5423_v63, 0.0 }
 0x4de   : > { %v17160_v35 = vadd.f32 %v19721_v46, %v16512_v20  ;;  %v5296_v7 = vpop.f32.mrb[157].mxu1 }
 0x4df   : > { %v17163_v25 = vadd.f32 %v19715_v54, %v5296_v7  ;;  %v16513_v17 = vpop.f32.mrb[158].mxu1  ;;  %5528 = vrot.lane.b32.xlu1 %v5455_v8, %s18215_s30 }
 0x4e0   : > { %v17166_v51 = vadd.f32 %v19723_v24, %v16513_v17  ;;  %v5299_v14 = vpop.f32.mrb[159].mxu1  ;;  %v5428_v54 = vadd.f32 %v17160_v35, %v19867_v61 }
 0x4e1   : > { %v17169_v16 = vadd.f32 %v19717_v34, %v5299_v14  ;;  %5530 = vrot.lane.b32.xlu0 %v5456_v9, %s18215_s30  ;;  %v5426_v28 = vadd.f32 %v17163_v25, %v19867_v61 }
 0x4e2   : > { %v5429_v24 = vadd.f32 %v17166_v51, %v19867_v61  ;;  %v5460_v38 = vmax.f32 %v5428_v54, 0.0 }
 0x4e3   : > { %5532 = vrot.lane.b32.xlu1 %v5457_v2, %s18215_s30  ;;  %v5458_v46 = vmax.f32 %v5426_v28, 0.0  ;;  %v5427_v57 = vadd.f32 %v17169_v16, %v19867_v61 }
 0x4e4   : > { %v5461_v58 = vmax.f32 %v5429_v24, 0.0 }
 0x4e5   : > { %v16516_v19 = vpop.f32.mrb[160].mxu1  ;;  %5534 = vrot.lane.b32.xlu0 %v5458_v46, %s18215_s30  ;;  %v5459_v3 = vmax.f32 %v5427_v57, 0.0 }
 0x4e6   : > { %v17172_v34 = vadd.f32 %v19763_v42, %v16516_v19  ;;  %v5312_v4 = vpop.f32.mrb[161].mxu1 }
 0x4e7   : > { %v17175_v50 = vadd.f32 %v19727_v44, %v5312_v4  ;;  %v16517_v52 = vpop.f32.mrb[162].mxu1  ;;  %5536 = vrot.lane.b32.xlu1 %v5459_v3, %s18215_s30 }
 0x4e8   : > { %v17178_v49 = vadd.f32 %v19774_v33, %v16517_v52  ;;  %v5315_v12 = vpop.f32.mrb[163].mxu1  ;;  %v5432_v44 = vadd.f32 %v17172_v34, %v19867_v61 }
 0x4e9   : > { %v17181_v15 = vadd.f32 %v19738_v55, %v5315_v12  ;;  %5538 = vrot.lane.b32.xlu0 %v5460_v38, %s18215_s30  ;;  %v5430_v22 = vadd.f32 %v17175_v50, %v19867_v61  ;;  %v18015_v50 = vld [vmem:[%s21735_s7 + $0x140] sm:$0xff]  }
 0x4ea   : > { %v5433_v33 = vadd.f32 %v17178_v49, %v19867_v61  ;;  %v5464_v48 = vmax.f32 %v5432_v44, 0.0  ;;  %16530 = vmatprep.subr.bf16.mxu0 %v18015_v50 }
 0x4eb   : > { %5540 = vrot.lane.b32.xlu1 %v5461_v58, %s18215_s30  ;;  %v5462_v42 = vmax.f32 %v5430_v22, 0.0  ;;  %v5431_v36 = vadd.f32 %v17181_v15, %v19867_v61 }
 0x4ec   : > { %v5465_v27 = vmax.f32 %v5433_v33, 0.0  ;;  %v18016_v33 = vld [vmem:[%s21735_s7 + $0x148] sm:$0xff]  }
 0x4ed   : > { %v16520_v18 = vpop.f32.mrb[164].mxu1  ;;  %5542 = vrot.lane.b32.xlu0 %v5462_v42, %s18215_s30  ;;  %v5463_v10 = vmax.f32 %v5431_v36, 0.0 }
 0x4ee   : > { %v17184_v55 = vadd.f32 %v19814_v6, %v16520_v18  ;;  %v5328_v62 = vpop.f32.mrb[165].mxu1 }
 0x4ef   : > { %v17187_v53 = vadd.f32 %v19793_v31, %v5328_v62  ;;  %v16521_v41 = vpop.f32.mrb[166].mxu1  ;;  %5544 = vrot.lane.b32.xlu1 %v5463_v10, %s18215_s30 }
 0x4f0   : > { %v17190_v30 = vadd.f32 %v19819_v0, %v16521_v41  ;;  %v5331_v40 = vpop.f32.mrb[167].mxu1  ;;  %v5436_v31 = vadd.f32 %v17184_v55, %v19867_v61 }
 0x4f1   : > { %v17193_v47 = vadd.f32 %v19801_v59, %v5331_v40  ;;  %5546 = vrot.lane.b32.xlu0 %v5464_v48, %s18215_s30  ;;  %v5434_v32 = vadd.f32 %v17187_v53, %v19867_v61 }
 0x4f2   : > { %v5437_v0 = vadd.f32 %v17190_v30, %v19867_v61  ;;  %v5468_v20 = vmax.f32 %v5436_v31, 0.0  ;;  %v18017_v30 = vld [vmem:[%s21735_s7 + $0x150] sm:$0xff]  }
 0x4f3   : > { %5548 = vrot.lane.b32.xlu1 %v5465_v27, %s18215_s30  ;;  %v5466_v6 = vmax.f32 %v5434_v32, 0.0  ;;  %v5435_v26 = vadd.f32 %v17193_v47, %v19867_v61 }
 0x4f4   : > { %v5469_v7 = vmax.f32 %v5437_v0, 0.0 }
 0x4f5   : > { %v16524_v39 = vpop.f32.mrb[168].mxu1  ;;  %5550 = vrot.lane.b32.xlu0 %v5466_v6, %s18215_s30  ;;  %v5467_v60 = vmax.f32 %v5435_v26, 0.0 }
 0x4f6   : > { %v17196_v59 = vadd.f32 %v19829_v29, %v16524_v39  ;;  %v5344_v23 = vpop.f32.mrb[169].mxu1 }
 0x4f7   : > { %v17199_v63 = vadd.f32 %v19823_v37, %v5344_v23  ;;  %v16525_v5 = vpop.f32.mrb[170].mxu1  ;;  %5552 = vrot.lane.b32.xlu1 %v5467_v60, %s18215_s30  ;;  %v18018_v60 = vld [vmem:[%s21735_s7 + $0x158] sm:$0xff]  }
 0x4f8   : > { %v17202_v8 = vadd.f32 %v19831_v43, %v16525_v5  ;;  %v5347_v45 = vpop.f32.mrb[171].mxu1  ;;  %v5440_v37 = vadd.f32 %v17196_v59, %v19867_v61 }
 0x4f9   : > { %v17205_v35 = vadd.f32 %v19825_v21, %v5347_v45  ;;  %5554 = vrot.lane.b32.xlu0 %v5468_v20, %s18215_s30  ;;  %v5438_v25 = vadd.f32 %v17199_v63, %v19867_v61  ;;  %v18019_v63 = vld [vmem:[%s21735_s7 + $0x160] sm:$0xff]  }
 0x4fa   : > { %v5441_v43 = vadd.f32 %v17202_v8, %v19867_v61  ;;  %v5472_v28 = vmax.f32 %v5440_v37, 0.0 }
 0x4fb   : > { %5556 = vrot.lane.b32.xlu1 %v5469_v7, %s18215_s30  ;;  %v5470_v29 = vmax.f32 %v5438_v25, 0.0  ;;  %v5439_v17 = vadd.f32 %v17205_v35, %v19867_v61 }
 0x4fc   : > { %v5473_v19 = vmax.f32 %v5441_v43, 0.0 }
 0x4fd   : > { %v16528_v9 = vpop.f32.mrb[172].mxu1  ;;  %5558 = vrot.lane.b32.xlu0 %v5470_v29, %s18215_s30  ;;  %v5471_v51 = vmax.f32 %v5439_v17, 0.0  ;;  %v18020_v29 = vld [vmem:[%s21735_s7 + $0x168] sm:$0xff]  }
 0x4fe   : > { %v17208_v21 = vadd.f32 %v19853_v56, %v16528_v9  ;;  %v5360_v14 = vpop.f32.mrb[173].mxu1 }
 0x4ff   : > { %v17211_v16 = vadd.f32 %v19835_v13, %v5360_v14  ;;  %v16529_v2 = vpop.f32.mrb[174].mxu1  ;;  %5560 = vrot.lane.b32.xlu1 %v5471_v51, %s18215_s30  ;;  %v18021_v51 = vld [vmem:[%s21735_s7 + $0x170] sm:$0xff]  }
 0x500   : > { %v17214_v46 = vadd.f32 %v19858_v11, %v16529_v2  ;;  %v5363_v57 = vpop.f32.mrb[175].mxu1  ;;  %v5444_v13 = vadd.f32 %v17208_v21, %v19867_v61 }
 0x501   : > { %v17217_v54 = vadd.f32 %v19837_v1, %v5363_v57  ;;  %5562 = vrot.lane.b32.xlu0 %v5472_v28, %s18215_s30  ;;  %v5442_v3 = vadd.f32 %v17211_v16, %v19867_v61  ;;  %v18022_v57 = vld [vmem:[%s21735_s7 + $0x178] sm:$0xff]  }
 0x502   : > { %v5445_v11 = vadd.f32 %v17214_v46, %v19867_v61  ;;  %v5476_v1 = vmax.f32 %v5444_v13, 0.0 }
 0x503   : > { %5564 = vrot.lane.b32.xlu1 %v5473_v19, %s18215_s30  ;;  %v5474_v56 = vmax.f32 %v5442_v3, 0.0  ;;  %v5443_v24 = vadd.f32 %v17217_v54, %v19867_v61 }
 0x504   : > { %v5477_v4 = vmax.f32 %v5445_v11, 0.0 }
 0x505   : > { %5566 = vrot.lane.b32.xlu0 %v5474_v56, %s18215_s30  ;;  %v5475_v34 = vmax.f32 %v5443_v24, 0.0 }
 0x507   : > { %5568 = vrot.lane.b32.xlu1 %v5475_v34, %s18215_s30 }
 0x509   : > { %5570 = vrot.lane.b32.xlu0 %v5476_v1, %s18215_s30 }
 0x50b   : > { %5572 = vrot.lane.b32.xlu1 %v5477_v4, %s18215_s30 }
 0x53f   : > { %v5511_v52 = vpop.permute.xlu0 %5510 }
 0x540   : > { %5607 = vst.msk [vmem:[#allocation2 + $0x19] sm:$0xff] %vm5606_vm2, %v5511_v52  ;;  %v20021_v52 = vld [vmem:[%s21735_s7 + $0x80] sm:$0xff]  }
 0x541   : > { %v5513_v38 = vpop.permute.xlu1 %5512 }
 0x542   : > { %5608 = vst.msk [vmem:[#allocation2 + $0x21] sm:$0xff] %vm5606_vm2, %v5513_v38 }
 0x543   : > { %v5515_v61 = vpop.permute.xlu0 %5514 }
 0x544   : > { %5609 = vst.msk [vmem:[#allocation2 + $0x31] sm:$0xff] %vm5606_vm2, %v5515_v61 }
 0x545   : > { %v5517_v49 = vpop.permute.xlu1 %5516 }
 0x546   : > { %5610 = vst.msk [vmem:[#allocation2 + $0x39] sm:$0xff] %vm5606_vm2, %v5517_v49 }
 0x547   : > { %v5519_v12 = vpop.permute.xlu0 %5518  ;;  %v5991_v15 = vld [vmem:[#allocation2 + $0x19] sm:$0xff] }
 0x548   : > { %5611 = vst.msk [vmem:[#allocation2 + $0x49] sm:$0xff] %vm5606_vm2, %v5519_v12  ;;  %v5927_v42 = vld [vmem:[#allocation2 + $0x18] sm:$0xff] }
 0x549   : > { %v5521_v58 = vpop.permute.xlu1 %5520  ;;  %v5992_v22 = vld [vmem:[#allocation2 + $0x21] sm:$0xff] }
 0x54a   : > { %v5928_v36 = vld [vmem:[#allocation2 + $0x20] sm:$0xff]  ;;  %v6023_v44 = vpack.c.bf16 %v5992_v22, %v5991_v15  ;;  %5612 = vst.msk [vmem:[#allocation2 + $0x51] sm:$0xff] %vm5606_vm2, %v5521_v58 }
 0x54b   : > { %v5959_v18 = vpack.c.bf16 %v5928_v36, %v5927_v42  ;;  %v5523_v10 = vpop.permute.xlu0 %5522  ;;  %v5993_v62 = vld [vmem:[#allocation2 + $0x31] sm:$0xff] }
 0x54c   : > { %6392 = vmatprep.mubr.bf16.mxu0 %v6023_v44  ;;  %5613 = vst.msk [vmem:[#allocation2 + $0x61] sm:$0xff] %vm5606_vm2, %v5523_v10  ;;  %6866 = vmatprep.mubr.bf16.mxu1 %v6023_v44  ;;  %v5929_v32 = vld [vmem:[#allocation2 + $0x30] sm:$0xff] }
 0x54d   : > { %v5525_v55 = vpop.permute.xlu1 %5524  ;;  %6393 = vmatmul.mubr.bf16.vlgmr.msra.gmra.mrb[208].mxu0 %v5959_v18  ;;  %6867 = vmatmul.mubr.bf16.gmra.mrb[244].mxu1 %v5959_v18  ;;  %v5994_v53 = vld [vmem:[#allocation2 + $0x39] sm:$0xff] }
 0x54e   : > { %5614 = vst.msk [vmem:[#allocation2 + $0x69] sm:$0xff] %vm5606_vm2, %v5525_v55  ;;  %v6024_v41 = vpack.c.bf16 %v5994_v53, %v5993_v62  ;;  %16531 = vmatpush3.bf16.msra.mxu0 %v18015_v50  ;;  %v5930_v40 = vld [vmem:[#allocation2 + $0x38] sm:$0xff] }
 0x54f   : > { %v5527_v48 = vpop.permute.xlu0 %5526  ;;  %16532 = vmatprep.subr.bf16.mxu0 %v18016_v33  ;;  %v5960_v26 = vpack.c.bf16 %v5930_v40, %v5929_v32  ;;  %v5995_v31 = vld [vmem:[#allocation2 + $0x49] sm:$0xff] }
 0x550   : > { %5615 = vst.msk [vmem:[#allocation2 + $0x79] sm:$0xff] %vm5606_vm2, %v5527_v48  ;;  %6400 = vmatprep.mubr.bf16.mxu0 %v6024_v41  ;;  %6874 = vmatprep.mubr.bf16.mxu1 %v6024_v41  ;;  %v5931_v8 = vld [vmem:[#allocation2 + $0x48] sm:$0xff] }
 0x551   : > { %v5529_v47 = vpop.permute.xlu1 %5528  ;;  %v5996_v27 = vld [vmem:[#allocation2 + $0x51] sm:$0xff] }
 0x552   : > { %5616 = vst.msk [vmem:[#allocation2 + $0x81] sm:$0xff] %vm5606_vm2, %v5529_v47  ;;  %16533 = vmatpush3.bf16.msra.mxu0 %v18016_v33  ;;  %v6025_v39 = vpack.c.bf16 %v5996_v27, %v5995_v31  ;;  %v5932_v23 = vld [vmem:[#allocation2 + $0x50] sm:$0xff] }
 0x553   : > { %v5531_v6 = vpop.permute.xlu0 %5530  ;;  %16534 = vmatprep.subr.bf16.mxu0 %v18017_v30  ;;  %v5961_v35 = vpack.c.bf16 %v5932_v23, %v5931_v8  ;;  %v5997_v7 = vld [vmem:[#allocation2 + $0x61] sm:$0xff] }
 0x554   : > { %5617 = vst.msk [vmem:[#allocation2 + $0x91] sm:$0xff] %vm5606_vm2, %v5531_v6  ;;  %v5933_v14 = vld [vmem:[#allocation2 + $0x60] sm:$0xff] }
 0x555   : > { %v5533_v0 = vpop.permute.xlu1 %5532  ;;  %6401 = vmatmul.mubr.bf16.gmra.mrb[212].mxu0 %v5960_v26  ;;  %6875 = vmatmul.mubr.bf16.gmra.mrb[248].mxu1 %v5960_v26  ;;  %v5998_v20 = vld [vmem:[#allocation2 + $0x69] sm:$0xff] }
 0x556   : > { %5618 = vst.msk [vmem:[#allocation2 + $0x99] sm:$0xff] %vm5606_vm2, %v5533_v0  ;;  %6408 = vmatprep.mubr.bf16.mxu0 %v6025_v39  ;;  %6882 = vmatprep.mubr.bf16.mxu1 %v6025_v39  ;;  %v6026_v25 = vpack.c.bf16 %v5998_v20, %v5997_v7  ;;  %v5934_v9 = vld [vmem:[#allocation2 + $0x68] sm:$0xff] }
 0x557   : > { %v5535_v59 = vpop.permute.xlu0 %5534  ;;  %16535 = vmatpush3.bf16.msra.mxu0 %v18017_v30  ;;  %v5962_v2 = vpack.c.bf16 %v5934_v9, %v5933_v14  ;;  %v5999_v28 = vld [vmem:[#allocation2 + $0x79] sm:$0xff] }
 0x558   : > { %5619 = vst.msk [vmem:[#allocation2 + $0xa9] sm:$0xff] %vm5606_vm2, %v5535_v59  ;;  %16536 = vmatprep.subr.bf16.mxu0 %v18018_v60  ;;  %v5935_v13 = vld [vmem:[#allocation2 + $0x78] sm:$0xff] }
 0x559   : > { %v5537_v5 = vpop.permute.xlu1 %5536  ;;  %v6000_v21 = vld [vmem:[#allocation2 + $0x81] sm:$0xff] }
 0x55a   : > { %5620 = vst.msk [vmem:[#allocation2 + $0xb1] sm:$0xff] %vm5606_vm2, %v5537_v5  ;;  %v6027_v46 = vpack.c.bf16 %v6000_v21, %v5999_v28  ;;  %v5936_v3 = vld [vmem:[#allocation2 + $0x80] sm:$0xff] }
 0x55b   : > { %v5539_v45 = vpop.permute.xlu0 %5538  ;;  %16537 = vmatpush3.bf16.msra.mxu0 %v18018_v60  ;;  %v5963_v11 = vpack.c.bf16 %v5936_v3, %v5935_v13  ;;  %v6001_v1 = vld [vmem:[#allocation2 + $0x91] sm:$0xff] }
 0x55c   : > { %5621 = vst.msk [vmem:[#allocation2 + $0xc1] sm:$0xff] %vm5606_vm2, %v5539_v45  ;;  %16538 = vmatprep.subr.bf16.mxu0 %v18019_v63  ;;  %v5937_v15 = vld [vmem:[#allocation2 + $0x90] sm:$0xff] }
 0x55d   : > { %v5541_v17 = vpop.permute.xlu1 %5540  ;;  %6409 = vmatmul.mubr.bf16.gmra.mrb[216].mxu0 %v5961_v35  ;;  %6883 = vmatmul.mubr.bf16.gmra.mrb[252].mxu1 %v5961_v35  ;;  %v6002_v24 = vld [vmem:[#allocation2 + $0x99] sm:$0xff] }
 0x55e   : > { %5622 = vst.msk [vmem:[#allocation2 + $0xc9] sm:$0xff] %vm5606_vm2, %v5541_v17  ;;  %6416 = vmatprep.mubr.bf16.mxu0 %v6026_v25  ;;  %6890 = vmatprep.mubr.bf16.mxu1 %v6026_v25  ;;  %v6028_v4 = vpack.c.bf16 %v6002_v24, %v6001_v1  ;;  %v5938_v61 = vld [vmem:[#allocation2 + $0x98] sm:$0xff] }
 0x55f   : > { %v5543_v37 = vpop.permute.xlu0 %5542  ;;  %16539 = vmatpush3.bf16.msra.mxu0 %v18019_v63  ;;  %v5964_v22 = vpack.c.bf16 %v5938_v61, %v5937_v15  ;;  %v6003_v42 = vld [vmem:[#allocation2 + $0xa9] sm:$0xff] }
 0x560   : > { %5623 = vst.msk [vmem:[#allocation2 + $0xd9] sm:$0xff] %vm5606_vm2, %v5543_v37  ;;  %16540 = vmatprep.subr.bf16.mxu0 %v18020_v29  ;;  %v5939_v62 = vld [vmem:[#allocation2 + $0xa8] sm:$0xff] }
 0x561   : > { %v5545_v43 = vpop.permute.xlu1 %5544  ;;  %v6004_v12 = vld [vmem:[#allocation2 + $0xb1] sm:$0xff] }
 0x562   : > { %5624 = vst.msk [vmem:[#allocation2 + $0xe1] sm:$0xff] %vm5606_vm2, %v5545_v43  ;;  %v6029_v36 = vpack.c.bf16 %v6004_v12, %v6003_v42  ;;  %v5940_v10 = vld [vmem:[#allocation2 + $0xb0] sm:$0xff] }
 0x563   : > { %v5547_v16 = vpop.permute.xlu0 %5546  ;;  %16541 = vmatpush3.bf16.msra.mxu0 %v18020_v29  ;;  %v5965_v41 = vpack.c.bf16 %v5940_v10, %v5939_v62  ;;  %v6005_v48 = vld [vmem:[#allocation2 + $0xc1] sm:$0xff] }
 0x564   : > { %5625 = vst.msk [vmem:[#allocation2 + $0xf1] sm:$0xff] %vm5606_vm2, %v5547_v16  ;;  %16542 = vmatprep.subr.bf16.mxu0 %v18021_v51  ;;  %v5941_v32 = vld [vmem:[#allocation2 + $0xc0] sm:$0xff] }
 0x565   : > { %v5549_v54 = vpop.permute.xlu1 %5548  ;;  %6417 = vmatmul.mubr.bf16.gmra.mrb[220].mxu0 %v5962_v2  ;;  %6891 = vmatmul.mubr.bf16.gmra.mrb[0].mxu1 %v5962_v2  ;;  %v6006_v55 = vld [vmem:[#allocation2 + $0xc9] sm:$0xff] }
 0x566   : > { %5626 = vst.msk [vmem:[#allocation2 + $0xf9] sm:$0xff] %vm5606_vm2, %v5549_v54  ;;  %6424 = vmatprep.mubr.bf16.mxu0 %v6027_v46  ;;  %6898 = vmatprep.mubr.bf16.mxu1 %v6027_v46  ;;  %v6030_v30 = vpack.c.bf16 %v6006_v55, %v6005_v48  ;;  %v5942_v47 = vld [vmem:[#allocation2 + $0xc8] sm:$0xff]  ;;  %v6057_v48 = vld [vmem:[#allocation2 + $0x32] sm:$0xff] }
 0x567   : > { %v5551_v19 = vpop.permute.xlu0 %5550  ;;  %16543 = vmatpush3.bf16.msra.mxu0 %v18021_v51  ;;  %v5966_v6 = vpack.c.bf16 %v5942_v47, %v5941_v32  ;;  %v6007_v26 = vld [vmem:[#allocation2 + $0xd9] sm:$0xff]  ;;  %v6056_v55 = vld [vmem:[#allocation2 + $0x22] sm:$0xff] }
 0x568   : > { %5627 = vst.msk [vmem:[#allocation2 + $0x109] sm:$0xff] %vm5606_vm2, %v5551_v19  ;;  %16544 = vmatprep.subr.bf16.mxu0 %v18022_v57  ;;  %v5943_v0 = vld [vmem:[#allocation2 + $0xd8] sm:$0xff]  ;;  %v18024_v32 = vld [vmem:[%s21735_s7 + $0x88] sm:$0xff]  }
 0x569   : > { %v5553_v56 = vpop.permute.xlu1 %5552  ;;  %v6008_v27 = vld [vmem:[#allocation2 + $0xe1] sm:$0xff]  ;;  %v6060_v47 = vld [vmem:[#allocation2 + $0x52] sm:$0xff] }
 0x56a   : > { %5628 = vst.msk [vmem:[#allocation2 + $0x111] sm:$0xff] %vm5606_vm2, %v5553_v56  ;;  %v6031_v31 = vpack.c.bf16 %v6008_v27, %v6007_v26  ;;  %v5944_v39 = vld [vmem:[#allocation2 + $0xe0] sm:$0xff]  ;;  %v18025_v26 = vld [vmem:[%s21735_s7 + $0x90] sm:$0xff]  }
 0x56b   : > { %v5555_v34 = vpop.permute.xlu0 %5554  ;;  %16545 = vmatpush3.bf16.msra.mxu0 %v18022_v57  ;;  %v5967_v59 = vpack.c.bf16 %v5944_v39, %v5943_v0  ;;  %v6009_v23 = vld [vmem:[#allocation2 + $0xf1] sm:$0xff]  ;;  %v6064_v0 = vld [vmem:[#allocation2 + $0x82] sm:$0xff] }
 0x56c   : > { %5629 = vst.msk [vmem:[#allocation2 + $0x121] sm:$0xff] %vm5606_vm2, %v5555_v34  ;;  %16578 = vmatprep.subr.bf16.mxu0 %v20021_v52  ;;  %v5945_v8 = vld [vmem:[#allocation2 + $0xf0] sm:$0xff] }
 0x56d   : > { %v5557_v50 = vpop.permute.xlu1 %5556  ;;  %6425 = vmatmul.mubr.bf16.gmra.mrb[224].mxu0 %v5963_v11  ;;  %6899 = vmatmul.mubr.bf16.gmra.mrb[4].mxu1 %v5963_v11  ;;  %v6010_v60 = vld [vmem:[#allocation2 + $0xf9] sm:$0xff]  ;;  %v6062_v39 = vld [vmem:[#allocation2 + $0x6a] sm:$0xff] }
 0x56e   : > { %5630 = vst.msk [vmem:[#allocation2 + $0x129] sm:$0xff] %vm5606_vm2, %v5557_v50  ;;  %6432 = vmatprep.mubr.bf16.mxu0 %v6028_v4  ;;  %6906 = vmatprep.mubr.bf16.mxu1 %v6028_v4  ;;  %v6032_v63 = vpack.c.bf16 %v6010_v60, %v6009_v23  ;;  %v5946_v5 = vld [vmem:[#allocation2 + $0xf8] sm:$0xff] }
 0x56f   : > { %v5559_v38 = vpop.permute.xlu0 %5558  ;;  %v5968_v45 = vpack.c.bf16 %v5946_v5, %v5945_v8  ;;  %v6011_v35 = vld [vmem:[#allocation2 + $0x109] sm:$0xff]  ;;  %v6063_v60 = vld [vmem:[#allocation2 + $0x7a] sm:$0xff]  ;;  %v6065_v5 = vld [vmem:[#allocation2 + $0x92] sm:$0xff] }
 0x570   : > { %5631 = vst.msk [vmem:[#allocation2 + $0x139] sm:$0xff] %vm5606_vm2, %v5559_v38  ;;  %v5947_v17 = vld [vmem:[#allocation2 + $0x108] sm:$0xff]  ;;  %v18026_v23 = vld [vmem:[%s21735_s7 + $0x98] sm:$0xff]  }
 0x571   : > { %v5561_v49 = vpop.permute.xlu1 %5560  ;;  %v6012_v20 = vld [vmem:[#allocation2 + $0x111] sm:$0xff] }
 0x572   : > { %5632 = vst.msk [vmem:[#allocation2 + $0x141] sm:$0xff] %vm5606_vm2, %v5561_v49  ;;  %v6033_v7 = vpack.c.bf16 %v6012_v20, %v6011_v35  ;;  %v5948_v25 = vld [vmem:[#allocation2 + $0x110] sm:$0xff]  ;;  %v6066_v20 = vld [vmem:[#allocation2 + $0x9a] sm:$0xff] }
 0x573   : > { %v5563_v58 = vpop.permute.xlu0 %5562  ;;  %v5969_v9 = vpack.c.bf16 %v5948_v25, %v5947_v17  ;;  %v6013_v51 = vld [vmem:[#allocation2 + $0x121] sm:$0xff]  ;;  %v6067_v8 = vld [vmem:[#allocation2 + $0xaa] sm:$0xff]  ;;  %v20064_v35 = vpack.c.bf16 %v6066_v20, %v6065_v5  ;;  %v18045_v20 = vld [vmem:[%s21735_s7 + $0x1f8] sm:$0xff]  }
 0x574   : > { %5633 = vst.msk [vmem:[#allocation2 + $0x151] sm:$0xff] %vm5606_vm2, %v5563_v58  ;;  %v5949_v54 = vld [vmem:[#allocation2 + $0x120] sm:$0xff] }
 0x575   : > { %v5565_v44 = vpop.permute.xlu1 %5564  ;;  %6433 = vmatmul.mubr.bf16.gmra.mrb[228].mxu0 %v5964_v22  ;;  %6907 = vmatmul.mubr.bf16.gmra.mrb[8].mxu1 %v5964_v22  ;;  %v6014_v29 = vld [vmem:[#allocation2 + $0x129] sm:$0xff] }
 0x576   : > { %5634 = vst.msk [vmem:[#allocation2 + $0x159] sm:$0xff] %vm5606_vm2, %v5565_v44  ;;  %6440 = vmatprep.mubr.bf16.mxu0 %v6029_v36  ;;  %6914 = vmatprep.mubr.bf16.mxu1 %v6029_v36  ;;  %v6034_v21 = vpack.c.bf16 %v6014_v29, %v6013_v51  ;;  %v5950_v46 = vld [vmem:[#allocation2 + $0x128] sm:$0xff]  ;;  %v18029_v29 = vld [vmem:[%s21735_s7 + $0xb0] sm:$0xff]  }
 0x577   : > { %v5567_v18 = vpop.permute.xlu0 %5566  ;;  %v5970_v19 = vpack.c.bf16 %v5950_v46, %v5949_v54  ;;  %v6015_v3 = vld [vmem:[#allocation2 + $0x139] sm:$0xff]  ;;  %v6069_v17 = vld [vmem:[#allocation2 + $0xc2] sm:$0xff]  ;;  %v6075_v54 = vld [vmem:[#allocation2 + $0x10a] sm:$0xff] }
 0x578   : > { %5635 = vst.msk [vmem:[#allocation2 + $0x169] sm:$0xff] %vm5606_vm2, %v5567_v18  ;;  %v5951_v34 = vld [vmem:[#allocation2 + $0x138] sm:$0xff]  ;;  %v6072_v51 = vld [vmem:[#allocation2 + $0xe2] sm:$0xff] }
 0x579   : > { %v5569_v33 = vpop.permute.xlu1 %5568  ;;  %v6016_v57 = vld [vmem:[#allocation2 + $0x141] sm:$0xff]  ;;  %v6073_v46 = vld [vmem:[#allocation2 + $0xf2] sm:$0xff] }
 0x57a   : > { %5636 = vst.msk [vmem:[#allocation2 + $0x171] sm:$0xff] %vm5606_vm2, %v5569_v33  ;;  %v6035_v56 = vpack.c.bf16 %v6016_v57, %v6015_v3  ;;  %v5952_v24 = vld [vmem:[#allocation2 + $0x140] sm:$0xff] }
 0x57b   : > { %v5571_v53 = vpop.permute.xlu0 %5570  ;;  %v5971_v11 = vpack.c.bf16 %v5952_v24, %v5951_v34  ;;  %v6017_v1 = vld [vmem:[#allocation2 + $0x151] sm:$0xff]  ;;  %v6055_v33 = vld [vmem:[#allocation2 + $0x1a] sm:$0xff]  ;;  %v6077_v24 = vld [vmem:[#allocation2 + $0x122] sm:$0xff] }
 0x57c   : > { %5637 = vst.msk [vmem:[#allocation2 + $0x181] sm:$0xff] %vm5606_vm2, %v5571_v53  ;;  %v5953_v61 = vld [vmem:[#allocation2 + $0x150] sm:$0xff]  ;;  %v6074_v57 = vld [vmem:[#allocation2 + $0xfa] sm:$0xff] }
 0x57d   : > { %6441 = vmatmul.mubr.bf16.gmra.mrb[232].mxu0 %v5965_v41  ;;  %6915 = vmatmul.mubr.bf16.gmra.mrb[12].mxu1 %v5965_v41  ;;  %v5573_v40 = vpop.permute.xlu1 %5572  ;;  %v6018_v13 = vld [vmem:[#allocation2 + $0x159] sm:$0xff]  ;;  %v20036_v41 = vpack.c.bf16 %v6056_v55, %v6055_v33  ;;  %v20088_v3 = vpack.c.bf16 %v6074_v57, %v6073_v46  ;;  %v18033_v33 = vld [vmem:[%s21735_s7 + $0x1c8] sm:$0xff]  }
 0x57e   : > { %5638 = vst.msk [vmem:[#allocation2 + $0x189] sm:$0xff] %vm5606_vm2, %v5573_v40  ;;  %6448 = vmatprep.mubr.bf16.mxu0 %v6030_v30  ;;  %6922 = vmatprep.mubr.bf16.mxu1 %v6030_v30  ;;  %v6036_v4 = vpack.c.bf16 %v6018_v13, %v6017_v1  ;;  %v5954_v50 = vld [vmem:[#allocation2 + $0x158] sm:$0xff]  ;;  %v6059_v40 = vld [vmem:[#allocation2 + $0x4a] sm:$0xff] }
 0x57f   : > { %v5972_v49 = vpack.c.bf16 %v5954_v50, %v5953_v61  ;;  %v6019_v12 = vld [vmem:[#allocation2 + $0x169] sm:$0xff]  ;;  %v6058_v30 = vld [vmem:[#allocation2 + $0x3a] sm:$0xff]  ;;  %v6081_v50 = vld [vmem:[#allocation2 + $0x152] sm:$0xff] }
 0x580   : > { %v5955_v42 = vld [vmem:[#allocation2 + $0x168] sm:$0xff]  ;;  %v20039_v27 = vpack.c.bf16 %v6058_v30, %v6057_v48  ;;  %v6079_v34 = vld [vmem:[#allocation2 + $0x13a] sm:$0xff] }
 0x581   : > { %v6020_v38 = vld [vmem:[#allocation2 + $0x171] sm:$0xff]  ;;  %v18034_v55 = vld [vmem:[%s21735_s7 + $0x188] sm:$0xff]   ;;  %v18039_v30 = vld [vmem:[%s21735_s7 + $0x1e0] sm:$0xff]  }
 0x582   : > { %v6037_v15 = vpack.c.bf16 %v6020_v38, %v6019_v12  ;;  %v5956_v58 = vld [vmem:[#allocation2 + $0x170] sm:$0xff]  ;;  %v6082_v38 = vld [vmem:[#allocation2 + $0x15a] sm:$0xff] }
 0x583   : > { %v5973_v36 = vpack.c.bf16 %v5956_v58, %v5955_v42  ;;  %v6021_v44 = vld [vmem:[#allocation2 + $0x181] sm:$0xff]  ;;  %v6078_v13 = vld [vmem:[#allocation2 + $0x12a] sm:$0xff]  ;;  %v20100_v12 = vpack.c.bf16 %v6082_v38, %v6081_v50  ;;  %v18038_v48 = vld [vmem:[%s21735_s7 + $0x198] sm:$0xff]  }
 0x584   : > { %v5957_v62 = vld [vmem:[#allocation2 + $0x180] sm:$0xff]  ;;  %v20094_v1 = vpack.c.bf16 %v6078_v13, %v6077_v24  ;;  %v6083_v61 = vld [vmem:[#allocation2 + $0x16a] sm:$0xff] }
 0x585   : > { %6449 = vmatmul.mubr.bf16.gmra.mrb[236].mxu0 %v5966_v6  ;;  %6923 = vmatmul.mubr.bf16.gmra.mrb[16].mxu1 %v5966_v6  ;;  %v6022_v22 = vld [vmem:[#allocation2 + $0x189] sm:$0xff]  ;;  %v20044_v6 = vpack.c.bf16 %v6060_v47, %v6059_v40  ;;  %v18040_v40 = vld [vmem:[%s21735_s7 + $0x1a0] sm:$0xff]  }
 0x586   : > { %6456 = vmatprep.mubr.bf16.mxu0 %v6031_v31  ;;  %6930 = vmatprep.mubr.bf16.mxu1 %v6031_v31  ;;  %v6038_v18 = vpack.c.bf16 %v6022_v22, %v6021_v44  ;;  %v5958_v10 = vld [vmem:[#allocation2 + $0x188] sm:$0xff] }
 0x587   : > { %v5974_v53 = vpack.c.bf16 %v5958_v10, %v5957_v62  ;;  %v6061_v31 = vld [vmem:[#allocation2 + $0x62] sm:$0xff]  ;;  %v5768_v22 = vld [vmem:[#allocation2 + $0xa] sm:$0xff] }
 0x588   : > { %v5767_v58 = vld [vmem:[#allocation2 + $0x2] sm:$0xff]  ;;  %v18035_v62 = vld [vmem:[%s21735_s7 + $0x1d0] sm:$0xff]  }
 0x589   : > { %v6085_v42 = vld [vmem:[#allocation2 + $0x182] sm:$0xff]  ;;  %v5799_v44 = vpack.c.bf16 %v5768_v22, %v5767_v58 }
 0x58a   : > { %v18032_v10 = vld [vmem:[%s21735_s7 + $0x180] sm:$0xff]   ;;  %v18041_v47 = vld [vmem:[%s21735_s7 + $0x1e8] sm:$0xff]  }
 0x58d   : > { %6457 = vmatmul.mubr.bf16.gmra.mrb[240].mxu0 %v5967_v59  ;;  %6931 = vmatmul.mubr.bf16.gmra.mrb[20].mxu1 %v5967_v59  ;;  %v20052_v59 = vpack.c.bf16 %v6062_v39, %v6061_v31 }
 0x58e   : > { %6464 = vmatprep.mubr.bf16.mxu0 %v6032_v63  ;;  %6938 = vmatprep.mubr.bf16.mxu1 %v6032_v63  ;;  %v20057_v63 = vpack.c.bf16 %v6064_v0, %v6063_v60 }
 0x595   : > { %6465 = vmatmul.mubr.bf16.gmra.mrb[244].mxu0 %v5968_v45  ;;  %6939 = vmatmul.mubr.bf16.gmra.mrb[24].mxu1 %v5968_v45  ;;  %v6068_v45 = vld [vmem:[#allocation2 + $0xb2] sm:$0xff] }
 0x596   : > { %6472 = vmatprep.mubr.bf16.mxu0 %v6033_v7  ;;  %6946 = vmatprep.mubr.bf16.mxu1 %v6033_v7  ;;  %v18028_v7 = vld [vmem:[%s21735_s7 + $0xa8] sm:$0xff]   ;;  %v20069_v25 = vpack.c.bf16 %v6068_v45, %v6067_v8 }
 0x598   : > { %v15136_v37 = vpop.f32.mrb[240].mxu1 }
 0x599   : > { %v15137_v43 = vpop.f32.mrb[241].mxu1 }
 0x59a   : > { %v20032_v14 = vadd.f32 %v15137_v43, %v15136_v37  ;;  %v15139_v16 = vpop.f32.mrb[242].mxu1  ;;  %v6070_v37 = vld [vmem:[#allocation2 + $0xca] sm:$0xff] }
 0x59b   : > { %v15140_v2 = vpop.f32.mrb[243].mxu1  ;;  %v20076_v43 = vpack.c.bf16 %v6070_v37, %v6069_v17  ;;  %v20168_v17 = vld [vmem:[%s21735_s7 + $0x200] sm:$0xff]  }
 0x59c   : > { %v20034_v28 = vadd.f32 %v15140_v2, %v15139_v16  ;;  %v18031_v2 = vld [vmem:[%s21735_s7 + $0x1c0] sm:$0xff]  }
 0x59d   : > { %6473 = vmatmul.mubr.bf16.gmra.mrb[248].mxu0 %v5969_v9  ;;  %6947 = vmatmul.mubr.bf16.gmra.mrb[28].mxu1 %v5969_v9  ;;  %v6071_v9 = vld [vmem:[#allocation2 + $0xda] sm:$0xff] }
 0x59e   : > { %6480 = vmatprep.mubr.bf16.mxu0 %v6034_v21  ;;  %6954 = vmatprep.mubr.bf16.mxu1 %v6034_v21  ;;  %v18030_v21 = vld [vmem:[%s21735_s7 + $0xb8] sm:$0xff]   ;;  %v20081_v16 = vpack.c.bf16 %v6072_v51, %v6071_v9 }
 0x5a5   : > { %6481 = vmatmul.mubr.bf16.gmra.mrb[252].mxu0 %v5970_v19  ;;  %6955 = vmatmul.mubr.bf16.gmra.mrb[32].mxu1 %v5970_v19  ;;  %v6076_v19 = vld [vmem:[#allocation2 + $0x112] sm:$0xff] }
 0x5a6   : > { %6488 = vmatprep.mubr.bf16.mxu0 %v6035_v56  ;;  %6962 = vmatprep.mubr.bf16.mxu1 %v6035_v56  ;;  %v20090_v56 = vpack.c.bf16 %v6076_v19, %v6075_v54 }
 0x5ad   : > { %6489 = vmatmul.mubr.bf16.gmra.mrb[0].mxu0 %v5971_v11  ;;  %6963 = vmatmul.mubr.bf16.gmra.mrb[36].mxu1 %v5971_v11  ;;  %v6080_v11 = vld [vmem:[#allocation2 + $0x142] sm:$0xff] }
 0x5ae   : > { %6496 = vmatprep.mubr.bf16.mxu0 %v6036_v4  ;;  %6970 = vmatprep.mubr.bf16.mxu1 %v6036_v4  ;;  %v20096_v4 = vpack.c.bf16 %v6080_v11, %v6079_v34 }
 0x5b5   : > { %6497 = vmatmul.mubr.bf16.gmra.mrb[4].mxu0 %v5972_v49  ;;  %6971 = vmatmul.mubr.bf16.gmra.mrb[40].mxu1 %v5972_v49  ;;  %v6084_v49 = vld [vmem:[#allocation2 + $0x172] sm:$0xff] }
 0x5b6   : > { %6504 = vmatprep.mubr.bf16.mxu0 %v6037_v15  ;;  %6978 = vmatprep.mubr.bf16.mxu1 %v6037_v15  ;;  %v20102_v15 = vpack.c.bf16 %v6084_v49, %v6083_v61 }
 0x5bd   : > { %6505 = vmatmul.mubr.bf16.gmra.mrb[8].mxu0 %v5973_v36  ;;  %6979 = vmatmul.mubr.bf16.gmra.mrb[44].mxu1 %v5973_v36  ;;  %v6086_v36 = vld [vmem:[#allocation2 + $0x18a] sm:$0xff] }
 0x5be   : > { %6512 = vmatprep.mubr.bf16.mxu0 %v6038_v18  ;;  %v6102_v18 = vpack.c.bf16 %v6086_v36, %v6085_v42 }
 0x5c5   : > { %6513 = vmatmul.mubr.bf16.gmra.mrb[12].mxu0 %v5974_v53  ;;  %v18036_v53 = vld [vmem:[%s21735_s7 + $0x190] sm:$0xff]  }
 0x5c6   : > { %16546 = vmatprep.mubr.bf16.mxu0 %v20036_v41 }
 0x5cd   : > { %16547 = vmatmul.mubr.bf16.vlgmr.msra.gmra.mrb[16].mxu0 %v20039_v27 }
 0x5ce   : > { %16550 = vmatprep.mubr.bf16.mxu0 %v20044_v6  ;;  %16579 = vmatpush3.bf16.msra.mxu0 %v20021_v52  ;;  %v18027_v52 = vld [vmem:[%s21735_s7 + $0xa0] sm:$0xff]  }
 0x5cf   : > { %16580 = vmatprep.subr.bf16.mxu0 %v18024_v32 }
 0x5d2   : > { %16581 = vmatpush3.bf16.msra.mxu0 %v18024_v32  ;;  %v18043_v32 = vld [vmem:[%s21735_s7 + $0x1f0] sm:$0xff]  }
 0x5d3   : > { %16582 = vmatprep.subr.bf16.mxu0 %v18025_v26 }
 0x5d5   : > { %16551 = vmatmul.mubr.bf16.gmra.mrb[20].mxu0 %v20052_v59 }
 0x5d6   : > { %16554 = vmatprep.mubr.bf16.mxu0 %v20057_v63  ;;  %16583 = vmatpush3.bf16.msra.mxu0 %v18025_v26 }
 0x5d7   : > { %16584 = vmatprep.subr.bf16.mxu0 %v18026_v23 }
 0x5da   : > { %16585 = vmatpush3.bf16.msra.mxu0 %v18026_v23 }
 0x5db   : > { %16586 = vmatprep.subr.bf16.mxu0 %v18027_v52 }
 0x5dd   : > { %16555 = vmatmul.mubr.bf16.gmra.mrb[24].mxu0 %v20064_v35 }
 0x5de   : > { %16558 = vmatprep.mubr.bf16.mxu0 %v20069_v25  ;;  %16587 = vmatpush3.bf16.msra.mxu0 %v18027_v52 }
 0x5df   : > { %16588 = vmatprep.subr.bf16.mxu0 %v18028_v7 }
 0x5e2   : > { %16589 = vmatpush3.bf16.msra.mxu0 %v18028_v7  ;;  %v18046_v7 = vld [vmem:[%s21735_s7 + $0x1b8] sm:$0xff]  }
 0x5e3   : > { %16590 = vmatprep.subr.bf16.mxu0 %v18029_v29 }
 0x5e5   : > { %16559 = vmatmul.mubr.bf16.gmra.mrb[28].mxu0 %v20076_v43 }
 0x5e6   : > { %16562 = vmatprep.mubr.bf16.mxu0 %v20081_v16  ;;  %16591 = vmatpush3.bf16.msra.mxu0 %v18029_v29 }
 0x5e7   : > { %16592 = vmatprep.subr.bf16.mxu0 %v18030_v21 }
 0x5ea   : > { %16593 = vmatpush3.bf16.msra.mxu0 %v18030_v21 }
 0x5eb   : > { %15256 = vmatprep.subr.bf16.mxu0 %v18031_v2 }
 0x5ed   : > { %16563 = vmatmul.mubr.bf16.gmra.mrb[32].mxu0 %v20088_v3 }
 0x5ee   : > { %16566 = vmatprep.mubr.bf16.mxu0 %v20090_v56 }
 0x5f5   : > { %16567 = vmatmul.mubr.bf16.gmra.mrb[36].mxu0 %v20094_v1 }
 0x5f6   : > { %16570 = vmatprep.mubr.bf16.mxu0 %v20096_v4 }
 0x5fd   : > { %16571 = vmatmul.mubr.bf16.gmra.mrb[40].mxu0 %v20100_v12 }
 0x5fe   : > { %16574 = vmatprep.mubr.bf16.mxu0 %v20102_v15 }
 0x605   : > { %16575 = vmatmul.mubr.bf16.gmra.mrb[44].mxu0 %v6102_v18 }
 0x606   : > { %16594 = vmatprep.mubr.bf16.mxu0 %v5799_v44 }
 0x60d   : > { %16595 = vmatmul.mubr.bf16.vlgmr.msra.gmra.mrb[16].mxu0 %v20036_v41  ;;  %v18037_v41 = vld [vmem:[%s21735_s7 + $0x1d8] sm:$0xff]  }
 0x60e   : > { %16598 = vmatprep.mubr.bf16.mxu0 %v20039_v27  ;;  %15257 = vmatpush3.bf16.msra.mxu0 %v18032_v10  ;;  %v18042_v27 = vld [vmem:[%s21735_s7 + $0x1a8] sm:$0xff]  }
 0x60f   : > { %15258 = vmatprep.subr.bf16.mxu0 %v18033_v33 }
 0x612   : > { %15259 = vmatpush3.bf16.msra.mxu0 %v18034_v55 }
 0x613   : > { %15260 = vmatprep.subr.bf16.mxu0 %v18035_v62 }
 0x615   : > { %16599 = vmatmul.mubr.bf16.gmra.mrb[20].mxu0 %v20044_v6 }
 0x616   : > { %16602 = vmatprep.mubr.bf16.mxu0 %v20052_v59  ;;  %15261 = vmatpush3.bf16.msra.mxu0 %v18036_v53 }
 0x617   : > { %15262 = vmatprep.subr.bf16.mxu0 %v18037_v41 }
 0x61a   : > { %15263 = vmatpush3.bf16.msra.mxu0 %v18038_v48 }
 0x61b   : > { %15264 = vmatprep.subr.bf16.mxu0 %v18039_v30 }
 0x61d   : > { %16603 = vmatmul.mubr.bf16.gmra.mrb[24].mxu0 %v20057_v63  ;;  %v18044_v63 = vld [vmem:[%s21735_s7 + $0x1b0] sm:$0xff]  }
 0x61e   : > { %16606 = vmatprep.mubr.bf16.mxu0 %v20064_v35  ;;  %15265 = vmatpush3.bf16.msra.mxu0 %v18040_v40 }
 0x61f   : > { %15266 = vmatprep.subr.bf16.mxu0 %v18041_v47 }
 0x620   : > { %v15000_v6 = vpop.f32.mrb[208].mxu0  ;;  %v15142_v26 = vpop.f32.mrb[244].mxu1 }
 0x621   : > { %v15001_v31 = vpop.f32.mrb[209].mxu0  ;;  %v15143_v39 = vpop.f32.mrb[245].mxu1 }
 0x622   : > { %v15002_v60 = vadd.f32 %v15001_v31, %v15000_v6  ;;  %v15144_v0 = vadd.f32 %v15143_v39, %v15142_v26  ;;  %v15003_v59 = vpop.f32.mrb[210].mxu0  ;;  %v15145_v23 = vpop.f32.mrb[246].mxu1  ;;  %15267 = vmatpush3.bf16.msra.mxu0 %v18042_v27  ;;  %v7213_v39 = vld [vmem:[#allocation2 + $0x39] sm:$0xff] }
 0x623   : > { %v15004_v52 = vpop.f32.mrb[211].mxu0  ;;  %v15146_v5 = vpop.f32.mrb[247].mxu1  ;;  %15268 = vmatprep.subr.bf16.mxu0 %v18043_v32 }
 0x624   : > { %v15005_v8 = vadd.f32 %v15004_v52, %v15003_v59  ;;  %v15147_v45 = vadd.f32 %v15146_v5, %v15145_v23  ;;  %v20155_v35 = vadd.f32 %v20032_v14, %v15002_v60  ;;  %v7212_v5 = vld [vmem:[#allocation2 + $0x31] sm:$0xff] }
 0x625   : > { %16607 = vmatmul.mubr.bf16.gmra.mrb[28].mxu0 %v20069_v25 }
 0x626   : > { %16610 = vmatprep.mubr.bf16.mxu0 %v20076_v43  ;;  %15269 = vmatpush3.bf16.msra.mxu0 %v18044_v63  ;;  %v20163_v29 = vadd.f32 %v20034_v28, %v15005_v8 }
 0x627   : > { %15270 = vmatprep.subr.bf16.mxu0 %v18045_v20 }
 0x628   : > { %v15006_v14 = vpop.f32.mrb[212].mxu0  ;;  %v15148_v37 = vpop.f32.mrb[248].mxu1 }
 0x629   : > { %v15007_v9 = vpop.f32.mrb[213].mxu0  ;;  %v15149_v25 = vpop.f32.mrb[249].mxu1 }
 0x62a   : > { %v15008_v51 = vadd.f32 %v15007_v9, %v15006_v14  ;;  %v15150_v43 = vadd.f32 %v15149_v25, %v15148_v37  ;;  %v15009_v21 = vpop.f32.mrb[214].mxu0  ;;  %v15151_v2 = vpop.f32.mrb[250].mxu1  ;;  %15271 = vmatpush3.bf16.msra.mxu0 %v18046_v7  ;;  %v7149_v37 = vld [vmem:[#allocation2 + $0x38] sm:$0xff] }
 0x62b   : > { %v15010_v46 = vpop.f32.mrb[215].mxu0  ;;  %v15152_v57 = vpop.f32.mrb[251].mxu1  ;;  %16626 = vmatprep.subr.bf16.mxu0 %v20168_v17 }
 0x62c   : > { %v15011_v28 = vadd.f32 %v15010_v46, %v15009_v21  ;;  %v15153_v54 = vadd.f32 %v15152_v57, %v15151_v2  ;;  %v20171_v19 = vadd.f32 %v15144_v0, %v15008_v51  ;;  %v7215_v51 = vld [vmem:[#allocation2 + $0x51] sm:$0xff] }
 0x62d   : > { %16611 = vmatmul.mubr.bf16.gmra.mrb[32].mxu0 %v20081_v16  ;;  %v7148_v57 = vld [vmem:[#allocation2 + $0x30] sm:$0xff] }
 0x62e   : > { %16614 = vmatprep.mubr.bf16.mxu0 %v20088_v3  ;;  %v20175_v24 = vadd.f32 %v15147_v45, %v15011_v28  ;;  %v7244_v45 = vpack.c.bf16 %v7213_v39, %v7212_v5  ;;  %v18051_v39 = vld [vmem:[%s21735_s7 + $0x220] sm:$0xff]  }
 0x630   : > { %v15012_v13 = vpop.f32.mrb[216].mxu0  ;;  %v15154_v34 = vpop.f32.mrb[252].mxu1 }
 0x631   : > { %v15013_v11 = vpop.f32.mrb[217].mxu0  ;;  %v15155_v50 = vpop.f32.mrb[253].mxu1 }
 0x632   : > { %v15014_v38 = vadd.f32 %v15013_v11, %v15012_v13  ;;  %v15156_v61 = vadd.f32 %v15155_v50, %v15154_v34  ;;  %v15015_v49 = vpop.f32.mrb[218].mxu0  ;;  %v15157_v58 = vpop.f32.mrb[254].mxu1  ;;  %v7180_v13 = vpack.c.bf16 %v7149_v37, %v7148_v57  ;;  %v7214_v34 = vld [vmem:[#allocation2 + $0x49] sm:$0xff] }
 0x633   : > { %v15016_v22 = vpop.f32.mrb[219].mxu0  ;;  %v15158_v42 = vpop.f32.mrb[255].mxu1 }
 0x634   : > { %v15017_v36 = vadd.f32 %v15016_v22, %v15015_v49  ;;  %v15159_v44 = vadd.f32 %v15158_v42, %v15157_v58  ;;  %v20177_v18 = vadd.f32 %v15150_v43, %v15014_v38  ;;  %v7245_v38 = vpack.c.bf16 %v7215_v51, %v7214_v34  ;;  %v18049_v58 = vld [vmem:[%s21735_s7 + $0x210] sm:$0xff]   ;;  %v18052_v51 = vld [vmem:[%s21735_s7 + $0x228] sm:$0xff]   ;;  %v7155_v34 = vld [vmem:[#allocation2 + $0x80] sm:$0xff] }
 0x635   : > { %16615 = vmatmul.mubr.bf16.gmra.mrb[36].mxu0 %v20090_v56 }
 0x636   : > { %16618 = vmatprep.mubr.bf16.mxu0 %v20094_v1  ;;  %v20181_v16 = vadd.f32 %v15153_v54, %v15017_v36  ;;  %v7151_v36 = vld [vmem:[#allocation2 + $0x50] sm:$0xff] }
 0x638   : > { %v15018_v3 = vpop.f32.mrb[220].mxu0  ;;  %v15160_v10 = vpop.f32.mrb[0].mxu1 }
 0x639   : > { %v15019_v33 = vpop.f32.mrb[221].mxu0  ;;  %v15161_v55 = vpop.f32.mrb[1].mxu1 }
 0x63a   : > { %v15020_v62 = vadd.f32 %v15019_v33, %v15018_v3  ;;  %v15162_v53 = vadd.f32 %v15161_v55, %v15160_v10  ;;  %v15021_v41 = vpop.f32.mrb[222].mxu0  ;;  %v15163_v48 = vpop.f32.mrb[2].mxu1  ;;  %v7217_v10 = vld [vmem:[#allocation2 + $0x69] sm:$0xff] }
 0x63b   : > { %v15022_v30 = vpop.f32.mrb[223].mxu0  ;;  %v15164_v40 = vpop.f32.mrb[3].mxu1 }
 0x63c   : > { %v15023_v47 = vadd.f32 %v15022_v30, %v15021_v41  ;;  %v15165_v27 = vadd.f32 %v15164_v40, %v15163_v48  ;;  %v20183_v32 = vadd.f32 %v15156_v61, %v15020_v62  ;;  %v7150_v41 = vld [vmem:[#allocation2 + $0x48] sm:$0xff] }
 0x63d   : > { %16619 = vmatmul.mubr.bf16.gmra.mrb[40].mxu0 %v20096_v4  ;;  %v7181_v30 = vpack.c.bf16 %v7151_v36, %v7150_v41  ;;  %v7216_v40 = vld [vmem:[#allocation2 + $0x61] sm:$0xff] }
 0x63e   : > { %16622 = vmatprep.mubr.bf16.mxu0 %v20100_v12  ;;  %v20187_v56 = vadd.f32 %v15159_v44, %v15023_v47  ;;  %v18050_v47 = vld [vmem:[%s21735_s7 + $0x218] sm:$0xff]  }
 0x640   : > { %v15024_v1 = vpop.f32.mrb[224].mxu0  ;;  %v15166_v6 = vpop.f32.mrb[4].mxu1 }
 0x641   : > { %v15025_v26 = vpop.f32.mrb[225].mxu0  ;;  %v15167_v31 = vpop.f32.mrb[5].mxu1 }
 0x642   : > { %v15026_v60 = vadd.f32 %v15025_v26, %v15024_v1  ;;  %v15168_v0 = vadd.f32 %v15167_v31, %v15166_v6  ;;  %v15027_v59 = vpop.f32.mrb[226].mxu0  ;;  %v15169_v23 = vpop.f32.mrb[6].mxu1  ;;  %v7246_v6 = vpack.c.bf16 %v7217_v10, %v7216_v40 }
 0x643   : > { %v15028_v63 = vpop.f32.mrb[227].mxu0  ;;  %v15170_v52 = vpop.f32.mrb[7].mxu1 }
 0x644   : > { %v15029_v20 = vadd.f32 %v15028_v63, %v15027_v59  ;;  %v15171_v8 = vadd.f32 %v15170_v52, %v15169_v23  ;;  %v20189_v4 = vadd.f32 %v15162_v53, %v15026_v60  ;;  %v7153_v59 = vld [vmem:[#allocation2 + $0x68] sm:$0xff] }
 0x645   : > { %16623 = vmatmul.mubr.bf16.gmra.mrb[44].mxu0 %v20102_v15  ;;  %v18048_v15 = vld [vmem:[%s21735_s7 + $0x208] sm:$0xff]  }
 0x646   : > { %7613 = vmatprep.mubr.bf16.mxu0 %v7244_v45  ;;  %v20192_v12 = vadd.f32 %v15165_v27, %v15029_v20  ;;  %v7219_v52 = vld [vmem:[#allocation2 + $0x81] sm:$0xff] }
 0x648   : > { %v15030_v7 = vpop.f32.mrb[228].mxu0  ;;  %v15172_v14 = vpop.f32.mrb[8].mxu1 }
 0x649   : > { %v15031_v9 = vpop.f32.mrb[229].mxu0  ;;  %v15173_v25 = vpop.f32.mrb[9].mxu1 }
 0x64a   : > { %v15032_v43 = vadd.f32 %v15031_v9, %v15030_v7  ;;  %v15174_v21 = vadd.f32 %v15173_v25, %v15172_v14  ;;  %v15033_v2 = vpop.f32.mrb[230].mxu0  ;;  %v15175_v46 = vpop.f32.mrb[10].mxu1  ;;  %v7152_v7 = vld [vmem:[#allocation2 + $0x60] sm:$0xff] }
 0x64b   : > { %v15034_v28 = vpop.f32.mrb[231].mxu0  ;;  %v15176_v54 = vpop.f32.mrb[11].mxu1  ;;  %v7182_v9 = vpack.c.bf16 %v7153_v59, %v7152_v7  ;;  %v7218_v25 = vld [vmem:[#allocation2 + $0x79] sm:$0xff]  ;;  %v7156_v59 = vld [vmem:[#allocation2 + $0x90] sm:$0xff] }
 0x64c   : > { %v15035_v11 = vadd.f32 %v15034_v28, %v15033_v2  ;;  %v15177_v50 = vadd.f32 %v15176_v54, %v15175_v46  ;;  %v20197_v61 = vadd.f32 %v15168_v0, %v15032_v43  ;;  %v7247_v2 = vpack.c.bf16 %v7219_v52, %v7218_v25  ;;  %v18053_v28 = vld [vmem:[%s21735_s7 + $0x230] sm:$0xff]  }
 0x64d   : > { %7614 = vmatmul.mubr.bf16.vlgmr.msra.gmra.mrb[48].mxu0 %v7180_v13 }
 0x64e   : > { %7621 = vmatprep.mubr.bf16.mxu0 %v7245_v38  ;;  %16627 = vmatpush3.bf16.msra.mxu0 %v20168_v17  ;;  %v20200_v49 = vadd.f32 %v15171_v8, %v15035_v11 }
 0x64f   : > { %16628 = vmatprep.subr.bf16.mxu0 %v18048_v15 }
 0x650   : > { %v15036_v22 = vpop.f32.mrb[232].mxu0  ;;  %v15178_v42 = vpop.f32.mrb[12].mxu1 }
 0x651   : > { %v15037_v44 = vpop.f32.mrb[233].mxu0  ;;  %v15179_v3 = vpop.f32.mrb[13].mxu1 }
 0x652   : > { %v15038_v33 = vadd.f32 %v15037_v44, %v15036_v22  ;;  %v15180_v55 = vadd.f32 %v15179_v3, %v15178_v42  ;;  %v15039_v62 = vpop.f32.mrb[234].mxu0  ;;  %v15181_v53 = vpop.f32.mrb[14].mxu1  ;;  %16629 = vmatpush3.bf16.msra.mxu0 %v18048_v15  ;;  %v7154_v42 = vld [vmem:[#allocation2 + $0x78] sm:$0xff] }
 0x653   : > { %v15040_v17 = vpop.f32.mrb[235].mxu0  ;;  %v15182_v48 = vpop.f32.mrb[15].mxu1  ;;  %16630 = vmatprep.subr.bf16.mxu0 %v18049_v58  ;;  %v7183_v10 = vpack.c.bf16 %v7155_v34, %v7154_v42  ;;  %v7158_v34 = vld [vmem:[#allocation2 + $0xa8] sm:$0xff] }
 0x654   : > { %v15041_v27 = vadd.f32 %v15040_v17, %v15039_v62  ;;  %v15183_v1 = vadd.f32 %v15182_v48, %v15181_v53  ;;  %v20208_v26 = vadd.f32 %v15174_v21, %v15038_v33  ;;  %v7220_v33 = vld [vmem:[#allocation2 + $0x91] sm:$0xff] }
 0x655   : > { %7622 = vmatmul.mubr.bf16.gmra.mrb[52].mxu0 %v7181_v30 }
 0x656   : > { %7629 = vmatprep.mubr.bf16.mxu0 %v7246_v6  ;;  %16631 = vmatpush3.bf16.msra.mxu0 %v18049_v58  ;;  %v20210_v31 = vadd.f32 %v15177_v50, %v15041_v27  ;;  %v7221_v50 = vld [vmem:[#allocation2 + $0x99] sm:$0xff]  ;;  %v7223_v6 = vld [vmem:[#allocation2 + $0xb1] sm:$0xff] }
 0x657   : > { %16632 = vmatprep.subr.bf16.mxu0 %v18050_v47  ;;  %v7248_v53 = vpack.c.bf16 %v7221_v50, %v7220_v33 }
 0x658   : > { %v15042_v60 = vpop.f32.mrb[236].mxu0  ;;  %v15184_v0 = vpop.f32.mrb[16].mxu1 }
 0x659   : > { %v15043_v23 = vpop.f32.mrb[237].mxu0  ;;  %v15185_v63 = vpop.f32.mrb[17].mxu1 }
 0x65a   : > { %v15044_v5 = vadd.f32 %v15043_v23, %v15042_v60  ;;  %v15186_v20 = vadd.f32 %v15185_v63, %v15184_v0  ;;  %v15045_v8 = vpop.f32.mrb[238].mxu0  ;;  %v15187_v45 = vpop.f32.mrb[18].mxu1  ;;  %16633 = vmatpush3.bf16.msra.mxu0 %v18050_v47  ;;  %v7157_v47 = vld [vmem:[#allocation2 + $0x98] sm:$0xff] }
 0x65b   : > { %v15046_v14 = vpop.f32.mrb[239].mxu0  ;;  %v15188_v37 = vpop.f32.mrb[19].mxu1  ;;  %16634 = vmatprep.subr.bf16.mxu0 %v18051_v39 }
 0x65c   : > { %v15047_v43 = vadd.f32 %v15046_v14, %v15045_v8  ;;  %v15189_v21 = vadd.f32 %v15188_v37, %v15187_v45  ;;  %v20218_v46 = vadd.f32 %v15180_v55, %v15044_v5  ;;  %v18054_v55 = vld [vmem:[%s21735_s7 + $0x238] sm:$0xff]   ;;  %v7184_v5 = vpack.c.bf16 %v7157_v47, %v7156_v59 }
 0x65d   : > { %7630 = vmatmul.mubr.bf16.gmra.mrb[56].mxu0 %v7182_v9 }
 0x65e   : > { %7637 = vmatprep.mubr.bf16.mxu0 %v7247_v2  ;;  %16635 = vmatpush3.bf16.msra.mxu0 %v18051_v39  ;;  %v20220_v57 = vadd.f32 %v15183_v1, %v15047_v43  ;;  %v7225_v2 = vld [vmem:[#allocation2 + $0xc9] sm:$0xff] }
 0x65f   : > { %16636 = vmatprep.subr.bf16.mxu0 %v18052_v51 }
 0x660   : > { %v15048_v54 = vpop.f32.mrb[240].mxu0  ;;  %v15190_v13 = vpop.f32.mrb[20].mxu1 }
 0x661   : > { %v15049_v15 = vpop.f32.mrb[241].mxu0  ;;  %v15191_v11 = vpop.f32.mrb[21].mxu1 }
 0x662   : > { %v15192_v38 = vadd.f32 %v15191_v11, %v15190_v13  ;;  %v15051_v58 = vpop.f32.mrb[242].mxu0  ;;  %v15193_v22 = vpop.f32.mrb[22].mxu1  ;;  %16637 = vmatpush3.bf16.msra.mxu0 %v18052_v51  ;;  %v15050_v36 = vadd.f32 %v15049_v15, %v15048_v54  ;;  %v7159_v51 = vld [vmem:[#allocation2 + $0xb0] sm:$0xff] }
 0x663   : > { %v15052_v44 = vpop.f32.mrb[243].mxu0  ;;  %v15194_v3 = vpop.f32.mrb[23].mxu1  ;;  %16638 = vmatprep.subr.bf16.mxu0 %v18053_v28 }
 0x664   : > { %v15195_v62 = vadd.f32 %v15194_v3, %v15193_v22  ;;  %v20228_v41 = vadd.f32 %v15186_v20, %v15050_v36  ;;  %v15053_v17 = vadd.f32 %v15052_v44, %v15051_v58  ;;  %v7222_v20 = vld [vmem:[#allocation2 + $0xa9] sm:$0xff]  ;;  %v7224_v58 = vld [vmem:[#allocation2 + $0xc1] sm:$0xff] }
 0x665   : > { %7638 = vmatmul.mubr.bf16.gmra.mrb[60].mxu0 %v7183_v10  ;;  %v7249_v45 = vpack.c.bf16 %v7223_v6, %v7222_v20  ;;  %v7250_v42 = vpack.c.bf16 %v7225_v2, %v7224_v58  ;;  %v7162_v2 = vld [vmem:[#allocation2 + $0xd8] sm:$0xff] }
 0x666   : > { %7645 = vmatprep.mubr.bf16.mxu0 %v7248_v53  ;;  %16639 = vmatpush3.bf16.msra.mxu0 %v18053_v28  ;;  %v20230_v48 = vadd.f32 %v15189_v21, %v15053_v17  ;;  %v7227_v17 = vld [vmem:[#allocation2 + $0xe1] sm:$0xff] }
 0x667   : > { %16640 = vmatprep.subr.bf16.mxu0 %v18054_v55 }
 0x668   : > { %v15054_v30 = vpop.f32.mrb[244].mxu0  ;;  %v15196_v40 = vpop.f32.mrb[24].mxu1 }
 0x669   : > { %v15055_v27 = vpop.f32.mrb[245].mxu0  ;;  %v15197_v1 = vpop.f32.mrb[25].mxu1 }
 0x66a   : > { %v15198_v39 = vadd.f32 %v15197_v1, %v15196_v40  ;;  %v15057_v60 = vpop.f32.mrb[246].mxu0  ;;  %v15199_v0 = vpop.f32.mrb[26].mxu1  ;;  %16641 = vmatpush3.bf16.msra.mxu0 %v18054_v55  ;;  %v15056_v23 = vadd.f32 %v15055_v27, %v15054_v30  ;;  %v7161_v55 = vld [vmem:[#allocation2 + $0xc8] sm:$0xff]  ;;  %v7160_v27 = vld [vmem:[#allocation2 + $0xc0] sm:$0xff] }
 0x66b   : > { %v15058_v63 = vpop.f32.mrb[247].mxu0  ;;  %v15200_v52 = vpop.f32.mrb[27].mxu1 }
 0x66c   : > { %v15201_v8 = vadd.f32 %v15200_v52, %v15199_v0  ;;  %v20232_v7 = vadd.f32 %v15192_v38, %v15056_v23  ;;  %v15059_v14 = vadd.f32 %v15058_v63, %v15057_v60  ;;  %v7185_v38 = vpack.c.bf16 %v7159_v51, %v7158_v34  ;;  %v7226_v0 = vld [vmem:[#allocation2 + $0xd9] sm:$0xff] }
 0x66d   : > { %7646 = vmatmul.mubr.bf16.gmra.mrb[64].mxu0 %v7184_v5  ;;  %v7251_v23 = vpack.c.bf16 %v7227_v17, %v7226_v0 }
 0x66e   : > { %7653 = vmatprep.mubr.bf16.mxu0 %v7249_v45  ;;  %v20234_v37 = vadd.f32 %v15195_v62, %v15059_v14  ;;  %v7163_v45 = vld [vmem:[#allocation2 + $0xe0] sm:$0xff] }
 0x670   : > { %v15060_v9 = vpop.f32.mrb[248].mxu0  ;;  %v15202_v25 = vpop.f32.mrb[28].mxu1 }
 0x671   : > { %v15061_v43 = vpop.f32.mrb[249].mxu0  ;;  %v15203_v21 = vpop.f32.mrb[29].mxu1 }
 0x672   : > { %v15204_v28 = vadd.f32 %v15203_v21, %v15202_v25  ;;  %v15063_v54 = vpop.f32.mrb[250].mxu0  ;;  %v15205_v13 = vpop.f32.mrb[30].mxu1  ;;  %v15062_v15 = vadd.f32 %v15061_v43, %v15060_v9  ;;  %v7229_v25 = vld [vmem:[#allocation2 + $0xf9] sm:$0xff] }
 0x673   : > { %v15064_v11 = vpop.f32.mrb[251].mxu0  ;;  %v15206_v50 = vpop.f32.mrb[31].mxu1 }
 0x674   : > { %v15207_v22 = vadd.f32 %v15206_v50, %v15205_v13  ;;  %v20236_v36 = vadd.f32 %v15198_v39, %v15062_v15  ;;  %v15065_v44 = vadd.f32 %v15064_v11, %v15063_v54  ;;  %v7186_v39 = vpack.c.bf16 %v7161_v55, %v7160_v27  ;;  %v7228_v15 = vld [vmem:[#allocation2 + $0xf1] sm:$0xff] }
 0x675   : > { %7654 = vmatmul.mubr.bf16.gmra.mrb[68].mxu0 %v7185_v38  ;;  %v7252_v50 = vpack.c.bf16 %v7229_v25, %v7228_v15  ;;  %v7233_v25 = vld [vmem:[#allocation2 + $0x129] sm:$0xff]  ;;  %v7232_v15 = vld [vmem:[#allocation2 + $0x121] sm:$0xff] }
 0x676   : > { %7661 = vmatprep.mubr.bf16.mxu0 %v7250_v42  ;;  %v20238_v3 = vadd.f32 %v15201_v8, %v15065_v44 }
 0x678   : > { %v15066_v10 = vpop.f32.mrb[252].mxu0  ;;  %v15208_v33 = vpop.f32.mrb[32].mxu1 }
 0x679   : > { %v15067_v62 = vpop.f32.mrb[253].mxu0  ;;  %v15209_v53 = vpop.f32.mrb[33].mxu1 }
 0x67a   : > { %v15210_v30 = vadd.f32 %v15209_v53, %v15208_v33  ;;  %v15069_v40 = vpop.f32.mrb[254].mxu0  ;;  %v15211_v47 = vpop.f32.mrb[34].mxu1  ;;  %v15068_v1 = vadd.f32 %v15067_v62, %v15066_v10  ;;  %v7165_v10 = vld [vmem:[#allocation2 + $0xf8] sm:$0xff] }
 0x67b   : > { %v15070_v6 = vpop.f32.mrb[255].mxu0  ;;  %v15212_v60 = vpop.f32.mrb[35].mxu1  ;;  %v7231_v62 = vld [vmem:[#allocation2 + $0x111] sm:$0xff] }
 0x67c   : > { %v15213_v59 = vadd.f32 %v15212_v60, %v15211_v47  ;;  %v20240_v63 = vadd.f32 %v15204_v28, %v15068_v1  ;;  %v15071_v52 = vadd.f32 %v15070_v6, %v15069_v40  ;;  %v7187_v28 = vpack.c.bf16 %v7163_v45, %v7162_v2  ;;  %v7164_v47 = vld [vmem:[#allocation2 + $0xf0] sm:$0xff] }
 0x67d   : > { %7662 = vmatmul.mubr.bf16.gmra.mrb[72].mxu0 %v7186_v39  ;;  %v7230_v60 = vld [vmem:[#allocation2 + $0x109] sm:$0xff] }
 0x67e   : > { %7669 = vmatprep.mubr.bf16.mxu0 %v7251_v23  ;;  %v20242_v5 = vadd.f32 %v15207_v22, %v15071_v52  ;;  %v7253_v0 = vpack.c.bf16 %v7231_v62, %v7230_v60  ;;  %v7167_v45 = vld [vmem:[#allocation2 + $0x110] sm:$0xff]  ;;  %v7235_v62 = vld [vmem:[#allocation2 + $0x141] sm:$0xff] }
 0x680   : > { %v15072_v20 = vpop.f32.mrb[0].mxu0  ;;  %v15214_v8 = vpop.f32.mrb[36].mxu1 }
 0x681   : > { %v15073_v14 = vpop.f32.mrb[1].mxu0  ;;  %v15215_v9 = vpop.f32.mrb[37].mxu1 }
 0x682   : > { %v15216_v51 = vadd.f32 %v15215_v9, %v15214_v8  ;;  %v15075_v43 = vpop.f32.mrb[2].mxu0  ;;  %v15217_v21 = vpop.f32.mrb[38].mxu1  ;;  %v15074_v54 = vadd.f32 %v15073_v14, %v15072_v20 }
 0x683   : > { %v15076_v13 = vpop.f32.mrb[3].mxu0  ;;  %v15218_v34 = vpop.f32.mrb[39].mxu1 }
 0x684   : > { %v15219_v11 = vadd.f32 %v15218_v34, %v15217_v21  ;;  %v20244_v38 = vadd.f32 %v15210_v30, %v15074_v54  ;;  %v15077_v58 = vadd.f32 %v15076_v13, %v15075_v43  ;;  %v7188_v30 = vpack.c.bf16 %v7165_v10, %v7164_v47  ;;  %v7166_v54 = vld [vmem:[#allocation2 + $0x108] sm:$0xff] }
 0x685   : > { %7670 = vmatmul.mubr.bf16.gmra.mrb[76].mxu0 %v7187_v28 }
 0x686   : > { %7677 = vmatprep.mubr.bf16.mxu0 %v7252_v50  ;;  %v20246_v22 = vadd.f32 %v15213_v59, %v15077_v58  ;;  %v7254_v58 = vpack.c.bf16 %v7233_v25, %v7232_v15  ;;  %v7239_v25 = vld [vmem:[#allocation2 + $0x171] sm:$0xff]  ;;  %v7240_v15 = vld [vmem:[#allocation2 + $0x181] sm:$0xff] }
 0x688   : > { %v15078_v42 = vpop.f32.mrb[4].mxu0  ;;  %v15220_v44 = vpop.f32.mrb[40].mxu1 }
 0x689   : > { %v15079_v33 = vpop.f32.mrb[5].mxu0  ;;  %v15221_v55 = vpop.f32.mrb[41].mxu1 }
 0x68a   : > { %v15222_v53 = vadd.f32 %v15221_v55, %v15220_v44  ;;  %v15081_v17 = vpop.f32.mrb[6].mxu0  ;;  %v15223_v40 = vpop.f32.mrb[42].mxu1  ;;  %v15080_v27 = vadd.f32 %v15079_v33, %v15078_v42  ;;  %v7169_v33 = vld [vmem:[#allocation2 + $0x128] sm:$0xff] }
 0x68b   : > { %v15082_v1 = vpop.f32.mrb[7].mxu0  ;;  %v15224_v6 = vpop.f32.mrb[43].mxu1 }
 0x68c   : > { %v15225_v39 = vadd.f32 %v15224_v6, %v15223_v40  ;;  %v20248_v23 = vadd.f32 %v15216_v51, %v15080_v27  ;;  %v15083_v59 = vadd.f32 %v15082_v1, %v15081_v17  ;;  %v7189_v51 = vpack.c.bf16 %v7167_v45, %v7166_v54  ;;  %v7168_v40 = vld [vmem:[#allocation2 + $0x120] sm:$0xff]  ;;  %v7236_v45 = vld [vmem:[#allocation2 + $0x151] sm:$0xff]  ;;  %v7238_v54 = vld [vmem:[#allocation2 + $0x169] sm:$0xff] }
 0x68d   : > { %7678 = vmatmul.mubr.bf16.gmra.mrb[80].mxu0 %v7188_v30  ;;  %v7190_v1 = vpack.c.bf16 %v7169_v33, %v7168_v40  ;;  %v7234_v6 = vld [vmem:[#allocation2 + $0x139] sm:$0xff] }
 0x68e   : > { %7685 = vmatprep.mubr.bf16.mxu0 %v7253_v0  ;;  %v20250_v52 = vadd.f32 %v15219_v11, %v15083_v59  ;;  %v7255_v30 = vpack.c.bf16 %v7235_v62, %v7234_v6  ;;  %v7237_v59 = vld [vmem:[#allocation2 + $0x159] sm:$0xff]  ;;  %v7278_v6 = vld [vmem:[#allocation2 + $0x4a] sm:$0xff] }
 0x68f   : > { %v7176_v33 = vld [vmem:[#allocation2 + $0x180] sm:$0xff] }
 0x690   : > { %v15084_v20 = vpop.f32.mrb[8].mxu0  ;;  %v15226_v8 = vpop.f32.mrb[44].mxu1 }
 0x691   : > { %v15085_v14 = vpop.f32.mrb[9].mxu0  ;;  %v15227_v9 = vpop.f32.mrb[45].mxu1 }
 0x692   : > { %v15228_v43 = vadd.f32 %v15227_v9, %v15226_v8  ;;  %v15087_v21 = vpop.f32.mrb[10].mxu0  ;;  %v15229_v2 = vpop.f32.mrb[46].mxu1  ;;  %v15086_v13 = vadd.f32 %v15085_v14, %v15084_v20  ;;  %v7170_v20 = vld [vmem:[#allocation2 + $0x138] sm:$0xff]  ;;  %v7256_v14 = vpack.c.bf16 %v7237_v59, %v7236_v45  ;;  %v7283_v45 = vld [vmem:[#allocation2 + $0x82] sm:$0xff] }
 0x693   : > { %v15088_v34 = vpop.f32.mrb[11].mxu0  ;;  %v15230_v28 = vpop.f32.mrb[47].mxu1  ;;  %v7173_v9 = vld [vmem:[#allocation2 + $0x158] sm:$0xff] }
 0x694   : > { %v15231_v50 = vadd.f32 %v15230_v28, %v15229_v2  ;;  %v20252_v42 = vadd.f32 %v15222_v53, %v15086_v13  ;;  %v15089_v11 = vadd.f32 %v15088_v34, %v15087_v21  ;;  %v7172_v21 = vld [vmem:[#allocation2 + $0x150] sm:$0xff]  ;;  %v7174_v28 = vld [vmem:[#allocation2 + $0x168] sm:$0xff] }
 0x695   : > { %7686 = vmatmul.mubr.bf16.gmra.mrb[84].mxu0 %v7189_v51  ;;  %v7192_v2 = vpack.c.bf16 %v7173_v9, %v7172_v21  ;;  %v7175_v13 = vld [vmem:[#allocation2 + $0x170] sm:$0xff]  ;;  %v7285_v9 = vld [vmem:[#allocation2 + $0x9a] sm:$0xff] }
 0x696   : > { %7693 = vmatprep.mubr.bf16.mxu0 %v7254_v58  ;;  %v20254_v44 = vadd.f32 %v15225_v39, %v15089_v11  ;;  %v7171_v39 = vld [vmem:[#allocation2 + $0x140] sm:$0xff]  ;;  %v7241_v34 = vld [vmem:[#allocation2 + $0x189] sm:$0xff]  ;;  %v7193_v51 = vpack.c.bf16 %v7175_v13, %v7174_v28 }
 0x697   : > { %v7191_v8 = vpack.c.bf16 %v7171_v39, %v7170_v20  ;;  %v7242_v58 = vld [vmem:[#allocation2 + $0x199] sm:$0xff]  ;;  %v7243_v11 = vld [vmem:[#allocation2 + $0x1a1] sm:$0xff]  ;;  %v7281_v39 = vld [vmem:[#allocation2 + $0x6a] sm:$0xff] }
 0x698   : > { %v15090_v10 = vpop.f32.mrb[12].mxu0  ;;  %v7289_v13 = vld [vmem:[#allocation2 + $0xca] sm:$0xff] }
 0x699   : > { %v15091_v55 = vpop.f32.mrb[13].mxu0 }
 0x69a   : > { %v15093_v17 = vpop.f32.mrb[14].mxu0  ;;  %v15092_v47 = vadd.f32 %v15091_v55, %v15090_v10  ;;  %v7177_v10 = vld [vmem:[#allocation2 + $0x188] sm:$0xff]  ;;  %v7259_v55 = vpack.c.bf16 %v7243_v11, %v7242_v58  ;;  %v7293_v58 = vld [vmem:[#allocation2 + $0xfa] sm:$0xff] }
 0x69b   : > { %v15094_v27 = vpop.f32.mrb[15].mxu0  ;;  %v7194_v62 = vpack.c.bf16 %v7177_v10, %v7176_v33  ;;  %v7294_v33 = vld [vmem:[#allocation2 + $0x10a] sm:$0xff] }
 0x69c   : > { %v20256_v60 = vadd.f32 %v15228_v43, %v15092_v47  ;;  %v15095_v53 = vadd.f32 %v15094_v27, %v15093_v17  ;;  %v7257_v43 = vpack.c.bf16 %v7239_v25, %v7238_v54  ;;  %v18202_v17 = vld [vmem:[#allocation2] sm:$0xff]  ;;  %v7276_v47 = vld [vmem:[#allocation2 + $0x32] sm:$0xff] }
 0x69d   : > { %7694 = vmatmul.mubr.bf16.gmra.mrb[88].mxu0 %v7190_v1  ;;  %v20260_v40 = vpack.c.bf16 %v18202_v17, %v18202_v17  ;;  %v7277_v27 = vld [vmem:[#allocation2 + $0x3a] sm:$0xff]  ;;  %v7287_v54 = vld [vmem:[#allocation2 + $0xb2] sm:$0xff]  ;;  %v7297_v17 = vld [vmem:[#allocation2 + $0x12a] sm:$0xff] }
 0x69e   : > { %7701 = vmatprep.mubr.bf16.mxu0 %v7255_v30  ;;  %v20258_v0 = vadd.f32 %v15231_v50, %v15095_v53  ;;  %v7258_v50 = vpack.c.bf16 %v7241_v34, %v7240_v15  ;;  %v7308_v1 = vpack.c.bf16 %v7277_v27, %v7276_v47  ;;  %v7279_v30 = vld [vmem:[#allocation2 + $0x52] sm:$0xff]  ;;  %v7280_v53 = vld [vmem:[#allocation2 + $0x62] sm:$0xff] }
 0x69f   : > { %v7309_v59 = vpack.c.bf16 %v7279_v30, %v7278_v6  ;;  %v7310_v20 = vpack.c.bf16 %v7281_v39, %v7280_v53  ;;  %v7291_v15 = vld [vmem:[#allocation2 + $0xe2] sm:$0xff]  ;;  %v7300_v30 = vld [vmem:[#allocation2 + $0x152] sm:$0xff]  ;;  %v7301_v53 = vld [vmem:[#allocation2 + $0x15a] sm:$0xff] }
 0x6a0   : > { %v7299_v6 = vld [vmem:[#allocation2 + $0x142] sm:$0xff] }
 0x6a5   : > { %7702 = vmatmul.mubr.bf16.gmra.mrb[92].mxu0 %v7191_v8  ;;  %v7282_v8 = vld [vmem:[#allocation2 + $0x7a] sm:$0xff] }
 0x6a6   : > { %7709 = vmatprep.mubr.bf16.mxu0 %v7256_v14  ;;  %v7284_v14 = vld [vmem:[#allocation2 + $0x92] sm:$0xff]  ;;  %v7311_v25 = vpack.c.bf16 %v7283_v45, %v7282_v8  ;;  %v7304_v45 = vld [vmem:[#allocation2 + $0x182] sm:$0xff] }
 0x6a7   : > { %v7312_v21 = vpack.c.bf16 %v7285_v9, %v7284_v14  ;;  %v7303_v8 = vld [vmem:[#allocation2 + $0x172] sm:$0xff]  ;;  %v7305_v14 = vld [vmem:[#allocation2 + $0x18a] sm:$0xff] }
 0x6ad   : > { %7710 = vmatmul.mubr.bf16.gmra.mrb[96].mxu0 %v7192_v2  ;;  %v7286_v2 = vld [vmem:[#allocation2 + $0xaa] sm:$0xff] }
 0x6ae   : > { %7717 = vmatprep.mubr.bf16.mxu0 %v7257_v43  ;;  %v7288_v43 = vld [vmem:[#allocation2 + $0xc2] sm:$0xff]  ;;  %v7313_v34 = vpack.c.bf16 %v7287_v54, %v7286_v2 }
 0x6af   : > { %v7314_v28 = vpack.c.bf16 %v7289_v13, %v7288_v43  ;;  %v7307_v2 = vld [vmem:[#allocation2 + $0x1a2] sm:$0xff] }
 0x6b5   : > { %7718 = vmatmul.mubr.bf16.gmra.mrb[100].mxu0 %v7193_v51  ;;  %v7290_v51 = vld [vmem:[#allocation2 + $0xda] sm:$0xff] }
 0x6b6   : > { %7725 = vmatprep.mubr.bf16.mxu0 %v7258_v50  ;;  %v7292_v50 = vld [vmem:[#allocation2 + $0xf2] sm:$0xff]  ;;  %v7315_v11 = vpack.c.bf16 %v7291_v15, %v7290_v51 }
 0x6b7   : > { %v7316_v10 = vpack.c.bf16 %v7293_v58, %v7292_v50 }
 0x6bd   : > { %7726 = vmatmul.mubr.bf16.gmra.mrb[104].mxu0 %v7194_v62  ;;  %v7296_v62 = vld [vmem:[#allocation2 + $0x122] sm:$0xff] }
 0x6be   : > { %7733 = vmatprep.mubr.bf16.mxu0 %v7259_v55  ;;  %v7295_v55 = vld [vmem:[#allocation2 + $0x112] sm:$0xff]  ;;  %v7318_v27 = vpack.c.bf16 %v7297_v17, %v7296_v62 }
 0x6bf   : > { %v7317_v47 = vpack.c.bf16 %v7295_v55, %v7294_v33 }
 0x6c5   : > { %7734 = vmatmul.mubr.bf16.gmra.mrb[108].mxu0 %v20260_v40 }
 0x6c6   : > { %16642 = vmatprep.mubr.bf16.mxu0 %v7308_v1  ;;  %v7298_v1 = vld [vmem:[#allocation2 + $0x13a] sm:$0xff] }
 0x6c7   : > { %v7319_v39 = vpack.c.bf16 %v7299_v6, %v7298_v1 }
 0x6cd   : > { %16643 = vmatmul.mubr.bf16.vlgmr.msra.gmra.mrb[16].mxu0 %v7309_v59  ;;  %v7320_v59 = vpack.c.bf16 %v7301_v53, %v7300_v30 }
 0x6ce   : > { %16646 = vmatprep.mubr.bf16.mxu0 %v7310_v20  ;;  %v7302_v20 = vld [vmem:[#allocation2 + $0x16a] sm:$0xff] }
 0x6cf   : > { %v7321_v9 = vpack.c.bf16 %v7303_v8, %v7302_v20 }
 0x6d5   : > { %16647 = vmatmul.mubr.bf16.gmra.mrb[20].mxu0 %v7311_v25  ;;  %v7322_v25 = vpack.c.bf16 %v7305_v14, %v7304_v45 }
 0x6d6   : > { %16650 = vmatprep.mubr.bf16.mxu0 %v7312_v21  ;;  %v7306_v21 = vld [vmem:[#allocation2 + $0x19a] sm:$0xff] }
 0x6d7   : > { %v7323_v54 = vpack.c.bf16 %v7307_v2, %v7306_v21 }
 0x6dd   : > { %16651 = vmatmul.mubr.bf16.gmra.mrb[24].mxu0 %v7313_v34 }
 0x6de   : > { %16654 = vmatprep.mubr.bf16.mxu0 %v7314_v28 }
 0x6e5   : > { %16655 = vmatmul.mubr.bf16.gmra.mrb[28].mxu0 %v7315_v11 }
 0x6e6   : > { %16658 = vmatprep.mubr.bf16.mxu0 %v7316_v10 }
 0x6ed   : > { %16659 = vmatmul.mubr.bf16.gmra.mrb[32].mxu0 %v7317_v47 }
 0x6ee   : > { %16662 = vmatprep.mubr.bf16.mxu0 %v7318_v27 }
 0x6f5   : > { %16663 = vmatmul.mubr.bf16.gmra.mrb[36].mxu0 %v7319_v39 }
 0x6f6   : > { %16666 = vmatprep.mubr.bf16.mxu0 %v7320_v59 }
 0x6fd   : > { %16667 = vmatmul.mubr.bf16.gmra.mrb[40].mxu0 %v7321_v9 }
 0x6fe   : > { %16670 = vmatprep.mubr.bf16.mxu0 %v7322_v25 }
 0x705   : > { %16671 = vmatmul.mubr.bf16.gmra.mrb[44].mxu0 %v7323_v54 }
 0x720   : > { %v15272_v43 = vpop.f32.mrb[48].mxu0 }
 0x721   : > { %v15273_v13 = vpop.f32.mrb[49].mxu0 }
 0x722   : > { %v15274_v34 = vadd.f32 %v15273_v13, %v15272_v43  ;;  %v15275_v28 = vpop.f32.mrb[50].mxu0 }
 0x723   : > { %v15276_v51 = vpop.f32.mrb[51].mxu0 }
 0x724   : > { %v15277_v15 = vadd.f32 %v15276_v51, %v15275_v28  ;;  %v20264_v50 = vadd.f32 %v20155_v35, %v15274_v34 }
 0x726   : > { %v20267_v58 = vadd.f32 %v20163_v29, %v15277_v15 }
 0x728   : > { %v15278_v11 = vpop.f32.mrb[52].mxu0 }
 0x729   : > { %v15279_v10 = vpop.f32.mrb[53].mxu0 }
 0x72a   : > { %v15280_v33 = vadd.f32 %v15279_v10, %v15278_v11  ;;  %v15281_v55 = vpop.f32.mrb[54].mxu0 }
 0x72b   : > { %v15282_v62 = vpop.f32.mrb[55].mxu0 }
 0x72c   : > { %v15283_v17 = vadd.f32 %v15282_v62, %v15281_v55  ;;  %v20270_v47 = vadd.f32 %v20171_v19, %v15280_v33 }
 0x72e   : > { %v20273_v27 = vadd.f32 %v20175_v24, %v15283_v17 }
 0x730   : > { %v15284_v1 = vpop.f32.mrb[56].mxu0 }
 0x731   : > { %v15285_v6 = vpop.f32.mrb[57].mxu0 }
 0x732   : > { %v15286_v30 = vadd.f32 %v15285_v6, %v15284_v1  ;;  %v15287_v35 = vpop.f32.mrb[58].mxu0 }
 0x733   : > { %v15288_v53 = vpop.f32.mrb[59].mxu0 }
 0x734   : > { %v15289_v39 = vadd.f32 %v15288_v53, %v15287_v35  ;;  %v20276_v29 = vadd.f32 %v20177_v18, %v15286_v30 }
 0x736   : > { %v20279_v59 = vadd.f32 %v20181_v16, %v15289_v39 }
 0x738   : > { %v15290_v20 = vpop.f32.mrb[60].mxu0 }
 0x739   : > { %v15291_v8 = vpop.f32.mrb[61].mxu0 }
 0x73a   : > { %v15292_v45 = vadd.f32 %v15291_v8, %v15290_v20  ;;  %v15293_v19 = vpop.f32.mrb[62].mxu0 }
 0x73b   : > { %v15294_v14 = vpop.f32.mrb[63].mxu0 }
 0x73c   : > { %v15295_v9 = vadd.f32 %v15294_v14, %v15293_v19  ;;  %v20282_v24 = vadd.f32 %v20183_v32, %v15292_v45 }
 0x73e   : > { %v20285_v25 = vadd.f32 %v20187_v56, %v15295_v9 }
 0x740   : > { %v15296_v21 = vpop.f32.mrb[64].mxu0 }
 0x741   : > { %v15297_v2 = vpop.f32.mrb[65].mxu0 }
 0x742   : > { %v15298_v54 = vadd.f32 %v15297_v2, %v15296_v21  ;;  %v15299_v18 = vpop.f32.mrb[66].mxu0 }
 0x743   : > { %v15300_v43 = vpop.f32.mrb[67].mxu0 }
 0x744   : > { %v15301_v13 = vadd.f32 %v15300_v43, %v15299_v18  ;;  %v20288_v16 = vadd.f32 %v20189_v4, %v15298_v54  ;;  %v18057_v18 = vld [vmem:[%s21737_s9 + $0x108] sm:$0xff]  }
 0x746   : > { %v20291_v34 = vadd.f32 %v20192_v12, %v15301_v13  ;;  %v18061_v13 = vld [vmem:[%s21737_s9 + $0x48] sm:$0xff]  }
 0x748   : > { %v15302_v28 = vpop.f32.mrb[68].mxu0 }
 0x749   : > { %v15303_v51 = vpop.f32.mrb[69].mxu0 }
 0x74a   : > { %v15304_v15 = vadd.f32 %v15303_v51, %v15302_v28  ;;  %v15305_v32 = vpop.f32.mrb[70].mxu0  ;;  %v18058_v51 = vld [vmem:[%s21737_s9 + $0xc8] sm:$0xff]  }
 0x74b   : > { %v15306_v11 = vpop.f32.mrb[71].mxu0 }
 0x74c   : > { %v15307_v10 = vadd.f32 %v15306_v11, %v15305_v32  ;;  %v20294_v56 = vadd.f32 %v20197_v61, %v15304_v15  ;;  %v18062_v11 = vld [vmem:[%s21737_s9 + $0x8] sm:$0xff]  }
 0x74e   : > { %v20297_v33 = vadd.f32 %v20200_v49, %v15307_v10  ;;  %v18063_v10 = vld [vmem:[%s21737_s9 + $0x110] sm:$0xff]  }
 0x750   : > { %v15308_v55 = vpop.f32.mrb[72].mxu0 }
 0x751   : > { %v15309_v62 = vpop.f32.mrb[73].mxu0 }
 0x752   : > { %v15310_v17 = vadd.f32 %v15309_v62, %v15308_v55  ;;  %v15311_v4 = vpop.f32.mrb[74].mxu0  ;;  %v18064_v62 = vld [vmem:[%s21737_s9 + $0x50] sm:$0xff]  }
 0x753   : > { %v15312_v1 = vpop.f32.mrb[75].mxu0 }
 0x754   : > { %v15313_v6 = vadd.f32 %v15312_v1, %v15311_v4  ;;  %v20300_v12 = vadd.f32 %v20208_v26, %v15310_v17  ;;  %v18065_v1 = vld [vmem:[%s21737_s9 + $0xd0] sm:$0xff]  }
 0x756   : > { %v20303_v30 = vadd.f32 %v20210_v31, %v15313_v6 }
 0x758   : > { %v15314_v35 = vpop.f32.mrb[76].mxu0 }
 0x759   : > { %v15315_v53 = vpop.f32.mrb[77].mxu0 }
 0x75a   : > { %v15316_v39 = vadd.f32 %v15315_v53, %v15314_v35  ;;  %v15317_v61 = vpop.f32.mrb[78].mxu0  ;;  %v18066_v35 = vld [vmem:[%s21737_s9 + $0x10] sm:$0xff]   ;;  %v18071_v53 = vld [vmem:[%s21737_s9 + $0x118] sm:$0xff]  }
 0x75b   : > { %v15318_v20 = vpop.f32.mrb[79].mxu0 }
 0x75c   : > { %v15319_v8 = vadd.f32 %v15318_v20, %v15317_v61  ;;  %v20306_v49 = vadd.f32 %v20218_v46, %v15316_v39  ;;  %v18055_v46 = vld [vmem:[%s21737_s9 + $0x100] sm:$0xff]  }
 0x75d   : > { %15392 = vmatprep.subr.bf16.mxu1 %v18055_v46  ;;  %v18077_v46 = vld [vmem:[%s21737_s9 + $0xe0] sm:$0xff]  }
 0x75e   : > { %v20309_v45 = vadd.f32 %v20220_v57, %v15319_v8  ;;  %v18056_v57 = vld [vmem:[%s21737_s9 + $0xc0] sm:$0xff]  }
 0x75f   : > { %15393 = vmatpush3.bf16.msra.mxu1 %v18056_v57 }
 0x760   : > { %v15320_v19 = vpop.f32.mrb[80].mxu0  ;;  %15394 = vmatprep.subr.bf16.mxu1 %v18057_v18  ;;  %v18070_v18 = vld [vmem:[%s21737_s9 + $0x20] sm:$0xff]  }
 0x761   : > { %v15321_v14 = vpop.f32.mrb[81].mxu0 }
 0x762   : > { %v15322_v9 = vadd.f32 %v15321_v14, %v15320_v19  ;;  %v15323_v26 = vpop.f32.mrb[82].mxu0  ;;  %v18068_v19 = vld [vmem:[%s21737_s9 + $0x18] sm:$0xff]   ;;  %v18075_v14 = vld [vmem:[%s21737_s9 + $0x120] sm:$0xff]  }
 0x763   : > { %v15324_v21 = vpop.f32.mrb[83].mxu0  ;;  %15395 = vmatpush3.bf16.msra.mxu1 %v18058_v51  ;;  %v18076_v51 = vld [vmem:[%s21737_s9 + $0x70] sm:$0xff]  }
 0x764   : > { %v15325_v2 = vadd.f32 %v15324_v21, %v15323_v26  ;;  %v20312_v31 = vadd.f32 %v20228_v41, %v15322_v9  ;;  %v18059_v41 = vld [vmem:[%s21737_s9 + $0x40] sm:$0xff]   ;;  %15396 = vmatprep.subr.bf16.mxu1 %v18063_v10  ;;  %v18078_v10 = vld [vmem:[%s21737_s9 + $0x30] sm:$0xff]  }
 0x765   : > { %15528 = vmatprep.subr.bf16.mxu0 %v18059_v41  ;;  %v18069_v26 = vld [vmem:[%s21737_s9 + $0x60] sm:$0xff]  }
 0x766   : > { %v20315_v54 = vadd.f32 %v20230_v48, %v15325_v2  ;;  %v18060_v48 = vld [vmem:[%s21737_s9] sm:$0xff]  }
 0x767   : > { %15529 = vmatpush3.bf16.msra.mxu0 %v18060_v48  ;;  %15397 = vmatpush3.bf16.msra.mxu1 %v18065_v1 }
 0x768   : > { %v15326_v43 = vpop.f32.mrb[84].mxu0  ;;  %15530 = vmatprep.subr.bf16.mxu0 %v18061_v13  ;;  %15398 = vmatprep.subr.bf16.mxu1 %v18071_v53 }
 0x769   : > { %v15327_v28 = vpop.f32.mrb[85].mxu0 }
 0x76a   : > { %v15328_v15 = vadd.f32 %v15327_v28, %v15326_v43  ;;  %v15329_v32 = vpop.f32.mrb[86].mxu0 }
 0x76b   : > { %v15330_v55 = vpop.f32.mrb[87].mxu0  ;;  %15531 = vmatpush3.bf16.msra.mxu0 %v18062_v11 }
 0x76c   : > { %v15331_v17 = vadd.f32 %v15330_v55, %v15329_v32  ;;  %v20348_v4 = vadd.f32 %v20232_v7, %v15328_v15  ;;  %15532 = vmatprep.subr.bf16.mxu0 %v18064_v62  ;;  %v18067_v7 = vld [vmem:[%s21737_s9 + $0x58] sm:$0xff]  }
 0x76e   : > { %v20354_v6 = vadd.f32 %v20234_v37, %v15331_v17  ;;  %v18073_v37 = vld [vmem:[%s21737_s9 + $0xd8] sm:$0xff]  }
 0x76f   : > { %15533 = vmatpush3.bf16.msra.mxu0 %v18066_v35  ;;  %15399 = vmatpush3.bf16.msra.mxu1 %v18073_v37 }
 0x770   : > { %v15332_v39 = vpop.f32.mrb[88].mxu0  ;;  %15534 = vmatprep.subr.bf16.mxu0 %v18067_v7  ;;  %15400 = vmatprep.subr.bf16.mxu1 %v18075_v14 }
 0x771   : > { %v15333_v61 = vpop.f32.mrb[89].mxu0 }
 0x772   : > { %v15334_v20 = vadd.f32 %v15333_v61, %v15332_v39  ;;  %v15335_v8 = vpop.f32.mrb[90].mxu0 }
 0x773   : > { %v15336_v9 = vpop.f32.mrb[91].mxu0  ;;  %15535 = vmatpush3.bf16.msra.mxu0 %v18068_v19  ;;  %15401 = vmatpush3.bf16.msra.mxu1 %v18077_v46 }
 0x774   : > { %v15337_v21 = vadd.f32 %v15336_v9, %v15335_v8  ;;  %v20378_v2 = vadd.f32 %v20236_v36, %v15334_v20  ;;  %15536 = vmatprep.subr.bf16.mxu0 %v18069_v26  ;;  %v18072_v36 = vld [vmem:[%s21737_s9 + $0x68] sm:$0xff]  }
 0x776   : > { %v20384_v57 = vadd.f32 %v20238_v3, %v15337_v21  ;;  %v18074_v3 = vld [vmem:[%s21737_s9 + $0x28] sm:$0xff]  }
 0x777   : > { %15537 = vmatpush3.bf16.msra.mxu0 %v18070_v18 }
 0x778   : > { %v15338_v41 = vpop.f32.mrb[92].mxu0  ;;  %15538 = vmatprep.subr.bf16.mxu0 %v18072_v36 }
 0x779   : > { %v15339_v48 = vpop.f32.mrb[93].mxu0 }
 0x77a   : > { %v15340_v43 = vadd.f32 %v15339_v48, %v15338_v41  ;;  %v15341_v13 = vpop.f32.mrb[94].mxu0 }
 0x77b   : > { %v15342_v28 = vpop.f32.mrb[95].mxu0  ;;  %15539 = vmatpush3.bf16.msra.mxu0 %v18074_v3 }
 0x77c   : > { %v15343_v15 = vadd.f32 %v15342_v28, %v15341_v13  ;;  %v20399_v32 = vadd.f32 %v20240_v63, %v15340_v43  ;;  %15540 = vmatprep.subr.bf16.mxu0 %v18076_v51  ;;  %v18080_v13 = vld [vmem:[%s21737_s9 + $0x78] sm:$0xff]  }
 0x77d   : > { %v18082_v51 = vld [vmem:[%s21737_s9 + $0x38] sm:$0xff]  }
 0x77e   : > { %v20402_v11 = vadd.f32 %v20242_v5, %v15343_v15 }
 0x77f   : > { %15541 = vmatpush3.bf16.msra.mxu0 %v18078_v10  ;;  %v8231_v10 = vld [vmem:[#allocation2 + $0x1] sm:$0xff] }
 0x780   : > { %v15344_v55 = vpop.f32.mrb[96].mxu0  ;;  %15542 = vmatprep.subr.bf16.mxu0 %v18080_v13 }
 0x781   : > { %v15345_v62 = vpop.f32.mrb[97].mxu0 }
 0x782   : > { %v15346_v17 = vadd.f32 %v15345_v62, %v15344_v55  ;;  %v15347_v1 = vpop.f32.mrb[98].mxu0  ;;  %v8232_v55 = vld [vmem:[#allocation2 + $0x9] sm:$0xff] }
 0x783   : > { %v15348_v35 = vpop.f32.mrb[99].mxu0  ;;  %15543 = vmatpush3.bf16.msra.mxu0 %v18082_v51  ;;  %v8263_v62 = vpack.c.bf16 %v8232_v55, %v8231_v10 }
 0x784   : > { %v15349_v53 = vadd.f32 %v15348_v35, %v15347_v1  ;;  %v20408_v7 = vadd.f32 %v20244_v38, %v15346_v17  ;;  %v18084_v1 = vld [vmem:[%s21737_s9 + $0xf0] sm:$0xff]  }
 0x785   : > { %9386 = vmatprep.mubr.bf16.mxu0 %v8263_v62 }
 0x786   : > { %v20411_v63 = vadd.f32 %v20246_v22, %v15349_v53  ;;  %9387 = vmatmul.mubr.bf16.vlgmr.msra.gmra.mrb[112].mxu0 %v20260_v40 }
 0x788   : > { %v15350_v5 = vpop.f32.mrb[100].mxu0 }
 0x789   : > { %v15351_v39 = vpop.f32.mrb[101].mxu0 }
 0x78a   : > { %v15352_v61 = vadd.f32 %v15351_v39, %v15350_v5  ;;  %v15353_v37 = vpop.f32.mrb[102].mxu0 }
 0x78b   : > { %v15354_v20 = vpop.f32.mrb[103].mxu0 }
 0x78c   : > { %v15355_v8 = vadd.f32 %v15354_v20, %v15353_v37  ;;  %v20414_v19 = vadd.f32 %v20248_v23, %v15352_v61  ;;  %v18085_v61 = vld [vmem:[%s21737_s9 + $0x138] sm:$0xff]  }
 0x78e   : > { %v20417_v14 = vadd.f32 %v20250_v52, %v15355_v8  ;;  %v18079_v52 = vld [vmem:[%s21737_s9 + $0x128] sm:$0xff]  }
 0x78f   : > { %15402 = vmatprep.subr.bf16.mxu1 %v18079_v52 }
 0x790   : > { %v15356_v9 = vpop.f32.mrb[104].mxu0 }
 0x791   : > { %v15357_v26 = vpop.f32.mrb[105].mxu0 }
 0x792   : > { %v15358_v21 = vadd.f32 %v15357_v26, %v15356_v9  ;;  %v15359_v38 = vpop.f32.mrb[106].mxu0 }
 0x793   : > { %v15360_v46 = vpop.f32.mrb[107].mxu0 }
 0x794   : > { %v15361_v18 = vadd.f32 %v15360_v46, %v15359_v38  ;;  %v20420_v22 = vadd.f32 %v20252_v42, %v15358_v21 }
 0x796   : > { %v20423_v36 = vadd.f32 %v20254_v44, %v15361_v18  ;;  %v18081_v44 = vld [vmem:[%s21737_s9 + $0xe8] sm:$0xff]  }
 0x797   : > { %15403 = vmatpush3.bf16.msra.mxu1 %v18081_v44 }
 0x798   : > { %v15362_v41 = vpop.f32.mrb[108].mxu0 }
 0x799   : > { %v15363_v48 = vpop.f32.mrb[109].mxu0 }
 0x79a   : > { %v15364_v43 = vadd.f32 %v15363_v48, %v15362_v41  ;;  %v15365_v23 = vpop.f32.mrb[110].mxu0 }
 0x79b   : > { %v15366_v3 = vpop.f32.mrb[111].mxu0 }
 0x79c   : > { %v15367_v28 = vadd.f32 %v15366_v3, %v15365_v23  ;;  %v20432_v42 = vadd.f32 %v20256_v60, %v15364_v43  ;;  %v18083_v60 = vld [vmem:[%s21737_s9 + $0x130] sm:$0xff]  }
 0x79d   : > { %15404 = vmatprep.subr.bf16.mxu1 %v18083_v60 }
 0x79e   : > { %v20441_v15 = vadd.f32 %v20258_v0, %v15367_v28  ;;  %v20453_v0 = vld [vmem:[%s21736_s8] ss:$0 sm:$0xff]  ;;  %15405 = vmatpush3.bf16.msra.mxu1 %v18084_v1 }
 0x79f   : > { %15406 = vmatprep.subr.bf16.mxu1 %v18085_v61 }
 0x7a0   : > { %v16644_v17 = vpop.f32.mrb[16].mxu0 }
 0x7a1   : > { %v17220_v35 = vadd.f32 %v20270_v47, %v16644_v17  ;;  %v7776_v53 = vpop.f32.mrb[17].mxu0 }
 0x7a2   : > { %v17223_v5 = vadd.f32 %v20264_v50, %v7776_v53  ;;  %v16645_v39 = vpop.f32.mrb[18].mxu0  ;;  %v18086_v50 = vld [vmem:[%s21737_s9 + $0xf8] sm:$0xff]  }
 0x7a3   : > { %v17226_v37 = vadd.f32 %v20273_v27, %v16645_v39  ;;  %v7779_v47 = vpop.f32.mrb[19].mxu0  ;;  %v7944_v9 = vadd.f32 %v17220_v35, %v20453_v0  ;;  %15407 = vmatpush3.bf16.msra.mxu1 %v18086_v50 }
 0x7a4   : > { %v7942_v20 = vadd.f32 %v17223_v5, %v20453_v0  ;;  %v17229_v8 = vadd.f32 %v20267_v58, %v7779_v47 }
 0x7a5   : > { %v7945_v21 = vadd.f32 %v17226_v37, %v20453_v0  ;;  %v7976_v18 = vmax.f32 %v7944_v9, 0.0 }
 0x7a6   : > { %v7974_v40 = vmax.f32 %v7942_v20, 0.0  ;;  %v7943_v26 = vadd.f32 %v17229_v8, %v20453_v0 }
 0x7a7   : > { %v7977_v52 = vmax.f32 %v7945_v21, 0.0 }
 0x7a8   : > { %v7975_v38 = vmax.f32 %v7943_v26, 0.0  ;;  %v16648_v27 = vpop.f32.mrb[20].mxu0  ;;  %8038 = vrot.lane.b32.xlu0 %v7974_v40, %s18216_s27 }
 0x7a9   : > { %v17232_v58 = vadd.f32 %v20282_v24, %v16648_v27  ;;  %v7792_v46 = vpop.f32.mrb[21].mxu0 }
 0x7aa   : > { %v17235_v41 = vadd.f32 %v20276_v29, %v7792_v46  ;;  %v16649_v48 = vpop.f32.mrb[22].mxu0  ;;  %8040 = vrot.lane.b32.xlu1 %v7975_v38, %s18216_s27 }
 0x7ab   : > { %v17238_v43 = vadd.f32 %v20285_v25, %v16649_v48  ;;  %v7795_v23 = vpop.f32.mrb[23].mxu0  ;;  %v7948_v28 = vadd.f32 %v17232_v58, %v20453_v0 }
 0x7ac   : > { %v7946_v13 = vadd.f32 %v17235_v41, %v20453_v0  ;;  %v17241_v3 = vadd.f32 %v20279_v59, %v7795_v23  ;;  %8042 = vrot.lane.b32.xlu0 %v7976_v18, %s18216_s27 }
 0x7ad   : > { %v7949_v29 = vadd.f32 %v17238_v43, %v20453_v0  ;;  %v7980_v60 = vmax.f32 %v7948_v28, 0.0 }
 0x7ae   : > { %v7978_v24 = vmax.f32 %v7946_v13, 0.0  ;;  %v7947_v44 = vadd.f32 %v17241_v3, %v20453_v0  ;;  %8044 = vrot.lane.b32.xlu1 %v7977_v52, %s18216_s27 }
 0x7af   : > { %v7981_v35 = vmax.f32 %v7949_v29, 0.0 }
 0x7b0   : > { %v7979_v51 = vmax.f32 %v7947_v44, 0.0  ;;  %v16652_v10 = vpop.f32.mrb[24].mxu0  ;;  %8046 = vrot.lane.b32.xlu0 %v7978_v24, %s18216_s27 }
 0x7b1   : > { %v17244_v25 = vadd.f32 %v20294_v56, %v16652_v10  ;;  %v7808_v55 = vpop.f32.mrb[25].mxu0 }
 0x7b2   : > { %v17247_v59 = vadd.f32 %v20288_v16, %v7808_v55  ;;  %v16653_v62 = vpop.f32.mrb[26].mxu0  ;;  %8048 = vrot.lane.b32.xlu1 %v7979_v51, %s18216_s27 }
 0x7b3   : > { %v17250_v17 = vadd.f32 %v20297_v33, %v16653_v62  ;;  %v7811_v1 = vpop.f32.mrb[27].mxu0  ;;  %v7952_v39 = vadd.f32 %v17244_v25, %v20453_v0 }
 0x7b4   : > { %v7950_v53 = vadd.f32 %v17247_v59, %v20453_v0  ;;  %v17253_v5 = vadd.f32 %v20291_v34, %v7811_v1  ;;  %8050 = vrot.lane.b32.xlu0 %v7980_v60, %s18216_s27 }
 0x7b5   : > { %v7953_v16 = vadd.f32 %v17250_v17, %v20453_v0  ;;  %v7984_v8 = vmax.f32 %v7952_v39, 0.0 }
 0x7b6   : > { %v7982_v56 = vmax.f32 %v7950_v53, 0.0  ;;  %v7951_v61 = vadd.f32 %v17253_v5, %v20453_v0  ;;  %8052 = vrot.lane.b32.xlu1 %v7981_v35, %s18216_s27 }
 0x7b7   : > { %v7985_v26 = vmax.f32 %v7953_v16, 0.0 }
 0x7b8   : > { %v7983_v37 = vmax.f32 %v7951_v61, 0.0  ;;  %v16656_v47 = vpop.f32.mrb[28].mxu0  ;;  %8054 = vrot.lane.b32.xlu0 %v7982_v56, %s18216_s27 }
 0x7b9   : > { %v17256_v33 = vadd.f32 %v20306_v49, %v16656_v47  ;;  %v7824_v20 = vpop.f32.mrb[29].mxu0 }
 0x7ba   : > { %v17259_v34 = vadd.f32 %v20300_v12, %v7824_v20  ;;  %v16657_v50 = vpop.f32.mrb[30].mxu0  ;;  %8056 = vrot.lane.b32.xlu1 %v7983_v37, %s18216_s27 }
 0x7bb   : > { %v17262_v9 = vadd.f32 %v20309_v45, %v16657_v50  ;;  %v7827_v40 = vpop.f32.mrb[31].mxu0  ;;  %v7956_v27 = vadd.f32 %v17256_v33, %v20453_v0 }
 0x7bc   : > { %v7954_v21 = vadd.f32 %v17259_v34, %v20453_v0  ;;  %v17265_v38 = vadd.f32 %v20303_v30, %v7827_v40  ;;  %8058 = vrot.lane.b32.xlu0 %v7984_v8, %s18216_s27 }
 0x7bd   : > { %v7957_v12 = vadd.f32 %v17262_v9, %v20453_v0  ;;  %v7988_v48 = vmax.f32 %v7956_v27, 0.0 }
 0x7be   : > { %v7986_v49 = vmax.f32 %v7954_v21, 0.0  ;;  %v7955_v58 = vadd.f32 %v17265_v38, %v20453_v0  ;;  %8060 = vrot.lane.b32.xlu1 %v7985_v26, %s18216_s27 }
 0x7bf   : > { %v7989_v13 = vmax.f32 %v7957_v12, 0.0 }
 0x7c0   : > { %v7987_v46 = vmax.f32 %v7955_v58, 0.0  ;;  %v16660_v18 = vpop.f32.mrb[32].mxu0  ;;  %8062 = vrot.lane.b32.xlu0 %v7986_v49, %s18216_s27 }
 0x7c1   : > { %v17268_v45 = vadd.f32 %v20348_v4, %v16660_v18  ;;  %v7840_v41 = vpop.f32.mrb[33].mxu0 }
 0x7c2   : > { %v17271_v30 = vadd.f32 %v20312_v31, %v7840_v41  ;;  %v16661_v43 = vpop.f32.mrb[34].mxu0  ;;  %8064 = vrot.lane.b32.xlu1 %v7987_v46, %s18216_s27 }
 0x7c3   : > { %v17274_v23 = vadd.f32 %v20354_v6, %v16661_v43  ;;  %v7843_v52 = vpop.f32.mrb[35].mxu0  ;;  %v7960_v24 = vadd.f32 %v17268_v45, %v20453_v0 }
 0x7c4   : > { %v7958_v3 = vadd.f32 %v17271_v30, %v20453_v0  ;;  %v17277_v28 = vadd.f32 %v20315_v54, %v7843_v52  ;;  %8066 = vrot.lane.b32.xlu0 %v7988_v48, %s18216_s27 }
 0x7c5   : > { %v7961_v31 = vadd.f32 %v17274_v23, %v20453_v0  ;;  %v7992_v25 = vmax.f32 %v7960_v24, 0.0 }
 0x7c6   : > { %v7990_v4 = vmax.f32 %v7958_v3, 0.0  ;;  %v7959_v44 = vadd.f32 %v17277_v28, %v20453_v0  ;;  %8068 = vrot.lane.b32.xlu1 %v7989_v13, %s18216_s27 }
 0x7c7   : > { %v7993_v62 = vmax.f32 %v7961_v31, 0.0 }
 0x7c8   : > { %v7991_v29 = vmax.f32 %v7959_v44, 0.0  ;;  %v16664_v51 = vpop.f32.mrb[36].mxu0  ;;  %8070 = vrot.lane.b32.xlu0 %v7990_v4, %s18216_s27 }
 0x7c9   : > { %v17280_v6 = vadd.f32 %v20399_v32, %v16664_v51  ;;  %v7856_v10 = vpop.f32.mrb[37].mxu0  ;;  %v18088_v51 = vld [vmem:[%s21737_s9 + $0x148] sm:$0xff]  }
 0x7ca   : > { %v17283_v54 = vadd.f32 %v20378_v2, %v7856_v10  ;;  %v16665_v55 = vpop.f32.mrb[38].mxu0  ;;  %8072 = vrot.lane.b32.xlu1 %v7991_v29, %s18216_s27 }
 0x7cb   : > { %v17286_v60 = vadd.f32 %v20402_v11, %v16665_v55  ;;  %v7859_v59 = vpop.f32.mrb[39].mxu0  ;;  %v7964_v35 = vadd.f32 %v17280_v6, %v20453_v0 }
 0x7cc   : > { %v7962_v17 = vadd.f32 %v17283_v54, %v20453_v0  ;;  %v17289_v1 = vadd.f32 %v20384_v57, %v7859_v59  ;;  %8074 = vrot.lane.b32.xlu0 %v7992_v25, %s18216_s27 }
 0x7cd   : > { %v7965_v2 = vadd.f32 %v17286_v60, %v20453_v0  ;;  %v7996_v61 = vmax.f32 %v7964_v35, 0.0  ;;  %v18089_v60 = vld [vmem:[%s21737_s9 + $0x150] sm:$0xff]  }
 0x7ce   : > { %v7994_v32 = vmax.f32 %v7962_v17, 0.0  ;;  %v7963_v53 = vadd.f32 %v17289_v1, %v20453_v0  ;;  %8076 = vrot.lane.b32.xlu1 %v7993_v62, %s18216_s27 }
 0x7cf   : > { %v7997_v33 = vmax.f32 %v7965_v2, 0.0 }
 0x7d0   : > { %v7995_v5 = vmax.f32 %v7963_v53, 0.0  ;;  %v16668_v39 = vpop.f32.mrb[40].mxu0  ;;  %8078 = vrot.lane.b32.xlu0 %v7994_v32, %s18216_s27 }
 0x7d1   : > { %v17292_v11 = vadd.f32 %v20414_v19, %v16668_v39  ;;  %v7872_v56 = vpop.f32.mrb[41].mxu0 }
 0x7d2   : > { %v17295_v57 = vadd.f32 %v20408_v7, %v7872_v56  ;;  %v16669_v16 = vpop.f32.mrb[42].mxu0  ;;  %8080 = vrot.lane.b32.xlu1 %v7995_v5, %s18216_s27  ;;  %v18090_v5 = vld [vmem:[%s21737_s9 + $0x158] sm:$0xff]  }
 0x7d3   : > { %v17298_v37 = vadd.f32 %v20417_v14, %v16669_v16  ;;  %v7875_v47 = vpop.f32.mrb[43].mxu0  ;;  %v7968_v34 = vadd.f32 %v17292_v11, %v20453_v0 }
 0x7d4   : > { %v7966_v20 = vadd.f32 %v17295_v57, %v20453_v0  ;;  %v17301_v8 = vadd.f32 %v20411_v63, %v7875_v47  ;;  %8082 = vrot.lane.b32.xlu0 %v7996_v61, %s18216_s27  ;;  %v18091_v61 = vld [vmem:[%s21737_s9 + $0x160] sm:$0xff]  }
 0x7d5   : > { %v7969_v7 = vadd.f32 %v17298_v37, %v20453_v0  ;;  %v8000_v21 = vmax.f32 %v7968_v34, 0.0  ;;  %v18092_v34 = vld [vmem:[%s21737_s9 + $0x168] sm:$0xff]  }
 0x7d6   : > { %v7998_v19 = vmax.f32 %v7966_v20, 0.0  ;;  %v7967_v50 = vadd.f32 %v17301_v8, %v20453_v0  ;;  %8084 = vrot.lane.b32.xlu1 %v7997_v33, %s18216_s27 }
 0x7d7   : > { %v8001_v58 = vmax.f32 %v7969_v7, 0.0 }
 0x7d8   : > { %v7999_v9 = vmax.f32 %v7967_v50, 0.0  ;;  %v16672_v40 = vpop.f32.mrb[44].mxu0  ;;  %8086 = vrot.lane.b32.xlu0 %v7998_v19, %s18216_s27 }
 0x7d9   : > { %v17304_v14 = vadd.f32 %v20432_v42, %v16672_v40  ;;  %v7888_v26 = vpop.f32.mrb[45].mxu0 }
 0x7da   : > { %v17307_v63 = vadd.f32 %v20420_v22, %v7888_v26  ;;  %v16673_v38 = vpop.f32.mrb[46].mxu0  ;;  %8088 = vrot.lane.b32.xlu1 %v7999_v9, %s18216_s27  ;;  %v18093_v9 = vld [vmem:[%s21737_s9 + $0x170] sm:$0xff]  }
 0x7db   : > { %v17310_v27 = vadd.f32 %v20441_v15, %v16673_v38  ;;  %v7891_v49 = vpop.f32.mrb[47].mxu0  ;;  %v7972_v18 = vadd.f32 %v17304_v14, %v20453_v0 }
 0x7dc   : > { %v7970_v12 = vadd.f32 %v17307_v63, %v20453_v0  ;;  %v17313_v46 = vadd.f32 %v20423_v36, %v7891_v49  ;;  %8090 = vrot.lane.b32.xlu0 %v8000_v21, %s18216_s27  ;;  %v18087_v36 = vld [vmem:[%s21737_s9 + $0x140] sm:$0xff]   ;;  %v18094_v49 = vld [vmem:[%s21737_s9 + $0x178] sm:$0xff]  }
 0x7dd   : > { %v7973_v22 = vadd.f32 %v17310_v27, %v20453_v0  ;;  %v8004_v15 = vmax.f32 %v7972_v18, 0.0  ;;  %16674 = vmatprep.subr.bf16.mxu1 %v18087_v36 }
 0x7de   : > { %v8002_v42 = vmax.f32 %v7970_v12, 0.0  ;;  %v7971_v45 = vadd.f32 %v17313_v46, %v20453_v0  ;;  %8092 = vrot.lane.b32.xlu1 %v8001_v58, %s18216_s27 }
 0x7df   : > { %v8005_v48 = vmax.f32 %v7973_v22, 0.0 }
 0x7e0   : > { %v8003_v41 = vmax.f32 %v7971_v45, 0.0  ;;  %8094 = vrot.lane.b32.xlu0 %v8002_v42, %s18216_s27 }
 0x7e2   : > { %8096 = vrot.lane.b32.xlu1 %v8003_v41, %s18216_s27 }
 0x7e4   : > { %8098 = vrot.lane.b32.xlu0 %v8004_v15, %s18216_s27 }
 0x7e6   : > { %8100 = vrot.lane.b32.xlu1 %v8005_v48, %s18216_s27 }
 0x81a   : > { %v8039_v30 = vpop.permute.xlu0 %8038 }
 0x81b   : > { %8135 = vst.msk [vmem:[#allocation2 + $0x19] sm:$0xff] %vm8134_vm3, %v8039_v30  ;;  %v20608_v30 = vld [vmem:[%s21737_s9 + $0x80] sm:$0xff]  }
 0x81c   : > { %v8041_v0 = vpop.permute.xlu1 %8040 }
 0x81d   : > { %8136 = vst.msk [vmem:[#allocation2 + $0x21] sm:$0xff] %vm8134_vm3, %v8041_v0 }
 0x81e   : > { %v8043_v43 = vpop.permute.xlu0 %8042 }
 0x81f   : > { %8137 = vst.msk [vmem:[#allocation2 + $0x31] sm:$0xff] %vm8134_vm3, %v8043_v43 }
 0x820   : > { %v8045_v23 = vpop.permute.xlu1 %8044 }
 0x821   : > { %8138 = vst.msk [vmem:[#allocation2 + $0x39] sm:$0xff] %vm8134_vm3, %v8045_v23 }
 0x822   : > { %v8047_v52 = vpop.permute.xlu0 %8046  ;;  %v8519_v13 = vld [vmem:[#allocation2 + $0x19] sm:$0xff] }
 0x823   : > { %8139 = vst.msk [vmem:[#allocation2 + $0x49] sm:$0xff] %vm8134_vm3, %v8047_v52  ;;  %v8455_v24 = vld [vmem:[#allocation2 + $0x18] sm:$0xff] }
 0x824   : > { %v8049_v3 = vpop.permute.xlu1 %8048  ;;  %v8520_v28 = vld [vmem:[#allocation2 + $0x21] sm:$0xff] }
 0x825   : > { %v8456_v4 = vld [vmem:[#allocation2 + $0x20] sm:$0xff]  ;;  %v8551_v44 = vpack.c.bf16 %v8520_v28, %v8519_v13  ;;  %8140 = vst.msk [vmem:[#allocation2 + $0x51] sm:$0xff] %vm8134_vm3, %v8049_v3 }
 0x826   : > { %v8487_v31 = vpack.c.bf16 %v8456_v4, %v8455_v24  ;;  %v8051_v29 = vpop.permute.xlu0 %8050  ;;  %v8521_v10 = vld [vmem:[#allocation2 + $0x31] sm:$0xff] }
 0x827   : > { %8920 = vmatprep.mubr.bf16.mxu1 %v8551_v44  ;;  %8141 = vst.msk [vmem:[#allocation2 + $0x61] sm:$0xff] %vm8134_vm3, %v8051_v29  ;;  %9394 = vmatprep.mubr.bf16.mxu0 %v8551_v44  ;;  %v8457_v1 = vld [vmem:[#allocation2 + $0x30] sm:$0xff] }
 0x828   : > { %v8053_v6 = vpop.permute.xlu1 %8052  ;;  %8921 = vmatmul.mubr.bf16.vlgmr.msra.gmra.mrb[80].mxu1 %v8487_v31  ;;  %9395 = vmatmul.mubr.bf16.gmra.mrb[116].mxu0 %v8487_v31  ;;  %v8522_v25 = vld [vmem:[#allocation2 + $0x39] sm:$0xff] }
 0x829   : > { %8142 = vst.msk [vmem:[#allocation2 + $0x69] sm:$0xff] %vm8134_vm3, %v8053_v6  ;;  %v8552_v54 = vpack.c.bf16 %v8522_v25, %v8521_v10  ;;  %16675 = vmatpush3.bf16.msra.mxu1 %v18087_v36  ;;  %v8458_v59 = vld [vmem:[#allocation2 + $0x38] sm:$0xff] }
 0x82a   : > { %v8055_v55 = vpop.permute.xlu0 %8054  ;;  %16676 = vmatprep.subr.bf16.mxu1 %v18088_v51  ;;  %v8488_v32 = vpack.c.bf16 %v8458_v59, %v8457_v1  ;;  %v8523_v53 = vld [vmem:[#allocation2 + $0x49] sm:$0xff] }
 0x82b   : > { %8143 = vst.msk [vmem:[#allocation2 + $0x79] sm:$0xff] %vm8134_vm3, %v8055_v55  ;;  %8928 = vmatprep.mubr.bf16.mxu1 %v8552_v54  ;;  %9402 = vmatprep.mubr.bf16.mxu0 %v8552_v54  ;;  %v8459_v37 = vld [vmem:[#allocation2 + $0x48] sm:$0xff] }
 0x82c   : > { %v8057_v62 = vpop.permute.xlu1 %8056  ;;  %v8524_v17 = vld [vmem:[#allocation2 + $0x51] sm:$0xff] }
 0x82d   : > { %8144 = vst.msk [vmem:[#allocation2 + $0x81] sm:$0xff] %vm8134_vm3, %v8057_v62  ;;  %16677 = vmatpush3.bf16.msra.mxu1 %v18088_v51  ;;  %v8553_v2 = vpack.c.bf16 %v8524_v17, %v8523_v53  ;;  %v8460_v56 = vld [vmem:[#allocation2 + $0x50] sm:$0xff] }
 0x82e   : > { %v8059_v35 = vpop.permute.xlu0 %8058  ;;  %16678 = vmatprep.subr.bf16.mxu1 %v18089_v60  ;;  %v8489_v33 = vpack.c.bf16 %v8460_v56, %v8459_v37  ;;  %v8525_v20 = vld [vmem:[#allocation2 + $0x61] sm:$0xff] }
 0x82f   : > { %8145 = vst.msk [vmem:[#allocation2 + $0x91] sm:$0xff] %vm8134_vm3, %v8059_v35  ;;  %v8461_v26 = vld [vmem:[#allocation2 + $0x60] sm:$0xff] }
 0x830   : > { %v8061_v39 = vpop.permute.xlu1 %8060  ;;  %8929 = vmatmul.mubr.bf16.gmra.mrb[84].mxu1 %v8488_v32  ;;  %9403 = vmatmul.mubr.bf16.gmra.mrb[120].mxu0 %v8488_v32  ;;  %v8526_v16 = vld [vmem:[#allocation2 + $0x69] sm:$0xff] }
 0x831   : > { %8146 = vst.msk [vmem:[#allocation2 + $0x99] sm:$0xff] %vm8134_vm3, %v8061_v39  ;;  %8936 = vmatprep.mubr.bf16.mxu1 %v8553_v2  ;;  %9410 = vmatprep.mubr.bf16.mxu0 %v8553_v2  ;;  %v8554_v8 = vpack.c.bf16 %v8526_v16, %v8525_v20  ;;  %v8462_v7 = vld [vmem:[#allocation2 + $0x68] sm:$0xff] }
 0x832   : > { %v8063_v11 = vpop.permute.xlu0 %8062  ;;  %16679 = vmatpush3.bf16.msra.mxu1 %v18089_v60  ;;  %v8490_v63 = vpack.c.bf16 %v8462_v7, %v8461_v26  ;;  %v8527_v38 = vld [vmem:[#allocation2 + $0x79] sm:$0xff] }
 0x833   : > { %8147 = vst.msk [vmem:[#allocation2 + $0xa9] sm:$0xff] %vm8134_vm3, %v8063_v11  ;;  %16680 = vmatprep.subr.bf16.mxu1 %v18090_v5  ;;  %v8463_v45 = vld [vmem:[#allocation2 + $0x78] sm:$0xff] }
 0x834   : > { %v8065_v57 = vpop.permute.xlu1 %8064  ;;  %v8528_v14 = vld [vmem:[#allocation2 + $0x81] sm:$0xff] }
 0x835   : > { %8148 = vst.msk [vmem:[#allocation2 + $0xb1] sm:$0xff] %vm8134_vm3, %v8065_v57  ;;  %v8555_v27 = vpack.c.bf16 %v8528_v14, %v8527_v38  ;;  %v8464_v46 = vld [vmem:[#allocation2 + $0x80] sm:$0xff] }
 0x836   : > { %v8067_v47 = vpop.permute.xlu0 %8066  ;;  %16681 = vmatpush3.bf16.msra.mxu1 %v18090_v5  ;;  %v8491_v41 = vpack.c.bf16 %v8464_v46, %v8463_v45  ;;  %v8529_v15 = vld [vmem:[#allocation2 + $0x91] sm:$0xff] }
 0x837   : > { %8149 = vst.msk [vmem:[#allocation2 + $0xc1] sm:$0xff] %vm8134_vm3, %v8067_v47  ;;  %16682 = vmatprep.subr.bf16.mxu1 %v18091_v61  ;;  %v8465_v13 = vld [vmem:[#allocation2 + $0x90] sm:$0xff] }
 0x838   : > { %v8069_v19 = vpop.permute.xlu1 %8068  ;;  %8937 = vmatmul.mubr.bf16.gmra.mrb[88].mxu1 %v8489_v33  ;;  %9411 = vmatmul.mubr.bf16.gmra.mrb[124].mxu0 %v8489_v33  ;;  %v8530_v42 = vld [vmem:[#allocation2 + $0x99] sm:$0xff] }
 0x839   : > { %8150 = vst.msk [vmem:[#allocation2 + $0xc9] sm:$0xff] %vm8134_vm3, %v8069_v19  ;;  %8944 = vmatprep.mubr.bf16.mxu1 %v8554_v8  ;;  %9418 = vmatprep.mubr.bf16.mxu0 %v8554_v8  ;;  %v8556_v48 = vpack.c.bf16 %v8530_v42, %v8529_v15  ;;  %v8466_v43 = vld [vmem:[#allocation2 + $0x98] sm:$0xff] }
 0x83a   : > { %v8071_v50 = vpop.permute.xlu0 %8070  ;;  %16683 = vmatpush3.bf16.msra.mxu1 %v18091_v61  ;;  %v8492_v28 = vpack.c.bf16 %v8466_v43, %v8465_v13  ;;  %v8531_v24 = vld [vmem:[#allocation2 + $0xa9] sm:$0xff] }
 0x83b   : > { %8151 = vst.msk [vmem:[#allocation2 + $0xd9] sm:$0xff] %vm8134_vm3, %v8071_v50  ;;  %16684 = vmatprep.subr.bf16.mxu1 %v18092_v34  ;;  %v8467_v10 = vld [vmem:[#allocation2 + $0xa8] sm:$0xff] }
 0x83c   : > { %v8073_v40 = vpop.permute.xlu1 %8072  ;;  %v8532_v52 = vld [vmem:[#allocation2 + $0xb1] sm:$0xff] }
 0x83d   : > { %8152 = vst.msk [vmem:[#allocation2 + $0xe1] sm:$0xff] %vm8134_vm3, %v8073_v40  ;;  %v8557_v4 = vpack.c.bf16 %v8532_v52, %v8531_v24  ;;  %v8468_v29 = vld [vmem:[#allocation2 + $0xb0] sm:$0xff] }
 0x83e   : > { %v8075_v21 = vpop.permute.xlu0 %8074  ;;  %16685 = vmatpush3.bf16.msra.mxu1 %v18092_v34  ;;  %v8493_v54 = vpack.c.bf16 %v8468_v29, %v8467_v10  ;;  %v8533_v55 = vld [vmem:[#allocation2 + $0xc1] sm:$0xff] }
 0x83f   : > { %8153 = vst.msk [vmem:[#allocation2 + $0xf1] sm:$0xff] %vm8134_vm3, %v8075_v21  ;;  %16686 = vmatprep.subr.bf16.mxu1 %v18093_v9  ;;  %v8469_v1 = vld [vmem:[#allocation2 + $0xc0] sm:$0xff] }
 0x840   : > { %v8077_v58 = vpop.permute.xlu1 %8076  ;;  %8945 = vmatmul.mubr.bf16.gmra.mrb[92].mxu1 %v8490_v63  ;;  %9419 = vmatmul.mubr.bf16.gmra.mrb[128].mxu0 %v8490_v63  ;;  %v8534_v6 = vld [vmem:[#allocation2 + $0xc9] sm:$0xff] }
 0x841   : > { %8154 = vst.msk [vmem:[#allocation2 + $0xf9] sm:$0xff] %vm8134_vm3, %v8077_v58  ;;  %8952 = vmatprep.mubr.bf16.mxu1 %v8555_v27  ;;  %9426 = vmatprep.mubr.bf16.mxu0 %v8555_v27  ;;  %v8558_v60 = vpack.c.bf16 %v8534_v6, %v8533_v55  ;;  %v8470_v62 = vld [vmem:[#allocation2 + $0xc8] sm:$0xff]  ;;  %v8585_v55 = vld [vmem:[#allocation2 + $0x32] sm:$0xff] }
 0x842   : > { %v8079_v12 = vpop.permute.xlu0 %8078  ;;  %16687 = vmatpush3.bf16.msra.mxu1 %v18093_v9  ;;  %v8494_v35 = vpack.c.bf16 %v8470_v62, %v8469_v1  ;;  %v8535_v32 = vld [vmem:[#allocation2 + $0xd9] sm:$0xff]  ;;  %v8584_v6 = vld [vmem:[#allocation2 + $0x22] sm:$0xff] }
 0x843   : > { %8155 = vst.msk [vmem:[#allocation2 + $0x109] sm:$0xff] %vm8134_vm3, %v8079_v12  ;;  %16688 = vmatprep.subr.bf16.mxu1 %v18094_v49  ;;  %v8471_v39 = vld [vmem:[#allocation2 + $0xd8] sm:$0xff]  ;;  %v18096_v1 = vld [vmem:[%s21737_s9 + $0x88] sm:$0xff]  }
 0x844   : > { %v8081_v18 = vpop.permute.xlu1 %8080  ;;  %v8536_v17 = vld [vmem:[#allocation2 + $0xe1] sm:$0xff]  ;;  %v8588_v62 = vld [vmem:[#allocation2 + $0x52] sm:$0xff] }
 0x845   : > { %8156 = vst.msk [vmem:[#allocation2 + $0x111] sm:$0xff] %vm8134_vm3, %v8081_v18  ;;  %v8559_v53 = vpack.c.bf16 %v8536_v17, %v8535_v32  ;;  %v8472_v2 = vld [vmem:[#allocation2 + $0xe0] sm:$0xff]  ;;  %v18097_v32 = vld [vmem:[%s21737_s9 + $0x90] sm:$0xff]  }
 0x846   : > { %v8083_v22 = vpop.permute.xlu0 %8082  ;;  %16689 = vmatpush3.bf16.msra.mxu1 %v18094_v49  ;;  %v8495_v11 = vpack.c.bf16 %v8472_v2, %v8471_v39  ;;  %v8537_v56 = vld [vmem:[#allocation2 + $0xf1] sm:$0xff]  ;;  %v8592_v39 = vld [vmem:[#allocation2 + $0x82] sm:$0xff] }
 0x847   : > { %8157 = vst.msk [vmem:[#allocation2 + $0x121] sm:$0xff] %vm8134_vm3, %v8083_v22  ;;  %16722 = vmatprep.subr.bf16.mxu1 %v20608_v30  ;;  %v8473_v37 = vld [vmem:[#allocation2 + $0xf0] sm:$0xff] }
 0x848   : > { %v8085_v36 = vpop.permute.xlu1 %8084  ;;  %8953 = vmatmul.mubr.bf16.gmra.mrb[96].mxu1 %v8491_v41  ;;  %9427 = vmatmul.mubr.bf16.gmra.mrb[132].mxu0 %v8491_v41  ;;  %v8538_v5 = vld [vmem:[#allocation2 + $0xf9] sm:$0xff]  ;;  %v8590_v2 = vld [vmem:[#allocation2 + $0x6a] sm:$0xff] }
 0x849   : > { %8158 = vst.msk [vmem:[#allocation2 + $0x129] sm:$0xff] %vm8134_vm3, %v8085_v36  ;;  %8960 = vmatprep.mubr.bf16.mxu1 %v8556_v48  ;;  %9434 = vmatprep.mubr.bf16.mxu0 %v8556_v48  ;;  %v8560_v61 = vpack.c.bf16 %v8538_v5, %v8537_v56  ;;  %v8474_v57 = vld [vmem:[#allocation2 + $0xf8] sm:$0xff] }
 0x84a   : > { %v8087_v0 = vpop.permute.xlu0 %8086  ;;  %v8496_v47 = vpack.c.bf16 %v8474_v57, %v8473_v37  ;;  %v8539_v33 = vld [vmem:[#allocation2 + $0x109] sm:$0xff]  ;;  %v8591_v5 = vld [vmem:[#allocation2 + $0x7a] sm:$0xff]  ;;  %v8593_v57 = vld [vmem:[#allocation2 + $0x92] sm:$0xff] }
 0x84b   : > { %8159 = vst.msk [vmem:[#allocation2 + $0x139] sm:$0xff] %vm8134_vm3, %v8087_v0  ;;  %v8475_v19 = vld [vmem:[#allocation2 + $0x108] sm:$0xff]  ;;  %v18098_v56 = vld [vmem:[%s21737_s9 + $0x98] sm:$0xff]  }
 0x84c   : > { %v8089_v23 = vpop.permute.xlu1 %8088  ;;  %v8540_v16 = vld [vmem:[#allocation2 + $0x111] sm:$0xff] }
 0x84d   : > { %8160 = vst.msk [vmem:[#allocation2 + $0x141] sm:$0xff] %vm8134_vm3, %v8089_v23  ;;  %v8561_v20 = vpack.c.bf16 %v8540_v16, %v8539_v33  ;;  %v8476_v8 = vld [vmem:[#allocation2 + $0x110] sm:$0xff]  ;;  %v8594_v16 = vld [vmem:[#allocation2 + $0x9a] sm:$0xff] }
 0x84e   : > { %v8091_v3 = vpop.permute.xlu0 %8090  ;;  %v8497_v7 = vpack.c.bf16 %v8476_v8, %v8475_v19  ;;  %v8541_v9 = vld [vmem:[#allocation2 + $0x121] sm:$0xff]  ;;  %v8595_v37 = vld [vmem:[#allocation2 + $0xaa] sm:$0xff]  ;;  %v20651_v33 = vpack.c.bf16 %v8594_v16, %v8593_v57  ;;  %v18117_v16 = vld [vmem:[%s21737_s9 + $0x1f8] sm:$0xff]  }
 0x84f   : > { %8161 = vst.msk [vmem:[#allocation2 + $0x151] sm:$0xff] %vm8134_vm3, %v8091_v3  ;;  %v8477_v58 = vld [vmem:[#allocation2 + $0x120] sm:$0xff] }
 0x850   : > { %v8093_v44 = vpop.permute.xlu1 %8092  ;;  %8961 = vmatmul.mubr.bf16.gmra.mrb[100].mxu1 %v8492_v28  ;;  %9435 = vmatmul.mubr.bf16.gmra.mrb[136].mxu0 %v8492_v28  ;;  %v8542_v34 = vld [vmem:[#allocation2 + $0x129] sm:$0xff] }
 0x851   : > { %8162 = vst.msk [vmem:[#allocation2 + $0x159] sm:$0xff] %vm8134_vm3, %v8093_v44  ;;  %8968 = vmatprep.mubr.bf16.mxu1 %v8557_v4  ;;  %9442 = vmatprep.mubr.bf16.mxu0 %v8557_v4  ;;  %v8562_v14 = vpack.c.bf16 %v8542_v34, %v8541_v9  ;;  %v8478_v27 = vld [vmem:[#allocation2 + $0x128] sm:$0xff]  ;;  %v18101_v34 = vld [vmem:[%s21737_s9 + $0xb0] sm:$0xff]  }
 0x852   : > { %v8095_v31 = vpop.permute.xlu0 %8094  ;;  %v8498_v12 = vpack.c.bf16 %v8478_v27, %v8477_v58  ;;  %v8543_v46 = vld [vmem:[#allocation2 + $0x139] sm:$0xff]  ;;  %v8597_v19 = vld [vmem:[#allocation2 + $0xc2] sm:$0xff]  ;;  %v8603_v58 = vld [vmem:[#allocation2 + $0x10a] sm:$0xff] }
 0x853   : > { %8163 = vst.msk [vmem:[#allocation2 + $0x169] sm:$0xff] %vm8134_vm3, %v8095_v31  ;;  %v8479_v22 = vld [vmem:[#allocation2 + $0x138] sm:$0xff]  ;;  %v8600_v9 = vld [vmem:[#allocation2 + $0xe2] sm:$0xff] }
 0x854   : > { %v8097_v51 = vpop.permute.xlu1 %8096  ;;  %v8544_v49 = vld [vmem:[#allocation2 + $0x141] sm:$0xff]  ;;  %v8601_v27 = vld [vmem:[#allocation2 + $0xf2] sm:$0xff] }
 0x855   : > { %8164 = vst.msk [vmem:[#allocation2 + $0x171] sm:$0xff] %vm8134_vm3, %v8097_v51  ;;  %v8563_v18 = vpack.c.bf16 %v8544_v49, %v8543_v46  ;;  %v8480_v42 = vld [vmem:[#allocation2 + $0x140] sm:$0xff] }
 0x856   : > { %v8099_v25 = vpop.permute.xlu0 %8098  ;;  %v8499_v41 = vpack.c.bf16 %v8480_v42, %v8479_v22  ;;  %v8545_v15 = vld [vmem:[#allocation2 + $0x151] sm:$0xff]  ;;  %v8583_v51 = vld [vmem:[#allocation2 + $0x1a] sm:$0xff]  ;;  %v8605_v42 = vld [vmem:[#allocation2 + $0x122] sm:$0xff] }
 0x857   : > { %8165 = vst.msk [vmem:[#allocation2 + $0x181] sm:$0xff] %vm8134_vm3, %v8099_v25  ;;  %v8481_v43 = vld [vmem:[#allocation2 + $0x150] sm:$0xff]  ;;  %v8602_v49 = vld [vmem:[#allocation2 + $0xfa] sm:$0xff] }
 0x858   : > { %8969 = vmatmul.mubr.bf16.gmra.mrb[104].mxu1 %v8493_v54  ;;  %9443 = vmatmul.mubr.bf16.gmra.mrb[140].mxu0 %v8493_v54  ;;  %v8101_v59 = vpop.permute.xlu1 %8100  ;;  %v8546_v45 = vld [vmem:[#allocation2 + $0x159] sm:$0xff]  ;;  %v20623_v54 = vpack.c.bf16 %v8584_v6, %v8583_v51  ;;  %v20675_v46 = vpack.c.bf16 %v8602_v49, %v8601_v27  ;;  %v18105_v51 = vld [vmem:[%s21737_s9 + $0x1c8] sm:$0xff]  }
 0x859   : > { %8166 = vst.msk [vmem:[#allocation2 + $0x189] sm:$0xff] %vm8134_vm3, %v8101_v59  ;;  %8976 = vmatprep.mubr.bf16.mxu1 %v8558_v60  ;;  %9450 = vmatprep.mubr.bf16.mxu0 %v8558_v60  ;;  %v15544_v50 = vpop.f32.mrb[112].mxu0  ;;  %v8564_v48 = vpack.c.bf16 %v8546_v45, %v8545_v15  ;;  %v8482_v36 = vld [vmem:[#allocation2 + $0x158] sm:$0xff]  ;;  %v8587_v59 = vld [vmem:[#allocation2 + $0x4a] sm:$0xff] }
 0x85a   : > { %v15545_v40 = vpop.f32.mrb[113].mxu0  ;;  %v8500_v23 = vpack.c.bf16 %v8482_v36, %v8481_v43  ;;  %v8547_v52 = vld [vmem:[#allocation2 + $0x169] sm:$0xff]  ;;  %v8586_v60 = vld [vmem:[#allocation2 + $0x3a] sm:$0xff]  ;;  %v8609_v36 = vld [vmem:[#allocation2 + $0x152] sm:$0xff] }
 0x85b   : > { %v20619_v26 = vadd.f32 %v15545_v40, %v15544_v50  ;;  %v15547_v21 = vpop.f32.mrb[114].mxu0  ;;  %v8483_v24 = vld [vmem:[#allocation2 + $0x168] sm:$0xff]  ;;  %v20626_v17 = vpack.c.bf16 %v8586_v60, %v8585_v55  ;;  %v8607_v22 = vld [vmem:[#allocation2 + $0x13a] sm:$0xff] }
 0x85c   : > { %v15548_v63 = vpop.f32.mrb[115].mxu0  ;;  %v8548_v0 = vld [vmem:[#allocation2 + $0x171] sm:$0xff]  ;;  %v18106_v6 = vld [vmem:[%s21737_s9 + $0x188] sm:$0xff]   ;;  %v18111_v60 = vld [vmem:[%s21737_s9 + $0x1e0] sm:$0xff]  }
 0x85d   : > { %v20621_v38 = vadd.f32 %v15548_v63, %v15547_v21  ;;  %v8565_v13 = vpack.c.bf16 %v8548_v0, %v8547_v52  ;;  %v8484_v3 = vld [vmem:[#allocation2 + $0x170] sm:$0xff]  ;;  %v18103_v63 = vld [vmem:[%s21737_s9 + $0x1c0] sm:$0xff]   ;;  %v18110_v55 = vld [vmem:[%s21737_s9 + $0x198] sm:$0xff]  }
 0x85e   : > { %v8501_v4 = vpack.c.bf16 %v8484_v3, %v8483_v24  ;;  %v8549_v44 = vld [vmem:[#allocation2 + $0x181] sm:$0xff]  ;;  %v8598_v50 = vld [vmem:[#allocation2 + $0xca] sm:$0xff] }
 0x85f   : > { %v8485_v10 = vld [vmem:[#allocation2 + $0x180] sm:$0xff]  ;;  %v20663_v40 = vpack.c.bf16 %v8598_v50, %v8597_v19  ;;  %v8606_v45 = vld [vmem:[#allocation2 + $0x12a] sm:$0xff] }
 0x860   : > { %8977 = vmatmul.mubr.bf16.gmra.mrb[108].mxu1 %v8494_v35  ;;  %9451 = vmatmul.mubr.bf16.gmra.mrb[144].mxu0 %v8494_v35  ;;  %v8550_v28 = vld [vmem:[#allocation2 + $0x189] sm:$0xff]  ;;  %v20631_v35 = vpack.c.bf16 %v8588_v62, %v8587_v59  ;;  %v20681_v15 = vpack.c.bf16 %v8606_v45, %v8605_v42  ;;  %v8610_v0 = vld [vmem:[#allocation2 + $0x15a] sm:$0xff] }
 0x861   : > { %8984 = vmatprep.mubr.bf16.mxu1 %v8559_v53  ;;  %9458 = vmatprep.mubr.bf16.mxu0 %v8559_v53  ;;  %v8566_v31 = vpack.c.bf16 %v8550_v28, %v8549_v44  ;;  %v8486_v29 = vld [vmem:[#allocation2 + $0x188] sm:$0xff]  ;;  %v20687_v52 = vpack.c.bf16 %v8610_v0, %v8609_v36  ;;  %v18112_v59 = vld [vmem:[%s21737_s9 + $0x1a0] sm:$0xff]  }
 0x862   : > { %v8502_v25 = vpack.c.bf16 %v8486_v29, %v8485_v10  ;;  %v8589_v53 = vld [vmem:[#allocation2 + $0x62] sm:$0xff]  ;;  %v8611_v43 = vld [vmem:[#allocation2 + $0x16a] sm:$0xff] }
 0x863   : > { %v8295_v3 = vld [vmem:[#allocation2 + $0x2] sm:$0xff]  ;;  %v8296_v28 = vld [vmem:[#allocation2 + $0xa] sm:$0xff] }
 0x864   : > { %v8613_v24 = vld [vmem:[#allocation2 + $0x182] sm:$0xff]  ;;  %v8327_v44 = vpack.c.bf16 %v8296_v28, %v8295_v3  ;;  %v18107_v10 = vld [vmem:[%s21737_s9 + $0x1d0] sm:$0xff]  }
 0x865   : > { %v18104_v29 = vld [vmem:[%s21737_s9 + $0x180] sm:$0xff]   ;;  %v18113_v62 = vld [vmem:[%s21737_s9 + $0x1e8] sm:$0xff]  }
 0x868   : > { %8985 = vmatmul.mubr.bf16.gmra.mrb[112].mxu1 %v8495_v11  ;;  %9459 = vmatmul.mubr.bf16.gmra.mrb[148].mxu0 %v8495_v11  ;;  %v20639_v11 = vpack.c.bf16 %v8590_v2, %v8589_v53 }
 0x869   : > { %8992 = vmatprep.mubr.bf16.mxu1 %v8560_v61  ;;  %9466 = vmatprep.mubr.bf16.mxu0 %v8560_v61  ;;  %v20644_v61 = vpack.c.bf16 %v8592_v39, %v8591_v5 }
 0x870   : > { %8993 = vmatmul.mubr.bf16.gmra.mrb[116].mxu1 %v8496_v47  ;;  %9467 = vmatmul.mubr.bf16.gmra.mrb[152].mxu0 %v8496_v47  ;;  %v8596_v47 = vld [vmem:[#allocation2 + $0xb2] sm:$0xff] }
 0x871   : > { %9000 = vmatprep.mubr.bf16.mxu1 %v8561_v20  ;;  %9474 = vmatprep.mubr.bf16.mxu0 %v8561_v20  ;;  %v18100_v20 = vld [vmem:[%s21737_s9 + $0xa8] sm:$0xff]   ;;  %v20656_v8 = vpack.c.bf16 %v8596_v47, %v8595_v37 }
 0x878   : > { %9001 = vmatmul.mubr.bf16.gmra.mrb[120].mxu1 %v8497_v7  ;;  %9475 = vmatmul.mubr.bf16.gmra.mrb[156].mxu0 %v8497_v7  ;;  %v8599_v7 = vld [vmem:[#allocation2 + $0xda] sm:$0xff] }
 0x879   : > { %9008 = vmatprep.mubr.bf16.mxu1 %v8562_v14  ;;  %9482 = vmatprep.mubr.bf16.mxu0 %v8562_v14  ;;  %v18102_v14 = vld [vmem:[%s21737_s9 + $0xb8] sm:$0xff]   ;;  %v20668_v21 = vpack.c.bf16 %v8600_v9, %v8599_v7 }
 0x880   : > { %9009 = vmatmul.mubr.bf16.gmra.mrb[124].mxu1 %v8498_v12  ;;  %9483 = vmatmul.mubr.bf16.gmra.mrb[160].mxu0 %v8498_v12  ;;  %v8604_v12 = vld [vmem:[#allocation2 + $0x112] sm:$0xff] }
 0x881   : > { %9016 = vmatprep.mubr.bf16.mxu1 %v8563_v18  ;;  %9490 = vmatprep.mubr.bf16.mxu0 %v8563_v18  ;;  %v20677_v18 = vpack.c.bf16 %v8604_v12, %v8603_v58 }
 0x888   : > { %9017 = vmatmul.mubr.bf16.gmra.mrb[128].mxu1 %v8499_v41  ;;  %9491 = vmatmul.mubr.bf16.gmra.mrb[164].mxu0 %v8499_v41  ;;  %v8608_v41 = vld [vmem:[#allocation2 + $0x142] sm:$0xff] }
 0x889   : > { %9024 = vmatprep.mubr.bf16.mxu1 %v8564_v48  ;;  %9498 = vmatprep.mubr.bf16.mxu0 %v8564_v48  ;;  %v20683_v48 = vpack.c.bf16 %v8608_v41, %v8607_v22 }
 0x890   : > { %9025 = vmatmul.mubr.bf16.gmra.mrb[132].mxu1 %v8500_v23  ;;  %9499 = vmatmul.mubr.bf16.gmra.mrb[168].mxu0 %v8500_v23  ;;  %v8612_v23 = vld [vmem:[#allocation2 + $0x172] sm:$0xff] }
 0x891   : > { %9032 = vmatprep.mubr.bf16.mxu1 %v8565_v13  ;;  %9506 = vmatprep.mubr.bf16.mxu0 %v8565_v13  ;;  %v20689_v13 = vpack.c.bf16 %v8612_v23, %v8611_v43 }
 0x898   : > { %9033 = vmatmul.mubr.bf16.gmra.mrb[136].mxu1 %v8501_v4  ;;  %9507 = vmatmul.mubr.bf16.gmra.mrb[172].mxu0 %v8501_v4  ;;  %v8614_v4 = vld [vmem:[#allocation2 + $0x18a] sm:$0xff] }
 0x899   : > { %9040 = vmatprep.mubr.bf16.mxu1 %v8566_v31  ;;  %v8630_v31 = vpack.c.bf16 %v8614_v4, %v8613_v24 }
 0x8a0   : > { %9041 = vmatmul.mubr.bf16.gmra.mrb[140].mxu1 %v8502_v25  ;;  %v18108_v25 = vld [vmem:[%s21737_s9 + $0x190] sm:$0xff]  }
 0x8a1   : > { %16690 = vmatprep.mubr.bf16.mxu1 %v20623_v54 }
 0x8a8   : > { %16691 = vmatmul.mubr.bf16.vlgmr.msra.gmra.mrb[48].mxu1 %v20626_v17 }
 0x8a9   : > { %16694 = vmatprep.mubr.bf16.mxu1 %v20631_v35  ;;  %16723 = vmatpush3.bf16.msra.mxu1 %v20608_v30  ;;  %v18099_v30 = vld [vmem:[%s21737_s9 + $0xa0] sm:$0xff]  }
 0x8aa   : > { %16724 = vmatprep.subr.bf16.mxu1 %v18096_v1 }
 0x8ad   : > { %16725 = vmatpush3.bf16.msra.mxu1 %v18096_v1  ;;  %v18115_v1 = vld [vmem:[%s21737_s9 + $0x1f0] sm:$0xff]  }
 0x8ae   : > { %16726 = vmatprep.subr.bf16.mxu1 %v18097_v32 }
 0x8b0   : > { %16695 = vmatmul.mubr.bf16.gmra.mrb[52].mxu1 %v20639_v11 }
 0x8b1   : > { %16698 = vmatprep.mubr.bf16.mxu1 %v20644_v61  ;;  %16727 = vmatpush3.bf16.msra.mxu1 %v18097_v32 }
 0x8b2   : > { %16728 = vmatprep.subr.bf16.mxu1 %v18098_v56 }
 0x8b5   : > { %16729 = vmatpush3.bf16.msra.mxu1 %v18098_v56 }
 0x8b6   : > { %16730 = vmatprep.subr.bf16.mxu1 %v18099_v30 }
 0x8b8   : > { %16699 = vmatmul.mubr.bf16.gmra.mrb[56].mxu1 %v20651_v33 }
 0x8b9   : > { %16702 = vmatprep.mubr.bf16.mxu1 %v20656_v8  ;;  %16731 = vmatpush3.bf16.msra.mxu1 %v18099_v30 }
 0x8ba   : > { %16732 = vmatprep.subr.bf16.mxu1 %v18100_v20 }
 0x8bd   : > { %16733 = vmatpush3.bf16.msra.mxu1 %v18100_v20 }
 0x8be   : > { %16734 = vmatprep.subr.bf16.mxu1 %v18101_v34 }
 0x8c0   : > { %16703 = vmatmul.mubr.bf16.gmra.mrb[60].mxu1 %v20663_v40 }
 0x8c1   : > { %16706 = vmatprep.mubr.bf16.mxu1 %v20668_v21  ;;  %16735 = vmatpush3.bf16.msra.mxu1 %v18101_v34  ;;  %v18118_v34 = vld [vmem:[%s21737_s9 + $0x1b8] sm:$0xff]  }
 0x8c2   : > { %16736 = vmatprep.subr.bf16.mxu1 %v18102_v14 }
 0x8c5   : > { %16737 = vmatpush3.bf16.msra.mxu1 %v18102_v14 }
 0x8c6   : > { %15664 = vmatprep.subr.bf16.mxu1 %v18103_v63 }
 0x8c8   : > { %16707 = vmatmul.mubr.bf16.gmra.mrb[64].mxu1 %v20675_v46 }
 0x8c9   : > { %16710 = vmatprep.mubr.bf16.mxu1 %v20677_v18 }
 0x8d0   : > { %16711 = vmatmul.mubr.bf16.gmra.mrb[68].mxu1 %v20681_v15 }
 0x8d1   : > { %16714 = vmatprep.mubr.bf16.mxu1 %v20683_v48 }
 0x8d8   : > { %16715 = vmatmul.mubr.bf16.gmra.mrb[72].mxu1 %v20687_v52 }
 0x8d9   : > { %16718 = vmatprep.mubr.bf16.mxu1 %v20689_v13 }
 0x8e0   : > { %16719 = vmatmul.mubr.bf16.gmra.mrb[76].mxu1 %v8630_v31 }
 0x8e1   : > { %16738 = vmatprep.mubr.bf16.mxu1 %v8327_v44 }
 0x8e8   : > { %16739 = vmatmul.mubr.bf16.vlgmr.msra.gmra.mrb[48].mxu1 %v20623_v54  ;;  %v18109_v54 = vld [vmem:[%s21737_s9 + $0x1d8] sm:$0xff]  }
 0x8e9   : > { %16742 = vmatprep.mubr.bf16.mxu1 %v20626_v17  ;;  %15665 = vmatpush3.bf16.msra.mxu1 %v18104_v29  ;;  %v18114_v17 = vld [vmem:[%s21737_s9 + $0x1a8] sm:$0xff]  }
 0x8ea   : > { %15666 = vmatprep.subr.bf16.mxu1 %v18105_v51 }
 0x8ed   : > { %15667 = vmatpush3.bf16.msra.mxu1 %v18106_v6 }
 0x8ee   : > { %15668 = vmatprep.subr.bf16.mxu1 %v18107_v10 }
 0x8f0   : > { %16743 = vmatmul.mubr.bf16.gmra.mrb[52].mxu1 %v20631_v35 }
 0x8f1   : > { %16746 = vmatprep.mubr.bf16.mxu1 %v20639_v11  ;;  %15669 = vmatpush3.bf16.msra.mxu1 %v18108_v25 }
 0x8f2   : > { %15670 = vmatprep.subr.bf16.mxu1 %v18109_v54 }
 0x8f5   : > { %15671 = vmatpush3.bf16.msra.mxu1 %v18110_v55 }
 0x8f6   : > { %15672 = vmatprep.subr.bf16.mxu1 %v18111_v60 }
 0x8f8   : > { %16747 = vmatmul.mubr.bf16.gmra.mrb[56].mxu1 %v20644_v61  ;;  %v18116_v61 = vld [vmem:[%s21737_s9 + $0x1b0] sm:$0xff]  }
 0x8f9   : > { %16750 = vmatprep.mubr.bf16.mxu1 %v20651_v33  ;;  %15673 = vmatpush3.bf16.msra.mxu1 %v18112_v59 }
 0x8fa   : > { %15674 = vmatprep.subr.bf16.mxu1 %v18113_v62 }
 0x8fb   : > { %v15408_v35 = vpop.f32.mrb[80].mxu1  ;;  %v15550_v32 = vpop.f32.mrb[116].mxu0 }
 0x8fc   : > { %v15409_v53 = vpop.f32.mrb[81].mxu1  ;;  %v15551_v2 = vpop.f32.mrb[117].mxu0 }
 0x8fd   : > { %v15410_v5 = vadd.f32 %v15409_v53, %v15408_v35  ;;  %v15552_v39 = vadd.f32 %v15551_v2, %v15550_v32  ;;  %v15411_v11 = vpop.f32.mrb[82].mxu1  ;;  %v15553_v56 = vpop.f32.mrb[118].mxu0  ;;  %15675 = vmatpush3.bf16.msra.mxu1 %v18114_v17  ;;  %v9741_v2 = vld [vmem:[#allocation2 + $0x39] sm:$0xff] }
 0x8fe   : > { %v15412_v30 = vpop.f32.mrb[83].mxu1  ;;  %v15554_v57 = vpop.f32.mrb[119].mxu0  ;;  %15676 = vmatprep.subr.bf16.mxu1 %v18115_v1 }
 0x8ff   : > { %v20742_v37 = vadd.f32 %v20619_v26, %v15410_v5  ;;  %v15413_v47 = vadd.f32 %v15412_v30, %v15411_v11  ;;  %v15555_v33 = vadd.f32 %v15554_v57, %v15553_v56  ;;  %v20755_v26 = vld [vmem:[%s21737_s9 + $0x200] sm:$0xff]   ;;  %v9740_v57 = vld [vmem:[#allocation2 + $0x31] sm:$0xff] }
 0x900   : > { %16751 = vmatmul.mubr.bf16.gmra.mrb[60].mxu1 %v20656_v8 }
 0x901   : > { %v20746_v20 = vadd.f32 %v20621_v38, %v15413_v47  ;;  %16754 = vmatprep.mubr.bf16.mxu1 %v20663_v40  ;;  %15677 = vmatpush3.bf16.msra.mxu1 %v18116_v61 }
 0x902   : > { %15678 = vmatprep.subr.bf16.mxu1 %v18117_v16 }
 0x903   : > { %v15414_v19 = vpop.f32.mrb[84].mxu1  ;;  %v15556_v50 = vpop.f32.mrb[120].mxu0 }
 0x904   : > { %v15415_v7 = vpop.f32.mrb[85].mxu1  ;;  %v15557_v8 = vpop.f32.mrb[121].mxu0 }
 0x905   : > { %v15416_v9 = vadd.f32 %v15415_v7, %v15414_v19  ;;  %v15558_v38 = vadd.f32 %v15557_v8, %v15556_v50  ;;  %v15417_v14 = vpop.f32.mrb[86].mxu1  ;;  %v15559_v63 = vpop.f32.mrb[122].mxu0  ;;  %15679 = vmatpush3.bf16.msra.mxu1 %v18118_v34  ;;  %v9677_v50 = vld [vmem:[#allocation2 + $0x38] sm:$0xff] }
 0x906   : > { %v15418_v40 = vpop.f32.mrb[87].mxu1  ;;  %v15560_v27 = vpop.f32.mrb[123].mxu0  ;;  %16770 = vmatprep.subr.bf16.mxu1 %v20755_v26 }
 0x907   : > { %v20758_v49 = vadd.f32 %v15552_v39, %v15416_v9  ;;  %v15419_v58 = vadd.f32 %v15418_v40, %v15417_v14  ;;  %v15561_v12 = vadd.f32 %v15560_v27, %v15559_v63  ;;  %v9743_v9 = vld [vmem:[#allocation2 + $0x51] sm:$0xff] }
 0x908   : > { %16755 = vmatmul.mubr.bf16.gmra.mrb[64].mxu1 %v20668_v21  ;;  %v9676_v27 = vld [vmem:[#allocation2 + $0x30] sm:$0xff] }
 0x909   : > { %v20761_v42 = vadd.f32 %v15555_v33, %v15419_v58  ;;  %16758 = vmatprep.mubr.bf16.mxu1 %v20675_v46  ;;  %v9772_v33 = vpack.c.bf16 %v9741_v2, %v9740_v57  ;;  %v18123_v2 = vld [vmem:[%s21737_s9 + $0x220] sm:$0xff]  }
 0x90b   : > { %v15420_v45 = vpop.f32.mrb[88].mxu1  ;;  %v15562_v22 = vpop.f32.mrb[124].mxu0 }
 0x90c   : > { %v15421_v41 = vpop.f32.mrb[89].mxu1  ;;  %v15563_v36 = vpop.f32.mrb[125].mxu0 }
 0x90d   : > { %v15422_v0 = vadd.f32 %v15421_v41, %v15420_v45  ;;  %v15564_v43 = vadd.f32 %v15563_v36, %v15562_v22  ;;  %v15423_v23 = vpop.f32.mrb[90].mxu1  ;;  %v15565_v3 = vpop.f32.mrb[126].mxu0  ;;  %v9708_v45 = vpack.c.bf16 %v9677_v50, %v9676_v27  ;;  %v9742_v22 = vld [vmem:[#allocation2 + $0x49] sm:$0xff] }
 0x90e   : > { %v15424_v28 = vpop.f32.mrb[91].mxu1  ;;  %v15566_v24 = vpop.f32.mrb[127].mxu0 }
 0x90f   : > { %v20764_v4 = vadd.f32 %v15558_v38, %v15422_v0  ;;  %v15425_v44 = vadd.f32 %v15424_v28, %v15423_v23  ;;  %v15567_v31 = vadd.f32 %v15566_v24, %v15565_v3  ;;  %v18121_v3 = vld [vmem:[%s21737_s9 + $0x210] sm:$0xff]  }
 0x910   : > { %16759 = vmatmul.mubr.bf16.gmra.mrb[68].mxu1 %v20677_v18 }
 0x911   : > { %v20767_v21 = vadd.f32 %v15561_v12, %v15425_v44  ;;  %16762 = vmatprep.mubr.bf16.mxu1 %v20681_v15  ;;  %v9679_v44 = vld [vmem:[#allocation2 + $0x50] sm:$0xff] }
 0x913   : > { %v15426_v46 = vpop.f32.mrb[92].mxu1  ;;  %v15568_v29 = vpop.f32.mrb[128].mxu0 }
 0x914   : > { %v15427_v51 = vpop.f32.mrb[93].mxu1  ;;  %v15569_v6 = vpop.f32.mrb[129].mxu0 }
 0x915   : > { %v15428_v10 = vadd.f32 %v15427_v51, %v15426_v46  ;;  %v15570_v25 = vadd.f32 %v15569_v6, %v15568_v29  ;;  %v15429_v54 = vpop.f32.mrb[94].mxu1  ;;  %v15571_v55 = vpop.f32.mrb[130].mxu0  ;;  %v9745_v29 = vld [vmem:[#allocation2 + $0x69] sm:$0xff] }
 0x916   : > { %v15430_v60 = vpop.f32.mrb[95].mxu1  ;;  %v15572_v59 = vpop.f32.mrb[131].mxu0 }
 0x917   : > { %v20770_v62 = vadd.f32 %v15564_v43, %v15428_v10  ;;  %v15431_v17 = vadd.f32 %v15430_v60, %v15429_v54  ;;  %v15573_v1 = vadd.f32 %v15572_v59, %v15571_v55  ;;  %v9773_v43 = vpack.c.bf16 %v9743_v9, %v9742_v22  ;;  %v9678_v54 = vld [vmem:[#allocation2 + $0x48] sm:$0xff]  ;;  %v9683_v22 = vld [vmem:[#allocation2 + $0x80] sm:$0xff] }
 0x918   : > { %16763 = vmatmul.mubr.bf16.gmra.mrb[72].mxu1 %v20683_v48  ;;  %v9744_v59 = vld [vmem:[#allocation2 + $0x61] sm:$0xff] }
 0x919   : > { %v20773_v18 = vadd.f32 %v15567_v31, %v15431_v17  ;;  %16766 = vmatprep.mubr.bf16.mxu1 %v20687_v52  ;;  %v18122_v17 = vld [vmem:[%s21737_s9 + $0x218] sm:$0xff]   ;;  %v18124_v9 = vld [vmem:[%s21737_s9 + $0x228] sm:$0xff]  }
 0x91b   : > { %v15432_v15 = vpop.f32.mrb[96].mxu1  ;;  %v15574_v35 = vpop.f32.mrb[132].mxu0 }
 0x91c   : > { %v15433_v32 = vpop.f32.mrb[97].mxu1  ;;  %v15575_v53 = vpop.f32.mrb[133].mxu0 }
 0x91d   : > { %v15434_v5 = vadd.f32 %v15433_v32, %v15432_v15  ;;  %v15576_v39 = vadd.f32 %v15575_v53, %v15574_v35  ;;  %v15435_v11 = vpop.f32.mrb[98].mxu1  ;;  %v15577_v56 = vpop.f32.mrb[134].mxu0  ;;  %v9774_v32 = vpack.c.bf16 %v9745_v29, %v9744_v59 }
 0x91e   : > { %v15436_v61 = vpop.f32.mrb[99].mxu1  ;;  %v15578_v30 = vpop.f32.mrb[135].mxu0 }
 0x91f   : > { %v20776_v16 = vadd.f32 %v15570_v25, %v15434_v5  ;;  %v15437_v47 = vadd.f32 %v15436_v61, %v15435_v11  ;;  %v15579_v48 = vadd.f32 %v15578_v30, %v15577_v56  ;;  %v9681_v11 = vld [vmem:[#allocation2 + $0x68] sm:$0xff] }
 0x920   : > { %16767 = vmatmul.mubr.bf16.gmra.mrb[76].mxu1 %v20689_v13  ;;  %v18120_v13 = vld [vmem:[%s21737_s9 + $0x208] sm:$0xff]  }
 0x921   : > { %v20779_v52 = vadd.f32 %v15573_v1, %v15437_v47  ;;  %10141 = vmatprep.mubr.bf16.mxu1 %v9772_v33  ;;  %v9747_v30 = vld [vmem:[#allocation2 + $0x81] sm:$0xff] }
 0x923   : > { %v15438_v34 = vpop.f32.mrb[100].mxu1  ;;  %v15580_v19 = vpop.f32.mrb[136].mxu0 }
 0x924   : > { %v15439_v7 = vpop.f32.mrb[101].mxu1  ;;  %v15581_v8 = vpop.f32.mrb[137].mxu0 }
 0x925   : > { %v15440_v38 = vadd.f32 %v15439_v7, %v15438_v34  ;;  %v15582_v14 = vadd.f32 %v15581_v8, %v15580_v19  ;;  %v15441_v63 = vpop.f32.mrb[102].mxu1  ;;  %v15583_v40 = vpop.f32.mrb[138].mxu0  ;;  %v9680_v34 = vld [vmem:[#allocation2 + $0x60] sm:$0xff] }
 0x926   : > { %v15442_v58 = vpop.f32.mrb[103].mxu1  ;;  %v15584_v12 = vpop.f32.mrb[139].mxu0  ;;  %v9710_v7 = vpack.c.bf16 %v9681_v11, %v9680_v34  ;;  %v9746_v8 = vld [vmem:[#allocation2 + $0x79] sm:$0xff] }
 0x927   : > { %v20784_v41 = vadd.f32 %v15576_v39, %v15440_v38  ;;  %v15443_v36 = vadd.f32 %v15442_v58, %v15441_v63  ;;  %v15585_v0 = vadd.f32 %v15584_v12, %v15583_v40  ;;  %v9775_v40 = vpack.c.bf16 %v9747_v30, %v9746_v8  ;;  %v18125_v58 = vld [vmem:[%s21737_s9 + $0x230] sm:$0xff]  }
 0x928   : > { %10142 = vmatmul.mubr.bf16.vlgmr.msra.gmra.mrb[176].mxu1 %v9708_v45 }
 0x929   : > { %v20786_v23 = vadd.f32 %v15579_v48, %v15443_v36  ;;  %10149 = vmatprep.mubr.bf16.mxu1 %v9773_v43  ;;  %16771 = vmatpush3.bf16.msra.mxu1 %v20755_v26  ;;  %v9709_v26 = vpack.c.bf16 %v9679_v44, %v9678_v54  ;;  %v9682_v44 = vld [vmem:[#allocation2 + $0x78] sm:$0xff] }
 0x92a   : > { %16772 = vmatprep.subr.bf16.mxu1 %v18120_v13  ;;  %v9711_v29 = vpack.c.bf16 %v9683_v22, %v9682_v44 }
 0x92b   : > { %v15444_v28 = vpop.f32.mrb[104].mxu1  ;;  %v15586_v24 = vpop.f32.mrb[140].mxu0 }
 0x92c   : > { %v15445_v31 = vpop.f32.mrb[105].mxu1  ;;  %v15587_v46 = vpop.f32.mrb[141].mxu0 }
 0x92d   : > { %v15446_v51 = vadd.f32 %v15445_v31, %v15444_v28  ;;  %v15588_v6 = vadd.f32 %v15587_v46, %v15586_v24  ;;  %v15447_v10 = vpop.f32.mrb[106].mxu1  ;;  %v15589_v25 = vpop.f32.mrb[142].mxu0  ;;  %16773 = vmatpush3.bf16.msra.mxu1 %v18120_v13 }
 0x92e   : > { %v15448_v55 = vpop.f32.mrb[107].mxu1  ;;  %v15590_v60 = vpop.f32.mrb[143].mxu0  ;;  %16774 = vmatprep.subr.bf16.mxu1 %v18121_v3 }
 0x92f   : > { %v20795_v1 = vadd.f32 %v15582_v14, %v15446_v51  ;;  %v15449_v15 = vadd.f32 %v15448_v55, %v15447_v10  ;;  %v15591_v35 = vadd.f32 %v15590_v60, %v15589_v25  ;;  %v9748_v51 = vld [vmem:[#allocation2 + $0x91] sm:$0xff] }
 0x930   : > { %10150 = vmatmul.mubr.bf16.gmra.mrb[180].mxu1 %v9709_v26 }
 0x931   : > { %v20797_v53 = vadd.f32 %v15585_v0, %v15449_v15  ;;  %10157 = vmatprep.mubr.bf16.mxu1 %v9774_v32  ;;  %16775 = vmatpush3.bf16.msra.mxu1 %v18121_v3  ;;  %v9749_v0 = vld [vmem:[#allocation2 + $0x99] sm:$0xff]  ;;  %v9751_v32 = vld [vmem:[#allocation2 + $0xb1] sm:$0xff] }
 0x932   : > { %16776 = vmatprep.subr.bf16.mxu1 %v18122_v17  ;;  %v9776_v55 = vpack.c.bf16 %v9749_v0, %v9748_v51 }
 0x933   : > { %v15450_v5 = vpop.f32.mrb[108].mxu1  ;;  %v15592_v39 = vpop.f32.mrb[144].mxu0 }
 0x934   : > { %v15451_v56 = vpop.f32.mrb[109].mxu1  ;;  %v15593_v61 = vpop.f32.mrb[145].mxu0 }
 0x935   : > { %v15452_v57 = vadd.f32 %v15451_v56, %v15450_v5  ;;  %v15594_v47 = vadd.f32 %v15593_v61, %v15592_v39  ;;  %v15453_v48 = vpop.f32.mrb[110].mxu1  ;;  %v15595_v33 = vpop.f32.mrb[146].mxu0  ;;  %16777 = vmatpush3.bf16.msra.mxu1 %v18122_v17  ;;  %v9685_v17 = vld [vmem:[#allocation2 + $0x98] sm:$0xff]  ;;  %v9684_v56 = vld [vmem:[#allocation2 + $0x90] sm:$0xff] }
 0x936   : > { %v15454_v19 = vpop.f32.mrb[111].mxu1  ;;  %v15596_v50 = vpop.f32.mrb[147].mxu0  ;;  %16778 = vmatprep.subr.bf16.mxu1 %v18123_v2 }
 0x937   : > { %v20805_v38 = vadd.f32 %v15588_v6, %v15452_v57  ;;  %v15455_v14 = vadd.f32 %v15454_v19, %v15453_v48  ;;  %v15597_v63 = vadd.f32 %v15596_v50, %v15595_v33  ;;  %v18126_v6 = vld [vmem:[%s21737_s9 + $0x238] sm:$0xff]   ;;  %v9712_v57 = vpack.c.bf16 %v9685_v17, %v9684_v56 }
 0x938   : > { %10158 = vmatmul.mubr.bf16.gmra.mrb[184].mxu1 %v9710_v7 }
 0x939   : > { %v20807_v27 = vadd.f32 %v15591_v35, %v15455_v14  ;;  %10165 = vmatprep.mubr.bf16.mxu1 %v9775_v40  ;;  %16779 = vmatpush3.bf16.msra.mxu1 %v18123_v2  ;;  %v9753_v40 = vld [vmem:[#allocation2 + $0xc9] sm:$0xff] }
 0x93a   : > { %16780 = vmatprep.subr.bf16.mxu1 %v18124_v9 }
 0x93b   : > { %v15456_v12 = vpop.f32.mrb[112].mxu1  ;;  %v15598_v45 = vpop.f32.mrb[148].mxu0 }
 0x93c   : > { %v15457_v13 = vpop.f32.mrb[113].mxu1  ;;  %v15599_v36 = vpop.f32.mrb[149].mxu0 }
 0x93d   : > { %v15458_v43 = vadd.f32 %v15457_v13, %v15456_v12  ;;  %v15600_v3 = vadd.f32 %v15599_v36, %v15598_v45  ;;  %v15459_v28 = vpop.f32.mrb[114].mxu1  ;;  %v15601_v24 = vpop.f32.mrb[150].mxu0  ;;  %16781 = vmatpush3.bf16.msra.mxu1 %v18124_v9  ;;  %v9687_v9 = vld [vmem:[#allocation2 + $0xb0] sm:$0xff]  ;;  %v9686_v13 = vld [vmem:[#allocation2 + $0xa8] sm:$0xff] }
 0x93e   : > { %v15460_v31 = vpop.f32.mrb[115].mxu1  ;;  %v15602_v46 = vpop.f32.mrb[151].mxu0  ;;  %16782 = vmatprep.subr.bf16.mxu1 %v18125_v58 }
 0x93f   : > { %v20815_v10 = vadd.f32 %v15594_v47, %v15458_v43  ;;  %v15461_v25 = vadd.f32 %v15460_v31, %v15459_v28  ;;  %v15603_v54 = vadd.f32 %v15602_v46, %v15601_v24  ;;  %v9750_v47 = vld [vmem:[#allocation2 + $0xa9] sm:$0xff]  ;;  %v9713_v43 = vpack.c.bf16 %v9687_v9, %v9686_v13  ;;  %v9756_v13 = vld [vmem:[#allocation2 + $0xf1] sm:$0xff] }
 0x940   : > { %10166 = vmatmul.mubr.bf16.gmra.mrb[188].mxu1 %v9711_v29  ;;  %v9777_v19 = vpack.c.bf16 %v9751_v32, %v9750_v47 }
 0x941   : > { %v20817_v60 = vadd.f32 %v15597_v63, %v15461_v25  ;;  %10173 = vmatprep.mubr.bf16.mxu1 %v9776_v55  ;;  %16783 = vmatpush3.bf16.msra.mxu1 %v18125_v58  ;;  %v9755_v55 = vld [vmem:[#allocation2 + $0xe1] sm:$0xff] }
 0x942   : > { %16784 = vmatprep.subr.bf16.mxu1 %v18126_v6 }
 0x943   : > { %v15462_v26 = vpop.f32.mrb[116].mxu1  ;;  %v15604_v59 = vpop.f32.mrb[152].mxu0 }
 0x944   : > { %v15463_v15 = vpop.f32.mrb[117].mxu1  ;;  %v15605_v35 = vpop.f32.mrb[153].mxu0 }
 0x945   : > { %v15464_v2 = vadd.f32 %v15463_v15, %v15462_v26  ;;  %v15606_v5 = vadd.f32 %v15605_v35, %v15604_v59  ;;  %v15465_v39 = vpop.f32.mrb[118].mxu1  ;;  %v15607_v11 = vpop.f32.mrb[154].mxu0  ;;  %16785 = vmatpush3.bf16.msra.mxu1 %v18126_v6  ;;  %v9689_v6 = vld [vmem:[#allocation2 + $0xc8] sm:$0xff]  ;;  %v9688_v35 = vld [vmem:[#allocation2 + $0xc0] sm:$0xff] }
 0x946   : > { %v15466_v61 = vpop.f32.mrb[119].mxu1  ;;  %v15608_v30 = vpop.f32.mrb[155].mxu0 }
 0x947   : > { %v20819_v48 = vadd.f32 %v15600_v3, %v15464_v2  ;;  %v15467_v33 = vadd.f32 %v15466_v61, %v15465_v39  ;;  %v15609_v34 = vadd.f32 %v15608_v30, %v15607_v11  ;;  %v9752_v3 = vld [vmem:[#allocation2 + $0xc1] sm:$0xff]  ;;  %v9754_v39 = vld [vmem:[#allocation2 + $0xd9] sm:$0xff] }
 0x948   : > { %10174 = vmatmul.mubr.bf16.gmra.mrb[192].mxu1 %v9712_v57  ;;  %v9778_v31 = vpack.c.bf16 %v9753_v40, %v9752_v3  ;;  %v9779_v30 = vpack.c.bf16 %v9755_v55, %v9754_v39 }
 0x949   : > { %v20821_v50 = vadd.f32 %v15603_v54, %v15467_v33  ;;  %10181 = vmatprep.mubr.bf16.mxu1 %v9777_v19 }
 0x94b   : > { %v15468_v7 = vpop.f32.mrb[120].mxu1  ;;  %v15610_v8 = vpop.f32.mrb[156].mxu0 }
 0x94c   : > { %v15469_v14 = vpop.f32.mrb[121].mxu1  ;;  %v15611_v63 = vpop.f32.mrb[157].mxu0 }
 0x94d   : > { %v15470_v58 = vadd.f32 %v15469_v14, %v15468_v7  ;;  %v15612_v12 = vadd.f32 %v15611_v63, %v15610_v8  ;;  %v15471_v45 = vpop.f32.mrb[122].mxu1  ;;  %v15613_v22 = vpop.f32.mrb[158].mxu0  ;;  %v9757_v8 = vld [vmem:[#allocation2 + $0xf9] sm:$0xff] }
 0x94e   : > { %v15472_v36 = vpop.f32.mrb[123].mxu1  ;;  %v15614_v0 = vpop.f32.mrb[159].mxu0  ;;  %v9780_v3 = vpack.c.bf16 %v9757_v8, %v9756_v13  ;;  %v9761_v8 = vld [vmem:[#allocation2 + $0x129] sm:$0xff]  ;;  %v9760_v13 = vld [vmem:[#allocation2 + $0x121] sm:$0xff] }
 0x94f   : > { %v20823_v28 = vadd.f32 %v15606_v5, %v15470_v58  ;;  %v15473_v24 = vadd.f32 %v15472_v36, %v15471_v45  ;;  %v15615_v44 = vadd.f32 %v15614_v0, %v15613_v22  ;;  %v9714_v5 = vpack.c.bf16 %v9689_v6, %v9688_v35  ;;  %v9690_v58 = vld [vmem:[#allocation2 + $0xd8] sm:$0xff] }
 0x950   : > { %10182 = vmatmul.mubr.bf16.gmra.mrb[196].mxu1 %v9713_v43 }
 0x951   : > { %v20825_v46 = vadd.f32 %v15609_v34, %v15473_v24  ;;  %10189 = vmatprep.mubr.bf16.mxu1 %v9778_v31  ;;  %v9691_v34 = vld [vmem:[#allocation2 + $0xe0] sm:$0xff] }
 0x952   : > { %v9715_v22 = vpack.c.bf16 %v9691_v34, %v9690_v58  ;;  %v9695_v34 = vld [vmem:[#allocation2 + $0x110] sm:$0xff] }
 0x953   : > { %v15474_v29 = vpop.f32.mrb[124].mxu1  ;;  %v15616_v51 = vpop.f32.mrb[160].mxu0 }
 0x954   : > { %v15475_v25 = vpop.f32.mrb[125].mxu1  ;;  %v15617_v54 = vpop.f32.mrb[161].mxu0 }
 0x955   : > { %v15476_v26 = vadd.f32 %v15475_v25, %v15474_v29  ;;  %v15618_v59 = vadd.f32 %v15617_v54, %v15616_v51  ;;  %v15477_v17 = vpop.f32.mrb[126].mxu1  ;;  %v15619_v15 = vpop.f32.mrb[162].mxu0  ;;  %v9693_v29 = vld [vmem:[#allocation2 + $0xf8] sm:$0xff] }
 0x956   : > { %v15478_v32 = vpop.f32.mrb[127].mxu1  ;;  %v15620_v2 = vpop.f32.mrb[163].mxu0  ;;  %v9759_v25 = vld [vmem:[#allocation2 + $0x111] sm:$0xff] }
 0x957   : > { %v20827_v11 = vadd.f32 %v15612_v12, %v15476_v26  ;;  %v15479_v56 = vadd.f32 %v15478_v32, %v15477_v17  ;;  %v15621_v61 = vadd.f32 %v15620_v2, %v15619_v15  ;;  %v9692_v15 = vld [vmem:[#allocation2 + $0xf0] sm:$0xff] }
 0x958   : > { %10190 = vmatmul.mubr.bf16.gmra.mrb[200].mxu1 %v9714_v5  ;;  %v9716_v32 = vpack.c.bf16 %v9693_v29, %v9692_v15  ;;  %v9758_v2 = vld [vmem:[#allocation2 + $0x109] sm:$0xff] }
 0x959   : > { %v20829_v57 = vadd.f32 %v15615_v44, %v15479_v56  ;;  %10197 = vmatprep.mubr.bf16.mxu1 %v9779_v30 }
 0x95b   : > { %v15480_v47 = vpop.f32.mrb[128].mxu1  ;;  %v15622_v33 = vpop.f32.mrb[164].mxu0 }
 0x95c   : > { %v15481_v19 = vpop.f32.mrb[129].mxu1  ;;  %v15623_v7 = vpop.f32.mrb[165].mxu0 }
 0x95d   : > { %v15482_v9 = vadd.f32 %v15481_v19, %v15480_v47  ;;  %v15624_v14 = vadd.f32 %v15623_v7, %v15622_v33  ;;  %v15483_v63 = vpop.f32.mrb[130].mxu1  ;;  %v15625_v40 = vpop.f32.mrb[166].mxu0 }
 0x95e   : > { %v15484_v12 = vpop.f32.mrb[131].mxu1  ;;  %v15626_v45 = vpop.f32.mrb[167].mxu0 }
 0x95f   : > { %v20831_v36 = vadd.f32 %v15618_v59, %v15482_v9  ;;  %v15485_v0 = vadd.f32 %v15484_v12, %v15483_v63  ;;  %v15627_v43 = vadd.f32 %v15626_v45, %v15625_v40  ;;  %v9694_v12 = vld [vmem:[#allocation2 + $0x108] sm:$0xff] }
 0x960   : > { %10198 = vmatmul.mubr.bf16.gmra.mrb[204].mxu1 %v9715_v22  ;;  %v9717_v22 = vpack.c.bf16 %v9695_v34, %v9694_v12  ;;  %v9764_v34 = vld [vmem:[#allocation2 + $0x151] sm:$0xff] }
 0x961   : > { %v20833_v24 = vadd.f32 %v15621_v61, %v15485_v0  ;;  %10205 = vmatprep.mubr.bf16.mxu1 %v9780_v3  ;;  %v9781_v61 = vpack.c.bf16 %v9759_v25, %v9758_v2  ;;  %v9763_v25 = vld [vmem:[#allocation2 + $0x141] sm:$0xff]  ;;  %v9703_v12 = vld [vmem:[#allocation2 + $0x170] sm:$0xff] }
 0x963   : > { %v15486_v44 = vpop.f32.mrb[132].mxu1  ;;  %v15628_v31 = vpop.f32.mrb[168].mxu0 }
 0x964   : > { %v15487_v51 = vpop.f32.mrb[133].mxu1  ;;  %v15629_v6 = vpop.f32.mrb[169].mxu0 }
 0x965   : > { %v15488_v54 = vadd.f32 %v15487_v51, %v15486_v44  ;;  %v15630_v55 = vadd.f32 %v15629_v6, %v15628_v31  ;;  %v15489_v26 = vpop.f32.mrb[134].mxu1  ;;  %v15631_v17 = vpop.f32.mrb[170].mxu0  ;;  %v9782_v44 = vpack.c.bf16 %v9761_v8, %v9760_v13  ;;  %v9697_v51 = vld [vmem:[#allocation2 + $0x128] sm:$0xff]  ;;  %v9767_v8 = vld [vmem:[#allocation2 + $0x171] sm:$0xff] }
 0x966   : > { %v15490_v59 = vpop.f32.mrb[135].mxu1  ;;  %v15632_v35 = vpop.f32.mrb[171].mxu0  ;;  %v9768_v13 = vld [vmem:[#allocation2 + $0x181] sm:$0xff] }
 0x967   : > { %v20835_v5 = vadd.f32 %v15624_v14, %v15488_v54  ;;  %v15491_v39 = vadd.f32 %v15490_v59, %v15489_v26  ;;  %v15633_v56 = vadd.f32 %v15632_v35, %v15631_v17  ;;  %v9696_v17 = vld [vmem:[#allocation2 + $0x120] sm:$0xff] }
 0x968   : > { %10206 = vmatmul.mubr.bf16.gmra.mrb[208].mxu1 %v9716_v32  ;;  %v9718_v59 = vpack.c.bf16 %v9697_v51, %v9696_v17  ;;  %v9762_v35 = vld [vmem:[#allocation2 + $0x139] sm:$0xff] }
 0x969   : > { %v20837_v30 = vadd.f32 %v15627_v43, %v15491_v39  ;;  %10213 = vmatprep.mubr.bf16.mxu1 %v9781_v61  ;;  %v9783_v2 = vpack.c.bf16 %v9763_v25, %v9762_v35  ;;  %v9765_v61 = vld [vmem:[#allocation2 + $0x159] sm:$0xff]  ;;  %v9806_v35 = vld [vmem:[#allocation2 + $0x4a] sm:$0xff] }
 0x96a   : > { %v9704_v51 = vld [vmem:[#allocation2 + $0x180] sm:$0xff]  ;;  %v9804_v17 = vld [vmem:[#allocation2 + $0x32] sm:$0xff] }
 0x96b   : > { %v15492_v47 = vpop.f32.mrb[136].mxu1  ;;  %v15634_v33 = vpop.f32.mrb[172].mxu0 }
 0x96c   : > { %v15493_v19 = vpop.f32.mrb[137].mxu1  ;;  %v15635_v7 = vpop.f32.mrb[173].mxu0 }
 0x96d   : > { %v15494_v9 = vadd.f32 %v15493_v19, %v15492_v47  ;;  %v15636_v63 = vadd.f32 %v15635_v7, %v15634_v33  ;;  %v15495_v40 = vpop.f32.mrb[138].mxu1  ;;  %v15637_v58 = vpop.f32.mrb[174].mxu0  ;;  %v9698_v47 = vld [vmem:[#allocation2 + $0x138] sm:$0xff]  ;;  %v9784_v19 = vpack.c.bf16 %v9765_v61, %v9764_v34  ;;  %v9811_v34 = vld [vmem:[#allocation2 + $0x82] sm:$0xff] }
 0x96e   : > { %v15496_v14 = vpop.f32.mrb[139].mxu1  ;;  %v15638_v45 = vpop.f32.mrb[175].mxu0  ;;  %v9701_v7 = vld [vmem:[#allocation2 + $0x158] sm:$0xff] }
 0x96f   : > { %v20839_v0 = vadd.f32 %v15630_v55, %v15494_v9  ;;  %v15497_v43 = vadd.f32 %v15496_v14, %v15495_v40  ;;  %v15639_v3 = vadd.f32 %v15638_v45, %v15637_v58  ;;  %v9700_v9 = vld [vmem:[#allocation2 + $0x150] sm:$0xff]  ;;  %v9702_v45 = vld [vmem:[#allocation2 + $0x168] sm:$0xff] }
 0x970   : > { %10214 = vmatmul.mubr.bf16.gmra.mrb[212].mxu1 %v9717_v22  ;;  %v9720_v40 = vpack.c.bf16 %v9701_v7, %v9700_v9  ;;  %v9769_v14 = vld [vmem:[#allocation2 + $0x189] sm:$0xff]  ;;  %v9721_v22 = vpack.c.bf16 %v9703_v12, %v9702_v45  ;;  %v9813_v7 = vld [vmem:[#allocation2 + $0x9a] sm:$0xff] }
 0x971   : > { %v20841_v31 = vadd.f32 %v15633_v56, %v15497_v43  ;;  %10221 = vmatprep.mubr.bf16.mxu1 %v9782_v44  ;;  %v9699_v56 = vld [vmem:[#allocation2 + $0x140] sm:$0xff]  ;;  %v9786_v43 = vpack.c.bf16 %v9769_v14, %v9768_v13  ;;  %v9817_v12 = vld [vmem:[#allocation2 + $0xca] sm:$0xff] }
 0x972   : > { %v9719_v33 = vpack.c.bf16 %v9699_v56, %v9698_v47  ;;  %v9771_v44 = vld [vmem:[#allocation2 + $0x1a1] sm:$0xff]  ;;  %v9809_v56 = vld [vmem:[#allocation2 + $0x6a] sm:$0xff] }
 0x973   : > { %v15498_v29 = vpop.f32.mrb[140].mxu1  ;;  %v9819_v13 = vld [vmem:[#allocation2 + $0xe2] sm:$0xff] }
 0x974   : > { %v15499_v6 = vpop.f32.mrb[141].mxu1 }
 0x975   : > { %v15500_v54 = vadd.f32 %v15499_v6, %v15498_v29  ;;  %v15501_v26 = vpop.f32.mrb[142].mxu1  ;;  %v9705_v29 = vld [vmem:[#allocation2 + $0x188] sm:$0xff] }
 0x976   : > { %v15502_v15 = vpop.f32.mrb[143].mxu1  ;;  %v9722_v25 = vpack.c.bf16 %v9705_v29, %v9704_v51  ;;  %v9822_v51 = vld [vmem:[#allocation2 + $0x10a] sm:$0xff] }
 0x977   : > { %v20843_v32 = vadd.f32 %v15636_v63, %v15500_v54  ;;  %v15503_v55 = vadd.f32 %v15502_v15, %v15501_v26  ;;  %v9766_v63 = vld [vmem:[#allocation2 + $0x169] sm:$0xff]  ;;  %v18203_v54 = vld [vmem:[#allocation2] sm:$0xff] }
 0x978   : > { %10222 = vmatmul.mubr.bf16.gmra.mrb[216].mxu1 %v9718_v59  ;;  %v9785_v58 = vpack.c.bf16 %v9767_v8, %v9766_v63  ;;  %v20847_v26 = vpack.c.bf16 %v18203_v54, %v18203_v54  ;;  %v9805_v15 = vld [vmem:[#allocation2 + $0x3a] sm:$0xff]  ;;  %v9815_v63 = vld [vmem:[#allocation2 + $0xb2] sm:$0xff]  ;;  %v9825_v54 = vld [vmem:[#allocation2 + $0x12a] sm:$0xff] }
 0x979   : > { %v20845_v39 = vadd.f32 %v15639_v3, %v15503_v55  ;;  %10229 = vmatprep.mubr.bf16.mxu1 %v9783_v2  ;;  %v9770_v3 = vld [vmem:[#allocation2 + $0x199] sm:$0xff]  ;;  %v9836_v59 = vpack.c.bf16 %v9805_v15, %v9804_v17  ;;  %v9808_v2 = vld [vmem:[#allocation2 + $0x62] sm:$0xff] }
 0x97a   : > { %v9787_v6 = vpack.c.bf16 %v9771_v44, %v9770_v3  ;;  %v9807_v55 = vld [vmem:[#allocation2 + $0x52] sm:$0xff]  ;;  %v9838_v47 = vpack.c.bf16 %v9809_v56, %v9808_v2  ;;  %v9821_v3 = vld [vmem:[#allocation2 + $0xfa] sm:$0xff] }
 0x97b   : > { %v9837_v61 = vpack.c.bf16 %v9807_v55, %v9806_v35  ;;  %v9827_v35 = vld [vmem:[#allocation2 + $0x142] sm:$0xff]  ;;  %v9828_v55 = vld [vmem:[#allocation2 + $0x152] sm:$0xff]  ;;  %v9829_v2 = vld [vmem:[#allocation2 + $0x15a] sm:$0xff] }
 0x980   : > { %10230 = vmatmul.mubr.bf16.gmra.mrb[220].mxu1 %v9719_v33  ;;  %v9810_v33 = vld [vmem:[#allocation2 + $0x7a] sm:$0xff] }
 0x981   : > { %10237 = vmatprep.mubr.bf16.mxu1 %v9784_v19  ;;  %v9812_v19 = vld [vmem:[#allocation2 + $0x92] sm:$0xff]  ;;  %v9839_v8 = vpack.c.bf16 %v9811_v34, %v9810_v33  ;;  %v9832_v34 = vld [vmem:[#allocation2 + $0x182] sm:$0xff] }
 0x982   : > { %v9840_v9 = vpack.c.bf16 %v9813_v7, %v9812_v19  ;;  %v9831_v33 = vld [vmem:[#allocation2 + $0x172] sm:$0xff]  ;;  %v9833_v19 = vld [vmem:[#allocation2 + $0x18a] sm:$0xff] }
 0x988   : > { %10238 = vmatmul.mubr.bf16.gmra.mrb[224].mxu1 %v9720_v40  ;;  %v9814_v40 = vld [vmem:[#allocation2 + $0xaa] sm:$0xff] }
 0x989   : > { %10245 = vmatprep.mubr.bf16.mxu1 %v9785_v58  ;;  %v9816_v58 = vld [vmem:[#allocation2 + $0xc2] sm:$0xff]  ;;  %v9841_v14 = vpack.c.bf16 %v9815_v63, %v9814_v40 }
 0x98a   : > { %v9842_v45 = vpack.c.bf16 %v9817_v12, %v9816_v58  ;;  %v9835_v40 = vld [vmem:[#allocation2 + $0x1a2] sm:$0xff] }
 0x990   : > { %10246 = vmatmul.mubr.bf16.gmra.mrb[228].mxu1 %v9721_v22  ;;  %v9818_v22 = vld [vmem:[#allocation2 + $0xda] sm:$0xff] }
 0x991   : > { %10253 = vmatprep.mubr.bf16.mxu1 %v9786_v43  ;;  %v9820_v43 = vld [vmem:[#allocation2 + $0xf2] sm:$0xff]  ;;  %v9843_v44 = vpack.c.bf16 %v9819_v13, %v9818_v22 }
 0x992   : > { %v9844_v29 = vpack.c.bf16 %v9821_v3, %v9820_v43 }
 0x998   : > { %10254 = vmatmul.mubr.bf16.gmra.mrb[232].mxu1 %v9722_v25  ;;  %v9824_v25 = vld [vmem:[#allocation2 + $0x122] sm:$0xff] }
 0x999   : > { %10261 = vmatprep.mubr.bf16.mxu1 %v9787_v6  ;;  %v9823_v6 = vld [vmem:[#allocation2 + $0x112] sm:$0xff]  ;;  %v9846_v15 = vpack.c.bf16 %v9825_v54, %v9824_v25 }
 0x99a   : > { %v9845_v17 = vpack.c.bf16 %v9823_v6, %v9822_v51 }
 0x9a0   : > { %10262 = vmatmul.mubr.bf16.gmra.mrb[236].mxu1 %v20847_v26 }
 0x9a1   : > { %16786 = vmatprep.mubr.bf16.mxu1 %v9836_v59  ;;  %v9826_v59 = vld [vmem:[#allocation2 + $0x13a] sm:$0xff] }
 0x9a2   : > { %v9847_v56 = vpack.c.bf16 %v9827_v35, %v9826_v59 }
 0x9a8   : > { %16787 = vmatmul.mubr.bf16.vlgmr.msra.gmra.mrb[48].mxu1 %v9837_v61  ;;  %v9848_v61 = vpack.c.bf16 %v9829_v2, %v9828_v55 }
 0x9a9   : > { %16790 = vmatprep.mubr.bf16.mxu1 %v9838_v47  ;;  %v9830_v47 = vld [vmem:[#allocation2 + $0x16a] sm:$0xff] }
 0x9aa   : > { %v9849_v7 = vpack.c.bf16 %v9831_v33, %v9830_v47 }
 0x9b0   : > { %16791 = vmatmul.mubr.bf16.gmra.mrb[52].mxu1 %v9839_v8  ;;  %v9850_v8 = vpack.c.bf16 %v9833_v19, %v9832_v34 }
 0x9b1   : > { %16794 = vmatprep.mubr.bf16.mxu1 %v9840_v9  ;;  %v9834_v9 = vld [vmem:[#allocation2 + $0x19a] sm:$0xff] }
 0x9b2   : > { %v9851_v63 = vpack.c.bf16 %v9835_v40, %v9834_v9 }
 0x9b8   : > { %16795 = vmatmul.mubr.bf16.gmra.mrb[56].mxu1 %v9841_v14 }
 0x9b9   : > { %16798 = vmatprep.mubr.bf16.mxu1 %v9842_v45 }
 0x9c0   : > { %16799 = vmatmul.mubr.bf16.gmra.mrb[60].mxu1 %v9843_v44 }
 0x9c1   : > { %16802 = vmatprep.mubr.bf16.mxu1 %v9844_v29 }
 0x9c8   : > { %16803 = vmatmul.mubr.bf16.gmra.mrb[64].mxu1 %v9845_v17 }
 0x9c9   : > { %16806 = vmatprep.mubr.bf16.mxu1 %v9846_v15 }
 0x9d0   : > { %16807 = vmatmul.mubr.bf16.gmra.mrb[68].mxu1 %v9847_v56 }
 0x9d1   : > { %16810 = vmatprep.mubr.bf16.mxu1 %v9848_v61 }
 0x9d8   : > { %16811 = vmatmul.mubr.bf16.gmra.mrb[72].mxu1 %v9849_v7 }
 0x9d9   : > { %16814 = vmatprep.mubr.bf16.mxu1 %v9850_v8 }
 0x9e0   : > { %16815 = vmatmul.mubr.bf16.gmra.mrb[76].mxu1 %v9851_v63 }
 0x9fb   : > { %v15680_v58 = vpop.f32.mrb[176].mxu1 }
 0x9fc   : > { %v15681_v12 = vpop.f32.mrb[177].mxu1 }
 0x9fd   : > { %v15682_v14 = vadd.f32 %v15681_v12, %v15680_v58  ;;  %v15683_v45 = vpop.f32.mrb[178].mxu1 }
 0x9fe   : > { %v15684_v22 = vpop.f32.mrb[179].mxu1 }
 0x9ff   : > { %v15685_v13 = vadd.f32 %v15684_v22, %v15683_v45  ;;  %v20851_v43 = vadd.f32 %v20742_v37, %v15682_v14 }
 0xa01   : > { %v20854_v3 = vadd.f32 %v20746_v20, %v15685_v13 }
 0xa03   : > { %v15686_v44 = vpop.f32.mrb[180].mxu1 }
 0xa04   : > { %v15687_v29 = vpop.f32.mrb[181].mxu1 }
 0xa05   : > { %v15688_v51 = vadd.f32 %v15687_v29, %v15686_v44  ;;  %v15689_v6 = vpop.f32.mrb[182].mxu1 }
 0xa06   : > { %v15690_v25 = vpop.f32.mrb[183].mxu1 }
 0xa07   : > { %v15691_v54 = vadd.f32 %v15690_v25, %v15689_v6  ;;  %v20857_v17 = vadd.f32 %v20758_v49, %v15688_v51 }
 0xa09   : > { %v20860_v15 = vadd.f32 %v20761_v42, %v15691_v54 }
 0xa0b   : > { %v15692_v59 = vpop.f32.mrb[184].mxu1 }
 0xa0c   : > { %v15693_v35 = vpop.f32.mrb[185].mxu1 }
 0xa0d   : > { %v15694_v55 = vadd.f32 %v15693_v35, %v15692_v59  ;;  %v15695_v37 = vpop.f32.mrb[186].mxu1 }
 0xa0e   : > { %v15696_v2 = vpop.f32.mrb[187].mxu1 }
 0xa0f   : > { %v15697_v56 = vadd.f32 %v15696_v2, %v15695_v37  ;;  %v20863_v20 = vadd.f32 %v20764_v4, %v15694_v55 }
 0xa11   : > { %v20866_v61 = vadd.f32 %v20767_v21, %v15697_v56 }
 0xa13   : > { %v15698_v47 = vpop.f32.mrb[188].mxu1 }
 0xa14   : > { %v15699_v33 = vpop.f32.mrb[189].mxu1 }
 0xa15   : > { %v15700_v34 = vadd.f32 %v15699_v33, %v15698_v47  ;;  %v15701_v49 = vpop.f32.mrb[190].mxu1 }
 0xa16   : > { %v15702_v19 = vpop.f32.mrb[191].mxu1 }
 0xa17   : > { %v15703_v7 = vadd.f32 %v15702_v19, %v15701_v49  ;;  %v20869_v42 = vadd.f32 %v20770_v62, %v15700_v34 }
 0xa19   : > { %v20872_v8 = vadd.f32 %v20773_v18, %v15703_v7 }
 0xa1b   : > { %v15704_v9 = vpop.f32.mrb[192].mxu1 }
 0xa1c   : > { %v15705_v40 = vpop.f32.mrb[193].mxu1 }
 0xa1d   : > { %v15706_v63 = vadd.f32 %v15705_v40, %v15704_v9  ;;  %v15707_v4 = vpop.f32.mrb[194].mxu1 }
 0xa1e   : > { %v15708_v58 = vpop.f32.mrb[195].mxu1 }
 0xa1f   : > { %v15709_v12 = vadd.f32 %v15708_v58, %v15707_v4  ;;  %v20875_v21 = vadd.f32 %v20776_v16, %v15706_v63  ;;  %v18129_v4 = vld [vmem:[%s21739_s11 + $0x108] sm:$0xff]  }
 0xa21   : > { %v20878_v14 = vadd.f32 %v20779_v52, %v15709_v12  ;;  %v18133_v12 = vld [vmem:[%s21739_s11 + $0x48] sm:$0xff]  }
 0xa23   : > { %v15710_v45 = vpop.f32.mrb[196].mxu1 }
 0xa24   : > { %v15711_v22 = vpop.f32.mrb[197].mxu1 }
 0xa25   : > { %v15712_v13 = vadd.f32 %v15711_v22, %v15710_v45  ;;  %v15713_v62 = vpop.f32.mrb[198].mxu1  ;;  %v18130_v22 = vld [vmem:[%s21739_s11 + $0xc8] sm:$0xff]  }
 0xa26   : > { %v15714_v44 = vpop.f32.mrb[199].mxu1 }
 0xa27   : > { %v15715_v29 = vadd.f32 %v15714_v44, %v15713_v62  ;;  %v20881_v18 = vadd.f32 %v20784_v41, %v15712_v13  ;;  %v18134_v44 = vld [vmem:[%s21739_s11 + $0x8] sm:$0xff]  }
 0xa29   : > { %v20884_v51 = vadd.f32 %v20786_v23, %v15715_v29  ;;  %v18135_v29 = vld [vmem:[%s21739_s11 + $0x110] sm:$0xff]  }
 0xa2b   : > { %v15716_v6 = vpop.f32.mrb[200].mxu1 }
 0xa2c   : > { %v15717_v25 = vpop.f32.mrb[201].mxu1 }
 0xa2d   : > { %v15718_v54 = vadd.f32 %v15717_v25, %v15716_v6  ;;  %v15719_v16 = vpop.f32.mrb[202].mxu1  ;;  %v18136_v25 = vld [vmem:[%s21739_s11 + $0x50] sm:$0xff]  }
 0xa2e   : > { %v15720_v59 = vpop.f32.mrb[203].mxu1 }
 0xa2f   : > { %v15721_v35 = vadd.f32 %v15720_v59, %v15719_v16  ;;  %v20887_v52 = vadd.f32 %v20795_v1, %v15718_v54  ;;  %v18137_v59 = vld [vmem:[%s21739_s11 + $0xd0] sm:$0xff]  }
 0xa31   : > { %v20890_v55 = vadd.f32 %v20797_v53, %v15721_v35 }
 0xa33   : > { %v15722_v37 = vpop.f32.mrb[204].mxu1 }
 0xa34   : > { %v15723_v2 = vpop.f32.mrb[205].mxu1 }
 0xa35   : > { %v15724_v56 = vadd.f32 %v15723_v2, %v15722_v37  ;;  %v15725_v41 = vpop.f32.mrb[206].mxu1  ;;  %v18138_v37 = vld [vmem:[%s21739_s11 + $0x10] sm:$0xff]   ;;  %v18143_v2 = vld [vmem:[%s21739_s11 + $0x118] sm:$0xff]  }
 0xa36   : > { %v15726_v47 = vpop.f32.mrb[207].mxu1 }
 0xa37   : > { %v15727_v33 = vadd.f32 %v15726_v47, %v15725_v41  ;;  %v20893_v23 = vadd.f32 %v20805_v38, %v15724_v56  ;;  %v18127_v38 = vld [vmem:[%s21739_s11 + $0x100] sm:$0xff]  }
 0xa38   : > { %15800 = vmatprep.subr.bf16.mxu0 %v18127_v38  ;;  %v18149_v38 = vld [vmem:[%s21739_s11 + $0xe0] sm:$0xff]  }
 0xa39   : > { %v20896_v34 = vadd.f32 %v20807_v27, %v15727_v33  ;;  %v18128_v27 = vld [vmem:[%s21739_s11 + $0xc0] sm:$0xff]  }
 0xa3a   : > { %15801 = vmatpush3.bf16.msra.mxu0 %v18128_v27 }
 0xa3b   : > { %v15728_v49 = vpop.f32.mrb[208].mxu1  ;;  %15802 = vmatprep.subr.bf16.mxu0 %v18129_v4  ;;  %v18142_v4 = vld [vmem:[%s21739_s11 + $0x20] sm:$0xff]  }
 0xa3c   : > { %v15729_v19 = vpop.f32.mrb[209].mxu1 }
 0xa3d   : > { %v15730_v7 = vadd.f32 %v15729_v19, %v15728_v49  ;;  %v15731_v1 = vpop.f32.mrb[210].mxu1  ;;  %v18140_v49 = vld [vmem:[%s21739_s11 + $0x18] sm:$0xff]   ;;  %v18147_v19 = vld [vmem:[%s21739_s11 + $0x120] sm:$0xff]  }
 0xa3e   : > { %v15732_v9 = vpop.f32.mrb[211].mxu1  ;;  %15803 = vmatpush3.bf16.msra.mxu0 %v18130_v22  ;;  %v18148_v22 = vld [vmem:[%s21739_s11 + $0x70] sm:$0xff]  }
 0xa3f   : > { %v15733_v40 = vadd.f32 %v15732_v9, %v15731_v1  ;;  %v20899_v53 = vadd.f32 %v20815_v10, %v15730_v7  ;;  %v18131_v10 = vld [vmem:[%s21739_s11 + $0x40] sm:$0xff]   ;;  %15804 = vmatprep.subr.bf16.mxu0 %v18135_v29  ;;  %v18150_v29 = vld [vmem:[%s21739_s11 + $0x30] sm:$0xff]  }
 0xa40   : > { %15936 = vmatprep.subr.bf16.mxu1 %v18131_v10  ;;  %v18141_v1 = vld [vmem:[%s21739_s11 + $0x60] sm:$0xff]  }
 0xa41   : > { %v20902_v63 = vadd.f32 %v20817_v60, %v15733_v40  ;;  %v18132_v60 = vld [vmem:[%s21739_s11] sm:$0xff]  }
 0xa42   : > { %15937 = vmatpush3.bf16.msra.mxu1 %v18132_v60  ;;  %15805 = vmatpush3.bf16.msra.mxu0 %v18137_v59 }
 0xa43   : > { %v15734_v58 = vpop.f32.mrb[212].mxu1  ;;  %15938 = vmatprep.subr.bf16.mxu1 %v18133_v12  ;;  %15806 = vmatprep.subr.bf16.mxu0 %v18143_v2 }
 0xa44   : > { %v15735_v45 = vpop.f32.mrb[213].mxu1 }
 0xa45   : > { %v15736_v13 = vadd.f32 %v15735_v45, %v15734_v58  ;;  %v15737_v62 = vpop.f32.mrb[214].mxu1 }
 0xa46   : > { %v15738_v6 = vpop.f32.mrb[215].mxu1  ;;  %15939 = vmatpush3.bf16.msra.mxu1 %v18134_v44 }
 0xa47   : > { %v15739_v54 = vadd.f32 %v15738_v6, %v15737_v62  ;;  %v20935_v16 = vadd.f32 %v20819_v48, %v15736_v13  ;;  %15940 = vmatprep.subr.bf16.mxu1 %v18136_v25  ;;  %v18139_v48 = vld [vmem:[%s21739_s11 + $0x58] sm:$0xff]  }
 0xa49   : > { %v20941_v35 = vadd.f32 %v20821_v50, %v15739_v54  ;;  %v18145_v50 = vld [vmem:[%s21739_s11 + $0xd8] sm:$0xff]  }
 0xa4a   : > { %15941 = vmatpush3.bf16.msra.mxu1 %v18138_v37  ;;  %15807 = vmatpush3.bf16.msra.mxu0 %v18145_v50 }
 0xa4b   : > { %v15740_v56 = vpop.f32.mrb[216].mxu1  ;;  %15942 = vmatprep.subr.bf16.mxu1 %v18139_v48  ;;  %15808 = vmatprep.subr.bf16.mxu0 %v18147_v19 }
 0xa4c   : > { %v15741_v41 = vpop.f32.mrb[217].mxu1 }
 0xa4d   : > { %v15742_v47 = vadd.f32 %v15741_v41, %v15740_v56  ;;  %v15743_v33 = vpop.f32.mrb[218].mxu1 }
 0xa4e   : > { %v15744_v7 = vpop.f32.mrb[219].mxu1  ;;  %15943 = vmatpush3.bf16.msra.mxu1 %v18140_v49  ;;  %15809 = vmatpush3.bf16.msra.mxu0 %v18149_v38 }
 0xa4f   : > { %v15745_v9 = vadd.f32 %v15744_v7, %v15743_v33  ;;  %v20965_v40 = vadd.f32 %v20823_v28, %v15742_v47  ;;  %15944 = vmatprep.subr.bf16.mxu1 %v18141_v1  ;;  %v18144_v28 = vld [vmem:[%s21739_s11 + $0x68] sm:$0xff]  }
 0xa51   : > { %v20971_v27 = vadd.f32 %v20825_v46, %v15745_v9  ;;  %v18146_v46 = vld [vmem:[%s21739_s11 + $0x28] sm:$0xff]  }
 0xa52   : > { %15945 = vmatpush3.bf16.msra.mxu1 %v18142_v4 }
 0xa53   : > { %v15746_v10 = vpop.f32.mrb[220].mxu1  ;;  %15946 = vmatprep.subr.bf16.mxu1 %v18144_v28 }
 0xa54   : > { %v15747_v60 = vpop.f32.mrb[221].mxu1 }
 0xa55   : > { %v15748_v58 = vadd.f32 %v15747_v60, %v15746_v10  ;;  %v15749_v12 = vpop.f32.mrb[222].mxu1 }
 0xa56   : > { %v15750_v45 = vpop.f32.mrb[223].mxu1  ;;  %15947 = vmatpush3.bf16.msra.mxu1 %v18146_v46 }
 0xa57   : > { %v15751_v13 = vadd.f32 %v15750_v45, %v15749_v12  ;;  %v20986_v62 = vadd.f32 %v20827_v11, %v15748_v58  ;;  %15948 = vmatprep.subr.bf16.mxu1 %v18148_v22  ;;  %v18152_v12 = vld [vmem:[%s21739_s11 + $0x78] sm:$0xff]  }
 0xa58   : > { %v18154_v22 = vld [vmem:[%s21739_s11 + $0x38] sm:$0xff]  }
 0xa59   : > { %v20989_v44 = vadd.f32 %v20829_v57, %v15751_v13 }
 0xa5a   : > { %15949 = vmatpush3.bf16.msra.mxu1 %v18150_v29  ;;  %v10759_v29 = vld [vmem:[#allocation2 + $0x1] sm:$0xff] }
 0xa5b   : > { %v15752_v6 = vpop.f32.mrb[224].mxu1  ;;  %15950 = vmatprep.subr.bf16.mxu1 %v18152_v12 }
 0xa5c   : > { %v15753_v25 = vpop.f32.mrb[225].mxu1 }
 0xa5d   : > { %v15754_v54 = vadd.f32 %v15753_v25, %v15752_v6  ;;  %v15755_v59 = vpop.f32.mrb[226].mxu1  ;;  %v10760_v6 = vld [vmem:[#allocation2 + $0x9] sm:$0xff] }
 0xa5e   : > { %v15756_v37 = vpop.f32.mrb[227].mxu1  ;;  %15951 = vmatpush3.bf16.msra.mxu1 %v18154_v22  ;;  %v10791_v25 = vpack.c.bf16 %v10760_v6, %v10759_v29 }
 0xa5f   : > { %v15757_v2 = vadd.f32 %v15756_v37, %v15755_v59  ;;  %v20995_v48 = vadd.f32 %v20831_v36, %v15754_v54  ;;  %v18156_v59 = vld [vmem:[%s21739_s11 + $0xf0] sm:$0xff]  }
 0xa60   : > { %11914 = vmatprep.mubr.bf16.mxu1 %v10791_v25 }
 0xa61   : > { %v20998_v11 = vadd.f32 %v20833_v24, %v15757_v2  ;;  %11915 = vmatmul.mubr.bf16.vlgmr.msra.gmra.mrb[144].mxu1 %v20847_v26 }
 0xa63   : > { %v15758_v57 = vpop.f32.mrb[228].mxu1 }
 0xa64   : > { %v15759_v56 = vpop.f32.mrb[229].mxu1 }
 0xa65   : > { %v15760_v41 = vadd.f32 %v15759_v56, %v15758_v57  ;;  %v15761_v50 = vpop.f32.mrb[230].mxu1 }
 0xa66   : > { %v15762_v47 = vpop.f32.mrb[231].mxu1 }
 0xa67   : > { %v15763_v33 = vadd.f32 %v15762_v47, %v15761_v50  ;;  %v21001_v49 = vadd.f32 %v20835_v5, %v15760_v41  ;;  %v18157_v41 = vld [vmem:[%s21739_s11 + $0x138] sm:$0xff]  }
 0xa69   : > { %v21004_v19 = vadd.f32 %v20837_v30, %v15763_v33  ;;  %v18151_v30 = vld [vmem:[%s21739_s11 + $0x128] sm:$0xff]  }
 0xa6a   : > { %15810 = vmatprep.subr.bf16.mxu0 %v18151_v30 }
 0xa6b   : > { %v15764_v7 = vpop.f32.mrb[232].mxu1 }
 0xa6c   : > { %v15765_v1 = vpop.f32.mrb[233].mxu1 }
 0xa6d   : > { %v15766_v9 = vadd.f32 %v15765_v1, %v15764_v7  ;;  %v15767_v36 = vpop.f32.mrb[234].mxu1 }
 0xa6e   : > { %v15768_v38 = vpop.f32.mrb[235].mxu1 }
 0xa6f   : > { %v15769_v4 = vadd.f32 %v15768_v38, %v15767_v36  ;;  %v21007_v24 = vadd.f32 %v20839_v0, %v15766_v9 }
 0xa71   : > { %v21010_v28 = vadd.f32 %v20841_v31, %v15769_v4  ;;  %v18153_v31 = vld [vmem:[%s21739_s11 + $0xe8] sm:$0xff]  }
 0xa72   : > { %15811 = vmatpush3.bf16.msra.mxu0 %v18153_v31 }
 0xa73   : > { %v15770_v10 = vpop.f32.mrb[236].mxu1 }
 0xa74   : > { %v15771_v60 = vpop.f32.mrb[237].mxu1 }
 0xa75   : > { %v15772_v58 = vadd.f32 %v15771_v60, %v15770_v10  ;;  %v15773_v5 = vpop.f32.mrb[238].mxu1 }
 0xa76   : > { %v15774_v46 = vpop.f32.mrb[239].mxu1 }
 0xa77   : > { %v15775_v45 = vadd.f32 %v15774_v46, %v15773_v5  ;;  %v21019_v0 = vadd.f32 %v20843_v32, %v15772_v58  ;;  %v18155_v32 = vld [vmem:[%s21739_s11 + $0x130] sm:$0xff]  }
 0xa78   : > { %15812 = vmatprep.subr.bf16.mxu0 %v18155_v32 }
 0xa79   : > { %v21028_v13 = vadd.f32 %v20845_v39, %v15775_v45  ;;  %v21040_v39 = vld [vmem:[%s21738_s10] ss:$0 sm:$0xff]  ;;  %15813 = vmatpush3.bf16.msra.mxu0 %v18156_v59 }
 0xa7a   : > { %15814 = vmatprep.subr.bf16.mxu0 %v18157_v41 }
 0xa7b   : > { %v16788_v54 = vpop.f32.mrb[48].mxu1 }
 0xa7c   : > { %v17316_v37 = vadd.f32 %v20857_v17, %v16788_v54  ;;  %v10304_v2 = vpop.f32.mrb[49].mxu1 }
 0xa7d   : > { %v17319_v57 = vadd.f32 %v20851_v43, %v10304_v2  ;;  %v16789_v56 = vpop.f32.mrb[50].mxu1  ;;  %v18158_v43 = vld [vmem:[%s21739_s11 + $0xf8] sm:$0xff]  }
 0xa7e   : > { %v17322_v50 = vadd.f32 %v20860_v15, %v16789_v56  ;;  %v10307_v17 = vpop.f32.mrb[51].mxu1  ;;  %v10472_v7 = vadd.f32 %v17316_v37, %v21040_v39  ;;  %15815 = vmatpush3.bf16.msra.mxu0 %v18158_v43 }
 0xa7f   : > { %v10470_v47 = vadd.f32 %v17319_v57, %v21040_v39  ;;  %v17325_v33 = vadd.f32 %v20854_v3, %v10307_v17 }
 0xa80   : > { %v10473_v9 = vadd.f32 %v17322_v50, %v21040_v39  ;;  %v10504_v4 = vmax.f32 %v10472_v7, 0.0 }
 0xa81   : > { %v10502_v26 = vmax.f32 %v10470_v47, 0.0  ;;  %v10471_v1 = vadd.f32 %v17325_v33, %v21040_v39 }
 0xa82   : > { %v10505_v30 = vmax.f32 %v10473_v9, 0.0 }
 0xa83   : > { %v10503_v36 = vmax.f32 %v10471_v1, 0.0  ;;  %v16792_v15 = vpop.f32.mrb[52].mxu1  ;;  %10566 = vrot.lane.b32.xlu0 %v10502_v26, %s18217_s22 }
 0xa84   : > { %v17328_v3 = vadd.f32 %v20869_v42, %v16792_v15  ;;  %v10320_v38 = vpop.f32.mrb[53].mxu1 }
 0xa85   : > { %v17331_v10 = vadd.f32 %v20863_v20, %v10320_v38  ;;  %v16793_v60 = vpop.f32.mrb[54].mxu1  ;;  %10568 = vrot.lane.b32.xlu1 %v10503_v36, %s18217_s22 }
 0xa86   : > { %v17334_v58 = vadd.f32 %v20872_v8, %v16793_v60  ;;  %v10323_v5 = vpop.f32.mrb[55].mxu1  ;;  %v10476_v45 = vadd.f32 %v17328_v3, %v21040_v39 }
 0xa87   : > { %v10474_v12 = vadd.f32 %v17331_v10, %v21040_v39  ;;  %v17337_v46 = vadd.f32 %v20866_v61, %v10323_v5  ;;  %10570 = vrot.lane.b32.xlu0 %v10504_v4, %s18217_s22 }
 0xa88   : > { %v10477_v20 = vadd.f32 %v17334_v58, %v21040_v39  ;;  %v10508_v32 = vmax.f32 %v10476_v45, 0.0 }
 0xa89   : > { %v10506_v42 = vmax.f32 %v10474_v12, 0.0  ;;  %v10475_v31 = vadd.f32 %v17337_v46, %v21040_v39  ;;  %10572 = vrot.lane.b32.xlu1 %v10505_v30, %s18217_s22 }
 0xa8a   : > { %v10509_v37 = vmax.f32 %v10477_v20, 0.0 }
 0xa8b   : > { %v10507_v22 = vmax.f32 %v10475_v31, 0.0  ;;  %v16796_v29 = vpop.f32.mrb[56].mxu1  ;;  %10574 = vrot.lane.b32.xlu0 %v10506_v42, %s18217_s22 }
 0xa8c   : > { %v17340_v8 = vadd.f32 %v20881_v18, %v16796_v29  ;;  %v10336_v6 = vpop.f32.mrb[57].mxu1 }
 0xa8d   : > { %v17343_v61 = vadd.f32 %v20875_v21, %v10336_v6  ;;  %v16797_v25 = vpop.f32.mrb[58].mxu1  ;;  %10576 = vrot.lane.b32.xlu1 %v10507_v22, %s18217_s22 }
 0xa8e   : > { %v17346_v54 = vadd.f32 %v20884_v51, %v16797_v25  ;;  %v10339_v59 = vpop.f32.mrb[59].mxu1  ;;  %v10480_v56 = vadd.f32 %v17340_v8, %v21040_v39 }
 0xa8f   : > { %v10478_v2 = vadd.f32 %v17343_v61, %v21040_v39  ;;  %v17349_v57 = vadd.f32 %v20878_v14, %v10339_v59  ;;  %10578 = vrot.lane.b32.xlu0 %v10508_v32, %s18217_s22 }
 0xa90   : > { %v10481_v21 = vadd.f32 %v17346_v54, %v21040_v39  ;;  %v10512_v33 = vmax.f32 %v10480_v56, 0.0 }
 0xa91   : > { %v10510_v18 = vmax.f32 %v10478_v2, 0.0  ;;  %v10479_v41 = vadd.f32 %v17349_v57, %v21040_v39  ;;  %10580 = vrot.lane.b32.xlu1 %v10509_v37, %s18217_s22 }
 0xa92   : > { %v10513_v1 = vmax.f32 %v10481_v21, 0.0 }
 0xa93   : > { %v10511_v50 = vmax.f32 %v10479_v41, 0.0  ;;  %v16800_v17 = vpop.f32.mrb[60].mxu1  ;;  %10582 = vrot.lane.b32.xlu0 %v10510_v18, %s18217_s22 }
 0xa94   : > { %v17352_v51 = vadd.f32 %v20893_v23, %v16800_v17  ;;  %v10352_v47 = vpop.f32.mrb[61].mxu1 }
 0xa95   : > { %v17355_v14 = vadd.f32 %v20887_v52, %v10352_v47  ;;  %v16801_v43 = vpop.f32.mrb[62].mxu1  ;;  %10584 = vrot.lane.b32.xlu1 %v10511_v50, %s18217_s22 }
 0xa96   : > { %v17358_v7 = vadd.f32 %v20896_v34, %v16801_v43  ;;  %v10355_v26 = vpop.f32.mrb[63].mxu1  ;;  %v10484_v15 = vadd.f32 %v17352_v51, %v21040_v39 }
 0xa97   : > { %v10482_v9 = vadd.f32 %v17355_v14, %v21040_v39  ;;  %v17361_v36 = vadd.f32 %v20890_v55, %v10355_v26  ;;  %10586 = vrot.lane.b32.xlu0 %v10512_v33, %s18217_s22 }
 0xa98   : > { %v10485_v52 = vadd.f32 %v17358_v7, %v21040_v39  ;;  %v10516_v60 = vmax.f32 %v10484_v15, 0.0 }
 0xa99   : > { %v10514_v23 = vmax.f32 %v10482_v9, 0.0  ;;  %v10483_v3 = vadd.f32 %v17361_v36, %v21040_v39  ;;  %10588 = vrot.lane.b32.xlu1 %v10513_v1, %s18217_s22 }
 0xa9a   : > { %v10517_v12 = vmax.f32 %v10485_v52, 0.0 }
 0xa9b   : > { %v10515_v38 = vmax.f32 %v10483_v3, 0.0  ;;  %v16804_v4 = vpop.f32.mrb[64].mxu1  ;;  %10590 = vrot.lane.b32.xlu0 %v10514_v23, %s18217_s22 }
 0xa9c   : > { %v17364_v34 = vadd.f32 %v20935_v16, %v16804_v4  ;;  %v10368_v10 = vpop.f32.mrb[65].mxu1 }
 0xa9d   : > { %v17367_v55 = vadd.f32 %v20899_v53, %v10368_v10  ;;  %v16805_v58 = vpop.f32.mrb[66].mxu1  ;;  %10592 = vrot.lane.b32.xlu1 %v10515_v38, %s18217_s22 }
 0xa9e   : > { %v17370_v5 = vadd.f32 %v20941_v35, %v16805_v58  ;;  %v10371_v30 = vpop.f32.mrb[67].mxu1  ;;  %v10488_v42 = vadd.f32 %v17364_v34, %v21040_v39 }
 0xa9f   : > { %v10486_v46 = vadd.f32 %v17367_v55, %v21040_v39  ;;  %v17373_v45 = vadd.f32 %v20902_v63, %v10371_v30  ;;  %10594 = vrot.lane.b32.xlu0 %v10516_v60, %s18217_s22 }
 0xaa0   : > { %v10489_v53 = vadd.f32 %v17370_v5, %v21040_v39  ;;  %v10520_v8 = vmax.f32 %v10488_v42, 0.0 }
 0xaa1   : > { %v10518_v16 = vmax.f32 %v10486_v46, 0.0  ;;  %v10487_v31 = vadd.f32 %v17373_v45, %v21040_v39  ;;  %10596 = vrot.lane.b32.xlu1 %v10517_v12, %s18217_s22 }
 0xaa2   : > { %v10521_v25 = vmax.f32 %v10489_v53, 0.0 }
 0xaa3   : > { %v10519_v20 = vmax.f32 %v10487_v31, 0.0  ;;  %v16808_v22 = vpop.f32.mrb[68].mxu1  ;;  %10598 = vrot.lane.b32.xlu0 %v10518_v16, %s18217_s22 }
 0xaa4   : > { %v17376_v35 = vadd.f32 %v20986_v62, %v16808_v22  ;;  %v10384_v29 = vpop.f32.mrb[69].mxu1  ;;  %v18160_v22 = vld [vmem:[%s21739_s11 + $0x148] sm:$0xff]  }
 0xaa5   : > { %v17379_v63 = vadd.f32 %v20965_v40, %v10384_v29  ;;  %v16809_v6 = vpop.f32.mrb[70].mxu1  ;;  %10600 = vrot.lane.b32.xlu1 %v10519_v20, %s18217_s22 }
 0xaa6   : > { %v17382_v32 = vadd.f32 %v20989_v44, %v16809_v6  ;;  %v10387_v61 = vpop.f32.mrb[71].mxu1  ;;  %v10492_v37 = vadd.f32 %v17376_v35, %v21040_v39 }
 0xaa7   : > { %v10490_v54 = vadd.f32 %v17379_v63, %v21040_v39  ;;  %v17385_v59 = vadd.f32 %v20971_v27, %v10387_v61  ;;  %10602 = vrot.lane.b32.xlu0 %v10520_v8, %s18217_s22 }
 0xaa8   : > { %v10493_v40 = vadd.f32 %v17382_v32, %v21040_v39  ;;  %v10524_v41 = vmax.f32 %v10492_v37, 0.0  ;;  %v18161_v32 = vld [vmem:[%s21739_s11 + $0x150] sm:$0xff]  }
 0xaa9   : > { %v10522_v62 = vmax.f32 %v10490_v54, 0.0  ;;  %v10491_v2 = vadd.f32 %v17385_v59, %v21040_v39  ;;  %10604 = vrot.lane.b32.xlu1 %v10521_v25, %s18217_s22 }
 0xaaa   : > { %v10525_v51 = vmax.f32 %v10493_v40, 0.0 }
 0xaab   : > { %v10523_v57 = vmax.f32 %v10491_v2, 0.0  ;;  %v16812_v56 = vpop.f32.mrb[72].mxu1  ;;  %10606 = vrot.lane.b32.xlu0 %v10522_v62, %s18217_s22 }
 0xaac   : > { %v17388_v44 = vadd.f32 %v21001_v49, %v16812_v56  ;;  %v10400_v18 = vpop.f32.mrb[73].mxu1 }
 0xaad   : > { %v17391_v27 = vadd.f32 %v20995_v48, %v10400_v18  ;;  %v16813_v21 = vpop.f32.mrb[74].mxu1  ;;  %10608 = vrot.lane.b32.xlu1 %v10523_v57, %s18217_s22  ;;  %v18162_v57 = vld [vmem:[%s21739_s11 + $0x158] sm:$0xff]  }
 0xaae   : > { %v17394_v50 = vadd.f32 %v21004_v19, %v16813_v21  ;;  %v10403_v17 = vpop.f32.mrb[75].mxu1  ;;  %v10496_v14 = vadd.f32 %v17388_v44, %v21040_v39 }
 0xaaf   : > { %v10494_v47 = vadd.f32 %v17391_v27, %v21040_v39  ;;  %v17397_v33 = vadd.f32 %v20998_v11, %v10403_v17  ;;  %10610 = vrot.lane.b32.xlu0 %v10524_v41, %s18217_s22  ;;  %v18163_v41 = vld [vmem:[%s21739_s11 + $0x160] sm:$0xff]  }
 0xab0   : > { %v10497_v48 = vadd.f32 %v17394_v50, %v21040_v39  ;;  %v10528_v9 = vmax.f32 %v10496_v14, 0.0  ;;  %v18164_v14 = vld [vmem:[%s21739_s11 + $0x168] sm:$0xff]  }
 0xab1   : > { %v10526_v49 = vmax.f32 %v10494_v47, 0.0  ;;  %v10495_v43 = vadd.f32 %v17397_v33, %v21040_v39  ;;  %10612 = vrot.lane.b32.xlu1 %v10525_v51, %s18217_s22 }
 0xab2   : > { %v10529_v3 = vmax.f32 %v10497_v48, 0.0 }
 0xab3   : > { %v10527_v7 = vmax.f32 %v10495_v43, 0.0  ;;  %v16816_v26 = vpop.f32.mrb[76].mxu1  ;;  %10614 = vrot.lane.b32.xlu0 %v10526_v49, %s18217_s22 }
 0xab4   : > { %v17400_v19 = vadd.f32 %v21019_v0, %v16816_v26  ;;  %v10416_v1 = vpop.f32.mrb[77].mxu1 }
 0xab5   : > { %v17403_v11 = vadd.f32 %v21007_v24, %v10416_v1  ;;  %v16817_v36 = vpop.f32.mrb[78].mxu1  ;;  %10616 = vrot.lane.b32.xlu1 %v10527_v7, %s18217_s22  ;;  %v18165_v7 = vld [vmem:[%s21739_s11 + $0x170] sm:$0xff]  }
 0xab6   : > { %v17406_v15 = vadd.f32 %v21028_v13, %v16817_v36  ;;  %v10419_v23 = vpop.f32.mrb[79].mxu1  ;;  %v10500_v4 = vadd.f32 %v17400_v19, %v21040_v39 }
 0xab7   : > { %v10498_v52 = vadd.f32 %v17403_v11, %v21040_v39  ;;  %v17409_v38 = vadd.f32 %v21010_v28, %v10419_v23  ;;  %10618 = vrot.lane.b32.xlu0 %v10528_v9, %s18217_s22  ;;  %v18159_v28 = vld [vmem:[%s21739_s11 + $0x140] sm:$0xff]   ;;  %v18166_v23 = vld [vmem:[%s21739_s11 + $0x178] sm:$0xff]  }
 0xab8   : > { %v10501_v24 = vadd.f32 %v17406_v15, %v21040_v39  ;;  %v10532_v13 = vmax.f32 %v10500_v4, 0.0  ;;  %16818 = vmatprep.subr.bf16.mxu0 %v18159_v28 }
 0xab9   : > { %v10530_v0 = vmax.f32 %v10498_v52, 0.0  ;;  %v10499_v34 = vadd.f32 %v17409_v38, %v21040_v39  ;;  %10620 = vrot.lane.b32.xlu1 %v10529_v3, %s18217_s22 }
 0xaba   : > { %v10533_v60 = vmax.f32 %v10501_v24, 0.0 }
 0xabb   : > { %v10531_v10 = vmax.f32 %v10499_v34, 0.0  ;;  %10622 = vrot.lane.b32.xlu0 %v10530_v0, %s18217_s22 }
 0xabd   : > { %10624 = vrot.lane.b32.xlu1 %v10531_v10, %s18217_s22 }
 0xabf   : > { %10626 = vrot.lane.b32.xlu0 %v10532_v13, %s18217_s22 }
 0xac1   : > { %10628 = vrot.lane.b32.xlu1 %v10533_v60, %s18217_s22 }
 0xaf5   : > { %v10567_v55 = vpop.permute.xlu0 %10566 }
 0xaf6   : > { %10663 = vst.msk [vmem:[#allocation2 + $0x19] sm:$0xff] %vm10662_vm4, %v10567_v55  ;;  %v21195_v55 = vld [vmem:[%s21739_s11 + $0x80] sm:$0xff]  }
 0xaf7   : > { %v10569_v39 = vpop.permute.xlu1 %10568 }
 0xaf8   : > { %10664 = vst.msk [vmem:[#allocation2 + $0x21] sm:$0xff] %vm10662_vm4, %v10569_v39 }
 0xaf9   : > { %v10571_v58 = vpop.permute.xlu0 %10570 }
 0xafa   : > { %10665 = vst.msk [vmem:[#allocation2 + $0x31] sm:$0xff] %vm10662_vm4, %v10571_v58 }
 0xafb   : > { %v10573_v5 = vpop.permute.xlu1 %10572 }
 0xafc   : > { %10666 = vst.msk [vmem:[#allocation2 + $0x39] sm:$0xff] %vm10662_vm4, %v10573_v5 }
 0xafd   : > { %v10575_v30 = vpop.permute.xlu0 %10574  ;;  %v11047_v12 = vld [vmem:[#allocation2 + $0x19] sm:$0xff] }
 0xafe   : > { %10667 = vst.msk [vmem:[#allocation2 + $0x49] sm:$0xff] %vm10662_vm4, %v10575_v30  ;;  %v10983_v42 = vld [vmem:[#allocation2 + $0x18] sm:$0xff] }
 0xaff   : > { %v10577_v46 = vpop.permute.xlu1 %10576  ;;  %v11048_v45 = vld [vmem:[#allocation2 + $0x21] sm:$0xff] }
 0xb00   : > { %v10984_v16 = vld [vmem:[#allocation2 + $0x20] sm:$0xff]  ;;  %v11079_v31 = vpack.c.bf16 %v11048_v45, %v11047_v12  ;;  %10668 = vst.msk [vmem:[#allocation2 + $0x51] sm:$0xff] %vm10662_vm4, %v10577_v46 }
 0xb01   : > { %v11015_v53 = vpack.c.bf16 %v10984_v16, %v10983_v42  ;;  %v10579_v20 = vpop.permute.xlu0 %10578  ;;  %v11049_v29 = vld [vmem:[#allocation2 + $0x31] sm:$0xff] }
 0xb02   : > { %11448 = vmatprep.mubr.bf16.mxu0 %v11079_v31  ;;  %10669 = vst.msk [vmem:[#allocation2 + $0x61] sm:$0xff] %vm10662_vm4, %v10579_v20  ;;  %11922 = vmatprep.mubr.bf16.mxu1 %v11079_v31  ;;  %v10985_v59 = vld [vmem:[#allocation2 + $0x30] sm:$0xff] }
 0xb03   : > { %v10581_v35 = vpop.permute.xlu1 %10580  ;;  %11449 = vmatmul.mubr.bf16.vlgmr.msra.gmra.mrb[176].mxu0 %v11015_v53  ;;  %11923 = vmatmul.mubr.bf16.gmra.mrb[148].mxu1 %v11015_v53  ;;  %v11050_v8 = vld [vmem:[#allocation2 + $0x39] sm:$0xff] }
 0xb04   : > { %10670 = vst.msk [vmem:[#allocation2 + $0x69] sm:$0xff] %vm10662_vm4, %v10581_v35  ;;  %v11080_v63 = vpack.c.bf16 %v11050_v8, %v11049_v29  ;;  %16819 = vmatpush3.bf16.msra.mxu0 %v18159_v28  ;;  %v10986_v61 = vld [vmem:[#allocation2 + $0x38] sm:$0xff] }
 0xb05   : > { %v10583_v6 = vpop.permute.xlu0 %10582  ;;  %16820 = vmatprep.subr.bf16.mxu0 %v18160_v22  ;;  %v11016_v62 = vpack.c.bf16 %v10986_v61, %v10985_v59  ;;  %v11051_v2 = vld [vmem:[#allocation2 + $0x49] sm:$0xff] }
 0xb06   : > { %10671 = vst.msk [vmem:[#allocation2 + $0x79] sm:$0xff] %vm10662_vm4, %v10583_v6  ;;  %11456 = vmatprep.mubr.bf16.mxu0 %v11080_v63  ;;  %11930 = vmatprep.mubr.bf16.mxu1 %v11080_v63  ;;  %v10987_v50 = vld [vmem:[#allocation2 + $0x48] sm:$0xff] }
 0xb07   : > { %v10585_v25 = vpop.permute.xlu1 %10584  ;;  %v11052_v54 = vld [vmem:[#allocation2 + $0x51] sm:$0xff] }
 0xb08   : > { %10672 = vst.msk [vmem:[#allocation2 + $0x81] sm:$0xff] %vm10662_vm4, %v10585_v25  ;;  %16821 = vmatpush3.bf16.msra.mxu0 %v18160_v22  ;;  %v11081_v40 = vpack.c.bf16 %v11052_v54, %v11051_v2  ;;  %v10988_v18 = vld [vmem:[#allocation2 + $0x50] sm:$0xff] }
 0xb09   : > { %v10587_v37 = vpop.permute.xlu0 %10586  ;;  %16822 = vmatprep.subr.bf16.mxu0 %v18161_v32  ;;  %v11017_v51 = vpack.c.bf16 %v10988_v18, %v10987_v50  ;;  %v11053_v47 = vld [vmem:[#allocation2 + $0x61] sm:$0xff] }
 0xb0a   : > { %10673 = vst.msk [vmem:[#allocation2 + $0x91] sm:$0xff] %vm10662_vm4, %v10587_v37  ;;  %v10989_v1 = vld [vmem:[#allocation2 + $0x60] sm:$0xff] }
 0xb0b   : > { %v10589_v56 = vpop.permute.xlu1 %10588  ;;  %11457 = vmatmul.mubr.bf16.gmra.mrb[180].mxu0 %v11016_v62  ;;  %11931 = vmatmul.mubr.bf16.gmra.mrb[152].mxu1 %v11016_v62  ;;  %v11054_v21 = vld [vmem:[#allocation2 + $0x69] sm:$0xff] }
 0xb0c   : > { %10674 = vst.msk [vmem:[#allocation2 + $0x99] sm:$0xff] %vm10662_vm4, %v10589_v56  ;;  %11464 = vmatprep.mubr.bf16.mxu0 %v11081_v40  ;;  %11938 = vmatprep.mubr.bf16.mxu1 %v11081_v40  ;;  %v11082_v33 = vpack.c.bf16 %v11054_v21, %v11053_v47  ;;  %v10990_v48 = vld [vmem:[#allocation2 + $0x68] sm:$0xff] }
 0xb0d   : > { %v10591_v44 = vpop.permute.xlu0 %10590  ;;  %16823 = vmatpush3.bf16.msra.mxu0 %v18161_v32  ;;  %v11018_v11 = vpack.c.bf16 %v10990_v48, %v10989_v1  ;;  %v11055_v36 = vld [vmem:[#allocation2 + $0x79] sm:$0xff] }
 0xb0e   : > { %10675 = vst.msk [vmem:[#allocation2 + $0xa9] sm:$0xff] %vm10662_vm4, %v10591_v44  ;;  %16824 = vmatprep.subr.bf16.mxu0 %v18162_v57  ;;  %v10991_v34 = vld [vmem:[#allocation2 + $0x78] sm:$0xff] }
 0xb0f   : > { %v10593_v27 = vpop.permute.xlu1 %10592  ;;  %v11056_v19 = vld [vmem:[#allocation2 + $0x81] sm:$0xff] }
 0xb10   : > { %10676 = vst.msk [vmem:[#allocation2 + $0xb1] sm:$0xff] %vm10662_vm4, %v10593_v27  ;;  %v11083_v15 = vpack.c.bf16 %v11056_v19, %v11055_v36  ;;  %v10992_v38 = vld [vmem:[#allocation2 + $0x80] sm:$0xff] }
 0xb11   : > { %v10595_v17 = vpop.permute.xlu0 %10594  ;;  %16825 = vmatpush3.bf16.msra.mxu0 %v18162_v57  ;;  %v11019_v10 = vpack.c.bf16 %v10992_v38, %v10991_v34  ;;  %v11057_v13 = vld [vmem:[#allocation2 + $0x91] sm:$0xff] }
 0xb12   : > { %10677 = vst.msk [vmem:[#allocation2 + $0xc1] sm:$0xff] %vm10662_vm4, %v10595_v17  ;;  %16826 = vmatprep.subr.bf16.mxu0 %v18163_v41  ;;  %v10993_v12 = vld [vmem:[#allocation2 + $0x90] sm:$0xff] }
 0xb13   : > { %v10597_v49 = vpop.permute.xlu1 %10596  ;;  %11465 = vmatmul.mubr.bf16.gmra.mrb[184].mxu0 %v11017_v51  ;;  %11939 = vmatmul.mubr.bf16.gmra.mrb[156].mxu1 %v11017_v51  ;;  %v11058_v0 = vld [vmem:[#allocation2 + $0x99] sm:$0xff] }
 0xb14   : > { %10678 = vst.msk [vmem:[#allocation2 + $0xc9] sm:$0xff] %vm10662_vm4, %v10597_v49  ;;  %11472 = vmatprep.mubr.bf16.mxu0 %v11082_v33  ;;  %11946 = vmatprep.mubr.bf16.mxu1 %v11082_v33  ;;  %v11084_v60 = vpack.c.bf16 %v11058_v0, %v11057_v13  ;;  %v10994_v58 = vld [vmem:[#allocation2 + $0x98] sm:$0xff] }
 0xb15   : > { %v10599_v43 = vpop.permute.xlu0 %10598  ;;  %16827 = vmatpush3.bf16.msra.mxu0 %v18163_v41  ;;  %v11020_v45 = vpack.c.bf16 %v10994_v58, %v10993_v12  ;;  %v11059_v42 = vld [vmem:[#allocation2 + $0xa9] sm:$0xff] }
 0xb16   : > { %10679 = vst.msk [vmem:[#allocation2 + $0xd9] sm:$0xff] %vm10662_vm4, %v10599_v43  ;;  %16828 = vmatprep.subr.bf16.mxu0 %v18164_v14  ;;  %v10995_v29 = vld [vmem:[#allocation2 + $0xa8] sm:$0xff] }
 0xb17   : > { %v10601_v26 = vpop.permute.xlu1 %10600  ;;  %v11060_v30 = vld [vmem:[#allocation2 + $0xb1] sm:$0xff] }
 0xb18   : > { %10680 = vst.msk [vmem:[#allocation2 + $0xe1] sm:$0xff] %vm10662_vm4, %v10601_v26  ;;  %v11085_v16 = vpack.c.bf16 %v11060_v30, %v11059_v42  ;;  %v10996_v20 = vld [vmem:[#allocation2 + $0xb0] sm:$0xff] }
 0xb19   : > { %v10603_v9 = vpop.permute.xlu0 %10602  ;;  %16829 = vmatpush3.bf16.msra.mxu0 %v18164_v14  ;;  %v11021_v63 = vpack.c.bf16 %v10996_v20, %v10995_v29  ;;  %v11061_v6 = vld [vmem:[#allocation2 + $0xc1] sm:$0xff] }
 0xb1a   : > { %10681 = vst.msk [vmem:[#allocation2 + $0xf1] sm:$0xff] %vm10662_vm4, %v10603_v9  ;;  %16830 = vmatprep.subr.bf16.mxu0 %v18165_v7  ;;  %v10997_v59 = vld [vmem:[#allocation2 + $0xc0] sm:$0xff] }
 0xb1b   : > { %v10605_v3 = vpop.permute.xlu1 %10604  ;;  %11473 = vmatmul.mubr.bf16.gmra.mrb[188].mxu0 %v11018_v11  ;;  %11947 = vmatmul.mubr.bf16.gmra.mrb[160].mxu1 %v11018_v11  ;;  %v11062_v35 = vld [vmem:[#allocation2 + $0xc9] sm:$0xff] }
 0xb1c   : > { %10682 = vst.msk [vmem:[#allocation2 + $0xf9] sm:$0xff] %vm10662_vm4, %v10605_v3  ;;  %11480 = vmatprep.mubr.bf16.mxu0 %v11083_v15  ;;  %11954 = vmatprep.mubr.bf16.mxu1 %v11083_v15  ;;  %v11086_v32 = vpack.c.bf16 %v11062_v35, %v11061_v6  ;;  %v10998_v25 = vld [vmem:[#allocation2 + $0xc8] sm:$0xff]  ;;  %v11113_v6 = vld [vmem:[#allocation2 + $0x32] sm:$0xff] }
 0xb1d   : > { %v10607_v52 = vpop.permute.xlu0 %10606  ;;  %16831 = vmatpush3.bf16.msra.mxu0 %v18165_v7  ;;  %v11022_v37 = vpack.c.bf16 %v10998_v25, %v10997_v59  ;;  %v11063_v62 = vld [vmem:[#allocation2 + $0xd9] sm:$0xff]  ;;  %v11112_v35 = vld [vmem:[#allocation2 + $0x22] sm:$0xff] }
 0xb1e   : > { %10683 = vst.msk [vmem:[#allocation2 + $0x109] sm:$0xff] %vm10662_vm4, %v10607_v52  ;;  %16832 = vmatprep.subr.bf16.mxu0 %v18166_v23  ;;  %v10999_v56 = vld [vmem:[#allocation2 + $0xd8] sm:$0xff]  ;;  %v18168_v59 = vld [vmem:[%s21739_s11 + $0x88] sm:$0xff]  }
 0xb1f   : > { %v10609_v4 = vpop.permute.xlu1 %10608  ;;  %v11064_v54 = vld [vmem:[#allocation2 + $0xe1] sm:$0xff]  ;;  %v11116_v25 = vld [vmem:[#allocation2 + $0x52] sm:$0xff] }
 0xb20   : > { %10684 = vst.msk [vmem:[#allocation2 + $0x111] sm:$0xff] %vm10662_vm4, %v10609_v4  ;;  %v11087_v2 = vpack.c.bf16 %v11064_v54, %v11063_v62  ;;  %v11000_v40 = vld [vmem:[#allocation2 + $0xe0] sm:$0xff]  ;;  %v18169_v62 = vld [vmem:[%s21739_s11 + $0x90] sm:$0xff]  }
 0xb21   : > { %v10611_v24 = vpop.permute.xlu0 %10610  ;;  %16833 = vmatpush3.bf16.msra.mxu0 %v18166_v23  ;;  %v11023_v44 = vpack.c.bf16 %v11000_v40, %v10999_v56  ;;  %v11065_v18 = vld [vmem:[#allocation2 + $0xf1] sm:$0xff]  ;;  %v11120_v56 = vld [vmem:[#allocation2 + $0x82] sm:$0xff] }
 0xb22   : > { %10685 = vst.msk [vmem:[#allocation2 + $0x121] sm:$0xff] %vm10662_vm4, %v10611_v24  ;;  %16866 = vmatprep.subr.bf16.mxu0 %v21195_v55  ;;  %v11001_v50 = vld [vmem:[#allocation2 + $0xf0] sm:$0xff] }
 0xb23   : > { %v10613_v28 = vpop.permute.xlu1 %10612  ;;  %11481 = vmatmul.mubr.bf16.gmra.mrb[192].mxu0 %v11019_v10  ;;  %11955 = vmatmul.mubr.bf16.gmra.mrb[164].mxu1 %v11019_v10  ;;  %v11066_v57 = vld [vmem:[#allocation2 + $0xf9] sm:$0xff]  ;;  %v11118_v40 = vld [vmem:[#allocation2 + $0x6a] sm:$0xff] }
 0xb24   : > { %10686 = vst.msk [vmem:[#allocation2 + $0x129] sm:$0xff] %vm10662_vm4, %v10613_v28  ;;  %11488 = vmatprep.mubr.bf16.mxu0 %v11084_v60  ;;  %11962 = vmatprep.mubr.bf16.mxu1 %v11084_v60  ;;  %v11088_v41 = vpack.c.bf16 %v11066_v57, %v11065_v18  ;;  %v11002_v27 = vld [vmem:[#allocation2 + $0xf8] sm:$0xff] }
 0xb25   : > { %v10615_v39 = vpop.permute.xlu0 %10614  ;;  %v11024_v17 = vpack.c.bf16 %v11002_v27, %v11001_v50  ;;  %v11067_v51 = vld [vmem:[#allocation2 + $0x109] sm:$0xff]  ;;  %v11119_v57 = vld [vmem:[#allocation2 + $0x7a] sm:$0xff]  ;;  %v11121_v27 = vld [vmem:[#allocation2 + $0x92] sm:$0xff] }
 0xb26   : > { %10687 = vst.msk [vmem:[#allocation2 + $0x139] sm:$0xff] %vm10662_vm4, %v10615_v39  ;;  %v11003_v49 = vld [vmem:[#allocation2 + $0x108] sm:$0xff]  ;;  %v18170_v18 = vld [vmem:[%s21739_s11 + $0x98] sm:$0xff]  }
 0xb27   : > { %v10617_v5 = vpop.permute.xlu1 %10616  ;;  %v11068_v21 = vld [vmem:[#allocation2 + $0x111] sm:$0xff] }
 0xb28   : > { %10688 = vst.msk [vmem:[#allocation2 + $0x141] sm:$0xff] %vm10662_vm4, %v10617_v5  ;;  %v11089_v47 = vpack.c.bf16 %v11068_v21, %v11067_v51  ;;  %v11004_v33 = vld [vmem:[#allocation2 + $0x110] sm:$0xff]  ;;  %v11122_v21 = vld [vmem:[#allocation2 + $0x9a] sm:$0xff] }
 0xb29   : > { %v10619_v46 = vpop.permute.xlu0 %10618  ;;  %v11025_v48 = vpack.c.bf16 %v11004_v33, %v11003_v49  ;;  %v11069_v7 = vld [vmem:[#allocation2 + $0x121] sm:$0xff]  ;;  %v11123_v50 = vld [vmem:[#allocation2 + $0xaa] sm:$0xff]  ;;  %v21238_v51 = vpack.c.bf16 %v11122_v21, %v11121_v27  ;;  %v18189_v21 = vld [vmem:[%s21739_s11 + $0x1f8] sm:$0xff]  }
 0xb2a   : > { %10689 = vst.msk [vmem:[#allocation2 + $0x151] sm:$0xff] %vm10662_vm4, %v10619_v46  ;;  %v11005_v3 = vld [vmem:[#allocation2 + $0x120] sm:$0xff] }
 0xb2b   : > { %v10621_v31 = vpop.permute.xlu1 %10620  ;;  %11489 = vmatmul.mubr.bf16.gmra.mrb[196].mxu0 %v11020_v45  ;;  %11963 = vmatmul.mubr.bf16.gmra.mrb[168].mxu1 %v11020_v45  ;;  %v11070_v14 = vld [vmem:[#allocation2 + $0x129] sm:$0xff] }
 0xb2c   : > { %10690 = vst.msk [vmem:[#allocation2 + $0x159] sm:$0xff] %vm10662_vm4, %v10621_v31  ;;  %11496 = vmatprep.mubr.bf16.mxu0 %v11085_v16  ;;  %11970 = vmatprep.mubr.bf16.mxu1 %v11085_v16  ;;  %v11090_v19 = vpack.c.bf16 %v11070_v14, %v11069_v7  ;;  %v11006_v15 = vld [vmem:[#allocation2 + $0x128] sm:$0xff]  ;;  %v18173_v14 = vld [vmem:[%s21739_s11 + $0xb0] sm:$0xff]  }
 0xb2d   : > { %v10623_v53 = vpop.permute.xlu0 %10622  ;;  %v11026_v52 = vpack.c.bf16 %v11006_v15, %v11005_v3  ;;  %v11071_v38 = vld [vmem:[#allocation2 + $0x139] sm:$0xff]  ;;  %v11125_v49 = vld [vmem:[#allocation2 + $0xc2] sm:$0xff]  ;;  %v11131_v3 = vld [vmem:[#allocation2 + $0x10a] sm:$0xff] }
 0xb2e   : > { %10691 = vst.msk [vmem:[#allocation2 + $0x169] sm:$0xff] %vm10662_vm4, %v10623_v53  ;;  %v11007_v24 = vld [vmem:[#allocation2 + $0x138] sm:$0xff]  ;;  %v11128_v7 = vld [vmem:[#allocation2 + $0xe2] sm:$0xff] }
 0xb2f   : > { %v10625_v22 = vpop.permute.xlu1 %10624  ;;  %v11072_v23 = vld [vmem:[#allocation2 + $0x141] sm:$0xff]  ;;  %v11129_v15 = vld [vmem:[#allocation2 + $0xf2] sm:$0xff] }
 0xb30   : > { %10692 = vst.msk [vmem:[#allocation2 + $0x171] sm:$0xff] %vm10662_vm4, %v10625_v22  ;;  %v11091_v4 = vpack.c.bf16 %v11072_v23, %v11071_v38  ;;  %v11008_v0 = vld [vmem:[#allocation2 + $0x140] sm:$0xff] }
 0xb31   : > { %v10627_v8 = vpop.permute.xlu0 %10626  ;;  %v11027_v10 = vpack.c.bf16 %v11008_v0, %v11007_v24  ;;  %v11073_v13 = vld [vmem:[#allocation2 + $0x151] sm:$0xff]  ;;  %v11111_v22 = vld [vmem:[#allocation2 + $0x1a] sm:$0xff]  ;;  %v11133_v0 = vld [vmem:[#allocation2 + $0x122] sm:$0xff] }
 0xb32   : > { %10693 = vst.msk [vmem:[#allocation2 + $0x181] sm:$0xff] %vm10662_vm4, %v10627_v8  ;;  %v11009_v58 = vld [vmem:[#allocation2 + $0x150] sm:$0xff]  ;;  %v11130_v23 = vld [vmem:[#allocation2 + $0xfa] sm:$0xff] }
 0xb33   : > { %11497 = vmatmul.mubr.bf16.gmra.mrb[200].mxu0 %v11021_v63  ;;  %11971 = vmatmul.mubr.bf16.gmra.mrb[172].mxu1 %v11021_v63  ;;  %v10629_v61 = vpop.permute.xlu1 %10628  ;;  %v11074_v34 = vld [vmem:[#allocation2 + $0x159] sm:$0xff]  ;;  %v21210_v63 = vpack.c.bf16 %v11112_v35, %v11111_v22  ;;  %v21262_v38 = vpack.c.bf16 %v11130_v23, %v11129_v15  ;;  %v18177_v22 = vld [vmem:[%s21739_s11 + $0x1c8] sm:$0xff]  }
 0xb34   : > { %10694 = vst.msk [vmem:[#allocation2 + $0x189] sm:$0xff] %vm10662_vm4, %v10629_v61  ;;  %11504 = vmatprep.mubr.bf16.mxu0 %v11086_v32  ;;  %11978 = vmatprep.mubr.bf16.mxu1 %v11086_v32  ;;  %v15952_v43 = vpop.f32.mrb[144].mxu1  ;;  %v11092_v60 = vpack.c.bf16 %v11074_v34, %v11073_v13  ;;  %v11010_v28 = vld [vmem:[#allocation2 + $0x158] sm:$0xff]  ;;  %v11115_v61 = vld [vmem:[#allocation2 + $0x4a] sm:$0xff] }
 0xb35   : > { %v15953_v26 = vpop.f32.mrb[145].mxu1  ;;  %v11028_v5 = vpack.c.bf16 %v11010_v28, %v11009_v58  ;;  %v11075_v30 = vld [vmem:[#allocation2 + $0x169] sm:$0xff]  ;;  %v11114_v32 = vld [vmem:[#allocation2 + $0x3a] sm:$0xff]  ;;  %v11137_v28 = vld [vmem:[#allocation2 + $0x152] sm:$0xff] }
 0xb36   : > { %v21206_v1 = vadd.f32 %v15953_v26, %v15952_v43  ;;  %v15955_v9 = vpop.f32.mrb[146].mxu1  ;;  %v11011_v42 = vld [vmem:[#allocation2 + $0x168] sm:$0xff]  ;;  %v21213_v54 = vpack.c.bf16 %v11114_v32, %v11113_v6  ;;  %v11135_v24 = vld [vmem:[#allocation2 + $0x13a] sm:$0xff] }
 0xb37   : > { %v15956_v11 = vpop.f32.mrb[147].mxu1  ;;  %v11076_v39 = vld [vmem:[#allocation2 + $0x171] sm:$0xff]  ;;  %v18178_v35 = vld [vmem:[%s21739_s11 + $0x188] sm:$0xff]   ;;  %v18183_v32 = vld [vmem:[%s21739_s11 + $0x1e0] sm:$0xff]  }
 0xb38   : > { %v21208_v36 = vadd.f32 %v15956_v11, %v15955_v9  ;;  %v11093_v12 = vpack.c.bf16 %v11076_v39, %v11075_v30  ;;  %v11012_v46 = vld [vmem:[#allocation2 + $0x170] sm:$0xff]  ;;  %v18175_v11 = vld [vmem:[%s21739_s11 + $0x1c0] sm:$0xff]   ;;  %v18182_v6 = vld [vmem:[%s21739_s11 + $0x198] sm:$0xff]  }
 0xb39   : > { %v11029_v16 = vpack.c.bf16 %v11012_v46, %v11011_v42  ;;  %v11077_v31 = vld [vmem:[#allocation2 + $0x181] sm:$0xff]  ;;  %v11126_v43 = vld [vmem:[#allocation2 + $0xca] sm:$0xff] }
 0xb3a   : > { %v11013_v29 = vld [vmem:[#allocation2 + $0x180] sm:$0xff]  ;;  %v21250_v26 = vpack.c.bf16 %v11126_v43, %v11125_v49  ;;  %v11134_v34 = vld [vmem:[#allocation2 + $0x12a] sm:$0xff] }
 0xb3b   : > { %11505 = vmatmul.mubr.bf16.gmra.mrb[204].mxu0 %v11022_v37  ;;  %11979 = vmatmul.mubr.bf16.gmra.mrb[240].mxu1 %v11022_v37  ;;  %v11078_v45 = vld [vmem:[#allocation2 + $0x189] sm:$0xff]  ;;  %v21218_v37 = vpack.c.bf16 %v11116_v25, %v11115_v61  ;;  %v21268_v13 = vpack.c.bf16 %v11134_v34, %v11133_v0  ;;  %v11138_v39 = vld [vmem:[#allocation2 + $0x15a] sm:$0xff] }
 0xb3c   : > { %11512 = vmatprep.mubr.bf16.mxu0 %v11087_v2  ;;  %11986 = vmatprep.mubr.bf16.mxu1 %v11087_v2  ;;  %v11094_v53 = vpack.c.bf16 %v11078_v45, %v11077_v31  ;;  %v11014_v20 = vld [vmem:[#allocation2 + $0x188] sm:$0xff]  ;;  %v21274_v30 = vpack.c.bf16 %v11138_v39, %v11137_v28  ;;  %v18184_v61 = vld [vmem:[%s21739_s11 + $0x1a0] sm:$0xff]  }
 0xb3d   : > { %v11030_v8 = vpack.c.bf16 %v11014_v20, %v11013_v29  ;;  %v11117_v2 = vld [vmem:[#allocation2 + $0x62] sm:$0xff]  ;;  %v11139_v58 = vld [vmem:[#allocation2 + $0x16a] sm:$0xff] }
 0xb3e   : > { %v10823_v46 = vld [vmem:[#allocation2 + $0x2] sm:$0xff]  ;;  %v10824_v45 = vld [vmem:[#allocation2 + $0xa] sm:$0xff] }
 0xb3f   : > { %v11141_v42 = vld [vmem:[#allocation2 + $0x182] sm:$0xff]  ;;  %v10855_v31 = vpack.c.bf16 %v10824_v45, %v10823_v46  ;;  %v18179_v29 = vld [vmem:[%s21739_s11 + $0x1d0] sm:$0xff]  }
 0xb40   : > { %v18176_v20 = vld [vmem:[%s21739_s11 + $0x180] sm:$0xff]   ;;  %v18185_v25 = vld [vmem:[%s21739_s11 + $0x1e8] sm:$0xff]  }
 0xb43   : > { %11513 = vmatmul.mubr.bf16.gmra.mrb[208].mxu0 %v11023_v44  ;;  %11987 = vmatmul.mubr.bf16.gmra.mrb[244].mxu1 %v11023_v44  ;;  %v21226_v44 = vpack.c.bf16 %v11118_v40, %v11117_v2 }
 0xb44   : > { %11520 = vmatprep.mubr.bf16.mxu0 %v11088_v41  ;;  %11994 = vmatprep.mubr.bf16.mxu1 %v11088_v41  ;;  %v21231_v41 = vpack.c.bf16 %v11120_v56, %v11119_v57 }
 0xb4b   : > { %11521 = vmatmul.mubr.bf16.gmra.mrb[212].mxu0 %v11024_v17  ;;  %11995 = vmatmul.mubr.bf16.gmra.mrb[248].mxu1 %v11024_v17  ;;  %v11124_v17 = vld [vmem:[#allocation2 + $0xb2] sm:$0xff] }
 0xb4c   : > { %11528 = vmatprep.mubr.bf16.mxu0 %v11089_v47  ;;  %12002 = vmatprep.mubr.bf16.mxu1 %v11089_v47  ;;  %v18172_v47 = vld [vmem:[%s21739_s11 + $0xa8] sm:$0xff]   ;;  %v21243_v33 = vpack.c.bf16 %v11124_v17, %v11123_v50 }
 0xb53   : > { %11529 = vmatmul.mubr.bf16.gmra.mrb[216].mxu0 %v11025_v48  ;;  %12003 = vmatmul.mubr.bf16.gmra.mrb[252].mxu1 %v11025_v48  ;;  %v11127_v48 = vld [vmem:[#allocation2 + $0xda] sm:$0xff] }
 0xb54   : > { %11536 = vmatprep.mubr.bf16.mxu0 %v11090_v19  ;;  %12010 = vmatprep.mubr.bf16.mxu1 %v11090_v19  ;;  %v18174_v19 = vld [vmem:[%s21739_s11 + $0xb8] sm:$0xff]   ;;  %v21255_v9 = vpack.c.bf16 %v11128_v7, %v11127_v48 }
 0xb5b   : > { %11537 = vmatmul.mubr.bf16.gmra.mrb[220].mxu0 %v11026_v52  ;;  %12011 = vmatmul.mubr.bf16.gmra.mrb[0].mxu1 %v11026_v52  ;;  %v11132_v52 = vld [vmem:[#allocation2 + $0x112] sm:$0xff] }
 0xb5c   : > { %11544 = vmatprep.mubr.bf16.mxu0 %v11091_v4  ;;  %12018 = vmatprep.mubr.bf16.mxu1 %v11091_v4  ;;  %v21264_v4 = vpack.c.bf16 %v11132_v52, %v11131_v3 }
 0xb63   : > { %11545 = vmatmul.mubr.bf16.gmra.mrb[224].mxu0 %v11027_v10  ;;  %12019 = vmatmul.mubr.bf16.gmra.mrb[4].mxu1 %v11027_v10  ;;  %v11136_v10 = vld [vmem:[#allocation2 + $0x142] sm:$0xff] }
 0xb64   : > { %11552 = vmatprep.mubr.bf16.mxu0 %v11092_v60  ;;  %12026 = vmatprep.mubr.bf16.mxu1 %v11092_v60  ;;  %v21270_v60 = vpack.c.bf16 %v11136_v10, %v11135_v24 }
 0xb6b   : > { %11553 = vmatmul.mubr.bf16.gmra.mrb[228].mxu0 %v11028_v5  ;;  %12027 = vmatmul.mubr.bf16.gmra.mrb[8].mxu1 %v11028_v5  ;;  %v11140_v5 = vld [vmem:[#allocation2 + $0x172] sm:$0xff] }
 0xb6c   : > { %11560 = vmatprep.mubr.bf16.mxu0 %v11093_v12  ;;  %12034 = vmatprep.mubr.bf16.mxu1 %v11093_v12  ;;  %v21276_v12 = vpack.c.bf16 %v11140_v5, %v11139_v58 }
 0xb73   : > { %11561 = vmatmul.mubr.bf16.gmra.mrb[232].mxu0 %v11029_v16  ;;  %12035 = vmatmul.mubr.bf16.gmra.mrb[12].mxu1 %v11029_v16  ;;  %v11142_v16 = vld [vmem:[#allocation2 + $0x18a] sm:$0xff] }
 0xb74   : > { %11568 = vmatprep.mubr.bf16.mxu0 %v11094_v53  ;;  %v11158_v53 = vpack.c.bf16 %v11142_v16, %v11141_v42 }
 0xb7b   : > { %11569 = vmatmul.mubr.bf16.gmra.mrb[236].mxu0 %v11030_v8  ;;  %v18180_v8 = vld [vmem:[%s21739_s11 + $0x190] sm:$0xff]  }
 0xb7c   : > { %16834 = vmatprep.mubr.bf16.mxu0 %v21210_v63 }
 0xb83   : > { %16835 = vmatmul.mubr.bf16.vlgmr.msra.gmra.mrb[240].mxu0 %v21213_v54 }
 0xb84   : > { %16838 = vmatprep.mubr.bf16.mxu0 %v21218_v37  ;;  %16867 = vmatpush3.bf16.msra.mxu0 %v21195_v55  ;;  %v18171_v55 = vld [vmem:[%s21739_s11 + $0xa0] sm:$0xff]  }
 0xb85   : > { %16868 = vmatprep.subr.bf16.mxu0 %v18168_v59 }
 0xb88   : > { %16869 = vmatpush3.bf16.msra.mxu0 %v18168_v59  ;;  %v18187_v59 = vld [vmem:[%s21739_s11 + $0x1f0] sm:$0xff]  }
 0xb89   : > { %16870 = vmatprep.subr.bf16.mxu0 %v18169_v62 }
 0xb8b   : > { %16839 = vmatmul.mubr.bf16.gmra.mrb[244].mxu0 %v21226_v44 }
 0xb8c   : > { %16842 = vmatprep.mubr.bf16.mxu0 %v21231_v41  ;;  %16871 = vmatpush3.bf16.msra.mxu0 %v18169_v62 }
 0xb8d   : > { %16872 = vmatprep.subr.bf16.mxu0 %v18170_v18 }
 0xb90   : > { %16873 = vmatpush3.bf16.msra.mxu0 %v18170_v18 }
 0xb91   : > { %16874 = vmatprep.subr.bf16.mxu0 %v18171_v55 }
 0xb93   : > { %16843 = vmatmul.mubr.bf16.gmra.mrb[248].mxu0 %v21238_v51 }
 0xb94   : > { %16846 = vmatprep.mubr.bf16.mxu0 %v21243_v33  ;;  %16875 = vmatpush3.bf16.msra.mxu0 %v18171_v55 }
 0xb95   : > { %16876 = vmatprep.subr.bf16.mxu0 %v18172_v47 }
 0xb98   : > { %16877 = vmatpush3.bf16.msra.mxu0 %v18172_v47 }
 0xb99   : > { %16878 = vmatprep.subr.bf16.mxu0 %v18173_v14 }
 0xb9b   : > { %16847 = vmatmul.mubr.bf16.gmra.mrb[252].mxu0 %v21250_v26 }
 0xb9c   : > { %16850 = vmatprep.mubr.bf16.mxu0 %v21255_v9  ;;  %16879 = vmatpush3.bf16.msra.mxu0 %v18173_v14  ;;  %v18190_v14 = vld [vmem:[%s21739_s11 + $0x1b8] sm:$0xff]  }
 0xb9d   : > { %16880 = vmatprep.subr.bf16.mxu0 %v18174_v19 }
 0xba0   : > { %16881 = vmatpush3.bf16.msra.mxu0 %v18174_v19 }
 0xba1   : > { %16072 = vmatprep.subr.bf16.mxu0 %v18175_v11 }
 0xba3   : > { %16851 = vmatmul.mubr.bf16.gmra.mrb[0].mxu0 %v21262_v38 }
 0xba4   : > { %16854 = vmatprep.mubr.bf16.mxu0 %v21264_v4 }
 0xbab   : > { %16855 = vmatmul.mubr.bf16.gmra.mrb[4].mxu0 %v21268_v13 }
 0xbac   : > { %16858 = vmatprep.mubr.bf16.mxu0 %v21270_v60 }
 0xbb3   : > { %16859 = vmatmul.mubr.bf16.gmra.mrb[8].mxu0 %v21274_v30 }
 0xbb4   : > { %16862 = vmatprep.mubr.bf16.mxu0 %v21276_v12 }
 0xbbb   : > { %16863 = vmatmul.mubr.bf16.gmra.mrb[12].mxu0 %v11158_v53 }
 0xbbc   : > { %16882 = vmatprep.mubr.bf16.mxu0 %v10855_v31 }
 0xbc3   : > { %16883 = vmatmul.mubr.bf16.vlgmr.msra.gmra.mrb[240].mxu0 %v21210_v63  ;;  %v18181_v63 = vld [vmem:[%s21739_s11 + $0x1d8] sm:$0xff]  }
 0xbc4   : > { %16886 = vmatprep.mubr.bf16.mxu0 %v21213_v54  ;;  %16073 = vmatpush3.bf16.msra.mxu0 %v18176_v20  ;;  %v18186_v54 = vld [vmem:[%s21739_s11 + $0x1a8] sm:$0xff]  }
 0xbc5   : > { %16074 = vmatprep.subr.bf16.mxu0 %v18177_v22 }
 0xbc8   : > { %16075 = vmatpush3.bf16.msra.mxu0 %v18178_v35 }
 0xbc9   : > { %16076 = vmatprep.subr.bf16.mxu0 %v18179_v29 }
 0xbcb   : > { %16887 = vmatmul.mubr.bf16.gmra.mrb[244].mxu0 %v21218_v37 }
 0xbcc   : > { %16890 = vmatprep.mubr.bf16.mxu0 %v21226_v44  ;;  %16077 = vmatpush3.bf16.msra.mxu0 %v18180_v8 }
 0xbcd   : > { %16078 = vmatprep.subr.bf16.mxu0 %v18181_v63 }
 0xbd0   : > { %16079 = vmatpush3.bf16.msra.mxu0 %v18182_v6 }
 0xbd1   : > { %16080 = vmatprep.subr.bf16.mxu0 %v18183_v32 }
 0xbd3   : > { %16891 = vmatmul.mubr.bf16.gmra.mrb[248].mxu0 %v21231_v41  ;;  %v18188_v41 = vld [vmem:[%s21739_s11 + $0x1b0] sm:$0xff]  }
 0xbd4   : > { %16894 = vmatprep.mubr.bf16.mxu0 %v21238_v51  ;;  %16081 = vmatpush3.bf16.msra.mxu0 %v18184_v61 }
 0xbd5   : > { %16082 = vmatprep.subr.bf16.mxu0 %v18185_v25 }
 0xbd6   : > { %v15816_v37 = vpop.f32.mrb[176].mxu0  ;;  %v15958_v62 = vpop.f32.mrb[148].mxu1 }
 0xbd7   : > { %v15817_v2 = vpop.f32.mrb[177].mxu0  ;;  %v15959_v40 = vpop.f32.mrb[149].mxu1 }
 0xbd8   : > { %v15818_v57 = vadd.f32 %v15817_v2, %v15816_v37  ;;  %v15960_v56 = vadd.f32 %v15959_v40, %v15958_v62  ;;  %v15819_v44 = vpop.f32.mrb[178].mxu0  ;;  %v15961_v18 = vpop.f32.mrb[150].mxu1  ;;  %16083 = vmatpush3.bf16.msra.mxu0 %v18186_v54  ;;  %v12269_v40 = vld [vmem:[#allocation2 + $0x39] sm:$0xff] }
 0xbd9   : > { %v15820_v55 = vpop.f32.mrb[179].mxu0  ;;  %v15962_v27 = vpop.f32.mrb[151].mxu1  ;;  %16084 = vmatprep.subr.bf16.mxu0 %v18187_v59 }
 0xbda   : > { %v21329_v50 = vadd.f32 %v21206_v1, %v15818_v57  ;;  %v15821_v17 = vadd.f32 %v15820_v55, %v15819_v44  ;;  %v15963_v51 = vadd.f32 %v15962_v27, %v15961_v18  ;;  %v21342_v1 = vld [vmem:[%s21739_s11 + $0x200] sm:$0xff]   ;;  %v12268_v27 = vld [vmem:[#allocation2 + $0x31] sm:$0xff] }
 0xbdb   : > { %16895 = vmatmul.mubr.bf16.gmra.mrb[252].mxu0 %v21243_v33 }
 0xbdc   : > { %v21333_v47 = vadd.f32 %v21208_v36, %v15821_v17  ;;  %16898 = vmatprep.mubr.bf16.mxu0 %v21250_v26  ;;  %16085 = vmatpush3.bf16.msra.mxu0 %v18188_v41 }
 0xbdd   : > { %16086 = vmatprep.subr.bf16.mxu0 %v18189_v21 }
 0xbde   : > { %v15822_v49 = vpop.f32.mrb[180].mxu0  ;;  %v15964_v43 = vpop.f32.mrb[152].mxu1 }
 0xbdf   : > { %v15823_v48 = vpop.f32.mrb[181].mxu0  ;;  %v15965_v33 = vpop.f32.mrb[153].mxu1 }
 0xbe0   : > { %v15824_v7 = vadd.f32 %v15823_v48, %v15822_v49  ;;  %v15966_v36 = vadd.f32 %v15965_v33, %v15964_v43  ;;  %v15825_v19 = vpop.f32.mrb[182].mxu0  ;;  %v15967_v11 = vpop.f32.mrb[154].mxu1  ;;  %16087 = vmatpush3.bf16.msra.mxu0 %v18190_v14  ;;  %v12205_v43 = vld [vmem:[#allocation2 + $0x38] sm:$0xff] }
 0xbe1   : > { %v15826_v26 = vpop.f32.mrb[183].mxu0  ;;  %v15968_v15 = vpop.f32.mrb[155].mxu1  ;;  %16914 = vmatprep.subr.bf16.mxu0 %v21342_v1 }
 0xbe2   : > { %v21345_v23 = vadd.f32 %v15960_v56, %v15824_v7  ;;  %v15827_v3 = vadd.f32 %v15826_v26, %v15825_v19  ;;  %v15969_v52 = vadd.f32 %v15968_v15, %v15967_v11  ;;  %v12271_v7 = vld [vmem:[#allocation2 + $0x51] sm:$0xff] }
 0xbe3   : > { %16899 = vmatmul.mubr.bf16.gmra.mrb[0].mxu0 %v21255_v9  ;;  %v12204_v15 = vld [vmem:[#allocation2 + $0x30] sm:$0xff] }
 0xbe4   : > { %v21348_v0 = vadd.f32 %v15963_v51, %v15827_v3  ;;  %16902 = vmatprep.mubr.bf16.mxu0 %v21262_v38  ;;  %v12300_v51 = vpack.c.bf16 %v12269_v40, %v12268_v27  ;;  %v18195_v40 = vld [vmem:[%s21739_s11 + $0x220] sm:$0xff]  }
 0xbe6   : > { %v15828_v34 = vpop.f32.mrb[184].mxu0  ;;  %v15970_v24 = vpop.f32.mrb[156].mxu1 }
 0xbe7   : > { %v15829_v10 = vpop.f32.mrb[185].mxu0  ;;  %v15971_v28 = vpop.f32.mrb[157].mxu1 }
 0xbe8   : > { %v15830_v39 = vadd.f32 %v15829_v10, %v15828_v34  ;;  %v15972_v58 = vadd.f32 %v15971_v28, %v15970_v24  ;;  %v15831_v5 = vpop.f32.mrb[186].mxu0  ;;  %v15973_v46 = vpop.f32.mrb[158].mxu1  ;;  %v12236_v34 = vpack.c.bf16 %v12205_v43, %v12204_v15  ;;  %v12270_v24 = vld [vmem:[#allocation2 + $0x49] sm:$0xff] }
 0xbe9   : > { %v15832_v45 = vpop.f32.mrb[187].mxu0  ;;  %v15974_v42 = vpop.f32.mrb[159].mxu1 }
 0xbea   : > { %v21351_v16 = vadd.f32 %v15966_v36, %v15830_v39  ;;  %v15833_v31 = vadd.f32 %v15832_v45, %v15831_v5  ;;  %v15975_v53 = vadd.f32 %v15974_v42, %v15973_v46  ;;  %v18193_v46 = vld [vmem:[%s21739_s11 + $0x210] sm:$0xff]  }
 0xbeb   : > { %16903 = vmatmul.mubr.bf16.gmra.mrb[4].mxu0 %v21264_v4 }
 0xbec   : > { %v21354_v9 = vadd.f32 %v15969_v52, %v15833_v31  ;;  %16906 = vmatprep.mubr.bf16.mxu0 %v21268_v13  ;;  %v12207_v31 = vld [vmem:[#allocation2 + $0x50] sm:$0xff] }
 0xbee   : > { %v15834_v38 = vpop.f32.mrb[188].mxu0  ;;  %v15976_v20 = vpop.f32.mrb[160].mxu1 }
 0xbef   : > { %v15835_v22 = vpop.f32.mrb[189].mxu0  ;;  %v15977_v35 = vpop.f32.mrb[161].mxu1 }
 0xbf0   : > { %v15836_v29 = vadd.f32 %v15835_v22, %v15834_v38  ;;  %v15978_v8 = vadd.f32 %v15977_v35, %v15976_v20  ;;  %v15837_v63 = vpop.f32.mrb[190].mxu0  ;;  %v15979_v6 = vpop.f32.mrb[162].mxu1  ;;  %v12273_v20 = vld [vmem:[#allocation2 + $0x69] sm:$0xff] }
 0xbf1   : > { %v15838_v32 = vpop.f32.mrb[191].mxu0  ;;  %v15980_v61 = vpop.f32.mrb[163].mxu1 }
 0xbf2   : > { %v21357_v25 = vadd.f32 %v15972_v58, %v15836_v29  ;;  %v15839_v54 = vadd.f32 %v15838_v32, %v15837_v63  ;;  %v15981_v59 = vadd.f32 %v15980_v61, %v15979_v6  ;;  %v12301_v58 = vpack.c.bf16 %v12271_v7, %v12270_v24  ;;  %v12206_v63 = vld [vmem:[#allocation2 + $0x48] sm:$0xff]  ;;  %v12211_v24 = vld [vmem:[#allocation2 + $0x80] sm:$0xff] }
 0xbf3   : > { %16907 = vmatmul.mubr.bf16.gmra.mrb[8].mxu0 %v21270_v60  ;;  %v12272_v61 = vld [vmem:[#allocation2 + $0x61] sm:$0xff] }
 0xbf4   : > { %v21360_v4 = vadd.f32 %v15975_v53, %v15839_v54  ;;  %16910 = vmatprep.mubr.bf16.mxu0 %v21274_v30  ;;  %v18194_v54 = vld [vmem:[%s21739_s11 + $0x218] sm:$0xff]   ;;  %v18196_v7 = vld [vmem:[%s21739_s11 + $0x228] sm:$0xff]  }
 0xbf6   : > { %v15840_v13 = vpop.f32.mrb[192].mxu0  ;;  %v15982_v37 = vpop.f32.mrb[164].mxu1 }
 0xbf7   : > { %v15841_v62 = vpop.f32.mrb[193].mxu0  ;;  %v15983_v2 = vpop.f32.mrb[165].mxu1 }
 0xbf8   : > { %v15842_v57 = vadd.f32 %v15841_v62, %v15840_v13  ;;  %v15984_v56 = vadd.f32 %v15983_v2, %v15982_v37  ;;  %v15843_v44 = vpop.f32.mrb[194].mxu0  ;;  %v15985_v18 = vpop.f32.mrb[166].mxu1  ;;  %v12302_v62 = vpack.c.bf16 %v12273_v20, %v12272_v61 }
 0xbf9   : > { %v15844_v41 = vpop.f32.mrb[195].mxu0  ;;  %v15986_v55 = vpop.f32.mrb[167].mxu1 }
 0xbfa   : > { %v21363_v21 = vadd.f32 %v15978_v8, %v15842_v57  ;;  %v15845_v17 = vadd.f32 %v15844_v41, %v15843_v44  ;;  %v15987_v60 = vadd.f32 %v15986_v55, %v15985_v18  ;;  %v12209_v44 = vld [vmem:[#allocation2 + $0x68] sm:$0xff] }
 0xbfb   : > { %16911 = vmatmul.mubr.bf16.gmra.mrb[12].mxu0 %v21276_v12  ;;  %v18192_v12 = vld [vmem:[%s21739_s11 + $0x208] sm:$0xff]  }
 0xbfc   : > { %v21366_v30 = vadd.f32 %v15981_v59, %v15845_v17  ;;  %12669 = vmatprep.mubr.bf16.mxu0 %v12300_v51  ;;  %v12275_v55 = vld [vmem:[#allocation2 + $0x81] sm:$0xff] }
 0xbfe   : > { %v15846_v14 = vpop.f32.mrb[196].mxu0  ;;  %v15988_v49 = vpop.f32.mrb[168].mxu1 }
 0xbff   : > { %v15847_v48 = vpop.f32.mrb[197].mxu0  ;;  %v15989_v33 = vpop.f32.mrb[169].mxu1 }
 0xc00   : > { %v15848_v36 = vadd.f32 %v15847_v48, %v15846_v14  ;;  %v15990_v19 = vadd.f32 %v15989_v33, %v15988_v49  ;;  %v15849_v11 = vpop.f32.mrb[198].mxu0  ;;  %v15991_v26 = vpop.f32.mrb[170].mxu1  ;;  %v12208_v14 = vld [vmem:[#allocation2 + $0x60] sm:$0xff] }
 0xc01   : > { %v15850_v3 = vpop.f32.mrb[199].mxu0  ;;  %v15992_v52 = vpop.f32.mrb[171].mxu1  ;;  %v12238_v48 = vpack.c.bf16 %v12209_v44, %v12208_v14  ;;  %v12274_v33 = vld [vmem:[#allocation2 + $0x79] sm:$0xff] }
 0xc02   : > { %v21371_v10 = vadd.f32 %v15984_v56, %v15848_v36  ;;  %v15851_v28 = vadd.f32 %v15850_v3, %v15849_v11  ;;  %v15993_v39 = vadd.f32 %v15992_v52, %v15991_v26  ;;  %v12303_v26 = vpack.c.bf16 %v12275_v55, %v12274_v33  ;;  %v18197_v3 = vld [vmem:[%s21739_s11 + $0x230] sm:$0xff]  }
 0xc03   : > { %12670 = vmatmul.mubr.bf16.vlgmr.msra.gmra.mrb[48].mxu0 %v12236_v34 }
 0xc04   : > { %v21373_v5 = vadd.f32 %v15987_v60, %v15851_v28  ;;  %12677 = vmatprep.mubr.bf16.mxu0 %v12301_v58  ;;  %16915 = vmatpush3.bf16.msra.mxu0 %v21342_v1  ;;  %v12237_v1 = vpack.c.bf16 %v12207_v31, %v12206_v63  ;;  %v12210_v31 = vld [vmem:[#allocation2 + $0x78] sm:$0xff] }
 0xc05   : > { %16916 = vmatprep.subr.bf16.mxu0 %v18192_v12  ;;  %v12239_v20 = vpack.c.bf16 %v12211_v24, %v12210_v31 }
 0xc06   : > { %v15852_v45 = vpop.f32.mrb[200].mxu0  ;;  %v15994_v42 = vpop.f32.mrb[172].mxu1 }
 0xc07   : > { %v15853_v53 = vpop.f32.mrb[201].mxu0  ;;  %v15995_v38 = vpop.f32.mrb[173].mxu1 }
 0xc08   : > { %v15854_v22 = vadd.f32 %v15853_v53, %v15852_v45  ;;  %v15996_v35 = vadd.f32 %v15995_v38, %v15994_v42  ;;  %v15855_v29 = vpop.f32.mrb[202].mxu0  ;;  %v15997_v8 = vpop.f32.mrb[174].mxu1  ;;  %16917 = vmatpush3.bf16.msra.mxu0 %v18192_v12 }
 0xc09   : > { %v15856_v6 = vpop.f32.mrb[203].mxu0  ;;  %v15998_v32 = vpop.f32.mrb[175].mxu1  ;;  %16918 = vmatprep.subr.bf16.mxu0 %v18193_v46 }
 0xc0a   : > { %v21382_v59 = vadd.f32 %v15990_v19, %v15854_v22  ;;  %v15857_v13 = vadd.f32 %v15856_v6, %v15855_v29  ;;  %v15999_v37 = vadd.f32 %v15998_v32, %v15997_v8  ;;  %v12276_v22 = vld [vmem:[#allocation2 + $0x91] sm:$0xff] }
 0xc0b   : > { %12678 = vmatmul.mubr.bf16.gmra.mrb[52].mxu0 %v12237_v1 }
 0xc0c   : > { %v21384_v2 = vadd.f32 %v15993_v39, %v15857_v13  ;;  %12685 = vmatprep.mubr.bf16.mxu0 %v12302_v62  ;;  %16919 = vmatpush3.bf16.msra.mxu0 %v18193_v46  ;;  %v12277_v39 = vld [vmem:[#allocation2 + $0x99] sm:$0xff]  ;;  %v12279_v62 = vld [vmem:[#allocation2 + $0xb1] sm:$0xff] }
 0xc0d   : > { %16920 = vmatprep.subr.bf16.mxu0 %v18194_v54  ;;  %v12304_v6 = vpack.c.bf16 %v12277_v39, %v12276_v22 }
 0xc0e   : > { %v15858_v57 = vpop.f32.mrb[204].mxu0  ;;  %v16000_v56 = vpop.f32.mrb[240].mxu1 }
 0xc0f   : > { %v15859_v18 = vpop.f32.mrb[205].mxu0  ;;  %v16001_v41 = vpop.f32.mrb[241].mxu1 }
 0xc10   : > { %v15860_v27 = vadd.f32 %v15859_v18, %v15858_v57  ;;  %v16002_v17 = vadd.f32 %v16001_v41, %v16000_v56  ;;  %v15861_v60 = vpop.f32.mrb[206].mxu0  ;;  %v16003_v51 = vpop.f32.mrb[242].mxu1  ;;  %16921 = vmatpush3.bf16.msra.mxu0 %v18194_v54  ;;  %v12213_v54 = vld [vmem:[#allocation2 + $0x98] sm:$0xff]  ;;  %v12212_v18 = vld [vmem:[#allocation2 + $0x90] sm:$0xff] }
 0xc11   : > { %v15862_v49 = vpop.f32.mrb[207].mxu0  ;;  %v16004_v43 = vpop.f32.mrb[243].mxu1  ;;  %16922 = vmatprep.subr.bf16.mxu0 %v18195_v40 }
 0xc12   : > { %v21392_v36 = vadd.f32 %v15996_v35, %v15860_v27  ;;  %v15863_v19 = vadd.f32 %v15862_v49, %v15861_v60  ;;  %v16005_v11 = vadd.f32 %v16004_v43, %v16003_v51  ;;  %v18198_v35 = vld [vmem:[%s21739_s11 + $0x238] sm:$0xff]   ;;  %v12240_v27 = vpack.c.bf16 %v12213_v54, %v12212_v18 }
 0xc13   : > { %12686 = vmatmul.mubr.bf16.gmra.mrb[56].mxu0 %v12238_v48 }
 0xc14   : > { %v21394_v15 = vadd.f32 %v15999_v37, %v15863_v19  ;;  %12693 = vmatprep.mubr.bf16.mxu0 %v12303_v26  ;;  %16923 = vmatpush3.bf16.msra.mxu0 %v18195_v40  ;;  %v12281_v26 = vld [vmem:[#allocation2 + $0xc9] sm:$0xff] }
 0xc15   : > { %16924 = vmatprep.subr.bf16.mxu0 %v18196_v7 }
 0xc16   : > { %v15864_v52 = vpop.f32.mrb[208].mxu0  ;;  %v16006_v34 = vpop.f32.mrb[244].mxu1 }
 0xc17   : > { %v15865_v12 = vpop.f32.mrb[209].mxu0  ;;  %v16007_v28 = vpop.f32.mrb[245].mxu1 }
 0xc18   : > { %v15866_v58 = vadd.f32 %v15865_v12, %v15864_v52  ;;  %v16008_v46 = vadd.f32 %v16007_v28, %v16006_v34  ;;  %v15867_v45 = vpop.f32.mrb[210].mxu0  ;;  %v16009_v42 = vpop.f32.mrb[246].mxu1  ;;  %16925 = vmatpush3.bf16.msra.mxu0 %v18196_v7  ;;  %v12215_v7 = vld [vmem:[#allocation2 + $0xb0] sm:$0xff]  ;;  %v12214_v12 = vld [vmem:[#allocation2 + $0xa8] sm:$0xff] }
 0xc19   : > { %v15868_v53 = vpop.f32.mrb[211].mxu0  ;;  %v16010_v38 = vpop.f32.mrb[247].mxu1  ;;  %16926 = vmatprep.subr.bf16.mxu0 %v18197_v3 }
 0xc1a   : > { %v21402_v29 = vadd.f32 %v16002_v17, %v15866_v58  ;;  %v15869_v8 = vadd.f32 %v15868_v53, %v15867_v45  ;;  %v16011_v63 = vadd.f32 %v16010_v38, %v16009_v42  ;;  %v12278_v17 = vld [vmem:[#allocation2 + $0xa9] sm:$0xff]  ;;  %v12241_v58 = vpack.c.bf16 %v12215_v7, %v12214_v12  ;;  %v12284_v12 = vld [vmem:[#allocation2 + $0xf1] sm:$0xff] }
 0xc1b   : > { %12694 = vmatmul.mubr.bf16.gmra.mrb[60].mxu0 %v12239_v20  ;;  %v12305_v49 = vpack.c.bf16 %v12279_v62, %v12278_v17 }
 0xc1c   : > { %v21404_v32 = vadd.f32 %v16005_v11, %v15869_v8  ;;  %12701 = vmatprep.mubr.bf16.mxu0 %v12304_v6  ;;  %16927 = vmatpush3.bf16.msra.mxu0 %v18197_v3  ;;  %v12283_v6 = vld [vmem:[#allocation2 + $0xe1] sm:$0xff] }
 0xc1d   : > { %16928 = vmatprep.subr.bf16.mxu0 %v18198_v35 }
 0xc1e   : > { %v15870_v1 = vpop.f32.mrb[212].mxu0  ;;  %v16012_v61 = vpop.f32.mrb[248].mxu1 }
 0xc1f   : > { %v15871_v13 = vpop.f32.mrb[213].mxu0  ;;  %v16013_v37 = vpop.f32.mrb[249].mxu1 }
 0xc20   : > { %v15872_v40 = vadd.f32 %v15871_v13, %v15870_v1  ;;  %v16014_v57 = vadd.f32 %v16013_v37, %v16012_v61  ;;  %v15873_v56 = vpop.f32.mrb[214].mxu0  ;;  %v16015_v44 = vpop.f32.mrb[250].mxu1  ;;  %16929 = vmatpush3.bf16.msra.mxu0 %v18198_v35  ;;  %v12217_v35 = vld [vmem:[#allocation2 + $0xc8] sm:$0xff]  ;;  %v12216_v37 = vld [vmem:[#allocation2 + $0xc0] sm:$0xff] }
 0xc21   : > { %v15874_v41 = vpop.f32.mrb[215].mxu0  ;;  %v16016_v55 = vpop.f32.mrb[251].mxu1 }
 0xc22   : > { %v21406_v60 = vadd.f32 %v16008_v46, %v15872_v40  ;;  %v15875_v51 = vadd.f32 %v15874_v41, %v15873_v56  ;;  %v16017_v14 = vadd.f32 %v16016_v55, %v16015_v44  ;;  %v12280_v46 = vld [vmem:[#allocation2 + $0xc1] sm:$0xff]  ;;  %v12282_v56 = vld [vmem:[#allocation2 + $0xd9] sm:$0xff] }
 0xc23   : > { %12702 = vmatmul.mubr.bf16.gmra.mrb[64].mxu0 %v12240_v27  ;;  %v12306_v53 = vpack.c.bf16 %v12281_v26, %v12280_v46  ;;  %v12307_v55 = vpack.c.bf16 %v12283_v6, %v12282_v56 }
 0xc24   : > { %v21408_v43 = vadd.f32 %v16011_v63, %v15875_v51  ;;  %12709 = vmatprep.mubr.bf16.mxu0 %v12305_v49 }
 0xc26   : > { %v15876_v48 = vpop.f32.mrb[216].mxu0  ;;  %v16018_v33 = vpop.f32.mrb[252].mxu1 }
 0xc27   : > { %v15877_v19 = vpop.f32.mrb[217].mxu0  ;;  %v16019_v11 = vpop.f32.mrb[253].mxu1 }
 0xc28   : > { %v15878_v3 = vadd.f32 %v15877_v19, %v15876_v48  ;;  %v16020_v52 = vadd.f32 %v16019_v11, %v16018_v33  ;;  %v15879_v34 = vpop.f32.mrb[218].mxu0  ;;  %v16021_v24 = vpop.f32.mrb[254].mxu1  ;;  %v12285_v33 = vld [vmem:[#allocation2 + $0xf9] sm:$0xff] }
 0xc29   : > { %v15880_v28 = vpop.f32.mrb[219].mxu0  ;;  %v16022_v39 = vpop.f32.mrb[255].mxu1  ;;  %v12308_v46 = vpack.c.bf16 %v12285_v33, %v12284_v12  ;;  %v12289_v33 = vld [vmem:[#allocation2 + $0x129] sm:$0xff]  ;;  %v12288_v12 = vld [vmem:[#allocation2 + $0x121] sm:$0xff] }
 0xc2a   : > { %v21410_v45 = vadd.f32 %v16014_v57, %v15878_v3  ;;  %v15881_v42 = vadd.f32 %v15880_v28, %v15879_v34  ;;  %v16023_v31 = vadd.f32 %v16022_v39, %v16021_v24  ;;  %v12242_v57 = vpack.c.bf16 %v12217_v35, %v12216_v37  ;;  %v12218_v3 = vld [vmem:[#allocation2 + $0xd8] sm:$0xff] }
 0xc2b   : > { %12710 = vmatmul.mubr.bf16.gmra.mrb[68].mxu0 %v12241_v58 }
 0xc2c   : > { %v21412_v38 = vadd.f32 %v16017_v14, %v15881_v42  ;;  %12717 = vmatprep.mubr.bf16.mxu0 %v12306_v53  ;;  %v12219_v14 = vld [vmem:[#allocation2 + $0xe0] sm:$0xff] }
 0xc2d   : > { %v12243_v24 = vpack.c.bf16 %v12219_v14, %v12218_v3  ;;  %v12223_v14 = vld [vmem:[#allocation2 + $0x110] sm:$0xff] }
 0xc2e   : > { %v15882_v20 = vpop.f32.mrb[220].mxu0  ;;  %v16024_v22 = vpop.f32.mrb[0].mxu1 }
 0xc2f   : > { %v15883_v8 = vpop.f32.mrb[221].mxu0  ;;  %v16025_v63 = vpop.f32.mrb[1].mxu1 }
 0xc30   : > { %v15884_v1 = vadd.f32 %v15883_v8, %v15882_v20  ;;  %v16026_v61 = vadd.f32 %v16025_v63, %v16024_v22  ;;  %v15885_v54 = vpop.f32.mrb[222].mxu0  ;;  %v16027_v13 = vpop.f32.mrb[2].mxu1  ;;  %v12221_v20 = vld [vmem:[#allocation2 + $0xf8] sm:$0xff] }
 0xc31   : > { %v15886_v62 = vpop.f32.mrb[223].mxu0  ;;  %v16028_v40 = vpop.f32.mrb[3].mxu1  ;;  %v12287_v8 = vld [vmem:[#allocation2 + $0x111] sm:$0xff] }
 0xc32   : > { %v21414_v44 = vadd.f32 %v16020_v52, %v15884_v1  ;;  %v15887_v18 = vadd.f32 %v15886_v62, %v15885_v54  ;;  %v16029_v41 = vadd.f32 %v16028_v40, %v16027_v13  ;;  %v12220_v13 = vld [vmem:[#allocation2 + $0xf0] sm:$0xff] }
 0xc33   : > { %12718 = vmatmul.mubr.bf16.gmra.mrb[72].mxu0 %v12242_v57  ;;  %v12244_v62 = vpack.c.bf16 %v12221_v20, %v12220_v13  ;;  %v12286_v40 = vld [vmem:[#allocation2 + $0x109] sm:$0xff] }
 0xc34   : > { %v21416_v27 = vadd.f32 %v16023_v31, %v15887_v18  ;;  %12725 = vmatprep.mubr.bf16.mxu0 %v12307_v55 }
 0xc36   : > { %v15888_v17 = vpop.f32.mrb[224].mxu0  ;;  %v16030_v51 = vpop.f32.mrb[4].mxu1 }
 0xc37   : > { %v15889_v49 = vpop.f32.mrb[225].mxu0  ;;  %v16031_v48 = vpop.f32.mrb[5].mxu1 }
 0xc38   : > { %v15890_v7 = vadd.f32 %v15889_v49, %v15888_v17  ;;  %v16032_v19 = vadd.f32 %v16031_v48, %v16030_v51  ;;  %v15891_v11 = vpop.f32.mrb[226].mxu0  ;;  %v16033_v26 = vpop.f32.mrb[6].mxu1 }
 0xc39   : > { %v15892_v52 = vpop.f32.mrb[227].mxu0  ;;  %v16034_v34 = vpop.f32.mrb[7].mxu1 }
 0xc3a   : > { %v21418_v28 = vadd.f32 %v16026_v61, %v15890_v7  ;;  %v15893_v39 = vadd.f32 %v15892_v52, %v15891_v11  ;;  %v16035_v58 = vadd.f32 %v16034_v34, %v16033_v26  ;;  %v12222_v52 = vld [vmem:[#allocation2 + $0x108] sm:$0xff] }
 0xc3b   : > { %12726 = vmatmul.mubr.bf16.gmra.mrb[76].mxu0 %v12243_v24  ;;  %v12245_v24 = vpack.c.bf16 %v12223_v14, %v12222_v52  ;;  %v12292_v14 = vld [vmem:[#allocation2 + $0x151] sm:$0xff] }
 0xc3c   : > { %v21420_v42 = vadd.f32 %v16029_v41, %v15893_v39  ;;  %12733 = vmatprep.mubr.bf16.mxu0 %v12308_v46  ;;  %v12309_v41 = vpack.c.bf16 %v12287_v8, %v12286_v40  ;;  %v12291_v8 = vld [vmem:[#allocation2 + $0x141] sm:$0xff]  ;;  %v12231_v52 = vld [vmem:[#allocation2 + $0x170] sm:$0xff] }
 0xc3e   : > { %v15894_v31 = vpop.f32.mrb[228].mxu0  ;;  %v16036_v53 = vpop.f32.mrb[8].mxu1 }
 0xc3f   : > { %v15895_v22 = vpop.f32.mrb[229].mxu0  ;;  %v16037_v35 = vpop.f32.mrb[9].mxu1 }
 0xc40   : > { %v15896_v63 = vadd.f32 %v15895_v22, %v15894_v31  ;;  %v16038_v6 = vadd.f32 %v16037_v35, %v16036_v53  ;;  %v15897_v1 = vpop.f32.mrb[230].mxu0  ;;  %v16039_v54 = vpop.f32.mrb[10].mxu1  ;;  %v12310_v31 = vpack.c.bf16 %v12289_v33, %v12288_v12  ;;  %v12225_v22 = vld [vmem:[#allocation2 + $0x128] sm:$0xff]  ;;  %v12295_v33 = vld [vmem:[#allocation2 + $0x171] sm:$0xff] }
 0xc41   : > { %v15898_v61 = vpop.f32.mrb[231].mxu0  ;;  %v16040_v37 = vpop.f32.mrb[11].mxu1  ;;  %v12296_v12 = vld [vmem:[#allocation2 + $0x181] sm:$0xff] }
 0xc42   : > { %v21422_v57 = vadd.f32 %v16032_v19, %v15896_v63  ;;  %v15899_v56 = vadd.f32 %v15898_v61, %v15897_v1  ;;  %v16041_v18 = vadd.f32 %v16040_v37, %v16039_v54  ;;  %v12224_v54 = vld [vmem:[#allocation2 + $0x120] sm:$0xff] }
 0xc43   : > { %12734 = vmatmul.mubr.bf16.gmra.mrb[80].mxu0 %v12244_v62  ;;  %v12246_v61 = vpack.c.bf16 %v12225_v22, %v12224_v54  ;;  %v12290_v37 = vld [vmem:[#allocation2 + $0x139] sm:$0xff] }
 0xc44   : > { %v21424_v55 = vadd.f32 %v16035_v58, %v15899_v56  ;;  %12741 = vmatprep.mubr.bf16.mxu0 %v12309_v41  ;;  %v12311_v40 = vpack.c.bf16 %v12291_v8, %v12290_v37  ;;  %v12293_v41 = vld [vmem:[#allocation2 + $0x159] sm:$0xff]  ;;  %v12334_v37 = vld [vmem:[#allocation2 + $0x4a] sm:$0xff] }
 0xc45   : > { %v12232_v22 = vld [vmem:[#allocation2 + $0x180] sm:$0xff]  ;;  %v12332_v54 = vld [vmem:[#allocation2 + $0x32] sm:$0xff] }
 0xc46   : > { %v15900_v17 = vpop.f32.mrb[232].mxu0  ;;  %v16042_v51 = vpop.f32.mrb[12].mxu1 }
 0xc47   : > { %v15901_v49 = vpop.f32.mrb[233].mxu0  ;;  %v16043_v48 = vpop.f32.mrb[13].mxu1 }
 0xc48   : > { %v15902_v7 = vadd.f32 %v15901_v49, %v15900_v17  ;;  %v16044_v11 = vadd.f32 %v16043_v48, %v16042_v51  ;;  %v15903_v26 = vpop.f32.mrb[234].mxu0  ;;  %v16045_v3 = vpop.f32.mrb[14].mxu1  ;;  %v12226_v17 = vld [vmem:[#allocation2 + $0x138] sm:$0xff]  ;;  %v12312_v49 = vpack.c.bf16 %v12293_v41, %v12292_v14  ;;  %v12339_v14 = vld [vmem:[#allocation2 + $0x82] sm:$0xff] }
 0xc49   : > { %v15904_v19 = vpop.f32.mrb[235].mxu0  ;;  %v16046_v34 = vpop.f32.mrb[15].mxu1  ;;  %v12229_v48 = vld [vmem:[#allocation2 + $0x158] sm:$0xff] }
 0xc4a   : > { %v21426_v39 = vadd.f32 %v16038_v6, %v15902_v7  ;;  %v15905_v58 = vadd.f32 %v15904_v19, %v15903_v26  ;;  %v16047_v46 = vadd.f32 %v16046_v34, %v16045_v3  ;;  %v12228_v7 = vld [vmem:[#allocation2 + $0x150] sm:$0xff]  ;;  %v12230_v34 = vld [vmem:[#allocation2 + $0x168] sm:$0xff] }
 0xc4b   : > { %12742 = vmatmul.mubr.bf16.gmra.mrb[84].mxu0 %v12245_v24  ;;  %v12248_v26 = vpack.c.bf16 %v12229_v48, %v12228_v7  ;;  %v12297_v19 = vld [vmem:[#allocation2 + $0x189] sm:$0xff]  ;;  %v12249_v24 = vpack.c.bf16 %v12231_v52, %v12230_v34  ;;  %v12341_v48 = vld [vmem:[#allocation2 + $0x9a] sm:$0xff] }
 0xc4c   : > { %v21428_v53 = vadd.f32 %v16041_v18, %v15905_v58  ;;  %12749 = vmatprep.mubr.bf16.mxu0 %v12310_v31  ;;  %v12227_v18 = vld [vmem:[#allocation2 + $0x140] sm:$0xff]  ;;  %v12314_v58 = vpack.c.bf16 %v12297_v19, %v12296_v12  ;;  %v12345_v52 = vld [vmem:[#allocation2 + $0xca] sm:$0xff] }
 0xc4d   : > { %v12247_v51 = vpack.c.bf16 %v12227_v18, %v12226_v17  ;;  %v12299_v31 = vld [vmem:[#allocation2 + $0x1a1] sm:$0xff]  ;;  %v12337_v18 = vld [vmem:[#allocation2 + $0x6a] sm:$0xff] }
 0xc4e   : > { %v15906_v20 = vpop.f32.mrb[236].mxu0  ;;  %v12347_v12 = vld [vmem:[#allocation2 + $0xe2] sm:$0xff] }
 0xc4f   : > { %v15907_v35 = vpop.f32.mrb[237].mxu0 }
 0xc50   : > { %v15908_v63 = vadd.f32 %v15907_v35, %v15906_v20  ;;  %v15909_v1 = vpop.f32.mrb[238].mxu0  ;;  %v12233_v20 = vld [vmem:[#allocation2 + $0x188] sm:$0xff] }
 0xc51   : > { %v15910_v13 = vpop.f32.mrb[239].mxu0  ;;  %v12250_v8 = vpack.c.bf16 %v12233_v20, %v12232_v22  ;;  %v12350_v22 = vld [vmem:[#allocation2 + $0x10a] sm:$0xff] }
 0xc52   : > { %v21430_v62 = vadd.f32 %v16044_v11, %v15908_v63  ;;  %v15911_v6 = vadd.f32 %v15910_v13, %v15909_v1  ;;  %v12294_v11 = vld [vmem:[#allocation2 + $0x169] sm:$0xff]  ;;  %v18204_v63 = vld [vmem:[#allocation2] sm:$0xff] }
 0xc53   : > { %12750 = vmatmul.mubr.bf16.gmra.mrb[88].mxu0 %v12246_v61  ;;  %v12313_v3 = vpack.c.bf16 %v12295_v33, %v12294_v11  ;;  %v12251_v1 = vpack.c.bf16 %v18204_v63, %v18204_v63  ;;  %v12333_v13 = vld [vmem:[#allocation2 + $0x3a] sm:$0xff]  ;;  %v12343_v11 = vld [vmem:[#allocation2 + $0xb2] sm:$0xff]  ;;  %v12353_v63 = vld [vmem:[#allocation2 + $0x12a] sm:$0xff] }
 0xc54   : > { %v21432_v56 = vadd.f32 %v16047_v46, %v15911_v6  ;;  %12757 = vmatprep.mubr.bf16.mxu0 %v12311_v40  ;;  %v12298_v46 = vld [vmem:[#allocation2 + $0x199] sm:$0xff]  ;;  %v12364_v61 = vpack.c.bf16 %v12333_v13, %v12332_v54  ;;  %v12336_v40 = vld [vmem:[#allocation2 + $0x62] sm:$0xff] }
 0xc55   : > { %v12315_v35 = vpack.c.bf16 %v12299_v31, %v12298_v46  ;;  %v12335_v6 = vld [vmem:[#allocation2 + $0x52] sm:$0xff]  ;;  %v12366_v17 = vpack.c.bf16 %v12337_v18, %v12336_v40  ;;  %v12349_v46 = vld [vmem:[#allocation2 + $0xfa] sm:$0xff] }
 0xc56   : > { %v12365_v41 = vpack.c.bf16 %v12335_v6, %v12334_v37  ;;  %v12354_v13 = vld [vmem:[#allocation2 + $0x13a] sm:$0xff]  ;;  %v12356_v37 = vld [vmem:[#allocation2 + $0x152] sm:$0xff] }
 0xc57   : > { %v12357_v6 = vld [vmem:[#allocation2 + $0x15a] sm:$0xff] }
 0xc58   : > { %v12376_v18 = vpack.c.bf16 %v12357_v6, %v12356_v37 }
 0xc5b   : > { %12758 = vmatmul.mubr.bf16.gmra.mrb[92].mxu0 %v12247_v51  ;;  %v12338_v51 = vld [vmem:[#allocation2 + $0x7a] sm:$0xff] }
 0xc5c   : > { %12765 = vmatprep.mubr.bf16.mxu0 %v12312_v49  ;;  %v12340_v49 = vld [vmem:[#allocation2 + $0x92] sm:$0xff]  ;;  %v12367_v33 = vpack.c.bf16 %v12339_v14, %v12338_v51  ;;  %v12360_v51 = vld [vmem:[#allocation2 + $0x182] sm:$0xff]  ;;  %v12361_v14 = vld [vmem:[#allocation2 + $0x18a] sm:$0xff] }
 0xc5d   : > { %v12368_v7 = vpack.c.bf16 %v12341_v48, %v12340_v49  ;;  %v12378_v48 = vpack.c.bf16 %v12361_v14, %v12360_v51 }
 0xc63   : > { %12766 = vmatmul.mubr.bf16.gmra.mrb[96].mxu0 %v12248_v26  ;;  %v12342_v26 = vld [vmem:[#allocation2 + $0xaa] sm:$0xff] }
 0xc64   : > { %12773 = vmatprep.mubr.bf16.mxu0 %v12313_v3  ;;  %v12344_v3 = vld [vmem:[#allocation2 + $0xc2] sm:$0xff]  ;;  %v12369_v19 = vpack.c.bf16 %v12343_v11, %v12342_v26 }
 0xc65   : > { %v12370_v34 = vpack.c.bf16 %v12345_v52, %v12344_v3 }
 0xc6b   : > { %12774 = vmatmul.mubr.bf16.gmra.mrb[100].mxu0 %v12249_v24  ;;  %v12346_v24 = vld [vmem:[#allocation2 + $0xda] sm:$0xff] }
 0xc6c   : > { %12781 = vmatprep.mubr.bf16.mxu0 %v12314_v58  ;;  %v12348_v58 = vld [vmem:[#allocation2 + $0xf2] sm:$0xff]  ;;  %v12371_v31 = vpack.c.bf16 %v12347_v12, %v12346_v24 }
 0xc6d   : > { %v12372_v20 = vpack.c.bf16 %v12349_v46, %v12348_v58 }
 0xc73   : > { %12782 = vmatmul.mubr.bf16.gmra.mrb[104].mxu0 %v12250_v8  ;;  %v12352_v8 = vld [vmem:[#allocation2 + $0x122] sm:$0xff] }
 0xc74   : > { %12789 = vmatprep.mubr.bf16.mxu0 %v12315_v35  ;;  %v12351_v35 = vld [vmem:[#allocation2 + $0x112] sm:$0xff]  ;;  %v12374_v54 = vpack.c.bf16 %v12353_v63, %v12352_v8 }
 0xc7b   : > { %12790 = vmatmul.mubr.bf16.gmra.mrb[108].mxu0 %v12251_v1  ;;  %v12373_v1 = vpack.c.bf16 %v12351_v35, %v12350_v22 }
 0xc7c   : > { %16930 = vmatprep.mubr.bf16.mxu0 %v12364_v61  ;;  %v12355_v61 = vld [vmem:[#allocation2 + $0x142] sm:$0xff] }
 0xc7d   : > { %v12375_v40 = vpack.c.bf16 %v12355_v61, %v12354_v13 }
 0xc83   : > { %16931 = vmatmul.mubr.bf16.vlgmr.msra.gmra.mrb[240].mxu0 %v12365_v41  ;;  %v12358_v41 = vld [vmem:[#allocation2 + $0x16a] sm:$0xff] }
 0xc84   : > { %16934 = vmatprep.mubr.bf16.mxu0 %v12366_v17  ;;  %v12359_v17 = vld [vmem:[#allocation2 + $0x172] sm:$0xff] }
 0xc85   : > { %v12377_v49 = vpack.c.bf16 %v12359_v17, %v12358_v41 }
 0xc8b   : > { %16935 = vmatmul.mubr.bf16.gmra.mrb[244].mxu0 %v12367_v33  ;;  %v12362_v33 = vld [vmem:[#allocation2 + $0x19a] sm:$0xff] }
 0xc8c   : > { %16938 = vmatprep.mubr.bf16.mxu0 %v12368_v7  ;;  %v12363_v7 = vld [vmem:[#allocation2 + $0x1a2] sm:$0xff] }
 0xc8d   : > { %v12379_v26 = vpack.c.bf16 %v12363_v7, %v12362_v33 }
 0xc93   : > { %16939 = vmatmul.mubr.bf16.gmra.mrb[248].mxu0 %v12369_v19 }
 0xc94   : > { %16942 = vmatprep.mubr.bf16.mxu0 %v12370_v34 }
 0xc9b   : > { %16943 = vmatmul.mubr.bf16.gmra.mrb[252].mxu0 %v12371_v31 }
 0xc9c   : > { %16946 = vmatprep.mubr.bf16.mxu0 %v12372_v20 }
 0xca3   : > { %16947 = vmatmul.mubr.bf16.gmra.mrb[0].mxu0 %v12373_v1 }
 0xca4   : > { %16950 = vmatprep.mubr.bf16.mxu0 %v12374_v54 }
 0xcab   : > { %16951 = vmatmul.mubr.bf16.gmra.mrb[4].mxu0 %v12375_v40 }
 0xcac   : > { %16954 = vmatprep.mubr.bf16.mxu0 %v12376_v18 }
 0xcb3   : > { %16955 = vmatmul.mubr.bf16.gmra.mrb[8].mxu0 %v12377_v49 }
 0xcb4   : > { %16958 = vmatprep.mubr.bf16.mxu0 %v12378_v48 }
 0xcbb   : > { %16959 = vmatmul.mubr.bf16.gmra.mrb[12].mxu0 %v12379_v26 }
 0xcd6   : > { %v16088_v11 = vpop.f32.mrb[48].mxu0 }
 0xcd7   : > { %v16089_v3 = vpop.f32.mrb[49].mxu0 }
 0xcd8   : > { %v16090_v52 = vadd.f32 %v16089_v3, %v16088_v11  ;;  %v16091_v19 = vpop.f32.mrb[50].mxu0 }
 0xcd9   : > { %v16092_v34 = vpop.f32.mrb[51].mxu0 }
 0xcda   : > { %v16093_v24 = vadd.f32 %v16092_v34, %v16091_v19  ;;  %v21435_v12 = vadd.f32 %v21329_v50, %v16090_v52 }
 0xcdc   : > { %v21438_v58 = vadd.f32 %v21333_v47, %v16093_v24 }
 0xcde   : > { %v16094_v46 = vpop.f32.mrb[52].mxu0 }
 0xcdf   : > { %v16095_v31 = vpop.f32.mrb[53].mxu0 }
 0xce0   : > { %v16096_v20 = vadd.f32 %v16095_v31, %v16094_v46  ;;  %v16097_v22 = vpop.f32.mrb[54].mxu0 }
 0xce1   : > { %v16098_v35 = vpop.f32.mrb[55].mxu0 }
 0xce2   : > { %v16099_v8 = vadd.f32 %v16098_v35, %v16097_v22  ;;  %v21441_v63 = vadd.f32 %v21345_v23, %v16096_v20 }
 0xce4   : > { %v21444_v1 = vadd.f32 %v21348_v0, %v16099_v8 }
 0xce6   : > { %v16100_v54 = vpop.f32.mrb[56].mxu0 }
 0xce7   : > { %v16101_v13 = vpop.f32.mrb[57].mxu0 }
 0xce8   : > { %v16102_v61 = vadd.f32 %v16101_v13, %v16100_v54  ;;  %v16103_v50 = vpop.f32.mrb[58].mxu0 }
 0xce9   : > { %v16104_v37 = vpop.f32.mrb[59].mxu0 }
 0xcea   : > { %v16105_v6 = vadd.f32 %v16104_v37, %v16103_v50  ;;  %v21447_v47 = vadd.f32 %v21351_v16, %v16102_v61 }
 0xcec   : > { %v21450_v40 = vadd.f32 %v21354_v9, %v16105_v6 }
 0xcee   : > { %v16106_v18 = vpop.f32.mrb[60].mxu0 }
 0xcef   : > { %v16107_v41 = vpop.f32.mrb[61].mxu0 }
 0xcf0   : > { %v16108_v17 = vadd.f32 %v16107_v41, %v16106_v18  ;;  %v16109_v23 = vpop.f32.mrb[62].mxu0 }
 0xcf1   : > { %v16110_v51 = vpop.f32.mrb[63].mxu0 }
 0xcf2   : > { %v16111_v14 = vadd.f32 %v16110_v51, %v16109_v23  ;;  %v21453_v0 = vadd.f32 %v21357_v25, %v16108_v17 }
 0xcf4   : > { %v21456_v49 = vadd.f32 %v21360_v4, %v16111_v14 }
 0xcf6   : > { %v16112_v48 = vpop.f32.mrb[64].mxu0 }
 0xcf7   : > { %v16113_v33 = vpop.f32.mrb[65].mxu0 }
 0xcf8   : > { %v16114_v7 = vadd.f32 %v16113_v33, %v16112_v48  ;;  %v16115_v16 = vpop.f32.mrb[66].mxu0 }
 0xcf9   : > { %v16116_v26 = vpop.f32.mrb[67].mxu0 }
 0xcfa   : > { %v16117_v11 = vadd.f32 %v16116_v26, %v16115_v16  ;;  %v21459_v9 = vadd.f32 %v21363_v21, %v16114_v7 }
 0xcfc   : > { %v21462_v3 = vadd.f32 %v21366_v30, %v16117_v11 }
 0xcfe   : > { %v16118_v52 = vpop.f32.mrb[68].mxu0 }
 0xcff   : > { %v16119_v19 = vpop.f32.mrb[69].mxu0 }
 0xd00   : > { %v16120_v34 = vadd.f32 %v16119_v19, %v16118_v52  ;;  %v16121_v25 = vpop.f32.mrb[70].mxu0 }
 0xd01   : > { %v16122_v24 = vpop.f32.mrb[71].mxu0 }
 0xd02   : > { %v16123_v46 = vadd.f32 %v16122_v24, %v16121_v25  ;;  %v21465_v4 = vadd.f32 %v21371_v10, %v16120_v34 }
 0xd04   : > { %v21468_v31 = vadd.f32 %v21373_v5, %v16123_v46 }
 0xd06   : > { %v16124_v20 = vpop.f32.mrb[72].mxu0 }
 0xd07   : > { %v16125_v22 = vpop.f32.mrb[73].mxu0 }
 0xd08   : > { %v16126_v35 = vadd.f32 %v16125_v22, %v16124_v20  ;;  %v16127_v21 = vpop.f32.mrb[74].mxu0 }
 0xd09   : > { %v16128_v8 = vpop.f32.mrb[75].mxu0 }
 0xd0a   : > { %v16129_v54 = vadd.f32 %v16128_v8, %v16127_v21  ;;  %v21471_v30 = vadd.f32 %v21382_v59, %v16126_v35 }
 0xd0c   : > { %v21474_v13 = vadd.f32 %v21384_v2, %v16129_v54 }
 0xd0e   : > { %v16130_v61 = vpop.f32.mrb[76].mxu0 }
 0xd0f   : > { %v16131_v50 = vpop.f32.mrb[77].mxu0 }
 0xd10   : > { %v16132_v37 = vadd.f32 %v16131_v50, %v16130_v61  ;;  %v16133_v10 = vpop.f32.mrb[78].mxu0 }
 0xd11   : > { %v16134_v6 = vpop.f32.mrb[79].mxu0 }
 0xd12   : > { %v16135_v18 = vadd.f32 %v16134_v6, %v16133_v10  ;;  %v21477_v5 = vadd.f32 %v21392_v36, %v16132_v37 }
 0xd14   : > { %v21480_v41 = vadd.f32 %v21394_v15, %v16135_v18 }
 0xd16   : > { %v16136_v17 = vpop.f32.mrb[80].mxu0 }
 0xd17   : > { %v16137_v23 = vpop.f32.mrb[81].mxu0 }
 0xd18   : > { %v16138_v51 = vadd.f32 %v16137_v23, %v16136_v17  ;;  %v16139_v59 = vpop.f32.mrb[82].mxu0 }
 0xd19   : > { %v16140_v14 = vpop.f32.mrb[83].mxu0 }
 0xd1a   : > { %v16141_v48 = vadd.f32 %v16140_v14, %v16139_v59  ;;  %v21483_v2 = vadd.f32 %v21402_v29, %v16138_v51 }
 0xd1c   : > { %v21486_v33 = vadd.f32 %v21404_v32, %v16141_v48 }
 0xd1e   : > { %v16142_v7 = vpop.f32.mrb[84].mxu0 }
 0xd1f   : > { %v16143_v16 = vpop.f32.mrb[85].mxu0 }
 0xd20   : > { %v16144_v26 = vadd.f32 %v16143_v16, %v16142_v7  ;;  %v16145_v36 = vpop.f32.mrb[86].mxu0 }
 0xd21   : > { %v16146_v11 = vpop.f32.mrb[87].mxu0 }
 0xd22   : > { %v16147_v52 = vadd.f32 %v16146_v11, %v16145_v36  ;;  %v21489_v15 = vadd.f32 %v21406_v60, %v16144_v26 }
 0xd24   : > { %v21492_v19 = vadd.f32 %v21408_v43, %v16147_v52 }
 0xd26   : > { %v16148_v34 = vpop.f32.mrb[88].mxu0 }
 0xd27   : > { %v16149_v25 = vpop.f32.mrb[89].mxu0 }
 0xd28   : > { %v16150_v24 = vadd.f32 %v16149_v25, %v16148_v34  ;;  %v16151_v29 = vpop.f32.mrb[90].mxu0 }
 0xd29   : > { %v16152_v46 = vpop.f32.mrb[91].mxu0 }
 0xd2a   : > { %v16153_v20 = vadd.f32 %v16152_v46, %v16151_v29  ;;  %v21495_v32 = vadd.f32 %v21410_v45, %v16150_v24 }
 0xd2c   : > { %v21498_v22 = vadd.f32 %v21412_v38, %v16153_v20  ;;  %v21509_v38 = vld [vmem:[%s21730_s2] sm:$0xff] }
 0xd2d   : > { %16240 = vmatprep.mubr.msk.f32.mxu1 %vm549_vm0, %v21509_v38 }
 0xd2e   : > { %v16154_v35 = vpop.f32.mrb[92].mxu0 }
 0xd2f   : > { %v16155_v21 = vpop.f32.mrb[93].mxu0 }
 0xd30   : > { %v16156_v8 = vadd.f32 %v16155_v21, %v16154_v35  ;;  %v16157_v60 = vpop.f32.mrb[94].mxu0 }
 0xd31   : > { %v16158_v54 = vpop.f32.mrb[95].mxu0 }
 0xd32   : > { %v16159_v61 = vadd.f32 %v16158_v54, %v16157_v60  ;;  %v21501_v43 = vadd.f32 %v21414_v44, %v16156_v8 }
 0xd34   : > { %v21504_v50 = vadd.f32 %v21416_v27, %v16159_v61 }
 0xd36   : > { %v16160_v37 = vpop.f32.mrb[96].mxu0 }
 0xd37   : > { %v16161_v10 = vpop.f32.mrb[97].mxu0 }
 0xd38   : > { %v16162_v6 = vadd.f32 %v16161_v10, %v16160_v37  ;;  %v16163_v45 = vpop.f32.mrb[98].mxu0 }
 0xd39   : > { %v16164_v18 = vpop.f32.mrb[99].mxu0 }
 0xd3a   : > { %v16165_v17 = vadd.f32 %v16164_v18, %v16163_v45  ;;  %v21512_v23 = vadd.f32 %v21418_v28, %v16162_v6 }
 0xd3c   : > { %v21517_v44 = vadd.f32 %v21420_v42, %v16165_v17 }
 0xd3e   : > { %v16166_v27 = vpop.f32.mrb[100].mxu0 }
 0xd3f   : > { %v16167_v51 = vpop.f32.mrb[101].mxu0 }
 0xd40   : > { %v16168_v59 = vadd.f32 %v16167_v51, %v16166_v27  ;;  %v16169_v14 = vpop.f32.mrb[102].mxu0 }
 0xd41   : > { %v16170_v48 = vpop.f32.mrb[103].mxu0 }
 0xd42   : > { %v16171_v7 = vadd.f32 %v16170_v48, %v16169_v14  ;;  %v21520_v16 = vadd.f32 %v21422_v57, %v16168_v59 }
 0xd44   : > { %v21523_v26 = vadd.f32 %v21424_v55, %v16171_v7 }
 0xd46   : > { %v16172_v28 = vpop.f32.mrb[104].mxu0 }
 0xd47   : > { %v16173_v36 = vpop.f32.mrb[105].mxu0 }
 0xd48   : > { %v16174_v11 = vadd.f32 %v16173_v36, %v16172_v28  ;;  %v16175_v52 = vpop.f32.mrb[106].mxu0 }
 0xd49   : > { %v16176_v34 = vpop.f32.mrb[107].mxu0 }
 0xd4a   : > { %v16177_v25 = vadd.f32 %v16176_v34, %v16175_v52  ;;  %v21526_v42 = vadd.f32 %v21426_v39, %v16174_v11 }
 0xd4c   : > { %v21529_v24 = vadd.f32 %v21428_v53, %v16177_v25  ;;  %v21541_v53 = vld [vmem:[%s21740_s12] ss:$0 sm:$0xff] }
 0xd4e   : > { %v16178_v29 = vpop.f32.mrb[108].mxu0 }
 0xd4f   : > { %v16179_v46 = vpop.f32.mrb[109].mxu0 }
 0xd50   : > { %v16180_v20 = vadd.f32 %v16179_v46, %v16178_v29  ;;  %v16181_v57 = vpop.f32.mrb[110].mxu0 }
 0xd51   : > { %v16182_v35 = vpop.f32.mrb[111].mxu0 }
 0xd52   : > { %v16183_v21 = vadd.f32 %v16182_v35, %v16181_v57  ;;  %v21532_v55 = vadd.f32 %v21430_v62, %v16180_v20 }
 0xd54   : > { %v21535_v8 = vadd.f32 %v21432_v56, %v16183_v21 }
 0xd56   : > { %v16932_v60 = vpop.f32.mrb[240].mxu0 }
 0xd57   : > { %v17412_v54 = vadd.f32 %v21441_v63, %v16932_v60  ;;  %v12832_v39 = vpop.f32.mrb[241].mxu0 }
 0xd58   : > { %v17415_v61 = vadd.f32 %v21435_v12, %v12832_v39  ;;  %v16933_v37 = vpop.f32.mrb[242].mxu0 }
 0xd59   : > { %v17418_v10 = vadd.f32 %v21444_v1, %v16933_v37  ;;  %v12835_v6 = vpop.f32.mrb[243].mxu0  ;;  %v21547_v56 = vadd.f32 %v17412_v54, %v21541_v53 }
 0xd5a   : > { %v17421_v62 = vadd.f32 %v21438_v58, %v12835_v6  ;;  %v21553_v63 = vadd.f32 %v17415_v61, %v21541_v53 }
 0xd5b   : > { %v21550_v45 = vadd.f32 %v17418_v10, %v21541_v53 }
 0xd5c   : > { %v21556_v18 = vadd.f32 %v17421_v62, %v21541_v53 }
 0xd5d   : > { %v16971_v12 = vpack.c.bf16 %v21550_v45, %v21547_v56 }
 0xd5e   : > { %v16965_v1 = vpack.c.bf16 %v21556_v18, %v21553_v63  ;;  %v16936_v17 = vpop.f32.mrb[244].mxu0 }
 0xd5f   : > { %v17424_v58 = vadd.f32 %v21453_v0, %v16936_v17  ;;  %v12848_v27 = vpop.f32.mrb[245].mxu0 }
 0xd60   : > { %v17427_v51 = vadd.f32 %v21447_v47, %v12848_v27  ;;  %v16937_v59 = vpop.f32.mrb[246].mxu0 }
 0xd61   : > { %v17430_v14 = vadd.f32 %v21456_v49, %v16937_v59  ;;  %v12851_v48 = vpop.f32.mrb[247].mxu0  ;;  %v21567_v28 = vadd.f32 %v17424_v58, %v21541_v53 }
 0xd62   : > { %v17433_v7 = vadd.f32 %v21450_v40, %v12851_v48  ;;  %v21573_v11 = vadd.f32 %v17427_v51, %v21541_v53 }
 0xd63   : > { %v21570_v36 = vadd.f32 %v17430_v14, %v21541_v53 }
 0xd64   : > { %v21576_v0 = vadd.f32 %v17433_v7, %v21541_v53 }
 0xd65   : > { %v16983_v47 = vpack.c.bf16 %v21570_v36, %v21567_v28 }
 0xd66   : > { %v16977_v49 = vpack.c.bf16 %v21576_v0, %v21573_v11  ;;  %v16940_v52 = vpop.f32.mrb[248].mxu0 }
 0xd67   : > { %v17436_v40 = vadd.f32 %v21465_v4, %v16940_v52  ;;  %v12864_v34 = vpop.f32.mrb[249].mxu0 }
 0xd68   : > { %v17439_v25 = vadd.f32 %v21459_v9, %v12864_v34  ;;  %v16941_v29 = vpop.f32.mrb[250].mxu0 }
 0xd69   : > { %v17442_v46 = vadd.f32 %v21468_v31, %v16941_v29  ;;  %v12867_v20 = vpop.f32.mrb[251].mxu0  ;;  %v21587_v35 = vadd.f32 %v17436_v40, %v21541_v53 }
 0xd6a   : > { %v17445_v57 = vadd.f32 %v21462_v3, %v12867_v20  ;;  %v21593_v60 = vadd.f32 %v17439_v25, %v21541_v53 }
 0xd6b   : > { %v21590_v21 = vadd.f32 %v17442_v46, %v21541_v53 }
 0xd6c   : > { %v21596_v4 = vadd.f32 %v17445_v57, %v21541_v53 }
 0xd6d   : > { %v16995_v9 = vpack.c.bf16 %v21590_v21, %v21587_v35 }
 0xd6e   : > { %v16989_v31 = vpack.c.bf16 %v21596_v4, %v21593_v60  ;;  %v16944_v54 = vpop.f32.mrb[252].mxu0 }
 0xd6f   : > { %v17448_v3 = vadd.f32 %v21477_v5, %v16944_v54  ;;  %v12880_v39 = vpop.f32.mrb[253].mxu0 }
 0xd70   : > { %v17451_v61 = vadd.f32 %v21471_v30, %v12880_v39  ;;  %v16945_v37 = vpop.f32.mrb[254].mxu0 }
 0xd71   : > { %v17454_v10 = vadd.f32 %v21480_v41, %v16945_v37  ;;  %v12883_v6 = vpop.f32.mrb[255].mxu0  ;;  %v21607_v17 = vadd.f32 %v17448_v3, %v21541_v53 }
 0xd72   : > { %v17457_v62 = vadd.f32 %v21474_v13, %v12883_v6  ;;  %v21613_v27 = vadd.f32 %v17451_v61, %v21541_v53 }
 0xd73   : > { %v21610_v58 = vadd.f32 %v17454_v10, %v21541_v53 }
 0xd74   : > { %v21616_v5 = vadd.f32 %v17457_v62, %v21541_v53 }
 0xd75   : > { %v17007_v30 = vpack.c.bf16 %v21610_v58, %v21607_v17 }
 0xd76   : > { %v17001_v41 = vpack.c.bf16 %v21616_v5, %v21613_v27  ;;  %v16948_v51 = vpop.f32.mrb[0].mxu0 }
 0xd77   : > { %v17460_v13 = vadd.f32 %v21489_v15, %v16948_v51  ;;  %v12896_v59 = vpop.f32.mrb[1].mxu0 }
 0xd78   : > { %v17463_v14 = vadd.f32 %v21483_v2, %v12896_v59  ;;  %v16949_v48 = vpop.f32.mrb[2].mxu0 }
 0xd79   : > { %v17466_v7 = vadd.f32 %v21492_v19, %v16949_v48  ;;  %v12899_v52 = vpop.f32.mrb[3].mxu0  ;;  %v13016_v34 = vadd.f32 %v17460_v13, %v21541_v53 }
 0xd7a   : > { %v17469_v40 = vadd.f32 %v21486_v33, %v12899_v52  ;;  %v13014_v29 = vadd.f32 %v17463_v14, %v21541_v53 }
 0xd7b   : > { %v13017_v25 = vadd.f32 %v17466_v7, %v21541_v53 }
 0xd7c   : > { %v13015_v46 = vadd.f32 %v17469_v40, %v21541_v53 }
 0xd7d   : > { %v16968_v20 = vpack.c.bf16 %v13017_v25, %v13016_v34 }
 0xd7e   : > { %v16962_v2 = vpack.c.bf16 %v13015_v46, %v13014_v29  ;;  %v16952_v19 = vpop.f32.mrb[4].mxu0 }
 0xd7f   : > { %v17472_v57 = vadd.f32 %v21501_v43, %v16952_v19  ;;  %v12912_v33 = vpop.f32.mrb[5].mxu0 }
 0xd80   : > { %v17475_v54 = vadd.f32 %v21495_v32, %v12912_v33  ;;  %v16953_v3 = vpop.f32.mrb[6].mxu0  ;;  %16964 = vmatprep.subr.msk.bf16.mxu1 %vm21632_vm5, %v16962_v2 }
 0xd81   : > { %v17478_v39 = vadd.f32 %v21504_v50, %v16953_v3  ;;  %v12915_v61 = vpop.f32.mrb[7].mxu0  ;;  %16967 = vmatpush3.bf16.xpose.msk.msra.mxu1 %vm21632_vm5, %v16965_v1  ;;  %v13020_v32 = vadd.f32 %v17472_v57, %v21541_v53 }
 0xd82   : > { %v17481_v37 = vadd.f32 %v21498_v22, %v12915_v61  ;;  %16970 = vmatprep.subr.msk.bf16.mxu1 %vm21632_vm5, %v16968_v20  ;;  %v13018_v10 = vadd.f32 %v17475_v54, %v21541_v53 }
 0xd83   : > { %v13021_v43 = vadd.f32 %v17478_v39, %v21541_v53 }
 0xd84   : > { %v13019_v50 = vadd.f32 %v17481_v37, %v21541_v53 }
 0xd85   : > { %v16980_v6 = vpack.c.bf16 %v13021_v43, %v13020_v32 }
 0xd86   : > { %v16974_v62 = vpack.c.bf16 %v13019_v50, %v13018_v10  ;;  %v16956_v51 = vpop.f32.mrb[8].mxu0 }
 0xd87   : > { %v17484_v63 = vadd.f32 %v21520_v16, %v16956_v51  ;;  %v12928_v18 = vpop.f32.mrb[9].mxu0 }
 0xd88   : > { %v17487_v1 = vadd.f32 %v21512_v23, %v12928_v18  ;;  %v16957_v22 = vpop.f32.mrb[10].mxu0 }
 0xd89   : > { %v17490_v13 = vadd.f32 %v21523_v26, %v16957_v22  ;;  %v12931_v59 = vpop.f32.mrb[11].mxu0  ;;  %16973 = vmatpush3.bf16.xpose.msk.msra.mxu1 %vm21632_vm5, %v16971_v12  ;;  %v13024_v16 = vadd.f32 %v17484_v63, %v21541_v53 }
 0xd8a   : > { %v17493_v14 = vadd.f32 %v21517_v44, %v12931_v59  ;;  %16976 = vmatprep.subr.msk.bf16.mxu1 %vm21632_vm5, %v16974_v62  ;;  %v13022_v23 = vadd.f32 %v17487_v1, %v21541_v53 }
 0xd8b   : > { %v13025_v48 = vadd.f32 %v17490_v13, %v21541_v53 }
 0xd8c   : > { %v13023_v26 = vadd.f32 %v17493_v14, %v21541_v53 }
 0xd8d   : > { %v16992_v7 = vpack.c.bf16 %v13025_v48, %v13024_v16 }
 0xd8e   : > { %v16986_v52 = vpack.c.bf16 %v13023_v26, %v13022_v23  ;;  %v16960_v40 = vpop.f32.mrb[12].mxu0 }
 0xd8f   : > { %v17496_v56 = vadd.f32 %v21532_v55, %v16960_v40  ;;  %v12944_v45 = vpop.f32.mrb[13].mxu0 }
 0xd90   : > { %v17499_v12 = vadd.f32 %v21526_v42, %v12944_v45  ;;  %v16961_v44 = vpop.f32.mrb[14].mxu0 }
 0xd91   : > { %v17502_v34 = vadd.f32 %v21535_v8, %v16961_v44  ;;  %v12947_v25 = vpop.f32.mrb[15].mxu0  ;;  %16979 = vmatpush3.bf16.xpose.msk.msra.mxu1 %vm21632_vm5, %v16977_v49  ;;  %v13028_v55 = vadd.f32 %v17496_v56, %v21541_v53 }
 0xd92   : > { %v17505_v29 = vadd.f32 %v21529_v24, %v12947_v25  ;;  %16982 = vmatprep.subr.msk.bf16.mxu1 %vm21632_vm5, %v16980_v6  ;;  %v13026_v46 = vadd.f32 %v17499_v12, %v21541_v53  ;;  %v13031_v24 = vld [vmem:[%s455_s20] sm:$0xff] }
 0xd93   : > { %v13029_v42 = vadd.f32 %v17502_v34, %v21541_v53  ;;  %v13033_v28 = vmul.f32 1.8, %v13031_v24 }
 0xd94   : > { %v13027_v8 = vadd.f32 %v17505_v29, %v21541_v53  ;;  %v13032_v53 = vld [vmem:[%s455_s20 + $0x8] sm:$0xff] }
 0xd95   : > { %v17004_v20 = vpack.c.bf16 %v13029_v42, %v13028_v55  ;;  %v13034_v36 = vmul.f32 1.8, %v13032_v53 }
 0xd96   : > { %v16998_v2 = vpack.c.bf16 %v13027_v8, %v13026_v46 }
 0xd99   : > { %16985 = vmatpush3.bf16.xpose.msk.msra.mxu1 %vm21632_vm5, %v16983_v47 }
 0xd9a   : > { %16988 = vmatprep.subr.msk.bf16.mxu1 %vm21632_vm5, %v16986_v52 }
 0xda1   : > { %16991 = vmatpush3.bf16.xpose.msk.msra.mxu1 %vm21632_vm5, %v16989_v31 }
 0xda2   : > { %16994 = vmatprep.subr.msk.bf16.mxu1 %vm21632_vm5, %v16992_v7 }
 0xda9   : > { %16997 = vmatpush3.bf16.xpose.msk.msra.mxu1 %vm21632_vm5, %v16995_v9 }
 0xdaa   : > { %17000 = vmatprep.subr.msk.bf16.mxu1 %vm21632_vm5, %v16998_v2 }
 0xdb1   : > { %17003 = vmatpush3.bf16.xpose.msk.msra.mxu1 %vm21632_vm5, %v17001_v41 }
 0xdb2   : > { %17006 = vmatprep.subr.msk.bf16.mxu1 %vm21632_vm5, %v17004_v20 }
 0xdb9   : > { %17009 = vmatpush3.bf16.xpose.msk.msra.mxu1 %vm21632_vm5, %v17007_v30 }
 0xdc0   : > { %16241 = vmatmul.mubr.msk.f32.vlgmr.msra.gmra.mrb[16].mxu1 %vm549_vm0, %v21509_v38 }
 0xe93   : > { %v13200_v11 = vpop.f32.mrb[16].mxu1 }
 0xe94   : > { %v13201_v0 = vadd.f32 %v13200_v11, %v13033_v28  ;;  %v13202_v47 = vpop.f32.mrb[17].mxu1 }
 0xe95   : > { %v13203_v49 = vadd.f32 %v13202_v47, %v13034_v36 }
 0xe96   : > { %13205 = vst [vmem:[%s460_s23] sm:$0xff] %v13201_v0 }
 0xe97   : > { %13206 = vst [vmem:[%s460_s23 + $0x8] sm:$0xff] %v13203_v49 }
 0xe98 PF: > { %s23_s25 = sadd.s32 1, %s18211_s25  }
 0xe99   : > { %p20_p4 = scmp.ge.s32.totalorder %s23_s25, 4  }
 0xe9b   :  { %22 = sbr.rel (!%p20_p4) target bundleno = 1 (0x1), region = 117 }

</bundles_post_ra>
